<compile_context>
chip_gen: v5e
topology: v5e:2x2
jax: 0.10.0
libtpu: 0.0.40
codegen_flags: <defaults>
</compile_context>

<pallas_src>
import math
import numpy as np
import jax
import jax.numpy as jnp
from jax import lax
from jax.experimental import pallas as pl
from jax.experimental.pallas import tpu as pltpu

# ------------------------- problem sizes (small demo) -------------------------
B = 2                   # batch
C = 4                   # channels        -> dim = (4, 16, 16)
H = W = 16
HW = H * W              # 256
N_LANES = B * HW        # 512 lanes: batch folded into the lane axis
HIDDEN = 32             # policy hidden width
HIDDEN2 = 2 * HIDDEN    # posterior | prior stacked
C2 = 2 * C
TRAJ_LENGTH = 100       # scheduler num_train_timesteps
SAMPLING_LENGTH = 4     # denoising steps used in sample_fwd
TEMB_FREQS = 8
LOG2PI = math.log(2.0 * math.pi)

# sched columns (SMEM f32[S, 7]):
#   0: sqrt(1 - alpha_bar_t)     1: 1 / sqrt(alpha_bar_t)
#   2: c1 (coef on pred_x0)      3: c2 (coef on x_t)
#   4: posterior std             5: 1 / posterior std
#   6: 1.0 if variance noise is added (t > 0) else 0.0


# ------------------------------ Pallas kernel ---------------------------------
def _fused_sampler_kernel(sched_ref,                              # SMEM  (S, 7)
                          w1_ref, b1_ref, w2_ref, b2_ref,         # VMEM weights
                          noise_ref, xinit_ref,                   # VMEM  (S,C,L), (C,L)
                          xout_ref, qpost_ref, qprior_ref):       # VMEM outputs
    num_steps = b1_ref.shape[0]

    # constant weights: load once, reused by every step of the unrolled loop
    w1 = w1_ref[...]          # (2H, C)   posterior|prior stacked
    w2 = w2_ref[...]          # (2C, 2H)  block-diagonal
    b2 = b2_ref[...]          # (2C, 1)

    def step(s, carry):
        x, accp, accq = carry

        # per-step scheduler scalars (SMEM, dynamic row index)
        sqrt_1mab = sched_ref[s, 0]
        inv_sqrt_ab = sched_ref[s, 1]
        c1 = sched_ref[s, 2]
        c2 = sched_ref[s, 3]
        std = sched_ref[s, 4]
        inv_std = sched_ref[s, 5]
        nz = sched_ref[s, 6]                 # 1.0 for t > 0 else 0.0

        n = noise_ref[s]                     # (C, N_LANES) host-drawn N(0,1)
        b1 = b1_ref[s]                       # (2H, 1) time-folded layer-1 bias

        # stacked posterior|prior policy: exactly 2 MXU dots per step
        h = jnp.dot(w1, x, preferred_element_type=jnp.float32) + b1
        h = h * jax.nn.sigmoid(h)            # SiLU (EUP)
        eps = jnp.dot(w2, h, preferred_element_type=jnp.float32) + b2
        eps_p = eps[:C, :]                   # posterior epsilon
        eps_q = eps[C:, :]                   # prior epsilon

        # DDPM 'fixed_small' epsilon-prediction step with x0 clipping
        x0_p = jnp.clip((x - sqrt_1mab * eps_p) * inv_sqrt_ab, -1.0, 1.0)
        x0_q = jnp.clip((x - sqrt_1mab * eps_q) * inv_sqrt_ab, -1.0, 1.0)
        mean_p = c1 * x0_p + c2 * x
        new_x = mean_p + (std * nz) * n      # prev_sample (trajectory = posterior)

        # log-prob quadratic partial sums, per lane (lane->batch reduce on host)
        #   posterior: (new_x - mean_p)/std == nz * n   (exact, no cancellation)
        accp = accp + nz * jnp.sum(n * n, axis=0, keepdims=True)
        #   prior:     (new_x - mean_q)/std == c1/std*(x0_p - x0_q) + nz * n
        zq = (c1 * inv_std) * (x0_p - x0_q) + nz * n
        accq = accq + jnp.sum(zq * zq, axis=0, keepdims=True)
        return new_x, accp, accq

    x0 = xinit_ref[...]
    zeros = jnp.zeros((1, N_LANES), jnp.float32)
    x_fin, accp, accq = lax.fori_loop(0, num_steps, step, (x0, zeros, zeros),
                                      unroll=True)

    xout_ref[...] = x_fin
    qpost_ref[...] = accp
    qprior_ref[...] = accq


@jax.jit
def _run_fused(sched, w1s, b1_steps, w2s, b2s, noise, x0):
    return pl.pallas_call(
        _fused_sampler_kernel,
        out_shape=(
            jax.ShapeDtypeStruct((C, N_LANES), jnp.float32),   # x_final (lanes)
            jax.ShapeDtypeStruct((1, N_LANES), jnp.float32),   # posterior sq-sum
            jax.ShapeDtypeStruct((1, N_LANES), jnp.float32),   # prior sq-sum
        ),
        in_specs=[
            pl.BlockSpec(memory_space=pltpu.MemorySpace.SMEM),   # sched  (S, 7)
            pl.BlockSpec(memory_space=pltpu.MemorySpace.VMEM),   # w1s    (2H, C)
            pl.BlockSpec(memory_space=pltpu.MemorySpace.VMEM),   # b1     (S, 2H, 1)
            pl.BlockSpec(memory_space=pltpu.MemorySpace.VMEM),   # w2s    (2C, 2H)
            pl.BlockSpec(memory_space=pltpu.MemorySpace.VMEM),   # b2s    (2C, 1)
            pl.BlockSpec(memory_space=pltpu.MemorySpace.VMEM),   # noise  (S, C, L)
            pl.BlockSpec(memory_space=pltpu.MemorySpace.VMEM),   # x_start(C, L)
        ],
        out_specs=(
            pl.BlockSpec(memory_space=pltpu.MemorySpace.VMEM),
            pl.BlockSpec(memory_space=pltpu.MemorySpace.VMEM),
            pl.BlockSpec(memory_space=pltpu.MemorySpace.VMEM),
        ),
    )(sched, w1s, b1_steps, w2s, b2s, noise, x0)


# ------------------------------- host glue ------------------------------------
def make_ddpm_schedule(traj_length, sampling_length):
    """DDPM scheduler table (epsilon prediction, variance_type='fixed_small')."""
    betas = np.linspace(1e-4, 0.02, traj_length, dtype=np.float64)
    alphas_cumprod = np.cumprod(1.0 - betas)
    step_ratio = traj_length // sampling_length
    timesteps = (np.arange(0, sampling_length) * step_ratio).round()[::-1].astype(np.int64)
    rows = []
    total_const = 0.0
    for t in timesteps:
        prev_t = t - step_ratio
        ab_t = alphas_cumprod[t]
        ab_prev = alphas_cumprod[prev_t] if prev_t >= 0 else 1.0
        beta_prod_t = 1.0 - ab_t
        beta_prod_prev = 1.0 - ab_prev
        current_alpha_t = ab_t / ab_prev
        current_beta_t = 1.0 - current_alpha_t
        c1 = math.sqrt(ab_prev) * current_beta_t / beta_prod_t
        c2 = math.sqrt(current_alpha_t) * beta_prod_prev / beta_prod_t
        variance = max(beta_prod_prev / beta_prod_t * current_beta_t, 1e-20)
        std = math.sqrt(variance)
        total_const += -(math.log(std) + 0.5 * LOG2PI) * float(C * HW)
        nz = 1.0 if t > 0 else 0.0   # diffusers adds variance noise only for t > 0
        rows.append([math.sqrt(beta_prod_t), 1.0 / math.sqrt(ab_t),
                     c1, c2, std, 1.0 / std, nz])
    return timesteps, np.asarray(rows, dtype=np.float32), np.float32(total_const)


def init_policy_params(key):
    k1, k2, k3 = jax.random.split(key, 3)
    return {
        "w1": jax.random.normal(k1, (HIDDEN, C), jnp.float32) / math.sqrt(C),
        "b1": jnp.zeros((HIDDEN, 1), jnp.float32),
        "w2": jax.random.normal(k2, (C, HIDDEN), jnp.float32) / math.sqrt(HIDDEN),
        "b2": jnp.zeros((C, 1), jnp.float32),
        "wt": jax.random.normal(k3, (HIDDEN, 2 * TEMB_FREQS), jnp.float32) * 0.1,
    }


def time_embedding(t, wt):
    freqs = jnp.exp(-jnp.arange(TEMB_FREQS, dtype=jnp.float32)
                    * (math.log(10000.0) / (TEMB_FREQS - 1)))
    ang = jnp.float32(t) * freqs
    feats = jnp.concatenate([jnp.sin(ang), jnp.cos(ang)])
    return (wt @ feats)[:, None]                       # (HIDDEN, 1)


def stack_policies(post_params, prior_params, timesteps):
    w1s = jnp.concatenate([post_params["w1"], prior_params["w1"]], axis=0)   # (2H, C)
    w2s = jnp.zeros((C2, HIDDEN2), jnp.float32)
    w2s = w2s.at[:C, :HIDDEN].set(post_params["w2"])
    w2s = w2s.at[C:, HIDDEN:].set(prior_params["w2"])                        # block-diag
    b2s = jnp.concatenate([post_params["b2"], prior_params["b2"]], axis=0)   # (2C, 1)
    b1_steps = []
    for t in timesteps:   # fold the per-step time embedding into the layer-1 bias
        bp = post_params["b1"] + time_embedding(float(t), post_params["wt"])
        bq = prior_params["b1"] + time_embedding(float(t), prior_params["wt"])
        b1_steps.append(jnp.concatenate([bp, bq], axis=0))                   # (2H, 1)
    b1_steps = jnp.stack(b1_steps, axis=0)                                   # (S, 2H, 1)
    return w1s, b1_steps, w2s, b2s


def sample_fwd(key, post_params, prior_params, batch_size=B,
               sampling_length=SAMPLING_LENGTH):
    """PosteriorPriorDGFN.forward(back_and_forth=False) semantics."""
    assert batch_size == B, "kernel is specialized to the module's batch size"
    timesteps, sched_np, total_const = make_ddpm_schedule(TRAJ_LENGTH, sampling_length)
    sched = jnp.asarray(sched_np)
    w1s, b1_steps, w2s, b2s = stack_policies(post_params, prior_params, timesteps)

    key, kx, kn = jax.random.split(key, 3)
    x = jax.random.normal(kx, (batch_size, C, H, W), jnp.float32)     # N(0,1) start
    # host RNG for per-step variance noise (the reference's scheduler draws
    # randn on the host as well); i.i.d. in the lane-folded layout
    noise = jax.random.normal(kn, (sampling_length, C, N_LANES), jnp.float32)

    # standard-normal log-prob of x_start (init glue, not the hot path)
    init_lp = jnp.sum(-0.5 * x * x - 0.5 * LOG2PI, axis=(1, 2, 3))

    # layout plumbing: (B, C, H, W) -> (C, B*HW); batch folded into lanes
    x_lanes = jnp.transpose(x.reshape(batch_size, C, HW), (1, 0, 2)).reshape(C, N_LANES)

    x_final_lanes, qpost, qprior = _run_fused(
        sched, w1s, b1_steps, w2s, b2s, noise, x_lanes)

    # lane -> batch reduction + per-step Normal constants (precomputed on host)
    qpost_b = jnp.sum(qpost.reshape(batch_size, HW), axis=1)
    qprior_b = jnp.sum(qprior.reshape(batch_size, HW), axis=1)
    lp_post = init_lp + total_const - 0.5 * qpost_b
    lp_prior = init_lp + total_const - 0.5 * qprior_b

    x_final = jnp.transpose(
        x_final_lanes.reshape(C, batch_size, HW), (1, 0, 2)).reshape(batch_size, C, H, W)

    return {
        "logpf_posterior": lp_post,
        "logpf_prior": lp_prior,
        "x": x_final,
    }


if __name__ == "__main__":
    root = jax.random.PRNGKey(0)
    k_post, k_prior, k_sample = jax.random.split(root, 3)
    posterior_params = init_policy_params(k_post)
    prior_params = init_policy_params(k_prior)

    out = sample_fwd(k_sample, posterior_params, prior_params, batch_size=B)
    jax.block_until_ready(out["x"])
    jax.block_until_ready(out["logpf_posterior"])
    jax.block_until_ready(out["logpf_prior"])

    assert out["x"].shape == (B, C, H, W)
    assert out["logpf_posterior"].shape == (B,)
    assert out["logpf_prior"].shape == (B,)
    assert bool(jnp.all(jnp.isfinite(out["x"])))
    assert bool(jnp.all(jnp.isfinite(out["logpf_posterior"])))
    assert bool(jnp.all(jnp.isfinite(out["logpf_prior"])))
    print("KERNEL_OK")
</pallas_src>

<mosaic_0001>
module attributes {stable_mosaic.version = 11 : i64} {
  func.func @_fused_sampler_kernel(%arg0: memref<4x7xf32, #tpu.memory_space<smem>>, %arg1: memref<64x4xf32, #tpu.memory_space<vmem>>, %arg2: memref<4x64x1xf32, #tpu.memory_space<vmem>>, %arg3: memref<8x64xf32, #tpu.memory_space<vmem>>, %arg4: memref<8x1xf32, #tpu.memory_space<vmem>>, %arg5: memref<4x4x512xf32, #tpu.memory_space<vmem>>, %arg6: memref<4x512xf32, #tpu.memory_space<vmem>>, %arg7: memref<4x512xf32, #tpu.memory_space<vmem>>, %arg8: memref<1x512xf32, #tpu.memory_space<vmem>>, %arg9: memref<1x512xf32, #tpu.memory_space<vmem>>) attributes {dimension_semantics = [], scalar_prefetch = 0 : i64, scratch_operands = 0 : i64, tpu.core_type = #tpu.core_type<tc>} {
    %c0 = arith.constant 0 : index
    %c0_0 = arith.constant 0 : index
    %0 = vector.load %arg1[%c0, %c0_0] : memref<64x4xf32, #tpu.memory_space<vmem>>, vector<64x4xf32>
    %c0_1 = arith.constant 0 : index
    %c0_2 = arith.constant 0 : index
    %1 = vector.load %arg3[%c0_1, %c0_2] : memref<8x64xf32, #tpu.memory_space<vmem>>, vector<8x64xf32>
    %c0_3 = arith.constant 0 : index
    %c0_4 = arith.constant 0 : index
    %2 = vector.load %arg4[%c0_3, %c0_4] : memref<8x1xf32, #tpu.memory_space<vmem>>, vector<8x1xf32>
    %c0_5 = arith.constant 0 : index
    %c0_6 = arith.constant 0 : index
    %3 = vector.load %arg6[%c0_5, %c0_6] : memref<4x512xf32, #tpu.memory_space<vmem>>, vector<4x512xf32>
    %cst = arith.constant 0.000000e+00 : f32
    %4 = vector.broadcast %cst : f32 to vector<1x512xf32>
    %c0_i32 = arith.constant 0 : i32
    %5 = arith.index_cast %c0_i32 : i32 to index
    %c0_7 = arith.constant 0 : index
    %6 = memref.load %arg0[%5, %c0_7] : memref<4x7xf32, #tpu.memory_space<smem>>
    %7 = arith.index_cast %c0_i32 : i32 to index
    %c1 = arith.constant 1 : index
    %8 = memref.load %arg0[%7, %c1] : memref<4x7xf32, #tpu.memory_space<smem>>
    %9 = arith.index_cast %c0_i32 : i32 to index
    %c2 = arith.constant 2 : index
    %10 = memref.load %arg0[%9, %c2] : memref<4x7xf32, #tpu.memory_space<smem>>
    %11 = arith.index_cast %c0_i32 : i32 to index
    %c3 = arith.constant 3 : index
    %12 = memref.load %arg0[%11, %c3] : memref<4x7xf32, #tpu.memory_space<smem>>
    %13 = arith.index_cast %c0_i32 : i32 to index
    %c4 = arith.constant 4 : index
    %14 = memref.load %arg0[%13, %c4] : memref<4x7xf32, #tpu.memory_space<smem>>
    %15 = arith.index_cast %c0_i32 : i32 to index
    %c5 = arith.constant 5 : index
    %16 = memref.load %arg0[%15, %c5] : memref<4x7xf32, #tpu.memory_space<smem>>
    %17 = arith.index_cast %c0_i32 : i32 to index
    %c6 = arith.constant 6 : index
    %18 = memref.load %arg0[%17, %c6] : memref<4x7xf32, #tpu.memory_space<smem>>
    %19 = arith.index_cast %c0_i32 : i32 to index
    %c0_8 = arith.constant 0 : index
    %c0_9 = arith.constant 0 : index
    %20 = vector.load %arg5[%19, %c0_8, %c0_9] : memref<4x4x512xf32, #tpu.memory_space<vmem>>, vector<1x4x512xf32>
    %21 = vector.shape_cast %20 : vector<1x4x512xf32> to vector<4x512xf32>
    %22 = arith.index_cast %c0_i32 : i32 to index
    %c0_10 = arith.constant 0 : index
    %c0_11 = arith.constant 0 : index
    %23 = vector.load %arg2[%22, %c0_10, %c0_11] : memref<4x64x1xf32, #tpu.memory_space<vmem>>, vector<1x64x1xf32>
    %24 = vector.shape_cast %23 : vector<1x64x1xf32> to vector<64x1xf32>
    %cst_12 = arith.constant dense<0.000000e+00> : vector<64x512xf32>
    %25 = tpu.matmul %0, %3, %cst_12 {dimension_numbers = #tpu.dot_dimension_numbers<[1], [0], [0], [1], [0, 0, 1, 1], [], []>} : vector<64x4xf32>, vector<4x512xf32>, vector<64x512xf32> -> vector<64x512xf32>
    %26 = vector.broadcast %24 : vector<64x1xf32> to vector<64x512xf32>
    %27 = arith.addf %25, %26 : vector<64x512xf32>
    %28 = arith.negf %27 : vector<64x512xf32>
    %29 = math.exp %28 : vector<64x512xf32>
    %cst_13 = arith.constant 1.000000e+00 : f32
    %30 = vector.broadcast %cst_13 : f32 to vector<64x512xf32>
    %31 = arith.addf %30, %29 : vector<64x512xf32>
    %32 = arith.divf %30, %31 : vector<64x512xf32>
    %33 = arith.mulf %27, %32 : vector<64x512xf32>
    %cst_14 = arith.constant dense<0.000000e+00> : vector<8x512xf32>
    %34 = tpu.matmul %1, %33, %cst_14 {dimension_numbers = #tpu.dot_dimension_numbers<[1], [0], [0], [1], [0, 0, 1, 1], [], []>} : vector<8x64xf32>, vector<64x512xf32>, vector<8x512xf32> -> vector<8x512xf32>
    %35 = vector.broadcast %2 : vector<8x1xf32> to vector<8x512xf32>
    %36 = arith.addf %34, %35 : vector<8x512xf32>
    %37 = vector.extract_strided_slice %36 {offsets = [0, 0], sizes = [4, 512], strides = [1, 1]} : vector<8x512xf32> to vector<4x512xf32>
    %38 = vector.extract_strided_slice %36 {offsets = [4, 0], sizes = [4, 512], strides = [1, 1]} : vector<8x512xf32> to vector<4x512xf32>
    %39 = vector.broadcast %6 : f32 to vector<4x512xf32>
    %40 = arith.mulf %39, %37 : vector<4x512xf32>
    %41 = arith.subf %3, %40 : vector<4x512xf32>
    %42 = vector.broadcast %8 : f32 to vector<4x512xf32>
    %43 = arith.mulf %41, %42 : vector<4x512xf32>
    %cst_15 = arith.constant -1.000000e+00 : f32
    %cst_16 = arith.constant 1.000000e+00 : f32
    %44 = vector.broadcast %cst_15 : f32 to vector<4x512xf32>
    %45 = arith.maximumf %44, %43 : vector<4x512xf32>
    %46 = vector.broadcast %cst_16 : f32 to vector<4x512xf32>
    %47 = arith.minimumf %46, %45 : vector<4x512xf32>
    %48 = vector.broadcast %6 : f32 to vector<4x512xf32>
    %49 = arith.mulf %48, %38 : vector<4x512xf32>
    %50 = arith.subf %3, %49 : vector<4x512xf32>
    %51 = vector.broadcast %8 : f32 to vector<4x512xf32>
    %52 = arith.mulf %50, %51 : vector<4x512xf32>
    %cst_17 = arith.constant -1.000000e+00 : f32
    %cst_18 = arith.constant 1.000000e+00 : f32
    %53 = vector.broadcast %cst_17 : f32 to vector<4x512xf32>
    %54 = arith.maximumf %53, %52 : vector<4x512xf32>
    %55 = vector.broadcast %cst_18 : f32 to vector<4x512xf32>
    %56 = arith.minimumf %55, %54 : vector<4x512xf32>
    %57 = vector.broadcast %10 : f32 to vector<4x512xf32>
    %58 = arith.mulf %57, %47 : vector<4x512xf32>
    %59 = vector.broadcast %12 : f32 to vector<4x512xf32>
    %60 = arith.mulf %59, %3 : vector<4x512xf32>
    %61 = arith.addf %58, %60 : vector<4x512xf32>
    %62 = arith.mulf %14, %18 : f32
    %63 = vector.broadcast %62 : f32 to vector<4x512xf32>
    %64 = arith.mulf %63, %21 : vector<4x512xf32>
    %65 = arith.addf %61, %64 : vector<4x512xf32>
    %66 = arith.mulf %21, %21 : vector<4x512xf32>
    %cst_19 = arith.constant dense<0.000000e+00> : vector<512xf32>
    %67 = vector.multi_reduction <add>, %66, %cst_19 [0] : vector<4x512xf32> to vector<512xf32>
    %68 = vector.shape_cast %67 : vector<512xf32> to vector<1x512xf32>
    %69 = vector.broadcast %18 : f32 to vector<1x512xf32>
    %70 = arith.mulf %69, %68 : vector<1x512xf32>
    %71 = arith.addf %4, %70 : vector<1x512xf32>
    %72 = arith.mulf %10, %16 : f32
    %73 = arith.subf %47, %56 : vector<4x512xf32>
    %74 = vector.broadcast %72 : f32 to vector<4x512xf32>
    %75 = arith.mulf %74, %73 : vector<4x512xf32>
    %76 = vector.broadcast %18 : f32 to vector<4x512xf32>
    %77 = arith.mulf %76, %21 : vector<4x512xf32>
    %78 = arith.addf %75, %77 : vector<4x512xf32>
    %79 = arith.mulf %78, %78 : vector<4x512xf32>
    %cst_20 = arith.constant dense<0.000000e+00> : vector<512xf32>
    %80 = vector.multi_reduction <add>, %79, %cst_20 [0] : vector<4x512xf32> to vector<512xf32>
    %81 = vector.shape_cast %80 : vector<512xf32> to vector<1x512xf32>
    %82 = arith.addf %4, %81 : vector<1x512xf32>
    %c1_i32 = arith.constant 1 : i32
    %83 = arith.index_cast %c1_i32 : i32 to index
    %c0_21 = arith.constant 0 : index
    %84 = memref.load %arg0[%83, %c0_21] : memref<4x7xf32, #tpu.memory_space<smem>>
    %85 = arith.index_cast %c1_i32 : i32 to index
    %c1_22 = arith.constant 1 : index
    %86 = memref.load %arg0[%85, %c1_22] : memref<4x7xf32, #tpu.memory_space<smem>>
    %87 = arith.index_cast %c1_i32 : i32 to index
    %c2_23 = arith.constant 2 : index
    %88 = memref.load %arg0[%87, %c2_23] : memref<4x7xf32, #tpu.memory_space<smem>>
    %89 = arith.index_cast %c1_i32 : i32 to index
    %c3_24 = arith.constant 3 : index
    %90 = memref.load %arg0[%89, %c3_24] : memref<4x7xf32, #tpu.memory_space<smem>>
    %91 = arith.index_cast %c1_i32 : i32 to index
    %c4_25 = arith.constant 4 : index
    %92 = memref.load %arg0[%91, %c4_25] : memref<4x7xf32, #tpu.memory_space<smem>>
    %93 = arith.index_cast %c1_i32 : i32 to index
    %c5_26 = arith.constant 5 : index
    %94 = memref.load %arg0[%93, %c5_26] : memref<4x7xf32, #tpu.memory_space<smem>>
    %95 = arith.index_cast %c1_i32 : i32 to index
    %c6_27 = arith.constant 6 : index
    %96 = memref.load %arg0[%95, %c6_27] : memref<4x7xf32, #tpu.memory_space<smem>>
    %97 = arith.index_cast %c1_i32 : i32 to index
    %c0_28 = arith.constant 0 : index
    %c0_29 = arith.constant 0 : index
    %98 = vector.load %arg5[%97, %c0_28, %c0_29] : memref<4x4x512xf32, #tpu.memory_space<vmem>>, vector<1x4x512xf32>
    %99 = vector.shape_cast %98 : vector<1x4x512xf32> to vector<4x512xf32>
    %100 = arith.index_cast %c1_i32 : i32 to index
    %c0_30 = arith.constant 0 : index
    %c0_31 = arith.constant 0 : index
    %101 = vector.load %arg2[%100, %c0_30, %c0_31] : memref<4x64x1xf32, #tpu.memory_space<vmem>>, vector<1x64x1xf32>
    %102 = vector.shape_cast %101 : vector<1x64x1xf32> to vector<64x1xf32>
    %cst_32 = arith.constant dense<0.000000e+00> : vector<64x512xf32>
    %103 = tpu.matmul %0, %65, %cst_32 {dimension_numbers = #tpu.dot_dimension_numbers<[1], [0], [0], [1], [0, 0, 1, 1], [], []>} : vector<64x4xf32>, vector<4x512xf32>, vector<64x512xf32> -> vector<64x512xf32>
    %104 = vector.broadcast %102 : vector<64x1xf32> to vector<64x512xf32>
    %105 = arith.addf %103, %104 : vector<64x512xf32>
    %106 = arith.negf %105 : vector<64x512xf32>
    %107 = math.exp %106 : vector<64x512xf32>
    %cst_33 = arith.constant 1.000000e+00 : f32
    %108 = vector.broadcast %cst_33 : f32 to vector<64x512xf32>
    %109 = arith.addf %108, %107 : vector<64x512xf32>
    %110 = arith.divf %108, %109 : vector<64x512xf32>
    %111 = arith.mulf %105, %110 : vector<64x512xf32>
    %cst_34 = arith.constant dense<0.000000e+00> : vector<8x512xf32>
    %112 = tpu.matmul %1, %111, %cst_34 {dimension_numbers = #tpu.dot_dimension_numbers<[1], [0], [0], [1], [0, 0, 1, 1], [], []>} : vector<8x64xf32>, vector<64x512xf32>, vector<8x512xf32> -> vector<8x512xf32>
    %113 = vector.broadcast %2 : vector<8x1xf32> to vector<8x512xf32>
    %114 = arith.addf %112, %113 : vector<8x512xf32>
    %115 = vector.extract_strided_slice %114 {offsets = [0, 0], sizes = [4, 512], strides = [1, 1]} : vector<8x512xf32> to vector<4x512xf32>
    %116 = vector.extract_strided_slice %114 {offsets = [4, 0], sizes = [4, 512], strides = [1, 1]} : vector<8x512xf32> to vector<4x512xf32>
    %117 = vector.broadcast %84 : f32 to vector<4x512xf32>
    %118 = arith.mulf %117, %115 : vector<4x512xf32>
    %119 = arith.subf %65, %118 : vector<4x512xf32>
    %120 = vector.broadcast %86 : f32 to vector<4x512xf32>
    %121 = arith.mulf %119, %120 : vector<4x512xf32>
    %cst_35 = arith.constant -1.000000e+00 : f32
    %cst_36 = arith.constant 1.000000e+00 : f32
    %122 = vector.broadcast %cst_35 : f32 to vector<4x512xf32>
    %123 = arith.maximumf %122, %121 : vector<4x512xf32>
    %124 = vector.broadcast %cst_36 : f32 to vector<4x512xf32>
    %125 = arith.minimumf %124, %123 : vector<4x512xf32>
    %126 = vector.broadcast %84 : f32 to vector<4x512xf32>
    %127 = arith.mulf %126, %116 : vector<4x512xf32>
    %128 = arith.subf %65, %127 : vector<4x512xf32>
    %129 = vector.broadcast %86 : f32 to vector<4x512xf32>
    %130 = arith.mulf %128, %129 : vector<4x512xf32>
    %cst_37 = arith.constant -1.000000e+00 : f32
    %cst_38 = arith.constant 1.000000e+00 : f32
    %131 = vector.broadcast %cst_37 : f32 to vector<4x512xf32>
    %132 = arith.maximumf %131, %130 : vector<4x512xf32>
    %133 = vector.broadcast %cst_38 : f32 to vector<4x512xf32>
    %134 = arith.minimumf %133, %132 : vector<4x512xf32>
    %135 = vector.broadcast %88 : f32 to vector<4x512xf32>
    %136 = arith.mulf %135, %125 : vector<4x512xf32>
    %137 = vector.broadcast %90 : f32 to vector<4x512xf32>
    %138 = arith.mulf %137, %65 : vector<4x512xf32>
    %139 = arith.addf %136, %138 : vector<4x512xf32>
    %140 = arith.mulf %92, %96 : f32
    %141 = vector.broadcast %140 : f32 to vector<4x512xf32>
    %142 = arith.mulf %141, %99 : vector<4x512xf32>
    %143 = arith.addf %139, %142 : vector<4x512xf32>
    %144 = arith.mulf %99, %99 : vector<4x512xf32>
    %cst_39 = arith.constant dense<0.000000e+00> : vector<512xf32>
    %145 = vector.multi_reduction <add>, %144, %cst_39 [0] : vector<4x512xf32> to vector<512xf32>
    %146 = vector.shape_cast %145 : vector<512xf32> to vector<1x512xf32>
    %147 = vector.broadcast %96 : f32 to vector<1x512xf32>
    %148 = arith.mulf %147, %146 : vector<1x512xf32>
    %149 = arith.addf %71, %148 : vector<1x512xf32>
    %150 = arith.mulf %88, %94 : f32
    %151 = arith.subf %125, %134 : vector<4x512xf32>
    %152 = vector.broadcast %150 : f32 to vector<4x512xf32>
    %153 = arith.mulf %152, %151 : vector<4x512xf32>
    %154 = vector.broadcast %96 : f32 to vector<4x512xf32>
    %155 = arith.mulf %154, %99 : vector<4x512xf32>
    %156 = arith.addf %153, %155 : vector<4x512xf32>
    %157 = arith.mulf %156, %156 : vector<4x512xf32>
    %cst_40 = arith.constant dense<0.000000e+00> : vector<512xf32>
    %158 = vector.multi_reduction <add>, %157, %cst_40 [0] : vector<4x512xf32> to vector<512xf32>
    %159 = vector.shape_cast %158 : vector<512xf32> to vector<1x512xf32>
    %160 = arith.addf %82, %159 : vector<1x512xf32>
    %c2_i32 = arith.constant 2 : i32
    %161 = arith.index_cast %c2_i32 : i32 to index
    %c0_41 = arith.constant 0 : index
    %162 = memref.load %arg0[%161, %c0_41] : memref<4x7xf32, #tpu.memory_space<smem>>
    %163 = arith.index_cast %c2_i32 : i32 to index
    %c1_42 = arith.constant 1 : index
    %164 = memref.load %arg0[%163, %c1_42] : memref<4x7xf32, #tpu.memory_space<smem>>
    %165 = arith.index_cast %c2_i32 : i32 to index
    %c2_43 = arith.constant 2 : index
    %166 = memref.load %arg0[%165, %c2_43] : memref<4x7xf32, #tpu.memory_space<smem>>
    %167 = arith.index_cast %c2_i32 : i32 to index
    %c3_44 = arith.constant 3 : index
    %168 = memref.load %arg0[%167, %c3_44] : memref<4x7xf32, #tpu.memory_space<smem>>
    %169 = arith.index_cast %c2_i32 : i32 to index
    %c4_45 = arith.constant 4 : index
    %170 = memref.load %arg0[%169, %c4_45] : memref<4x7xf32, #tpu.memory_space<smem>>
    %171 = arith.index_cast %c2_i32 : i32 to index
    %c5_46 = arith.constant 5 : index
    %172 = memref.load %arg0[%171, %c5_46] : memref<4x7xf32, #tpu.memory_space<smem>>
    %173 = arith.index_cast %c2_i32 : i32 to index
    %c6_47 = arith.constant 6 : index
    %174 = memref.load %arg0[%173, %c6_47] : memref<4x7xf32, #tpu.memory_space<smem>>
    %175 = arith.index_cast %c2_i32 : i32 to index
    %c0_48 = arith.constant 0 : index
    %c0_49 = arith.constant 0 : index
    %176 = vector.load %arg5[%175, %c0_48, %c0_49] : memref<4x4x512xf32, #tpu.memory_space<vmem>>, vector<1x4x512xf32>
    %177 = vector.shape_cast %176 : vector<1x4x512xf32> to vector<4x512xf32>
    %178 = arith.index_cast %c2_i32 : i32 to index
    %c0_50 = arith.constant 0 : index
    %c0_51 = arith.constant 0 : index
    %179 = vector.load %arg2[%178, %c0_50, %c0_51] : memref<4x64x1xf32, #tpu.memory_space<vmem>>, vector<1x64x1xf32>
    %180 = vector.shape_cast %179 : vector<1x64x1xf32> to vector<64x1xf32>
    %cst_52 = arith.constant dense<0.000000e+00> : vector<64x512xf32>
    %181 = tpu.matmul %0, %143, %cst_52 {dimension_numbers = #tpu.dot_dimension_numbers<[1], [0], [0], [1], [0, 0, 1, 1], [], []>} : vector<64x4xf32>, vector<4x512xf32>, vector<64x512xf32> -> vector<64x512xf32>
    %182 = vector.broadcast %180 : vector<64x1xf32> to vector<64x512xf32>
    %183 = arith.addf %181, %182 : vector<64x512xf32>
    %184 = arith.negf %183 : vector<64x512xf32>
    %185 = math.exp %184 : vector<64x512xf32>
    %cst_53 = arith.constant 1.000000e+00 : f32
    %186 = vector.broadcast %cst_53 : f32 to vector<64x512xf32>
    %187 = arith.addf %186, %185 : vector<64x512xf32>
    %188 = arith.divf %186, %187 : vector<64x512xf32>
    %189 = arith.mulf %183, %188 : vector<64x512xf32>
    %cst_54 = arith.constant dense<0.000000e+00> : vector<8x512xf32>
    %190 = tpu.matmul %1, %189, %cst_54 {dimension_numbers = #tpu.dot_dimension_numbers<[1], [0], [0], [1], [0, 0, 1, 1], [], []>} : vector<8x64xf32>, vector<64x512xf32>, vector<8x512xf32> -> vector<8x512xf32>
    %191 = vector.broadcast %2 : vector<8x1xf32> to vector<8x512xf32>
    %192 = arith.addf %190, %191 : vector<8x512xf32>
    %193 = vector.extract_strided_slice %192 {offsets = [0, 0], sizes = [4, 512], strides = [1, 1]} : vector<8x512xf32> to vector<4x512xf32>
    %194 = vector.extract_strided_slice %192 {offsets = [4, 0], sizes = [4, 512], strides = [1, 1]} : vector<8x512xf32> to vector<4x512xf32>
    %195 = vector.broadcast %162 : f32 to vector<4x512xf32>
    %196 = arith.mulf %195, %193 : vector<4x512xf32>
    %197 = arith.subf %143, %196 : vector<4x512xf32>
    %198 = vector.broadcast %164 : f32 to vector<4x512xf32>
    %199 = arith.mulf %197, %198 : vector<4x512xf32>
    %cst_55 = arith.constant -1.000000e+00 : f32
    %cst_56 = arith.constant 1.000000e+00 : f32
    %200 = vector.broadcast %cst_55 : f32 to vector<4x512xf32>
    %201 = arith.maximumf %200, %199 : vector<4x512xf32>
    %202 = vector.broadcast %cst_56 : f32 to vector<4x512xf32>
    %203 = arith.minimumf %202, %201 : vector<4x512xf32>
    %204 = vector.broadcast %162 : f32 to vector<4x512xf32>
    %205 = arith.mulf %204, %194 : vector<4x512xf32>
    %206 = arith.subf %143, %205 : vector<4x512xf32>
    %207 = vector.broadcast %164 : f32 to vector<4x512xf32>
    %208 = arith.mulf %206, %207 : vector<4x512xf32>
    %cst_57 = arith.constant -1.000000e+00 : f32
    %cst_58 = arith.constant 1.000000e+00 : f32
    %209 = vector.broadcast %cst_57 : f32 to vector<4x512xf32>
    %210 = arith.maximumf %209, %208 : vector<4x512xf32>
    %211 = vector.broadcast %cst_58 : f32 to vector<4x512xf32>
    %212 = arith.minimumf %211, %210 : vector<4x512xf32>
    %213 = vector.broadcast %166 : f32 to vector<4x512xf32>
    %214 = arith.mulf %213, %203 : vector<4x512xf32>
    %215 = vector.broadcast %168 : f32 to vector<4x512xf32>
    %216 = arith.mulf %215, %143 : vector<4x512xf32>
    %217 = arith.addf %214, %216 : vector<4x512xf32>
    %218 = arith.mulf %170, %174 : f32
    %219 = vector.broadcast %218 : f32 to vector<4x512xf32>
    %220 = arith.mulf %219, %177 : vector<4x512xf32>
    %221 = arith.addf %217, %220 : vector<4x512xf32>
    %222 = arith.mulf %177, %177 : vector<4x512xf32>
    %cst_59 = arith.constant dense<0.000000e+00> : vector<512xf32>
    %223 = vector.multi_reduction <add>, %222, %cst_59 [0] : vector<4x512xf32> to vector<512xf32>
    %224 = vector.shape_cast %223 : vector<512xf32> to vector<1x512xf32>
    %225 = vector.broadcast %174 : f32 to vector<1x512xf32>
    %226 = arith.mulf %225, %224 : vector<1x512xf32>
    %227 = arith.addf %149, %226 : vector<1x512xf32>
    %228 = arith.mulf %166, %172 : f32
    %229 = arith.subf %203, %212 : vector<4x512xf32>
    %230 = vector.broadcast %228 : f32 to vector<4x512xf32>
    %231 = arith.mulf %230, %229 : vector<4x512xf32>
    %232 = vector.broadcast %174 : f32 to vector<4x512xf32>
    %233 = arith.mulf %232, %177 : vector<4x512xf32>
    %234 = arith.addf %231, %233 : vector<4x512xf32>
    %235 = arith.mulf %234, %234 : vector<4x512xf32>
    %cst_60 = arith.constant dense<0.000000e+00> : vector<512xf32>
    %236 = vector.multi_reduction <add>, %235, %cst_60 [0] : vector<4x512xf32> to vector<512xf32>
    %237 = vector.shape_cast %236 : vector<512xf32> to vector<1x512xf32>
    %238 = arith.addf %160, %237 : vector<1x512xf32>
    %c3_i32 = arith.constant 3 : i32
    %239 = arith.index_cast %c3_i32 : i32 to index
    %c0_61 = arith.constant 0 : index
    %240 = memref.load %arg0[%239, %c0_61] : memref<4x7xf32, #tpu.memory_space<smem>>
    %241 = arith.index_cast %c3_i32 : i32 to index
    %c1_62 = arith.constant 1 : index
    %242 = memref.load %arg0[%241, %c1_62] : memref<4x7xf32, #tpu.memory_space<smem>>
    %243 = arith.index_cast %c3_i32 : i32 to index
    %c2_63 = arith.constant 2 : index
    %244 = memref.load %arg0[%243, %c2_63] : memref<4x7xf32, #tpu.memory_space<smem>>
    %245 = arith.index_cast %c3_i32 : i32 to index
    %c3_64 = arith.constant 3 : index
    %246 = memref.load %arg0[%245, %c3_64] : memref<4x7xf32, #tpu.memory_space<smem>>
    %247 = arith.index_cast %c3_i32 : i32 to index
    %c4_65 = arith.constant 4 : index
    %248 = memref.load %arg0[%247, %c4_65] : memref<4x7xf32, #tpu.memory_space<smem>>
    %249 = arith.index_cast %c3_i32 : i32 to index
    %c5_66 = arith.constant 5 : index
    %250 = memref.load %arg0[%249, %c5_66] : memref<4x7xf32, #tpu.memory_space<smem>>
    %251 = arith.index_cast %c3_i32 : i32 to index
    %c6_67 = arith.constant 6 : index
    %252 = memref.load %arg0[%251, %c6_67] : memref<4x7xf32, #tpu.memory_space<smem>>
    %253 = arith.index_cast %c3_i32 : i32 to index
    %c0_68 = arith.constant 0 : index
    %c0_69 = arith.constant 0 : index
    %254 = vector.load %arg5[%253, %c0_68, %c0_69] : memref<4x4x512xf32, #tpu.memory_space<vmem>>, vector<1x4x512xf32>
    %255 = vector.shape_cast %254 : vector<1x4x512xf32> to vector<4x512xf32>
    %256 = arith.index_cast %c3_i32 : i32 to index
    %c0_70 = arith.constant 0 : index
    %c0_71 = arith.constant 0 : index
    %257 = vector.load %arg2[%256, %c0_70, %c0_71] : memref<4x64x1xf32, #tpu.memory_space<vmem>>, vector<1x64x1xf32>
    %258 = vector.shape_cast %257 : vector<1x64x1xf32> to vector<64x1xf32>
    %cst_72 = arith.constant dense<0.000000e+00> : vector<64x512xf32>
    %259 = tpu.matmul %0, %221, %cst_72 {dimension_numbers = #tpu.dot_dimension_numbers<[1], [0], [0], [1], [0, 0, 1, 1], [], []>} : vector<64x4xf32>, vector<4x512xf32>, vector<64x512xf32> -> vector<64x512xf32>
    %260 = vector.broadcast %258 : vector<64x1xf32> to vector<64x512xf32>
    %261 = arith.addf %259, %260 : vector<64x512xf32>
    %262 = arith.negf %261 : vector<64x512xf32>
    %263 = math.exp %262 : vector<64x512xf32>
    %cst_73 = arith.constant 1.000000e+00 : f32
    %264 = vector.broadcast %cst_73 : f32 to vector<64x512xf32>
    %265 = arith.addf %264, %263 : vector<64x512xf32>
    %266 = arith.divf %264, %265 : vector<64x512xf32>
    %267 = arith.mulf %261, %266 : vector<64x512xf32>
    %cst_74 = arith.constant dense<0.000000e+00> : vector<8x512xf32>
    %268 = tpu.matmul %1, %267, %cst_74 {dimension_numbers = #tpu.dot_dimension_numbers<[1], [0], [0], [1], [0, 0, 1, 1], [], []>} : vector<8x64xf32>, vector<64x512xf32>, vector<8x512xf32> -> vector<8x512xf32>
    %269 = vector.broadcast %2 : vector<8x1xf32> to vector<8x512xf32>
    %270 = arith.addf %268, %269 : vector<8x512xf32>
    %271 = vector.extract_strided_slice %270 {offsets = [0, 0], sizes = [4, 512], strides = [1, 1]} : vector<8x512xf32> to vector<4x512xf32>
    %272 = vector.extract_strided_slice %270 {offsets = [4, 0], sizes = [4, 512], strides = [1, 1]} : vector<8x512xf32> to vector<4x512xf32>
    %273 = vector.broadcast %240 : f32 to vector<4x512xf32>
    %274 = arith.mulf %273, %271 : vector<4x512xf32>
    %275 = arith.subf %221, %274 : vector<4x512xf32>
    %276 = vector.broadcast %242 : f32 to vector<4x512xf32>
    %277 = arith.mulf %275, %276 : vector<4x512xf32>
    %cst_75 = arith.constant -1.000000e+00 : f32
    %cst_76 = arith.constant 1.000000e+00 : f32
    %278 = vector.broadcast %cst_75 : f32 to vector<4x512xf32>
    %279 = arith.maximumf %278, %277 : vector<4x512xf32>
    %280 = vector.broadcast %cst_76 : f32 to vector<4x512xf32>
    %281 = arith.minimumf %280, %279 : vector<4x512xf32>
    %282 = vector.broadcast %240 : f32 to vector<4x512xf32>
    %283 = arith.mulf %282, %272 : vector<4x512xf32>
    %284 = arith.subf %221, %283 : vector<4x512xf32>
    %285 = vector.broadcast %242 : f32 to vector<4x512xf32>
    %286 = arith.mulf %284, %285 : vector<4x512xf32>
    %cst_77 = arith.constant -1.000000e+00 : f32
    %cst_78 = arith.constant 1.000000e+00 : f32
    %287 = vector.broadcast %cst_77 : f32 to vector<4x512xf32>
    %288 = arith.maximumf %287, %286 : vector<4x512xf32>
    %289 = vector.broadcast %cst_78 : f32 to vector<4x512xf32>
    %290 = arith.minimumf %289, %288 : vector<4x512xf32>
    %291 = vector.broadcast %244 : f32 to vector<4x512xf32>
    %292 = arith.mulf %291, %281 : vector<4x512xf32>
    %293 = vector.broadcast %246 : f32 to vector<4x512xf32>
    %294 = arith.mulf %293, %221 : vector<4x512xf32>
    %295 = arith.addf %292, %294 : vector<4x512xf32>
    %296 = arith.mulf %248, %252 : f32
    %297 = vector.broadcast %296 : f32 to vector<4x512xf32>
    %298 = arith.mulf %297, %255 : vector<4x512xf32>
    %299 = arith.addf %295, %298 : vector<4x512xf32>
    %300 = arith.mulf %255, %255 : vector<4x512xf32>
    %cst_79 = arith.constant dense<0.000000e+00> : vector<512xf32>
    %301 = vector.multi_reduction <add>, %300, %cst_79 [0] : vector<4x512xf32> to vector<512xf32>
    %302 = vector.shape_cast %301 : vector<512xf32> to vector<1x512xf32>
    %303 = vector.broadcast %252 : f32 to vector<1x512xf32>
    %304 = arith.mulf %303, %302 : vector<1x512xf32>
    %305 = arith.addf %227, %304 : vector<1x512xf32>
    %306 = arith.mulf %244, %250 : f32
    %307 = arith.subf %281, %290 : vector<4x512xf32>
    %308 = vector.broadcast %306 : f32 to vector<4x512xf32>
    %309 = arith.mulf %308, %307 : vector<4x512xf32>
    %310 = vector.broadcast %252 : f32 to vector<4x512xf32>
    %311 = arith.mulf %310, %255 : vector<4x512xf32>
    %312 = arith.addf %309, %311 : vector<4x512xf32>
    %313 = arith.mulf %312, %312 : vector<4x512xf32>
    %cst_80 = arith.constant dense<0.000000e+00> : vector<512xf32>
    %314 = vector.multi_reduction <add>, %313, %cst_80 [0] : vector<4x512xf32> to vector<512xf32>
    %315 = vector.shape_cast %314 : vector<512xf32> to vector<1x512xf32>
    %316 = arith.addf %238, %315 : vector<1x512xf32>
    %c4_i32 = arith.constant 4 : i32
    %c0_81 = arith.constant 0 : index
    %c0_82 = arith.constant 0 : index
    %317 = vector.load %arg7[%c0_81, %c0_82] : memref<4x512xf32, #tpu.memory_space<vmem>>, vector<4x512xf32>
    tpu.vector_store %arg7[%c0_81, %c0_82], %299 {strides = array<i32>} : memref<4x512xf32, #tpu.memory_space<vmem>>, vector<4x512xf32>,
    %c0_83 = arith.constant 0 : index
    %c0_84 = arith.constant 0 : index
    %318 = vector.load %arg8[%c0_83, %c0_84] : memref<1x512xf32, #tpu.memory_space<vmem>>, vector<1x512xf32>
    tpu.vector_store %arg8[%c0_83, %c0_84], %305 {strides = array<i32>} : memref<1x512xf32, #tpu.memory_space<vmem>>, vector<1x512xf32>,
    %c0_85 = arith.constant 0 : index
    %c0_86 = arith.constant 0 : index
    %319 = vector.load %arg9[%c0_85, %c0_86] : memref<1x512xf32, #tpu.memory_space<vmem>>, vector<1x512xf32>
    tpu.vector_store %arg9[%c0_85, %c0_86], %316 {strides = array<i32>} : memref<1x512xf32, #tpu.memory_space<vmem>>, vector<1x512xf32>,
    return
  }
}

</mosaic_0001>

<bundles_post_ra>
// kernel: _run_fused.1
= control target key start
LH: loop header
LB: loop body
LE: loop exit
PB: predicated region body
PF: predicated region fallthrough
CT: control target
= control target key end

     0   :  { %15 = vsyncpa [#allocation4], 0  ;;  %s10858_s0 = inlined_call_operand.vmem [shape: f32[4,7], index: 0, kind: input, shape index: {}]   ;;  %s10859_s1 = inlined_call_operand.vmem [shape: f32[64,4], index: 1, kind: input, shape index: {}]   ;;  %s10860_s2 = inlined_call_operand.vmem [shape: f32[4,64,1], index: 2, kind: input, shape index: {}]   ;;  %s10861_s3 = inlined_call_operand.vmem [shape: f32[8,64], index: 3, kind: input, shape index: {}]   ;;  %s10862_s4 = inlined_call_operand.vmem [shape: f32[8,1], index: 4, kind: input, shape index: {}]   ;;  %s10863_s5 = inlined_call_operand.vmem [shape: f32[4,4,512], index: 5, kind: input, shape index: {}]   ;;  %s10864_s6 = inlined_call_operand.vmem [shape: f32[4,512], index: 6, kind: input, shape index: {}]   ;;  %s10865_s7 = inlined_call_operand.hbm [shape: f32[4,512], index: 7, kind: output, shape index: {0}]   ;;  %s10866_s8 = inlined_call_operand.hbm [shape: f32[1,512], index: 8, kind: output, shape index: {1}]   ;;  %s10867_s9 = inlined_call_operand.hbm [shape: f32[1,512], index: 9, kind: output, shape index: {2}]  }
   0x1   :  { %16 = vsyncpa [#allocation3], 0 }
   0x2   :  { %17 = vsyncpa [#allocation7], 0  ;;  %s23_s11 = sshll.u32 %s10858_s0, 4  ;;  %s5668_s12 = smov [#allocation2]   ;;  %s24_s11 = int_to_ptr.vmem [resolvable:$true] %s23_s11 }
   0x3   :  { %26 = dma.vmem_to_smem %s24_s11, 64, %s5668_s12, [#allocation4]  }
   0x4   :  { %5662 = dma.done.wait [#allocation4], 64  }
   0x5   :  { %5663 = vsyncadd [#allocation4], 4294967232 }
   0x6   :  { %43 = sfence }
   0x7   :  { %v72_v0 = vld [vmem:[%s10860_s2 + $0x38] sm:$0xff]  ;;  %v70_v1 = vld [vmem:[%s10860_s2 + $0x28] sm:$0xff]  ;;  %v5735_v2 = vld [vmem:[%s10864_s6] sm:$0xff]  ;;  %v5669_v3 = vmov 0   ;;  %vm10931_vm0 = vcmask 1043456   ;;  %vm10930_vm1 = vcmask 31744  }
   0x8   :  { %11036 = vst [vmem:[#allocation12_spill] sm:$0xff] %v5735_v2  ;;  %5037 = vset.pattern.permute.xlu1 %v5669_v3  ;;  %5036 = vset.pattern.permute.xlu0 %v5669_v3  ;;  %v5741_v4 = vld [vmem:[%s10864_s6 + $0x8] sm:$0xff]  ;;  %v68_v5 = vld [vmem:[%s10860_s2 + $0x18] sm:$0xff]  ;;  %v71_v6 = vld [vmem:[%s10860_s2 + $0x30] sm:$0xff]  ;;  %s56_s26 = sld [smem:[#allocation2]] }
   0x9   :  { %115 = vst [vmem:[#allocation1] ss:$2 sm:$0xff] %v5735_v2  ;;  %110 = vperm.xlu0 %5036, %v72_v0   ;;  %100 = vperm.xlu1 %5037, %v70_v1   ;;  %v69_v7 = vld [vmem:[%s10860_s2 + $0x20] sm:$0xff]  ;;  %v67_v13 = vld [vmem:[%s10860_s2 + $0x10] sm:$0xff]  ;;  %v66_v14 = vld [vmem:[%s10860_s2 + $0x8] sm:$0xff]  ;;  %s4670_s29 = sld [smem:[#allocation2 + $0x1]] }
   0xa   :  { %11037 = vst [vmem:[#allocation13_spill] sm:$0xff] %v5741_v4  ;;  %5038 = vset.pattern.permute.xlu2 %v5669_v3  ;;  %v44_v8 = vld [vmem:[%s10859_s1] sm:$0xff]  ;;  %v45_v16 = vld [vmem:[%s10859_s1 + $0x8] sm:$0xff]  ;;  %v4768_v18 = vld [vmem:[%s10860_s2 + $0x78] sm:$0xff]  ;;  %s4674_s30 = sld [smem:[#allocation2 + $0x5]] }
   0xb   :  { %117 = vst [vmem:[#allocation1 + $0x10] ss:$2 sm:$0xff] %v5741_v4  ;;  %90 = vperm.xlu2 %5038, %v68_v5   ;;  %v65_v15 = vld [vmem:[%s10860_s2] sm:$0xff]  ;;  %v4767_v19 = vld [vmem:[%s10860_s2 + $0x70] sm:$0xff]  ;;  %v4766_v21 = vld [vmem:[%s10860_s2 + $0x68] sm:$0xff]  ;;  %s6864_s10 = sld [smem:[#allocation2 + $0x2]] }
   0xc   :  { %v53_v17 = vld [vmem:[%s10862_s4] sm:$0xff]  ;;  %v46_v20 = vld [vmem:[%s10859_s1 + $0x10] sm:$0xff]  ;;  %v4764_v23 = vld [vmem:[%s10860_s2 + $0x58] sm:$0xff]  ;;  %s4675_s11 = sld [smem:[#allocation2 + $0x6]] }
   0xd   :  { %v4765_v22 = vld [vmem:[%s10860_s2 + $0x60] sm:$0xff]  ;;  %v47_v24 = vld [vmem:[%s10859_s1 + $0x18] sm:$0xff]  ;;  %v4763_v25 = vld [vmem:[%s10860_s2 + $0x50] sm:$0xff]  ;;  %s6867_s12 = sld [smem:[#allocation2 + $0x3]] }
   0xe   :  { %v4762_v26 = vld [vmem:[%s10860_s2 + $0x48] sm:$0xff]  ;;  %v4761_v27 = vld [vmem:[%s10860_s2 + $0x40] sm:$0xff]  ;;  %v4861_v29 = vld [vmem:[%s10860_s2 + $0xb8] sm:$0xff]  ;;  %s4673_s13 = sld [smem:[#allocation2 + $0x4]] }
   0xf   :  { %v48_v28 = vld [vmem:[%s10859_s1 + $0x20] sm:$0xff]  ;;  %v4860_v30 = vld [vmem:[%s10860_s2 + $0xb0] sm:$0xff]  ;;  %v4859_v31 = vld [vmem:[%s10860_s2 + $0xa8] sm:$0xff]  ;;  %s8150_s16 = sld [smem:[#allocation2 + $0x82]] }
  0x10   :  { %v118_v9 = vld.sshfl [vmem:[#allocation1] sm:$0xff pattern:$0x75316420]  ;;  %v119_v10 = vld.sshfl [vmem:[#allocation1 + $0x8] sm:$0xff pattern:$0x75316420] }
  0x11   :  { %4676 = vmatpush.msk.msra.mxu0 %vm10931_vm0, %v118_v9  ;;  %4685 = vmatpush.msk.msra.mxu1 %vm10931_vm0, %v119_v10  ;;  %v49_v32 = vld [vmem:[%s10859_s1 + $0x28] sm:$0xff]  ;;  %v4858_v33 = vld [vmem:[%s10860_s2 + $0xa0] sm:$0xff]  ;;  %v4857_v34 = vld [vmem:[%s10860_s2 + $0x98] sm:$0xff]  ;;  %s1157_s14 = smul.f32 %s4674_s30, %s6864_s10  ;;  %s4758_s17 = sld [smem:[#allocation2 + $0x86]] }
  0x12   :  { %v120_v11 = vld.sshfl [vmem:[#allocation1 + $0x10] sm:$0xff pattern:$0x75316420]  ;;  %v121_v12 = vld.sshfl [vmem:[#allocation1 + $0x18] sm:$0xff pattern:$0x75316420]  ;;  %105 = vperm.xlu0 %5036, %v71_v6   ;;  %95 = vperm.xlu1 %5037, %v69_v7  }
  0x13   :  { %4694 = vmatpush.msk.msra.mxu2 %vm10931_vm0, %v120_v11  ;;  %4703 = vmatpush.msk.msra.mxu3 %vm10931_vm0, %v121_v12  ;;  %v4856_v35 = vld [vmem:[%s10860_s2 + $0x90] sm:$0xff]  ;;  %v4855_v37 = vld [vmem:[%s10860_s2 + $0x88] sm:$0xff]  ;;  %v4854_v38 = vld [vmem:[%s10860_s2 + $0x80] sm:$0xff]  ;;  %s4756_s18 = sld [smem:[#allocation2 + $0x84]] }
  0x14   :  { %4677 = vmatmul.msk.f32.vlgmr.msra.gmra.mxu0 %vm10930_vm1, %v44_v8  ;;  %4686 = vmatmul.msk.f32.vlgmr.msra.gmra.mxu1 %vm10930_vm1, %v44_v8  ;;  %v50_v36 = vld [vmem:[%s10859_s1 + $0x30] sm:$0xff]  ;;  %v4954_v39 = vld [vmem:[%s10860_s2 + $0xf8] sm:$0xff]  ;;  %v4952_v42 = vld [vmem:[%s10860_s2 + $0xe8] sm:$0xff]  ;;  %s1099_s15 = smul.f32 %s4675_s11, %s4673_s13  ;;  %s8155_s19 = sld [smem:[#allocation2 + $0x83]] }
  0x15   :  { %4695 = vmatmul.msk.f32.vlgmr.msra.gmra.mxu2 %vm10930_vm1, %v44_v8  ;;  %4704 = vmatmul.msk.f32.vlgmr.msra.gmra.mxu3 %vm10930_vm1, %v44_v8  ;;  %v51_v40 = vld [vmem:[%s10859_s1 + $0x38] sm:$0xff]  ;;  %v4953_v41 = vld [vmem:[%s10860_s2 + $0xf0] sm:$0xff]  ;;  %v4951_v43 = vld [vmem:[%s10860_s2 + $0xe0] sm:$0xff]  ;;  %s9333_s4 = sld [smem:[#allocation2 + $0x102]] }
  0x16   :  { %85 = vperm.xlu2 %5038, %v67_v13   ;;  %v4950_v44 = vld [vmem:[%s10860_s2 + $0xd8] sm:$0xff]  ;;  %v4949_v45 = vld [vmem:[%s10860_s2 + $0xd0] sm:$0xff]  ;;  %v4948_v46 = vld [vmem:[%s10860_s2 + $0xc8] sm:$0xff]  ;;  %s4851_s21 = sld [smem:[#allocation2 + $0x106]] }
  0x17   :  { %v4947_v47 = vld [vmem:[%s10860_s2 + $0xc0] sm:$0xff]  ;;  %s4849_s22 = sld [smem:[#allocation2 + $0x104]] }
  0x18   :  { %s9338_s24 = sld [smem:[#allocation2 + $0x103]] }
  0x19   :  { %s2224_s20 = smul.f32 %s4758_s17, %s4756_s18  ;;  %s10624_s2 = sld [smem:[#allocation2 + $0x182]] }
  0x1a   :  { %80 = vperm.xlu0 %5036, %v66_v14   ;;  %75 = vperm.xlu1 %5037, %v65_v15   ;;  %s10626_s6 = sld [smem:[#allocation2 + $0x185]] }
  0x1c   :  { %4678 = vmatmul.msk.f32.gmra.mxu0 %vm10930_vm1, %v45_v16  ;;  %4687 = vmatmul.msk.f32.gmra.mxu1 %vm10930_vm1, %v45_v16 }
  0x1d   :  { %4696 = vmatmul.msk.f32.gmra.mxu2 %vm10930_vm1, %v45_v16  ;;  %4705 = vmatmul.msk.f32.gmra.mxu3 %vm10930_vm1, %v45_v16  ;;  %s3349_s25 = smul.f32 %s4851_s21, %s4849_s22 }
  0x1e   :  { %962 = vperm.xlu2 %5038, %v53_v17  }
  0x20   :  { %s4532_s27 = smul.f32 %s10626_s6, %s10624_s2 }
  0x22   :  { %1270 = vperm.xlu0 %5036, %v4768_v18   ;;  %1265 = vperm.xlu1 %5037, %v4767_v19  }
  0x24   :  { %4679 = vmatmul.msk.f32.gmra.mxu0 %vm10930_vm1, %v46_v20  ;;  %4688 = vmatmul.msk.f32.gmra.mxu1 %vm10930_vm1, %v46_v20 }
  0x25   :  { %4697 = vmatmul.msk.f32.gmra.mxu2 %vm10930_vm1, %v46_v20  ;;  %4706 = vmatmul.msk.f32.gmra.mxu3 %vm10930_vm1, %v46_v20 }
  0x26   :  { %1260 = vperm.xlu2 %5038, %v4766_v21  }
  0x2a   :  { %1255 = vperm.xlu0 %5036, %v4765_v22   ;;  %1250 = vperm.xlu1 %5037, %v4764_v23  }
  0x2c   :  { %4680 = vmatmul.msk.f32.gmra.mxu0 %vm10930_vm1, %v47_v24  ;;  %4689 = vmatmul.msk.f32.gmra.mxu1 %vm10930_vm1, %v47_v24 }
  0x2d   :  { %4698 = vmatmul.msk.f32.gmra.mxu2 %vm10930_vm1, %v47_v24  ;;  %4707 = vmatmul.msk.f32.gmra.mxu3 %vm10930_vm1, %v47_v24 }
  0x2e   :  { %1245 = vperm.xlu2 %5038, %v4763_v25  }
  0x32   :  { %1240 = vperm.xlu0 %5036, %v4762_v26   ;;  %1235 = vperm.xlu1 %5037, %v4761_v27  }
  0x34   :  { %4681 = vmatmul.msk.f32.gmra.mxu0 %vm10930_vm1, %v48_v28  ;;  %4690 = vmatmul.msk.f32.gmra.mxu1 %vm10930_vm1, %v48_v28 }
  0x35   :  { %4699 = vmatmul.msk.f32.gmra.mxu2 %vm10930_vm1, %v48_v28  ;;  %4708 = vmatmul.msk.f32.gmra.mxu3 %vm10930_vm1, %v48_v28 }
  0x36   :  { %2395 = vperm.xlu2 %5038, %v4861_v29  }
  0x3a   :  { %2390 = vperm.xlu0 %5036, %v4860_v30   ;;  %2385 = vperm.xlu1 %5037, %v4859_v31  }
  0x3c   :  { %4682 = vmatmul.msk.f32.gmra.mxu0 %vm10930_vm1, %v49_v32  ;;  %4691 = vmatmul.msk.f32.gmra.mxu1 %vm10930_vm1, %v49_v32 }
  0x3d   :  { %4700 = vmatmul.msk.f32.gmra.mxu2 %vm10930_vm1, %v49_v32  ;;  %4709 = vmatmul.msk.f32.gmra.mxu3 %vm10930_vm1, %v49_v32 }
  0x3e   :  { %2380 = vperm.xlu2 %5038, %v4858_v33  }
  0x42   :  { %2375 = vperm.xlu0 %5036, %v4857_v34   ;;  %2370 = vperm.xlu1 %5037, %v4856_v35  }
  0x44   :  { %4683 = vmatmul.msk.f32.gmra.mxu0 %vm10930_vm1, %v50_v36  ;;  %4692 = vmatmul.msk.f32.gmra.mxu1 %vm10930_vm1, %v50_v36 }
  0x45   :  { %4701 = vmatmul.msk.f32.gmra.mxu2 %vm10930_vm1, %v50_v36  ;;  %4710 = vmatmul.msk.f32.gmra.mxu3 %vm10930_vm1, %v50_v36 }
  0x46   :  { %2365 = vperm.xlu2 %5038, %v4855_v37  }
  0x4a   :  { %2360 = vperm.xlu0 %5036, %v4854_v38   ;;  %3520 = vperm.xlu1 %5037, %v4954_v39  }
  0x4c   :  { %4684 = vmatmul.msk.f32.gmra.mxu0 %vm10930_vm1, %v51_v40  ;;  %4693 = vmatmul.msk.f32.gmra.mxu1 %vm10930_vm1, %v51_v40 }
  0x4d   :  { %4702 = vmatmul.msk.f32.gmra.mxu2 %vm10930_vm1, %v51_v40  ;;  %4711 = vmatmul.msk.f32.gmra.mxu3 %vm10930_vm1, %v51_v40 }
  0x4e   :  { %3515 = vperm.xlu2 %5038, %v4953_v41  }
  0x52   :  { %3510 = vperm.xlu0 %5036, %v4952_v42   ;;  %3505 = vperm.xlu1 %5037, %v4951_v43  }
  0x56   :  { %3500 = vperm.xlu2 %5038, %v4950_v44  }
  0x5a   :  { %3495 = vperm.xlu0 %5036, %v4949_v45   ;;  %3490 = vperm.xlu1 %5037, %v4948_v46  }
  0x5e   :  { %3485 = vperm.xlu2 %5038, %v4947_v47  }
  0x65   :  { %v5907_v56 = vpop.permute.xlu2 %90 }
  0x70   :  { %v86_v8 = vpop.permute.xlu2 %85 }
  0x7b   :  { %v5897_v48 = vpop.permute.xlu1 %100  ;;  %v5899_v49 = vpop.permute.xlu0 %110 }
  0x84   :  { %v5901_v50 = vpop.permute.xlu1 %95  ;;  %v5903_v51 = vpop.permute.xlu0 %105 }
  0x8c   :  { %v76_v54 = vpop.permute.xlu1 %75  ;;  %v81_v58 = vpop.permute.xlu0 %80 }
  0x91   :  { %v173_v52 = vpop.f32.mrf.mxu0  ;;  %v214_v53 = vpop.f32.mrf.mxu1 }
  0x92   :  { %v5905_v55 = vadd.f32 %v173_v52, %v76_v54  ;;  %v5909_v57 = vadd.f32 %v214_v53, %v76_v54 }
  0x94   :  { %11038 = vst [vmem:[#allocation14_spill] sm:$0xff] %v5905_v55  ;;  %v4712_v59 = vmul.f32 -1.442695, %v5905_v55  ;;  %v4713_v62 = vmul.f32 -1.442695, %v5909_v57 }
  0x95   :  { %11039 = vst [vmem:[#allocation15_spill] sm:$0xff] %v5909_v57 }
  0x96   :  { %5039 = vpow2.f32 %v4712_v59 }
  0x97   :  { %5041 = vpow2.f32 %v4713_v62 }
  0x98   :  { %v255_v60 = vpop.f32.mrf.mxu2  ;;  %v296_v61 = vpop.f32.mrf.mxu3 }
  0x99   :  { %v5913_v63 = vadd.f32 %v255_v60, %v76_v54  ;;  %v176_v0 = vpop.f32.mrf.mxu0  ;;  %v217_v1 = vpop.f32.mrf.mxu1  ;;  %v5921_v9 = vadd.f32 %v296_v61, %v76_v54 }
  0x9a   :  { %v5915_v3 = vadd.f32 %v176_v0, %v81_v58  ;;  %v5918_v6 = vadd.f32 %v217_v1, %v81_v58 }
  0x9b   :  { %11040 = vst [vmem:[#allocation16_spill] sm:$0xff] %v5913_v63  ;;  %v4714_v5 = vmul.f32 -1.442695, %v5913_v63  ;;  %v4715_v19 = vmul.f32 -1.442695, %v5921_v9 }
  0x9c   :  { %11041 = vst [vmem:[#allocation17_spill] sm:$0xff] %v5915_v3  ;;  %v4716_v7 = vmul.f32 -1.442695, %v5915_v3  ;;  %v4717_v10 = vmul.f32 -1.442695, %v5918_v6  ;;  %v5040_v13 = vpop.eup %5039 }
  0x9d   :  { %11042 = vst [vmem:[#allocation18_spill] sm:$0xff] %v5918_v6  ;;  %5043 = vpow2.f32 %v4714_v5  ;;  %v5042_v18 = vpop.eup %5041  ;;  %v5930_v22 = vadd.f32 1.0, %v5040_v13 }
  0x9e   :  { %11043 = vst [vmem:[#allocation19_spill] sm:$0xff] %v5921_v9  ;;  %5045 = vpow2.f32 %v4716_v7  ;;  %v5935_v25 = vadd.f32 1.0, %v5042_v18 }
  0x9f   :  { %11046 = vst [vmem:[#allocation22_spill] sm:$0xff] %v5930_v22  ;;  %5047 = vpow2.f32 %v4717_v10 }
  0xa0   :  { %v258_v11 = vpop.f32.mrf.mxu2  ;;  %v299_v12 = vpop.f32.mrf.mxu3  ;;  %11048 = vst [vmem:[#allocation24_spill] sm:$0xff] %v5935_v25 }
  0xa1   :  { %v5924_v14 = vadd.f32 %v258_v11, %v81_v58  ;;  %v179_v15 = vpop.f32.mrf.mxu0  ;;  %v220_v16 = vpop.f32.mrf.mxu1  ;;  %v5937_v26 = vadd.f32 %v299_v12, %v81_v58 }
  0xa2   :  { %v5926_v17 = vadd.f32 %v179_v15, %v86_v8  ;;  %v5932_v23 = vadd.f32 %v220_v16, %v86_v8 }
  0xa3   :  { %11044 = vst [vmem:[#allocation20_spill] sm:$0xff] %v5924_v14  ;;  %v4718_v20 = vmul.f32 -1.442695, %v5924_v14  ;;  %v5044_v21 = vpop.eup %5043  ;;  %v4719_v36 = vmul.f32 -1.442695, %v5937_v26 }
  0xa4   :  { %11045 = vst [vmem:[#allocation21_spill] sm:$0xff] %v5926_v17  ;;  %v4720_v24 = vmul.f32 -1.442695, %v5926_v17  ;;  %v5939_v27 = vadd.f32 1.0, %v5044_v21  ;;  %v5046_v28 = vpop.eup %5045  ;;  %v4721_v29 = vmul.f32 -1.442695, %v5932_v23 }
  0xa5   :  { %11047 = vst [vmem:[#allocation23_spill] sm:$0xff] %v5932_v23  ;;  %5049 = vpow2.f32 %v4718_v20  ;;  %v5048_v35 = vpop.eup %5047  ;;  %v5951_v39 = vadd.f32 1.0, %v5046_v28 }
  0xa6   :  { %11049 = vst [vmem:[#allocation25_spill] sm:$0xff] %v5937_v26  ;;  %5051 = vpow2.f32 %v4715_v19  ;;  %v5962_v45 = vadd.f32 1.0, %v5048_v35 }
  0xa7   :  { %11050 = vst [vmem:[#allocation26_spill] sm:$0xff] %v5939_v27  ;;  %5053 = vrcp.f32 %v5930_v22 }
  0xa8   :  { %v261_v30 = vpop.f32.mrf.mxu2  ;;  %v302_v31 = vpop.f32.mrf.mxu3  ;;  %5055 = vpow2.f32 %v4720_v24  ;;  %11052 = vst [vmem:[#allocation28_spill] sm:$0xff] %v5951_v39 }
  0xa9   :  { %v5943_v32 = vadd.f32 %v261_v30, %v86_v8  ;;  %v182_v33 = vpop.f32.mrf.mxu0  ;;  %v223_v34 = vpop.f32.mrf.mxu1  ;;  %5057 = vrcp.f32 %v5935_v25  ;;  %v5957_v42 = vadd.f32 %v302_v31, %v86_v8  ;;  %11054 = vst [vmem:[#allocation30_spill] sm:$0xff] %v5962_v45 }
  0xaa   :  { %v5948_v37 = vadd.f32 %v182_v33, %v5907_v56  ;;  %5059 = vrcp.f32 %v5939_v27  ;;  %v5955_v41 = vadd.f32 %v223_v34, %v5907_v56 }
  0xab   :  { %11051 = vst [vmem:[#allocation27_spill] sm:$0xff] %v5943_v32  ;;  %v5050_v38 = vpop.eup %5049  ;;  %v4722_v40 = vmul.f32 -1.442695, %v5943_v32  ;;  %5061 = vpow2.f32 %v4721_v29  ;;  %v4723_v58 = vmul.f32 -1.442695, %v5957_v42 }
  0xac   :  { %11053 = vst [vmem:[#allocation29_spill] sm:$0xff] %v5957_v42  ;;  %v4724_v43 = vmul.f32 -1.442695, %v5948_v37  ;;  %v5960_v44 = vpop.eup %5051  ;;  %v5966_v47 = vadd.f32 1.0, %v5050_v38  ;;  %v4725_v53 = vmul.f32 -1.442695, %v5955_v41 }
  0xad   :  { %5063 = vpow2.f32 %v4722_v40  ;;  %v5964_v46 = vpop.eup %5053 }
  0xae   :  { %11055 = vst [vmem:[#allocation31_spill] sm:$0xff] %v5964_v46  ;;  %5065 = vpow2.f32 %v4719_v36  ;;  %v5056_v52 = vpop.eup %5055 }
  0xaf   :  { %11056 = vst [vmem:[#allocation32_spill] sm:$0xff] %v5966_v47  ;;  %5067 = vrcp.f32 %v5951_v39  ;;  %v5970_v54 = vpop.eup %5057  ;;  %v5976_v62 = vadd.f32 1.0, %v5056_v52 }
  0xb0   :  { %11057 = vst [vmem:[#allocation33_spill] sm:$0xff] %v5970_v54  ;;  %5069 = vpow2.f32 %v4724_v43  ;;  %v264_v59 = vpop.f32.mrf.mxu2  ;;  %v305_v60 = vpop.f32.mrf.mxu3 }
  0xb1   :  { %v5973_v61 = vpop.eup %5059  ;;  %5071 = vrcp.f32 %v5962_v45  ;;  %11059 = vst [vmem:[#allocation35_spill] sm:$0xff] %v5976_v62  ;;  %v5979_v0 = vadd.f32 %v264_v59, %v5907_v56  ;;  %v185_v1 = vpop.f32.mrf.mxu0  ;;  %v5983_v8 = vadd.f32 %v305_v60, %v5907_v56 }
  0xb2   :  { %11058 = vst [vmem:[#allocation34_spill] sm:$0xff] %v5973_v61  ;;  %v226_v5 = vpop.f32.mrf.mxu1  ;;  %v5062_v7 = vpop.eup %5061  ;;  %5073 = vrcp.f32 %v5966_v47  ;;  %v5989_v13 = vadd.f32 %v185_v1, %v5901_v50 }
  0xb3   :  { %11060 = vst [vmem:[#allocation36_spill] sm:$0xff] %v5979_v0  ;;  %v5064_v10 = vpop.eup %5063  ;;  %v5985_v11 = vadd.f32 1.0, %v5062_v7  ;;  %5075 = vpow2.f32 %v4725_v53  ;;  %v4726_v12 = vmul.f32 -1.442695, %v5979_v0  ;;  %v5999_v56 = vadd.f32 %v226_v5, %v5901_v50 }
  0xb4   :  { %11061 = vst [vmem:[#allocation37_spill] sm:$0xff] %v5983_v8  ;;  %v5991_v15 = vpop.eup %5065  ;;  %v5993_v16 = vadd.f32 1.0, %v5064_v10  ;;  %5077 = vpow2.f32 %v4723_v58  ;;  %v4727_v20 = vmul.f32 -1.442695, %v5983_v8  ;;  %v4728_v28 = vmul.f32 -1.442695, %v5989_v13 }
  0xb5   :  { %11062 = vst [vmem:[#allocation38_spill] sm:$0xff] %v5985_v11  ;;  %v5995_v18 = vpop.eup %5067  ;;  %5079 = vrcp.f32 %v5976_v62  ;;  %v4729_v34 = vmul.f32 -1.442695, %v5999_v56 }
  0xb6   :  { %11063 = vst [vmem:[#allocation39_spill] sm:$0xff] %v5991_v15  ;;  %v5070_v19 = vpop.eup %5069  ;;  %5081 = vrcp.f32 %v5985_v11 }
  0xb7   :  { %11064 = vst [vmem:[#allocation40_spill] sm:$0xff] %v5993_v16  ;;  %v6003_v21 = vpop.eup %5071  ;;  %v6005_v24 = vadd.f32 1.0, %v5070_v19  ;;  %5083 = vpow2.f32 %v4726_v12 }
  0xb8   :  { %11065 = vst [vmem:[#allocation41_spill] sm:$0xff] %v5995_v18  ;;  %v6008_v29 = vpop.eup %5073  ;;  %5085 = vrcp.f32 %v5993_v16  ;;  %v267_v30 = vpop.f32.mrf.mxu2 }
  0xb9   :  { %11066 = vst [vmem:[#allocation42_spill] sm:$0xff] %v6003_v21  ;;  %v308_v31 = vpop.f32.mrf.mxu3  ;;  %v5076_v33 = vpop.eup %5075  ;;  %5087 = vrcp.f32 %v6005_v24  ;;  %v6014_v35 = vadd.f32 %v267_v30, %v5901_v50 }
  0xba   :  { %11067 = vst [vmem:[#allocation43_spill] sm:$0xff] %v6008_v29  ;;  %v6017_v36 = vadd.f32 %v308_v31, %v5901_v50  ;;  %v188_v38 = vpop.f32.mrf.mxu0  ;;  %v229_v40 = vpop.f32.mrf.mxu1  ;;  %v6021_v52 = vadd.f32 1.0, %v5076_v33  ;;  %5089 = vpow2.f32 %v4727_v20 }
  0xbb   :  { %11068 = vst [vmem:[#allocation44_spill] sm:$0xff] %v6014_v35  ;;  %v6019_v43 = vpop.eup %5077  ;;  %v6024_v53 = vadd.f32 %v188_v38, %v5897_v48  ;;  %v6027_v58 = vadd.f32 %v229_v40, %v5897_v48  ;;  %5091 = vpow2.f32 %v4728_v28  ;;  %v4730_v60 = vmul.f32 -1.442695, %v6014_v35 }
  0xbc   :  { %11069 = vst [vmem:[#allocation45_spill] sm:$0xff] %v6017_v36  ;;  %v6029_v59 = vpop.eup %5079  ;;  %v4731_v50 = vmul.f32 -1.442695, %v6017_v36  ;;  %5093 = vrcp.f32 %v6021_v52 }
  0xbd   :  { %11070 = vst [vmem:[#allocation46_spill] sm:$0xff] %v6029_v59  ;;  %v6033_v1 = vpop.eup %5081  ;;  %5095 = vpow2.f32 %v4729_v34  ;;  %v4732_v7 = vmul.f32 -1.442695, %v6024_v53  ;;  %v4733_v19 = vmul.f32 -1.442695, %v6027_v58 }
  0xbe   :  { %11071 = vst [vmem:[#allocation47_spill] sm:$0xff] %v6033_v1  ;;  %v5084_v5 = vpop.eup %5083  ;;  %5097 = vpow2.f32 %v4730_v60 }
  0xbf   :  { %v6037_v10 = vpop.eup %5085  ;;  %v6039_v12 = vadd.f32 1.0, %v5084_v5  ;;  %5099 = vpow2.f32 %v4731_v50 }
  0xc0   :  { %11072 = vst [vmem:[#allocation48_spill] sm:$0xff] %v6037_v10  ;;  %v6042_v20 = vpop.eup %5087  ;;  %v270_v30 = vpop.f32.mrf.mxu2 }
  0xc1   :  { %11073 = vst [vmem:[#allocation49_spill] sm:$0xff] %v6039_v12  ;;  %v5090_v28 = vpop.eup %5089  ;;  %5101 = vrcp.f32 %v6039_v12  ;;  %v311_v31 = vpop.f32.mrf.mxu3  ;;  %v6048_v34 = vadd.f32 %v270_v30, %v5897_v48 }
  0xc2   :  { %v5092_v33 = vpop.eup %5091  ;;  %v6045_v38 = vadd.f32 1.0, %v5090_v28  ;;  %5103 = vpow2.f32 %v4732_v7  ;;  %v6051_v40 = vadd.f32 %v311_v31, %v5897_v48  ;;  %v191_v60 = vpop.f32.mrf.mxu0 }
  0xc3   :  { %11075 = vst [vmem:[#allocation51_spill] sm:$0xff] %v6048_v34  ;;  %v232_v5 = vpop.f32.mrf.mxu1  ;;  %v6053_v4 = vpop.eup %5093  ;;  %v6055_v50 = vadd.f32 1.0, %v5092_v33  ;;  %5105 = vpow2.f32 %v4733_v19  ;;  %v4734_v28 = vmul.f32 -1.442695, %v6048_v34  ;;  %v6063_v48 = vadd.f32 %v191_v60, %v5903_v51 }
  0xc4   :  { %11074 = vst [vmem:[#allocation50_spill] sm:$0xff] %v6045_v38  ;;  %v5096_v2 = vpop.eup %5095  ;;  %5107 = vrcp.f32 %v6045_v38  ;;  %v6066_v30 = vadd.f32 %v232_v5, %v5903_v51  ;;  %v4735_v19 = vmul.f32 -1.442695, %v6051_v40 }
  0xc5   :  { %11076 = vst [vmem:[#allocation52_spill] sm:$0xff] %v6051_v40  ;;  %v5098_v9 = vpop.eup %5097  ;;  %5109 = vrcp.f32 %v6055_v50  ;;  %v6060_v7 = vadd.f32 1.0, %v5096_v2  ;;  %vm693_vm3 = vweird.f32 %v6055_v50 }
  0xc6   :  { %v5100_v31 = vpop.eup %5099  ;;  %v6068_v33 = vadd.f32 1.0, %v5098_v9  ;;  %5111 = vpow2.f32 %v4734_v28  ;;  %v4736_v9 = vmul.f32 -1.442695, %v6063_v48  ;;  %v4737_v28 = vmul.f32 -1.442695, %v6066_v30 }
  0xc7   :  { %v6071_v63 = vpop.eup %5101  ;;  %5113 = vrcp.f32 %v6060_v7  ;;  %v6074_v26 = vadd.f32 1.0, %v5100_v31 }
  0xc8   :  { %11077 = vst [vmem:[#allocation53_spill] sm:$0xff] %v6068_v33  ;;  %v5104_v2 = vpop.eup %5103  ;;  %5115 = vrcp.f32 %v6068_v33  ;;  %v273_v14 = vpop.f32.mrf.mxu2 }
  0xc9   :  { %11078 = vst [vmem:[#allocation54_spill] sm:$0xff] %v6071_v63  ;;  %v5106_v60 = vpop.eup %5105  ;;  %5117 = vrcp.f32 %v6074_v26  ;;  %v6078_v5 = vadd.f32 1.0, %v5104_v2  ;;  %v314_v42 = vpop.f32.mrf.mxu3  ;;  %v6087_v31 = vadd.f32 %v273_v14, %v5903_v51 }
  0xca   :  { %11079 = vst [vmem:[#allocation55_spill] sm:$0xff] %v6074_v26  ;;  %v6082_v61 = vpop.eup %5107  ;;  %v6084_v27 = vadd.f32 1.0, %v5106_v60  ;;  %5119 = vpow2.f32 %v4735_v19  ;;  %v6090_v32 = vadd.f32 %v314_v42, %v5903_v51  ;;  %v194_v29 = vpop.f32.mrf.mxu0  ;;  %v699_v51 = vand.u32 2147483648, %v6055_v50 }
  0xcb   :  { %11080 = vst [vmem:[#allocation56_spill] sm:$0xff] %v6082_v61  ;;  %v235_v2 = vpop.f32.mrf.mxu1  ;;  %v6092_v47 = vpop.eup %5109  ;;  %5121 = vrcp.f32 %v6078_v5  ;;  %v6096_v8 = vadd.f32 %v194_v29, %v5899_v49  ;;  %v4738_v19 = vmul.f32 -1.442695, %v6087_v31  ;;  %v6115_v61 = vadd.f32 1.0, %v5960_v44 }
  0xcc   :  { %11081 = vst [vmem:[#allocation57_spill] sm:$0xff] %v6087_v31  ;;  %v5112_v0 = vpop.eup %5111  ;;  %5123 = vrcp.f32 %v6084_v27  ;;  %v6101_v14 = vadd.f32 %v235_v2, %v5899_v49  ;;  %v4739_v10 = vmul.f32 -1.442695, %v6090_v32  ;;  %v6118_v2 = vadd.f32 1.0, %v6019_v43 }
  0xcd   :  { %11082 = vst [vmem:[#allocation58_spill] sm:$0xff] %v6090_v32  ;;  %v6104_v42 = vpop.eup %5113  ;;  %v6106_v60 = vadd.f32 1.0, %v5112_v0  ;;  %5125 = vpow2.f32 %v4736_v9  ;;  %v4740_v29 = vmul.f32 -1.442695, %v6096_v8  ;;  %v759_v0 = vand.u32 2147483648, %v6078_v5 }
  0xce   :  { %v6109_v16 = vpop.eup %5115  ;;  %5127 = vpow2.f32 %v4737_v28  ;;  %11086 = vst [vmem:[#allocation62_spill] sm:$0xff] %v6115_v61  ;;  %v4741_v38 = vmul.f32 -1.442695, %v6101_v14  ;;  %v697_v28 = vand.u32 2147483647, %v6055_v50  ;;  %v6124_v55 = vor.u32 1.1754944e-38, %v699_v51 }
  0xcf   :  { %11083 = vst [vmem:[#allocation59_spill] sm:$0xff] %v6106_v60  ;;  %v6112_v57 = vpop.eup %5117  ;;  %5129 = vrcp.f32 %v6106_v60  ;;  %v757_v61 = vand.u32 2147483647, %v6078_v5  ;;  %vm753_vm2 = vweird.f32 %v6078_v5  ;;  %v6147_v54 = vor.u32 1.1754944e-38, %v759_v0 }
  0xd0   :  { %11084 = vst [vmem:[#allocation60_spill] sm:$0xff] %v6109_v16  ;;  %v5120_v9 = vpop.eup %5119  ;;  %5131 = vpow2.f32 %v4738_v19  ;;  %v276_v44 = vpop.f32.mrf.mxu2  ;;  %v772_v25 = vand.u32 2147483647, %v6084_v27  ;;  %vm768_vm4 = vweird.f32 %v6084_v27  ;;  %vm694_vm5 = vweird.f32 %v6092_v47 }
  0xd1   :  { %11085 = vst [vmem:[#allocation61_spill] sm:$0xff] %v6112_v57  ;;  %v6126_v36 = vpop.eup %5121  ;;  %v6128_v15 = vadd.f32 1.0, %v5120_v9  ;;  %5133 = vpow2.f32 %v4739_v10  ;;  %v317_v43 = vpop.f32.mrf.mxu3  ;;  %v6138_v63 = vadd.f32 %v276_v44, %v5899_v49  ;;  %v774_v10 = vand.u32 2147483648, %v6084_v27  ;;  %vm6256_vm1 = vmor %vm693_vm3, %vm694_vm5 }
  0xd2   :  { %11087 = vst [vmem:[#allocation63_spill] sm:$0xff] %v6118_v2  ;;  %v6133_v2 = vmul.f32 %v6042_v20, %v6005_v24  ;;  %v6135_v19 = vpop.eup %5123  ;;  %5135 = vpow2.f32 %v4740_v29  ;;  %v749_v51 = vmul.f32 %v6126_v36, %v6078_v5  ;;  %v6145_v12 = vadd.f32 %v317_v43, %v5899_v49 }
  0xd3   :  { %11088 = vst [vmem:[#allocation64_spill] sm:$0xff] %v6128_v15  ;;  %v5126_v9 = vpop.eup %5125  ;;  %v689_v29 = vmul.f32 %v6092_v47, %v6055_v50  ;;  %5137 = vpow2.f32 %v4741_v38  ;;  %v4742_v46 = vmul.f32 -1.442695, %v6138_v63  ;;  %v764_v22 = vmul.f32 %v6135_v19, %v6084_v27 }
  0xd4   :  { %v5128_v44 = vpop.eup %5127  ;;  %v6152_v35 = vadd.f32 1.0, %v5126_v9  ;;  %5139 = vrcp.f32 %v6128_v15  ;;  %v6167_v38 = vmul.f32 %v6104_v42, %v6060_v7  ;;  %v750_v9 = vsub.f32 1.0, %v749_v51 }
  0xd5   :  { %v6158_v49 = vpop.eup %5129  ;;  %v6161_v0 = vadd.f32 1.0, %v5128_v44  ;;  %vm754_vm6 = vweird.f32 %v6126_v36  ;;  %vm6171_vm7 = vcmp.eq.f32.partialorder %v757_v61, 8.507059e+37  ;;  %v6175_v44 = vor.u32 1.1754944e-38, %v774_v10 }
  0xd6   :  { %11089 = vst [vmem:[#allocation65_spill] sm:$0xff] %v6158_v49  ;;  %v5132_v43 = vpop.eup %5131  ;;  %5141 = vrcp.f32 %v6152_v35  ;;  %v819_v3 = vand.u32 2147483648, %v6152_v35  ;;  %vm769_vm8 = vweird.f32 %v6135_v19  ;;  %v4743_v61 = vmul.f32 -1.442695, %v6145_v12  ;;  %vm6225_vm13 = vmor %vm753_vm2, %vm754_vm6 }
  0xd7   :  { %v5134_v57 = vpop.eup %5133  ;;  %5143 = vrcp.f32 %v6161_v0  ;;  %v6178_v26 = vadd.f32 1.0, %v5132_v43  ;;  %v765_v51 = vsub.f32 1.0, %v764_v22  ;;  %v834_v33 = vand.u32 2147483648, %v6161_v0  ;;  %vm6273_vm3 = vmor %vm768_vm4, %vm769_vm8 }
  0xd8   :  { %v5136_v40 = vpop.eup %5135  ;;  %v6182_v16 = vadd.f32 1.0, %v5134_v57  ;;  %5145 = vpow2.f32 %v4742_v46  ;;  %v690_v21 = vsub.f32 1.0, %v689_v29  ;;  %vm813_vm9 = vweird.f32 %v6152_v35 }
  0xd9   :  { %5147 = vrcp.f32 %v6178_v26  ;;  %v6186_v10 = vadd.f32 1.0, %v5136_v40  ;;  %v5138_v43 = vpop.eup %5137  ;;  %v817_v45 = vand.u32 2147483647, %v6152_v35  ;;  %v751_v57 = vmul.f32 %v6126_v36, %v750_v9 }
  0xda   :  { %5149 = vrcp.f32 %v6182_v16  ;;  %vm6193_vm10 = vcmp.eq.f32.partialorder %v772_v25, 8.507059e+37  ;;  %vm6197_vm11 = vcmp.eq.f32.partialorder %v697_v28, 8.507059e+37  ;;  %v6201_v40 = vpop.eup %5139  ;;  %v6204_v29 = vadd.f32 1.0, %v5138_v43 }
  0xdb   :  { %11096 = vst [vmem:[#allocation66_spill] sm:$0xff] %v6201_v40  ;;  %5151 = vrcp.f32 %v6186_v10  ;;  %v6206_v34 = vor.u32 1.1754944e-38, %v819_v3  ;;  %vm828_vm12 = vweird.f32 %v6161_v0  ;;  %v832_v9 = vand.u32 2147483647, %v6161_v0 }
  0xdc   :  { %v6210_v25 = vpop.eup %5141  ;;  %5153 = vpow2.f32 %v4743_v61  ;;  %v879_v28 = vand.u32 2147483648, %v6186_v10  ;;  %v752_v18 = vadd.f32 %v6126_v36, %v751_v57  ;;  %v766_v39 = vmul.f32 %v6135_v19, %v765_v51 }
  0xdd   :  { %v6215_v23 = vpop.eup %5143  ;;  %5155 = vrcp.f32 %v6204_v29  ;;  %v877_v3 = vand.u32 2147483647, %v6186_v10  ;;  %v6219_v43 = vor.u32 1.1754944e-38, %v834_v33  ;;  %v691_v57 = vmul.f32 %v6092_v47, %v690_v21 }
  0xde   :  { %v5146_v40 = vpop.eup %5145  ;;  %v6230_v51 = vor.u32 1.1754944e-38, %v879_v28  ;;  %v892_v15 = vand.u32 2147483647, %v6204_v29  ;;  %v894_v17 = vand.u32 2147483648, %v6204_v29  ;;  %v809_v33 = vmul.f32 %v6210_v25, %v6152_v35 }
  0xdf   :  { %vm6236_vm14 = vcmp.eq.f32.partialorder %v817_v45, 8.507059e+37  ;;  %v6240_v5 = vpop.eup %5147  ;;  %v6242_v49 = vadd.f32 1.0, %v5146_v40  ;;  %vm814_vm15 = vweird.f32 %v6210_v25  ;;  %v824_v21 = vmul.f32 %v6215_v23, %v6161_v0 }
  0xe0   :  { %vm829_vm2 = vweird.f32 %v6215_v23  ;;  %vm6248_vm6 = vcmp.eq.f32.partialorder %v832_v9, 8.507059e+37  ;;  %v6260_v40 = vpop.eup %5149  ;;  %vm873_vm0 = vweird.f32 %v6186_v10  ;;  %v6263_v60 = vor.u32 1.1754944e-38, %v894_v17 }
  0xe1   :  { %v810_v1 = vsub.f32 1.0, %v809_v33  ;;  %v756_v9 = vsel %vm6225_vm13, %v6126_v36, %v752_v18  ;;  %v767_v11 = vadd.f32 %v6135_v19, %v766_v39  ;;  %v5152_v31 = vpop.eup %5151  ;;  %5157 = vrcp.f32 %v6242_v49 }
  0xe2   :  { %v825_v17 = vsub.f32 1.0, %v824_v21  ;;  %v761_v33 = vsel %vm6171_vm7, %v6147_v54, %v756_v9  ;;  %v692_v18 = vadd.f32 %v6092_v47, %v691_v57  ;;  %v5154_v36 = vpop.eup %5153  ;;  %v869_v39 = vmul.f32 %v5152_v31, %v6186_v10 }
  0xe3   :  { %vm874_vm5 = vweird.f32 %v5152_v31  ;;  %vm6283_vm13 = vcmp.eq.f32.partialorder %v877_v3, 8.507059e+37  ;;  %vm888_vm4 = vweird.f32 %v6204_v29  ;;  %v811_v61 = vmul.f32 %v6210_v25, %v810_v1  ;;  %v5156_v59 = vpop.eup %5155 }
  0xe4   :  { %v6290_v21 = vmul.f32 %v761_v33, %v6024_v53  ;;  %v6292_v6 = vadd.f32 1.0, %v5154_v36  ;;  %v826_v54 = vmul.f32 %v6215_v23, %v825_v17  ;;  %v771_v57 = vsel %vm6273_vm3, %v6135_v19, %v767_v11  ;;  %vm815_vm3 = vmor %vm813_vm9, %vm814_vm15 }
  0xe5   :  { %v696_v3 = vsel %vm6256_vm1, %v6092_v47, %v692_v18  ;;  %v870_v9 = vsub.f32 1.0, %v869_v39  ;;  %v884_v62 = vmul.f32 %v5156_v59, %v6204_v29  ;;  %vm889_vm7 = vweird.f32 %v5156_v59  ;;  %vm830_vm1 = vmor %vm828_vm12, %vm829_vm2 }
  0xe6   :  { %vm6302_vm8 = vcmp.eq.f32.partialorder %v892_v15, 8.507059e+37  ;;  %v812_v1 = vadd.f32 %v6210_v25, %v811_v61  ;;  %5159 = vrcp.f32 %v6292_v6  ;;  %v827_v11 = vadd.f32 %v6215_v23, %v826_v54  ;;  %vm875_vm9 = vmor %vm873_vm0, %vm874_vm5 }
  0xe7   :  { %v776_v47 = vsel %vm6193_vm10, %v6175_v44, %v771_v57  ;;  %v701_v15 = vsel %vm6197_vm11, %v6124_v55, %v696_v3  ;;  %v871_v19 = vmul.f32 %v5152_v31, %v870_v9  ;;  %v885_v45 = vsub.f32 1.0, %v884_v62  ;;  %v6327_v17 = vpop.eup %5157  ;;  %vm890_vm0 = vmor %vm888_vm4, %vm889_vm7 }
  0xe8   :  { %v816_v50 = vsel %vm815_vm3, %v6210_v25, %v812_v1  ;;  %v6325_v35 = vmul.f32 %v776_v47, %v6027_v58  ;;  %v831_v55 = vsel %vm830_vm1, %v6215_v23, %v827_v11  ;;  %v944_v62 = vmul.f32 %v701_v15, %v5989_v13 }
  0xe9   :  { %v821_v44 = vsel %vm6236_vm14, %v6206_v34, %v816_v50  ;;  %v705_v46 = vsub.f32 1.0, %v6167_v38  ;;  %v872_v22 = vadd.f32 %v5152_v31, %v871_v19  ;;  %v886_v25 = vmul.f32 %v5156_v59, %v885_v45  ;;  %v11139_v45 = vld [vmem:[#allocation65_spill] sm:$0xff] }
  0xea   :  { %v952_v0 = vmul.f32 %v821_v44, %v6063_v48  ;;  %v836_v58 = vsel %vm6248_vm6, %v6219_v43, %v831_v55  ;;  %vm708_vm10 = vweird.f32 %v6060_v7  ;;  %vm709_vm11 = vweird.f32 %v6104_v42 }
  0xeb   :  { %v953_v32 = vmul.f32 %v836_v58, %v6066_v30  ;;  %v706_v23 = vmul.f32 %v6104_v42, %v705_v46  ;;  %v876_v13 = vsel %vm875_vm9, %v5152_v31, %v872_v22  ;;  %v887_v34 = vadd.f32 %v5156_v59, %v886_v25  ;;  %vm6346_vm12 = vmor %vm708_vm10, %vm709_vm11 }
  0xec   :  { %v712_v38 = vand.u32 2147483647, %v6060_v7  ;;  %v714_v43 = vand.u32 2147483648, %v6060_v7  ;;  %v6352_v10 = vpop.eup %5159  ;;  %v881_v30 = vsel %vm6283_vm13, %v6230_v51, %v876_v13  ;;  %v899_v28 = vmul.f32 %v6327_v17, %v6242_v49 }
  0xed   :  { %v707_v31 = vadd.f32 %v6104_v42, %v706_v23  ;;  %vm903_vm14 = vweird.f32 %v6242_v49  ;;  %v956_v33 = vmul.f32 %v881_v30, %v6096_v8  ;;  %v891_v7 = vsel %vm890_vm0, %v5156_v59, %v887_v34 }
  0xee   :  { %vm713_vm15 = vcmp.eq.f32.partialorder %v712_v38, 8.507059e+37  ;;  %v715_v18 = vor.u32 1.1754944e-38, %v714_v43  ;;  %v896_v51 = vsel %vm6302_vm8, %v6263_v60, %v891_v7  ;;  %v900_v36 = vsub.f32 1.0, %v899_v28 }
  0xef   :  { %v711_v29 = vsel %vm6346_vm12, %v6104_v42, %v707_v31  ;;  %vm904_vm2 = vweird.f32 %v6327_v17  ;;  %977 = vmatpush.msrb.mxu0 %v956_v33  ;;  %v957_v39 = vmul.f32 %v896_v51, %v6101_v14  ;;  %v907_v8 = vand.u32 2147483647, %v6242_v49  ;;  %v11131_v42 = vld [vmem:[#allocation57_spill] sm:$0xff] }
  0xf0   :  { %v716_v27 = vsel %vm713_vm15, %v715_v18, %v711_v29  ;;  %v909_v59 = vand.u32 2147483648, %v6242_v49  ;;  %v901_v54 = vmul.f32 %v6327_v17, %v900_v36  ;;  %v914_v60 = vmul.f32 %v6352_v10, %v6292_v6  ;;  %vm905_vm4 = vmor %vm903_vm14, %vm904_vm2 }
  0xf1   :  { %v945_v61 = vmul.f32 %v716_v27, %v5999_v56  ;;  %vm918_vm6 = vweird.f32 %v6292_v6  ;;  %997 = vmatpush.msrb.mxu1 %v957_v39  ;;  %978 = vmatpush.msrb.mxu0 %v952_v0  ;;  %vm6380_vm5 = vcmp.eq.f32.partialorder %v907_v8, 8.507059e+37  ;;  %vm919_vm13 = vweird.f32 %v6352_v10  ;;  %v11129_v39 = vld [vmem:[#allocation35_spill] sm:$0xff]  ;;  %v11130_v27 = vld [vmem:[#allocation46_spill] sm:$0xff] }
  0xf2   :  { %v910_v14 = vor.u32 1.1754944e-38, %v909_v59  ;;  %v922_v57 = vand.u32 2147483647, %v6292_v6  ;;  %v902_v56 = vadd.f32 %v6327_v17, %v901_v54  ;;  %v915_v3 = vsub.f32 1.0, %v914_v60  ;;  %vm920_vm11 = vmor %vm918_vm6, %vm919_vm13 }
  0xf3   :  { %v924_v9 = vand.u32 2147483648, %v6292_v6  ;;  %v630_v53 = vsub.f32 1.0, %v6133_v2  ;;  %998 = vmatpush.msrb.mxu1 %v953_v32  ;;  %979 = vmatpush.msrb.mxu0 %v6290_v21  ;;  %vm633_vm8 = vweird.f32 %v6005_v24  ;;  %vm634_vm3 = vweird.f32 %v6042_v20 }
  0xf4   :  { %vm6394_vm7 = vcmp.eq.f32.partialorder %v922_v57, 8.507059e+37  ;;  %v637_v11 = vand.u32 2147483647, %v6005_v24  ;;  %v906_v2 = vsel %vm905_vm4, %v6327_v17, %v902_v56  ;;  %v916_v47 = vmul.f32 %v6352_v10, %v915_v3  ;;  %vm6407_vm1 = vmor %vm633_vm8, %vm634_vm3  ;;  %v11132_v56 = vld [vmem:[#allocation38_spill] sm:$0xff]  ;;  %v11133_v3 = vld [vmem:[#allocation47_spill] sm:$0xff] }
  0xf5   :  { %v925_v21 = vor.u32 1.1754944e-38, %v924_v9  ;;  %v631_v15 = vmul.f32 %v6042_v20, %v630_v53  ;;  %999 = vmatpush.msrb.mxu1 %v6325_v35  ;;  %980 = vmatpush.msrb.mxu0 %v944_v62  ;;  %v911_v49 = vsel %vm6380_vm5, %v910_v14, %v906_v2  ;;  %v639_v50 = vand.u32 2147483648, %v6005_v24 }
  0xf6   :  { %vm6411_vm9 = vcmp.eq.f32.partialorder %v637_v11, 8.507059e+37  ;;  %v644_v17 = vmul.f32 %v6053_v4, %v6021_v52  ;;  %v958_v44 = vmul.f32 %v911_v49, %v6138_v63  ;;  %v917_v35 = vadd.f32 %v6352_v10, %v916_v47 }
  0xf7   :  { %v632_v55 = vadd.f32 %v6042_v20, %v631_v15  ;;  %vm648_vm10 = vweird.f32 %v6021_v52  ;;  %1000 = vmatpush.msrb.mxu1 %v945_v61  ;;  %v640_v62 = vor.u32 1.1754944e-38, %v639_v50  ;;  %vm649_vm12 = vweird.f32 %v6053_v4 }
  0xf8   :  { %v645_v46 = vsub.f32 1.0, %v644_v17  ;;  %v652_v24 = vand.u32 2147483647, %v6021_v52  ;;  %1017 = vmatpush.msrb.mxu2 %v958_v44  ;;  %v921_v63 = vsel %vm920_vm11, %v6352_v10, %v917_v35  ;;  %v654_v25 = vand.u32 2147483648, %v6021_v52  ;;  %vm6448_vm14 = vmor %vm648_vm10, %vm649_vm12  ;;  %v11140_v17 = vld [vmem:[#allocation58_spill] sm:$0xff] }
  0xf9   :  { %v636_v22 = vsel %vm6407_vm1, %v6042_v20, %v632_v55  ;;  %v839_v0 = vmul.f32 %v6240_v5, %v6178_v26  ;;  %v926_v6 = vsel %vm6394_vm7, %v925_v21, %v921_v63  ;;  %vm843_vm15 = vweird.f32 %v6178_v26 }
  0xfa   :  { %v641_v58 = vsel %vm6411_vm9, %v640_v62, %v636_v22  ;;  %v646_v32 = vmul.f32 %v6053_v4, %v645_v46  ;;  %vm6440_vm0 = vcmp.eq.f32.partialorder %v652_v24, 8.507059e+37  ;;  %v959_v13 = vmul.f32 %v926_v6, %v6145_v12 }
  0xfb   :  { %v940_v20 = vmul.f32 %v641_v58, %v5948_v37  ;;  %v655_v48 = vor.u32 1.1754944e-38, %v654_v25  ;;  %v840_v38 = vsub.f32 1.0, %v839_v0  ;;  %vm844_vm2 = vweird.f32 %v6240_v5  ;;  %v11145_v58 = vld [vmem:[#allocation21_spill] sm:$0xff] }
  0xfc   :  { %v647_v43 = vadd.f32 %v6053_v4, %v646_v32  ;;  %v847_v10 = vand.u32 2147483647, %v6178_v26  ;;  %1037 = vmatpush.msrb.mxu3 %v959_v13  ;;  %v849_v52 = vand.u32 2147483648, %v6178_v26  ;;  %v854_v12 = vmul.f32 %v6260_v40, %v6182_v16  ;;  %vm845_vm4 = vmor %vm843_vm15, %vm844_vm2  ;;  %v11146_v13 = vld [vmem:[#allocation64_spill] sm:$0xff] }
  0xfd   :  { %981 = vmatpush.msrb.mxu0 %v940_v20  ;;  %v841_v37 = vmul.f32 %v6240_v5, %v840_v38  ;;  %vm858_vm6 = vweird.f32 %v6182_v16  ;;  %vm859_vm13 = vweird.f32 %v6260_v40  ;;  %v862_v28 = vand.u32 2147483647, %v6182_v16  ;;  %v11147_v20 = vld [vmem:[#allocation66_spill] sm:$0xff] }
  0xfe   :  { %v651_v30 = vsel %vm6448_vm14, %v6053_v4, %v647_v43  ;;  %vm6464_vm5 = vcmp.eq.f32.partialorder %v847_v10, 8.507059e+37  ;;  %v850_v18 = vor.u32 1.1754944e-38, %v849_v52  ;;  %v855_v51 = vsub.f32 1.0, %v854_v12  ;;  %vm860_vm1 = vmor %vm858_vm6, %vm859_vm13  ;;  %v11174_v38 = vld [vmem:[#allocation18_spill] sm:$0xff] }
  0xff   :  { %v656_v33 = vsel %vm6440_vm0, %v655_v48, %v651_v30  ;;  %v842_v7 = vadd.f32 %v6240_v5, %v841_v37  ;;  %vm6478_vm7 = vcmp.eq.f32.partialorder %v862_v28, 8.507059e+37  ;;  %v864_v36 = vand.u32 2147483648, %v6182_v16  ;;  %v11150_v30 = vld [vmem:[#allocation23_spill] sm:$0xff] }
 0x100   :  { %v941_v29 = vmul.f32 %v656_v33, %v5955_v41  ;;  %v569_v8 = vmul.f32 %v11130_v27, %v11129_v39  ;;  %v856_v61 = vmul.f32 %v6260_v40, %v855_v51  ;;  %vm573_vm8 = vweird.f32 %v11129_v39  ;;  %v11151_v33 = vld [vmem:[#allocation28_spill] sm:$0xff] }
 0x101   :  { %v846_v59 = vsel %vm845_vm4, %v6240_v5, %v842_v7  ;;  %vm574_vm3 = vweird.f32 %v11130_v27  ;;  %v865_v41 = vor.u32 1.1754944e-38, %v864_v36  ;;  %v577_v60 = vand.u32 2147483647, %v11129_v39  ;;  %v11152_v7 = vld [vmem:[#allocation41_spill] sm:$0xff] }
 0x102   :  { %1001 = vmatpush.msrb.mxu1 %v941_v29  ;;  %v851_v26 = vsel %vm6464_vm5, %v850_v18, %v846_v59  ;;  %v570_v54 = vsub.f32 1.0, %v569_v8  ;;  %v857_v57 = vadd.f32 %v6260_v40, %v856_v61  ;;  %v579_v5 = vand.u32 2147483648, %v11129_v39  ;;  %vm6513_vm12 = vmor %vm573_vm8, %vm574_vm3  ;;  %v11155_v59 = vld [vmem:[#allocation51_spill] sm:$0xff] }
 0x103   :  { %v954_v14 = vmul.f32 %v851_v26, %v11131_v42  ;;  %v584_v9 = vmul.f32 %v11133_v3, %v11132_v56  ;;  %vm6502_vm9 = vcmp.eq.f32.partialorder %v577_v60, 8.507059e+37  ;;  %vm588_vm10 = vweird.f32 %v11132_v56  ;;  %v11157_v60 = vld [vmem:[#allocation42_spill] sm:$0xff] }
 0x104   :  { %v571_v53 = vmul.f32 %v11130_v27, %v570_v54  ;;  %vm589_vm11 = vweird.f32 %v11133_v3  ;;  %v861_v11 = vsel %vm860_vm1, %v6260_v40, %v857_v57  ;;  %v580_v2 = vor.u32 1.1754944e-38, %v579_v5  ;;  %v11138_v40 = vld [vmem:[#allocation59_spill] sm:$0xff]  ;;  %v11156_v54 = vld [vmem:[#allocation30_spill] sm:$0xff] }
 0x105   :  { %1018 = vmatpush.msrb.mxu2 %v954_v14  ;;  %v585_v47 = vsub.f32 1.0, %v584_v9  ;;  %v592_v21 = vand.u32 2147483647, %v11132_v56  ;;  %v866_v15 = vsel %vm6478_vm7, %v865_v41, %v861_v11  ;;  %v594_v19 = vand.u32 2147483648, %v11132_v56  ;;  %vm6538_vm15 = vmor %vm588_vm10, %vm589_vm11 }
 0x106   :  { %v572_v49 = vadd.f32 %v11130_v27, %v571_v53  ;;  %v779_v50 = vmul.f32 %v11139_v45, %v11138_v40  ;;  %v955_v44 = vmul.f32 %v866_v15, %v11140_v17  ;;  %vm783_vm14 = vweird.f32 %v11138_v40  ;;  %v11164_v15 = vld [vmem:[#allocation52_spill] sm:$0xff] }
 0x107   :  { %v586_v35 = vmul.f32 %v11133_v3, %v585_v47  ;;  %vm6526_vm0 = vcmp.eq.f32.partialorder %v592_v21, 8.507059e+37  ;;  %v595_v24 = vor.u32 1.1754944e-38, %v594_v19  ;;  %vm784_vm2 = vweird.f32 %v11139_v45  ;;  %v11163_v47 = vld [vmem:[#allocation60_spill] sm:$0xff] }
 0x108   :  { %v576_v62 = vsel %vm6513_vm12, %v11130_v27, %v572_v49  ;;  %v780_v63 = vsub.f32 1.0, %v779_v50  ;;  %1038 = vmatpush.msrb.mxu3 %v955_v44  ;;  %v787_v0 = vand.u32 2147483647, %v11138_v40  ;;  %v789_v6 = vand.u32 2147483648, %v11138_v40  ;;  %vm785_vm4 = vmor %vm783_vm14, %vm784_vm2 }
 0x109   :  { %v581_v22 = vsel %vm6502_vm9, %v580_v2, %v576_v62  ;;  %v587_v25 = vadd.f32 %v11133_v3, %v586_v35  ;;  %v794_v34 = vmul.f32 %v11147_v20, %v11146_v13  ;;  %vm798_vm6 = vweird.f32 %v11146_v13  ;;  %v11162_v2 = vld [vmem:[#allocation53_spill] sm:$0xff] }
 0x10a   :  { %v936_v32 = vmul.f32 %v581_v22, %v11145_v58  ;;  %v781_v23 = vmul.f32 %v11139_v45, %v780_v63  ;;  %vm6556_vm5 = vcmp.eq.f32.partialorder %v787_v0, 8.507059e+37  ;;  %v790_v43 = vor.u32 1.1754944e-38, %v789_v6  ;;  %v11171_v0 = vld [vmem:[#allocation61_spill] sm:$0xff] }
 0x10b   :  { %v591_v48 = vsel %vm6538_vm15, %v11133_v3, %v587_v25  ;;  %vm799_vm13 = vweird.f32 %v11147_v20  ;;  %v795_v52 = vsub.f32 1.0, %v794_v34  ;;  %v802_v12 = vand.u32 2147483647, %v11146_v13  ;;  %v11170_v25 = vld [vmem:[#allocation55_spill] sm:$0xff] }
 0x10c   :  { %982 = vmatpush.msrb.mxu0 %v936_v32  ;;  %v596_v10 = vsel %vm6526_vm0, %v595_v24, %v591_v48  ;;  %v782_v37 = vadd.f32 %v11139_v45, %v781_v23  ;;  %v804_v28 = vand.u32 2147483648, %v11146_v13  ;;  %v509_v18 = vmul.f32 %v11152_v7, %v11151_v33  ;;  %vm800_vm1 = vmor %vm798_vm6, %vm799_vm13  ;;  %v11169_v24 = vld [vmem:[#allocation17_spill] sm:$0xff] }
 0x10d   :  { %v937_v31 = vmul.f32 %v596_v10, %v11150_v30  ;;  %vm513_vm7 = vweird.f32 %v11151_v33  ;;  %v796_v29 = vmul.f32 %v11147_v20, %v795_v52  ;;  %vm6576_vm8 = vcmp.eq.f32.partialorder %v802_v12, 8.507059e+37  ;;  %v11176_v52 = vld [vmem:[#allocation31_spill] sm:$0xff] }
 0x10e   :  { %v786_v51 = vsel %vm785_vm4, %v11139_v45, %v782_v37  ;;  %vm514_vm3 = vweird.f32 %v11152_v7  ;;  %v805_v39 = vor.u32 1.1754944e-38, %v804_v28  ;;  %v510_v27 = vsub.f32 1.0, %v509_v18  ;;  %v11175_v37 = vld [vmem:[#allocation22_spill] sm:$0xff] }
 0x10f   :  { %1002 = vmatpush.msrb.mxu1 %v937_v31  ;;  %v791_v36 = vsel %vm6556_vm5, %v790_v43, %v786_v51  ;;  %v517_v8 = vand.u32 2147483647, %v11151_v33  ;;  %v797_v26 = vadd.f32 %v11147_v20, %v796_v29  ;;  %v519_v41 = vand.u32 2147483648, %v11151_v33  ;;  %vm6605_vm12 = vmor %vm513_vm7, %vm514_vm3  ;;  %v11179_v29 = vld [vmem:[#allocation44_spill] sm:$0xff] }
 0x110   :  { %v950_v61 = vmul.f32 %v791_v36, %v11155_v59  ;;  %v524_v42 = vmul.f32 %v11157_v60, %v11156_v54  ;;  %v511_v14 = vmul.f32 %v11152_v7, %v510_v27  ;;  %vm528_vm10 = vweird.f32 %v11156_v54  ;;  %v11180_v27 = vld [vmem:[#allocation24_spill] sm:$0xff] }
 0x111   :  { %vm6594_vm9 = vcmp.eq.f32.partialorder %v517_v8, 8.507059e+37  ;;  %vm529_vm11 = vweird.f32 %v11157_v60  ;;  %v801_v5 = vsel %vm800_vm1, %v11147_v20, %v797_v26  ;;  %v520_v3 = vor.u32 1.1754944e-38, %v519_v41  ;;  %v11181_v8 = vld [vmem:[#allocation33_spill] sm:$0xff] }
 0x112   :  { %1019 = vmatpush.msrb.mxu2 %v950_v61  ;;  %v525_v9 = vsub.f32 1.0, %v524_v42  ;;  %v532_v53 = vand.u32 2147483647, %v11156_v54  ;;  %v806_v1 = vsel %vm6576_vm8, %v805_v39, %v801_v5  ;;  %v512_v11 = vadd.f32 %v11152_v7, %v511_v14  ;;  %vm6630_vm15 = vmor %vm528_vm10, %vm529_vm11 }
 0x113   :  { %v534_v16 = vand.u32 2147483648, %v11156_v54  ;;  %v719_v21 = vmul.f32 %v11163_v47, %v11162_v2  ;;  %v951_v49 = vmul.f32 %v806_v1, %v11164_v15  ;;  %vm723_vm14 = vweird.f32 %v11162_v2  ;;  %v11188_v1 = vld [vmem:[#allocation39_spill] sm:$0xff] }
 0x114   :  { %v526_v19 = vmul.f32 %v11157_v60, %v525_v9  ;;  %vm6618_vm0 = vcmp.eq.f32.partialorder %v532_v53, 8.507059e+37  ;;  %v516_v45 = vsel %vm6605_vm12, %v11152_v7, %v512_v11  ;;  %vm724_vm2 = vweird.f32 %v11163_v47  ;;  %v11187_v9 = vld [vmem:[#allocation54_spill] sm:$0xff] }
 0x115   :  { %v535_v17 = vor.u32 1.1754944e-38, %v534_v16  ;;  %v720_v44 = vsub.f32 1.0, %v719_v21  ;;  %1039 = vmatpush.msrb.mxu3 %v951_v49  ;;  %v521_v35 = vsel %vm6594_vm9, %v520_v3, %v516_v45  ;;  %v727_v62 = vand.u32 2147483647, %v11162_v2  ;;  %vm725_vm4 = vmor %vm723_vm14, %vm724_vm2  ;;  %v11186_v3 = vld [vmem:[#allocation49_spill] sm:$0xff]  ;;  %v11189_v16 = vld [vmem:[#allocation63_spill] sm:$0xff] }
 0x116   :  { %v527_v55 = vadd.f32 %v11157_v60, %v526_v19  ;;  %v729_v46 = vand.u32 2147483648, %v11162_v2  ;;  %v932_v63 = vmul.f32 %v521_v35, %v11169_v24  ;;  %v734_v6 = vmul.f32 %v11171_v0, %v11170_v25  ;;  %v11190_v2 = vld [vmem:[#allocation45_spill] sm:$0xff]  ;;  %v11196_v24 = vld [vmem:[#allocation50_spill] sm:$0xff]  ;;  %v11210_v49 = vld [vmem:[#allocation27_spill] sm:$0xff] }
 0x117   :  { %v721_v22 = vmul.f32 %v11163_v47, %v720_v44  ;;  %vm738_vm6 = vweird.f32 %v11170_v25  ;;  %vm6648_vm5 = vcmp.eq.f32.partialorder %v727_v62, 8.507059e+37  ;;  %vm739_vm13 = vweird.f32 %v11171_v0 }
 0x118   :  { %v531_v58 = vsel %vm6630_vm15, %v11157_v60, %v527_v55  ;;  %v730_v23 = vor.u32 1.1754944e-38, %v729_v46  ;;  %983 = vmatpush.msrb.mxu0 %v932_v63  ;;  %v735_v34 = vsub.f32 1.0, %v734_v6  ;;  %v742_v48 = vand.u32 2147483647, %v11170_v25  ;;  %vm740_vm1 = vmor %vm738_vm6, %vm739_vm13  ;;  %v11195_v55 = vld [vmem:[#allocation14_spill] sm:$0xff]  ;;  %v11197_v63 = vld [vmem:[#allocation56_spill] sm:$0xff] }
 0x119   :  { %v536_v13 = vsel %vm6618_vm0, %v535_v17, %v531_v58  ;;  %v722_v20 = vadd.f32 %v11163_v47, %v721_v22  ;;  %v744_v10 = vand.u32 2147483648, %v11170_v25  ;;  %v449_v12 = vmul.f32 %v11176_v52, %v11175_v37  ;;  %v6751_v6 = vld [vmem:[%s10861_s3] sm:$0xff] }
 0x11a   :  { %v933_v43 = vmul.f32 %v536_v13, %v11174_v38  ;;  %vm453_vm7 = vweird.f32 %v11175_v37  ;;  %v736_v31 = vmul.f32 %v11171_v0, %v735_v34  ;;  %vm6668_vm8 = vcmp.eq.f32.partialorder %v742_v48, 8.507059e+37  ;;  %v11200_v34 = vld [vmem:[#allocation15_spill] sm:$0xff] }
 0x11b   :  { %v726_v30 = vsel %vm725_vm4, %v11163_v47, %v722_v20  ;;  %vm454_vm3 = vweird.f32 %v11176_v52  ;;  %v745_v7 = vor.u32 1.1754944e-38, %v744_v10  ;;  %v450_v18 = vsub.f32 1.0, %v449_v12  ;;  %v11202_v10 = vld [vmem:[#allocation48_spill] sm:$0xff] }
 0x11c   :  { %1003 = vmatpush.msrb.mxu1 %v933_v43  ;;  %v731_v33 = vsel %vm6648_vm5, %v730_v23, %v726_v30  ;;  %v457_v51 = vand.u32 2147483647, %v11175_v37  ;;  %v737_v36 = vadd.f32 %v11171_v0, %v736_v31  ;;  %v459_v39 = vand.u32 2147483648, %v11175_v37  ;;  %vm6697_vm12 = vmor %vm453_vm7, %vm454_vm3  ;;  %v11201_v43 = vld [vmem:[#allocation40_spill] sm:$0xff]  ;;  %v11203_v31 = vld [vmem:[#allocation62_spill] sm:$0xff] }
 0x11d   :  { %v946_v4 = vmul.f32 %v731_v33, %v11179_v29  ;;  %v464_v59 = vmul.f32 %v11181_v8, %v11180_v27  ;;  %v451_v61 = vmul.f32 %v11176_v52, %v450_v18  ;;  %vm468_vm10 = vweird.f32 %v11180_v27 }
 0x11e   :  { %vm6686_vm9 = vcmp.eq.f32.partialorder %v457_v51, 8.507059e+37  ;;  %vm469_vm11 = vweird.f32 %v11181_v8  ;;  %v741_v41 = vsel %vm740_vm1, %v11171_v0, %v737_v36  ;;  %v460_v60 = vor.u32 1.1754944e-38, %v459_v39  ;;  %v11213_v0 = vld [vmem:[#allocation29_spill] sm:$0xff] }
 0x11f   :  { %1020 = vmatpush.msrb.mxu2 %v946_v4  ;;  %v465_v42 = vsub.f32 1.0, %v464_v59  ;;  %v472_v14 = vand.u32 2147483647, %v11180_v27  ;;  %v746_v57 = vsel %vm6668_vm8, %v745_v7, %v741_v41  ;;  %v452_v5 = vadd.f32 %v11176_v52, %v451_v61  ;;  %vm6721_vm0 = vmor %vm468_vm10, %vm469_vm11  ;;  %v11204_v7 = vld [vmem:[#allocation36_spill] sm:$0xff] }
 0x120   :  { %v474_v56 = vand.u32 2147483648, %v11180_v27  ;;  %v659_v53 = vmul.f32 %v11187_v9, %v11186_v3  ;;  %v6709_v11 = vadd.f32 1.0, %v11188_v1  ;;  %5161 = vrcp.f32 %v11189_v16 }
 0x121   :  { %v947_v47 = vmul.f32 %v746_v57, %v11190_v2  ;;  %v466_v21 = vmul.f32 %v11181_v8, %v465_v42  ;;  %v456_v15 = vsel %vm6697_vm12, %v11176_v52, %v452_v5  ;;  %vm6725_vm14 = vcmp.eq.f32.partialorder %v472_v14, 8.507059e+37  ;;  %v11206_v5 = vld [vmem:[#allocation32_spill] sm:$0xff] }
 0x122   :  { %v475_v40 = vor.u32 1.1754944e-38, %v474_v56  ;;  %v660_v45 = vsub.f32 1.0, %v659_v53  ;;  %v461_v50 = vsel %vm6686_vm9, %v460_v60, %v456_v15  ;;  %v667_v44 = vand.u32 2147483647, %v11186_v3  ;;  %v11205_v60 = vld [vmem:[#allocation37_spill] sm:$0xff]  ;;  %v11207_v56 = vld [vmem:[#allocation43_spill] sm:$0xff] }
 0x123   :  { %1040 = vmatpush.msrb.mxu3 %v947_v47  ;;  %v467_v17 = vadd.f32 %v11181_v8, %v466_v21  ;;  %v669_v35 = vand.u32 2147483648, %v11186_v3  ;;  %v928_v62 = vmul.f32 %v461_v50, %v11195_v55  ;;  %vm664_vm15 = vweird.f32 %v11187_v9 }
 0x124   :  { %v661_v46 = vmul.f32 %v11187_v9, %v660_v45  ;;  %v674_v22 = vmul.f32 %v11197_v63, %v11196_v24  ;;  %5163 = vrcp.f32 %v6709_v11  ;;  %vm663_vm2 = vweird.f32 %v11186_v3 }
 0x125   :  { %v471_v25 = vsel %vm6721_vm0, %v11181_v8, %v467_v17  ;;  %vm6744_vm6 = vcmp.eq.f32.partialorder %v667_v44, 8.507059e+37  ;;  %984 = vmatpush.msrb.mxu0 %v928_v62  ;;  %v670_v23 = vor.u32 1.1754944e-38, %v669_v35  ;;  %vm665_vm5 = vmor %vm663_vm2, %vm664_vm15  ;;  %v684_v38 = vand.u32 2147483648, %v11196_v24 }
 0x126   :  { %v476_v58 = vsel %vm6725_vm14, %v475_v40, %v471_v25  ;;  %v662_v32 = vadd.f32 %v11187_v9, %v661_v46  ;;  %v675_v13 = vsub.f32 1.0, %v674_v22  ;;  %v6756_v20 = vpop.eup %5161  ;;  %vm10981_vm13 = vcmask 523264   ;;  %v11212_v22 = vld [vmem:[#allocation34_spill] sm:$0xff] }
 0x127   :  { %v929_v48 = vmul.f32 %v476_v58, %v11200_v34  ;;  %v599_v37 = vmul.f32 %v11202_v10, %v11201_v43  ;;  %vm679_vm4 = vweird.f32 %v11197_v63  ;;  %v682_v30 = vand.u32 2147483647, %v11196_v24  ;;  %4744 = vmatmul.msk.f32.vlgmr.msrb.gmra.mxu0 %vm10981_vm13, %v6751_v6 }
 0x128   :  { %v666_v52 = vsel %vm665_vm5, %v11187_v9, %v662_v32  ;;  %v676_v12 = vmul.f32 %v11197_v63, %v675_v13  ;;  %5165 = vrcp.f32 %v11203_v31  ;;  %vm678_vm7 = vweird.f32 %v11196_v24 }
 0x129   :  { %1004 = vmatpush.msrb.mxu1 %v929_v48  ;;  %v671_v28 = vsel %vm6744_vm6, %v670_v23, %v666_v52  ;;  %v600_v33 = vsub.f32 1.0, %v599_v37  ;;  %v685_v29 = vor.u32 1.1754944e-38, %v684_v38  ;;  %v609_v4 = vand.u32 2147483648, %v11201_v43  ;;  %vm680_vm8 = vmor %vm678_vm7, %vm679_vm4  ;;  %v11214_v37 = vld [vmem:[#allocation20_spill] sm:$0xff] }
 0x12a   :  { %v942_v18 = vmul.f32 %v671_v28, %v11204_v7  ;;  %v677_v51 = vadd.f32 %v11197_v63, %v676_v12  ;;  %4745 = vmatmul.msk.f32.vlgmr.msrb.gmra.mxu1 %vm10981_vm13, %v6751_v6  ;;  %v6777_v36 = vpop.eup %5163  ;;  %vm604_vm3 = vweird.f32 %v11202_v10  ;;  %v607_v27 = vand.u32 2147483647, %v11201_v43 }
 0x12b   :  { %v601_v39 = vmul.f32 %v11202_v10, %v600_v33  ;;  %v614_v8 = vmul.f32 %v6756_v20, %v11189_v16  ;;  %vm683_vm1 = vcmp.eq.f32.partialorder %v682_v30, 8.507059e+37  ;;  %vm603_vm9 = vweird.f32 %v11201_v43 }
 0x12c   :  { %1021 = vmatpush.msrb.mxu2 %v942_v18  ;;  %v681_v59 = vsel %vm680_vm8, %v11197_v63, %v677_v51  ;;  %v622_v61 = vand.u32 2147483647, %v11189_v16  ;;  %vm618_vm10 = vweird.f32 %v11189_v16  ;;  %vm605_vm11 = vmor %vm603_vm9, %vm604_vm3  ;;  %v610_v14 = vor.u32 1.1754944e-38, %v609_v4  ;;  %v11211_v63 = vld [vmem:[#allocation26_spill] sm:$0xff] }
 0x12d   :  { %v686_v26 = vsel %vm683_vm1, %v685_v29, %v681_v59  ;;  %v602_v41 = vadd.f32 %v11202_v10, %v601_v39  ;;  %v615_v54 = vsub.f32 1.0, %v614_v8  ;;  %v624_v57 = vand.u32 2147483648, %v11189_v16  ;;  %v11215_v29 = vld [vmem:[#allocation25_spill] sm:$0xff] }
 0x12e   :  { %v943_v42 = vmul.f32 %v686_v26, %v11205_v60  ;;  %v539_v3 = vmul.f32 %v11207_v56, %v11206_v5  ;;  %v6793_v9 = vpop.eup %5165  ;;  %vm608_vm12 = vcmp.eq.f32.partialorder %v607_v27, 8.507059e+37  ;;  %vm619_vm0 = vweird.f32 %v6756_v20 }
 0x12f   :  { %v606_v53 = vsel %vm605_vm11, %v11202_v10, %v602_v41  ;;  %v616_v1 = vmul.f32 %v6756_v20, %v615_v54  ;;  %vm6798_vm14 = vcmp.eq.f32.partialorder %v622_v61, 8.507059e+37  ;;  %v549_v15 = vand.u32 2147483648, %v11206_v5  ;;  %vm620_vm2 = vmor %vm618_vm10, %vm619_vm0  ;;  %v11216_v61 = vld [vmem:[#allocation16_spill] sm:$0xff] }
 0x130   :  { %1041 = vmatpush.msrb.mxu3 %v943_v42  ;;  %v611_v2 = vsel %vm608_vm12, %v610_v14, %v606_v53  ;;  %v540_v21 = vsub.f32 1.0, %v539_v3  ;;  %vm543_vm15 = vweird.f32 %v11206_v5  ;;  %v554_v45 = vmul.f32 %v6777_v36, %v6709_v11  ;;  %v11217_v42 = vld [vmem:[#allocation19_spill] sm:$0xff]  ;;  %v63_v3 = vld [vmem:[%s10863_s5] sm:$0xff] }
 0x131   :  { %v938_v19 = vmul.f32 %v611_v2, %v11210_v49  ;;  %v617_v40 = vadd.f32 %v6756_v20, %v616_v1  ;;  %v625_v50 = vor.u32 1.1754944e-38, %v624_v57  ;;  %vm544_vm6 = vweird.f32 %v11207_v56 }
 0x132   :  { %v541_v17 = vmul.f32 %v11207_v56, %v540_v21  ;;  %v547_v44 = vand.u32 2147483647, %v11206_v5  ;;  %v555_v55 = vsub.f32 1.0, %v554_v45  ;;  %vm558_vm5 = vweird.f32 %v6709_v11  ;;  %vm545_vm4 = vmor %vm543_vm15, %vm544_vm6 }
 0x133   :  { %1022 = vmatpush.msrb.mxu2 %v938_v19  ;;  %v621_v35 = vsel %vm620_vm2, %v6756_v20, %v617_v40  ;;  %v564_v62 = vand.u32 2147483648, %v6709_v11  ;;  %v550_v24 = vor.u32 1.1754944e-38, %v549_v15  ;;  %v479_v25 = vmul.f32 %v11212_v22, %v11211_v63  ;;  %v11220_v15 = vld [vmem:[#allocation12_spill] sm:$0xff] }
 0x134   :  { %v626_v46 = vsel %vm6798_vm14, %v625_v50, %v621_v35  ;;  %v542_v16 = vadd.f32 %v11207_v56, %v541_v17  ;;  %v556_v32 = vmul.f32 %v6777_v36, %v555_v55  ;;  %vm559_vm7 = vweird.f32 %v6777_v36 }
 0x135   :  { %v939_v58 = vmul.f32 %v626_v46, %v11213_v0  ;;  %v562_v23 = vand.u32 2147483647, %v6709_v11  ;;  %vm548_vm8 = vcmp.eq.f32.partialorder %v547_v44, 8.507059e+37  ;;  %v565_v20 = vor.u32 1.1754944e-38, %v564_v62  ;;  %vm560_vm3 = vmor %vm558_vm5, %vm559_vm7 }
 0x136   :  { %v546_v13 = vsel %vm545_vm4, %v11207_v56, %v542_v16  ;;  %v480_v34 = vsub.f32 1.0, %v479_v25  ;;  %v557_v38 = vadd.f32 %v6777_v36, %v556_v32  ;;  %v489_v43 = vand.u32 2147483648, %v11211_v63 }
 0x137   :  { %1042 = vmatpush.msrb.mxu3 %v939_v58  ;;  %v551_v48 = vsel %vm548_vm8, %v550_v24, %v546_v13  ;;  %v494_v10 = vmul.f32 %v6793_v9, %v11203_v31  ;;  %vm484_vm1 = vweird.f32 %v11212_v22  ;;  %v487_v30 = vand.u32 2147483647, %v11211_v63 }
 0x138   :  { %v934_v52 = vmul.f32 %v551_v48, %v11214_v37  ;;  %v481_v12 = vmul.f32 %v11212_v22, %v480_v34  ;;  %v561_v28 = vsel %vm560_vm3, %v6777_v36, %v557_v38  ;;  %vm563_vm9 = vcmp.eq.f32.partialorder %v562_v23, 8.507059e+37 }
 0x139   :  { %vm483_vm10 = vweird.f32 %v11211_v63  ;;  %v495_v33 = vsub.f32 1.0, %v494_v10  ;;  %v566_v7 = vsel %vm563_vm9, %v565_v20, %v561_v28  ;;  %v490_v51 = vor.u32 1.1754944e-38, %v489_v43  ;;  %v64_v10 = vld [vmem:[%s10863_s5 + $0x8] sm:$0xff] }
 0x13a   :  { %1023 = vmatpush.msrb.mxu2 %v934_v52  ;;  %v482_v18 = vadd.f32 %v11212_v22, %v481_v12  ;;  %v504_v11 = vand.u32 2147483648, %v11203_v31  ;;  %v935_v4 = vmul.f32 %v566_v7, %v11215_v29  ;;  %vm485_vm11 = vmor %vm483_vm10, %vm484_vm1  ;;  %vm499_vm12 = vweird.f32 %v6793_v9  ;;  %v11228_v29 = vld [vmem:[#allocation13_spill] sm:$0xff] }
 0x13b   :  { %v496_v39 = vmul.f32 %v6793_v9, %v495_v33  ;;  %v502_v36 = vand.u32 2147483647, %v11203_v31  ;;  %vm488_vm0 = vcmp.eq.f32.partialorder %v487_v30, 8.507059e+37  ;;  %vm498_vm14 = vweird.f32 %v11203_v31  ;;  %v6856_v31 = vpop.permute.xlu2 %962 }
 0x13c   :  { %v486_v27 = vsel %vm485_vm11, %v11212_v22, %v482_v18  ;;  %1043 = vmatpush.msrb.mxu3 %v935_v4  ;;  %vm500_vm15 = vmor %vm498_vm14, %vm499_vm12  ;;  %v505_v41 = vor.u32 1.1754944e-38, %v504_v11  ;;  %11218 = vst [vmem:[#allocation35_spill] sm:$0xff] %v6856_v31  ;;  %v1049_v5 = vstv %s56_s26  ;;  %v1105_v2 = vmul.f32 %v63_v3, %v63_v3 }
 0x13d   :  { %v491_v8 = vsel %vm488_vm0, %v490_v51, %v486_v27  ;;  %v497_v59 = vadd.f32 %v6793_v9, %v496_v39  ;;  %vm503_vm2 = vcmp.eq.f32.partialorder %v502_v36, 8.507059e+37  ;;  %vm11219_vm6 = vcmask 1043456  }
 0x13e   :  { %v930_v26 = vmul.f32 %v491_v8, %v11216_v61  ;;  %v1066_v19 = vstv %s4670_s29  ;;  %v6871_v44 = vstv %s4675_s11  ;;  %v1160_v62 = vstv %s1157_s14  ;;  %vm11227_vm5 = vmmov %vm11219_vm6  ;;  %v5551_v8 = vld [vmem:[%s10859_s1] sm:$0xff]  ;;  %s4752_s11 = sld [smem:[#allocation2 + $0x80]] }
 0x13f   :  { %v501_v54 = vsel %vm500_vm15, %v6793_v9, %v497_v59  ;;  %11221 = vst [vmem:[#allocation46_spill] sm:$0xff] %v6871_v44  ;;  %v1163_v16 = vmul.f32 %v6871_v44, %v63_v3  ;;  %v1091_v63 = vstv %s6864_s10  ;;  %v1094_v22 = vstv %s6867_s12  ;;  %vm11229_vm4 = vmmov %vm11227_vm5  ;;  %s4753_s14 = sld [smem:[#allocation2 + $0x81]]  ;;  %s4629_s12 = sshll.u32 %s10865_s7, 4  ;;  %s4630_s12 = int_to_ptr.hbm [resolvable:$true] %s4629_s12 }
 0x140   :  { %1024 = vmatpush.msrb.mxu2 %v930_v26  ;;  %v506_v60 = vsel %vm503_vm2, %v505_v41, %v501_v54  ;;  %v1095_v58 = vmul.f32 %v1094_v22, %v11220_v15  ;;  %v1100_v23 = vstv %s1099_s15  ;;  %v1106_v7 = vmul.f32 %v64_v10, %v64_v10  ;;  %vm11230_vm7 = vmmov %vm11229_vm4  ;;  %s4757_s15 = sld [smem:[#allocation2 + $0x85]]  ;;  %s5671_s7 = smov [#allocation6]  }
 0x141   :  { %v931_v14 = vmul.f32 %v506_v60, %v11217_v42  ;;  %4746 = vmatmul.msk.f32.vlgmr.msrb.gmra.mxu2 %vm10981_vm13, %v6751_v6  ;;  %v1101_v48 = vmul.f32 %v1100_v23, %v63_v3  ;;  %vm11231_vm8 = vcmask 31744   ;;  %v1164_v42 = vmul.f32 %v6871_v44, %v64_v10  ;;  %vm11244_vm14 = vmmov %vm11229_vm4  ;;  %s10812_s13 = sshll.u32 %s5671_s7, 4  ;;  %s4639_s13 = int_to_ptr.vmem [resolvable:$true] %s10812_s13 }
 0x142   :  { %vm11232_vm3 = vmmov %vm11231_vm8  ;;  %v1096_v3 = vmul.f32 %v1094_v22, %v11228_v29 }
 0x143   :  { %1044 = vmatpush.msrb.mxu3 %v931_v14  ;;  %v5552_v14 = vld [vmem:[%s10859_s1 + $0x8] sm:$0xff]  ;;  %vm11233_vm1 = vmmov %vm11232_vm3 }
 0x144   :  { %4747 = vmatmul.msk.f32.vlgmr.msrb.gmra.mxu3 %vm10981_vm13, %v6751_v6  ;;  %vm11234_vm9 = vmmov %vm11233_vm1 }
 0x145   :  { %vm11237_vm10 = vmmov %vm11233_vm1 }
 0x146   :  { %vm11238_vm11 = vmmov %vm11233_vm1  ;;  %s2282_s0 = smul.f32 %s4757_s15, %s8150_s16 }
 0x147   :  { %vm11242_vm12 = vmmov %vm11233_vm1 }
 0x148   :  { %vm11243_vm0 = vmmov %vm11233_vm1 }
 0x149   :  { %vm11245_vm15 = vmmov %vm11229_vm4 }
 0x14a   :  { %vm11246_vm2 = vmmov %vm11243_vm0 }
 0x1a4   :  { %v986_v57 = vpop.f32.mrf.mxu0 }
 0x1a5   :  { %v987_v56 = vadd.f32 %v986_v57, %v6856_v31 }
 0x1a7   :  { %v1006_v9 = vpop.f32.mrf.mxu1  ;;  %v1050_v53 = vmul.f32 %v1049_v5, %v987_v56 }
 0x1a8   :  { %v1007_v1 = vadd.f32 %v1006_v9, %v6856_v31 }
 0x1a9   :  { %1073 = vst.sshfl [vmem:[#allocation1] sm:$0xff pattern:$0x75316420] %v1050_v53 }
 0x1aa   :  { %v1051_v47 = vmul.f32 %v1049_v5, %v1007_v1 }
 0x1ac   :  { %v1058_v6 = vrot.slane %v1051_v47, 4  ;;  %1074 = vst.sshfl [vmem:[#allocation1 + $0x8] sm:$0xff pattern:$0x75316420] %v1051_v47 }
 0x1ad   :  { %1109 = vst [vmem:[#allocation1] ss:$2 sm:$0xff] %v1105_v2  ;;  %v5553_v2 = vld [vmem:[%s10859_s1 + $0x10] sm:$0xff] }
 0x1ae   :  { %v1060_v21 = vsel %vm11219_vm6, %v1050_v53, %v1058_v6  ;;  %v1102_v6 = vmul.f32 %v1100_v23, %v64_v10  ;;  %vm11247_vm6 = vmmov %vm11243_vm0 }
 0x1af   :  { %v1064_v49 = vsub.f32 %v11220_v15, %v1060_v21 }
 0x1b1   :  { %v1067_v45 = vmul.f32 %v1066_v19, %v1064_v49 }
 0x1b3   :  { %v1078_v40 = vld [vmem:[#allocation1 + $0x1] ss:$2 sm:$0xff]  ;;  %v4748_v35 = vclamps-f32 %v1067_v45, 1.0 }
 0x1b4   :  { %v1083_v50 = vsub.f32 %v11220_v15, %v1078_v40  ;;  %v6877_v13 = vld.sshfl [vmem:[#allocation1] sm:$0xff pattern:$0x75316420]  ;;  %v6879_v20 = vld.sshfl [vmem:[#allocation1 + $0x8] sm:$0xff pattern:$0x75316420] }
 0x1b5   :  { %v1092_v0 = vmul.f32 %v4748_v35, %v1091_v63  ;;  %11222 = vst [vmem:[#allocation57_spill] sm:$0xff] %v6877_v13 }
 0x1b6   :  { %v1085_v17 = vmul.f32 %v1083_v50, %v1066_v19  ;;  %11223 = vst [vmem:[#allocation38_spill] sm:$0xff] %v6879_v20  ;;  %v5555_v50 = vld [vmem:[%s10859_s1 + $0x20] sm:$0xff] }
 0x1b7   :  { %v1097_v34 = vadd.f32 %v1095_v58, %v1092_v0  ;;  %v6977_v58 = vpop.permute.xlu2 %1260 }
 0x1b8   :  { %v4750_v55 = vclamps-f32 %v1085_v17, 1.0  ;;  %v5556_v17 = vld [vmem:[%s10859_s1 + $0x28] sm:$0xff] }
 0x1b9   :  { %v6885_v12 = vadd.f32 %v1101_v48, %v1097_v34 }
 0x1ba   :  { %v1158_v46 = vsub.f32 %v4748_v35, %v4750_v55  ;;  %v5557_v35 = vld [vmem:[%s10859_s1 + $0x30] sm:$0xff]  ;;  %v5558_v55 = vld [vmem:[%s10859_s1 + $0x38] sm:$0xff] }
 0x1bb   :  { %11224 = vst [vmem:[#allocation47_spill] sm:$0xff] %v6885_v12 }
 0x1bc   :  { %v1161_v24 = vmul.f32 %v1160_v62, %v1158_v46  ;;  %v6971_v46 = vpop.permute.xlu0 %1270 }
 0x1be   :  { %v1165_v25 = vadd.f32 %v1163_v16, %v1161_v24 }
 0x1c0   :  { %v1167_v32 = vmul.f32 %v1165_v25, %v1165_v25 }
 0x1c2   :  { %1171 = vst [vmem:[#allocation1] ss:$2 sm:$0xff] %v1167_v32 }
 0x1c4   :  { %v1026_v38 = vpop.f32.mrf.mxu2  ;;  %v6975_v22 = vpop.permute.xlu0 %1255 }
 0x1c5   :  { %v1027_v43 = vadd.f32 %v1026_v38, %v6856_v31 }
 0x1c7   :  { %v1052_v37 = vmul.f32 %v1049_v5, %v1027_v43  ;;  %v1046_v52 = vpop.f32.mrf.mxu3 }
 0x1c8   :  { %v1047_v30 = vadd.f32 %v1046_v52, %v6856_v31 }
 0x1c9   :  { %v6888_v28 = vld.sshfl [vmem:[#allocation1] sm:$0xff pattern:$0x75316420]  ;;  %v6890_v33 = vld.sshfl [vmem:[#allocation1 + $0x8] sm:$0xff pattern:$0x75316420] }
 0x1ca   :  { %11225 = vst [vmem:[#allocation59_spill] sm:$0xff] %v6888_v28  ;;  %v1053_v18 = vmul.f32 %v1049_v5, %v1047_v30  ;;  %v6990_v30 = vpop.permute.xlu2 %1245 }
 0x1cb   :  { %11226 = vst [vmem:[#allocation65_spill] sm:$0xff] %v6890_v33 }
 0x1cc   :  { %1275 = vst [vmem:[#allocation1] ss:$2 sm:$0xff] %v6885_v12  ;;  %v1059_v51 = vrot.slane %v1053_v18, 4  ;;  %v6984_v38 = vpop.permute.xlu0 %1240 }
 0x1cd   :  { %1075 = vst.sshfl [vmem:[#allocation1 + $0x10] sm:$0xff pattern:$0x75316420] %v1052_v37 }
 0x1ce   :  { %1076 = vst.sshfl [vmem:[#allocation1 + $0x18] sm:$0xff pattern:$0x75316420] %v1053_v18  ;;  %v1061_v11 = vsel %vm11227_vm5, %v1052_v37, %v1059_v51  ;;  %vm11248_vm5 = vmmov %vm11243_vm0 }
 0x1cf   :  { %1111 = vst [vmem:[#allocation1 + $0x10] ss:$2 sm:$0xff] %v1106_v7  ;;  %v1065_v4 = vsub.f32 %v11228_v29, %v1061_v11 }
 0x1d1   :  { %v1068_v59 = vmul.f32 %v1066_v19, %v1065_v4 }
 0x1d3   :  { %v1278_v39 = vld.sshfl [vmem:[#allocation1] sm:$0xff pattern:$0x75316420]  ;;  %v1279_v36 = vld.sshfl [vmem:[#allocation1 + $0x8] sm:$0xff pattern:$0x75316420] }
 0x1d4   :  { %4769 = vmatpush.msk.msra.mxu0 %vm11229_vm4, %v1278_v39  ;;  %4778 = vmatpush.msk.msra.mxu1 %vm11230_vm7, %v1279_v36  ;;  %v4749_v41 = vclamps-f32 %v1068_v59, 1.0  ;;  %vm11249_vm4 = vmmov %vm11243_vm0 }
 0x1d5   :  { %v1080_v27 = vld [vmem:[#allocation1 + $0x11] ss:$2 sm:$0xff]  ;;  %4770 = vmatmul.msk.f32.vlgmr.msra.gmra.mxu0 %vm11231_vm8, %v5551_v8  ;;  %4779 = vmatmul.msk.f32.vlgmr.msra.gmra.mxu1 %vm11232_vm3, %v5551_v8  ;;  %vm11250_vm7 = vmmov %vm11243_vm0 }
 0x1d6   :  { %v1084_v61 = vsub.f32 %v11228_v29, %v1080_v27  ;;  %v1093_v56 = vmul.f32 %v4749_v41, %v1091_v63  ;;  %v6910_v53 = vld.sshfl [vmem:[#allocation1 + $0x10] sm:$0xff pattern:$0x75316420]  ;;  %v6912_v1 = vld.sshfl [vmem:[#allocation1 + $0x18] sm:$0xff pattern:$0x75316420]  ;;  %vm11251_vm8 = vmmov %vm11243_vm0 }
 0x1d7   :  { %11235 = vst [vmem:[#allocation58_spill] sm:$0xff] %v6910_v53  ;;  %vm11252_vm3 = vmmov %vm11243_vm0 }
 0x1d8   :  { %v1086_v26 = vmul.f32 %v1084_v61, %v1066_v19  ;;  %11236 = vst [vmem:[#allocation21_spill] sm:$0xff] %v6912_v1  ;;  %v1098_v47 = vadd.f32 %v1096_v3, %v1093_v56  ;;  %v5554_v19 = vld [vmem:[%s10859_s1 + $0x18] sm:$0xff] }
 0x1da   :  { %v4751_v54 = vclamps-f32 %v1086_v26, 1.0  ;;  %v6919_v21 = vadd.f32 %v1102_v6, %v1098_v47 }
 0x1dc   :  { %v1159_v60 = vsub.f32 %v4749_v41, %v4751_v54  ;;  %11239 = vst [vmem:[#allocation64_spill] sm:$0xff] %v6919_v21 }
 0x1dd   :  { %4771 = vmatmul.msk.f32.gmra.mxu0 %vm11233_vm1, %v5552_v14  ;;  %4780 = vmatmul.msk.f32.gmra.mxu1 %vm11234_vm9, %v5552_v14  ;;  %vm11253_vm1 = vmmov %vm11243_vm0 }
 0x1de   :  { %v1162_v57 = vmul.f32 %v1160_v62, %v1159_v60  ;;  %vm11254_vm9 = vmmov %vm11243_vm0  ;;  %v6969_v62 = vpop.permute.xlu1 %1265 }
 0x1e0   :  { %v1166_v5 = vadd.f32 %v1164_v42, %v1162_v57 }
 0x1e2   :  { %v1168_v9 = vmul.f32 %v1166_v5, %v1166_v5 }
 0x1e4   :  { %1173 = vst [vmem:[#allocation1 + $0x10] ss:$2 sm:$0xff] %v1168_v9 }
 0x1e5   :  { %4772 = vmatmul.msk.f32.gmra.mxu0 %vm11237_vm10, %v5553_v2  ;;  %4781 = vmatmul.msk.f32.gmra.mxu1 %vm11238_vm11, %v5553_v2  ;;  %vm11255_vm10 = vmmov %vm11243_vm0 }
 0x1e6   :  { %vm11256_vm11 = vmmov %vm11243_vm0  ;;  %v6973_v63 = vpop.permute.xlu1 %1250 }
 0x1eb   :  { %v6921_v15 = vld.sshfl [vmem:[#allocation1 + $0x10] sm:$0xff pattern:$0x75316420]  ;;  %v6923_v49 = vld.sshfl [vmem:[#allocation1 + $0x18] sm:$0xff pattern:$0x75316420] }
 0x1ec   :  { %11240 = vst [vmem:[#allocation66_spill] sm:$0xff] %v6921_v15 }
 0x1ed   :  { %11241 = vst [vmem:[#allocation23_spill] sm:$0xff] %v6923_v49  ;;  %4773 = vmatmul.msk.f32.gmra.mxu0 %vm11242_vm12, %v5554_v19  ;;  %4782 = vmatmul.msk.f32.gmra.mxu1 %vm11243_vm0, %v5554_v19  ;;  %vm11257_vm12 = vmmov %vm11243_vm0 }
 0x1ee   :  { %1277 = vst [vmem:[#allocation1 + $0x10] ss:$2 sm:$0xff] %v6919_v21  ;;  %v1236_v32 = vpop.permute.xlu1 %1235 }
 0x1f5   :  { %v1280_v40 = vld.sshfl [vmem:[#allocation1 + $0x10] sm:$0xff pattern:$0x75316420]  ;;  %v1281_v45 = vld.sshfl [vmem:[#allocation1 + $0x18] sm:$0xff pattern:$0x75316420]  ;;  %4774 = vmatmul.msk.f32.gmra.mxu0 %vm11248_vm5, %v5555_v50  ;;  %4783 = vmatmul.msk.f32.gmra.mxu1 %vm11249_vm4, %v5555_v50  ;;  %vm11262_vm5 = vmmov %vm11243_vm0 }
 0x1f6   :  { %4787 = vmatpush.msk.msra.mxu2 %vm11244_vm14, %v1280_v40  ;;  %4796 = vmatpush.msk.msra.mxu3 %vm11245_vm15, %v1281_v45  ;;  %vm11258_vm14 = vmmov %vm11243_vm0 }
 0x1f7   :  { %4788 = vmatmul.msk.f32.vlgmr.msra.gmra.mxu2 %vm11246_vm2, %v5551_v8  ;;  %4797 = vmatmul.msk.f32.vlgmr.msra.gmra.mxu3 %vm11247_vm6, %v5551_v8  ;;  %vm11259_vm15 = vmmov %vm11243_vm0 }
 0x1f8   :  { %vm11260_vm2 = vmmov %vm11243_vm0 }
 0x1f9   :  { %vm11261_vm6 = vmmov %vm11243_vm0 }
 0x1fa   :  { %vm11263_vm4 = vmmov %vm11243_vm0 }
 0x1fd   :  { %4775 = vmatmul.msk.f32.gmra.mxu0 %vm11252_vm3, %v5556_v17  ;;  %4784 = vmatmul.msk.f32.gmra.mxu1 %vm11253_vm1, %v5556_v17  ;;  %vm11266_vm3 = vmmov %vm11243_vm0 }
 0x1fe   :  { %vm11267_vm1 = vmmov %vm11243_vm0 }
 0x1ff   :  { %4789 = vmatmul.msk.f32.gmra.mxu2 %vm11250_vm7, %v5552_v14  ;;  %4798 = vmatmul.msk.f32.gmra.mxu3 %vm11251_vm8, %v5552_v14  ;;  %vm11264_vm7 = vmmov %vm11243_vm0 }
 0x200   :  { %vm11265_vm8 = vmmov %vm11243_vm0 }
 0x205   :  { %4776 = vmatmul.msk.f32.gmra.mxu0 %vm11256_vm11, %v5557_v35  ;;  %4785 = vmatmul.msk.f32.gmra.mxu1 %vm11257_vm12, %v5557_v35 }
 0x207   :  { %4790 = vmatmul.msk.f32.gmra.mxu2 %vm11254_vm9, %v5553_v2  ;;  %4799 = vmatmul.msk.f32.gmra.mxu3 %vm11255_vm10, %v5553_v2  ;;  %vm11268_vm9 = vmmov %vm11243_vm0 }
 0x20d   :  { %4777 = vmatmul.msk.f32.gmra.mxu0 %vm11259_vm15, %v5558_v55  ;;  %4786 = vmatmul.msk.f32.gmra.mxu1 %vm11260_vm2, %v5558_v55 }
 0x20f   :  { %4791 = vmatmul.msk.f32.gmra.mxu2 %vm11243_vm0, %v5554_v19  ;;  %4800 = vmatmul.msk.f32.gmra.mxu3 %vm11258_vm14, %v5554_v19 }
 0x217   :  { %4792 = vmatmul.msk.f32.gmra.mxu2 %vm11261_vm6, %v5555_v50  ;;  %4801 = vmatmul.msk.f32.gmra.mxu3 %vm11262_vm5, %v5555_v50 }
 0x21f   :  { %4793 = vmatmul.msk.f32.gmra.mxu2 %vm11263_vm4, %v5556_v17  ;;  %4802 = vmatmul.msk.f32.gmra.mxu3 %vm11264_vm7, %v5556_v17 }
 0x227   :  { %4794 = vmatmul.msk.f32.gmra.mxu2 %vm11265_vm8, %v5557_v35  ;;  %4803 = vmatmul.msk.f32.gmra.mxu3 %vm11266_vm3, %v5557_v35 }
 0x22f   :  { %4795 = vmatmul.msk.f32.gmra.mxu2 %vm11267_vm1, %v5558_v55  ;;  %4804 = vmatmul.msk.f32.gmra.mxu3 %vm11268_vm9, %v5558_v55 }
 0x252   :  { %v1307_v16 = vpop.f32.mrf.mxu0  ;;  %v1348_v24 = vpop.f32.mrf.mxu1 }
 0x253   :  { %v6979_v23 = vadd.f32 %v1307_v16, %v1236_v32  ;;  %v6981_v34 = vadd.f32 %v1348_v24, %v1236_v32 }
 0x255   :  { %v4805_v48 = vmul.f32 -1.442695, %v6979_v23  ;;  %v4806_v10 = vmul.f32 -1.442695, %v6981_v34 }
 0x257   :  { %5167 = vpow2.f32 %v4805_v48 }
 0x258   :  { %5169 = vpow2.f32 %v4806_v10 }
 0x25a   :  { %v1310_v25 = vpop.f32.mrf.mxu0  ;;  %v1351_v0 = vpop.f32.mrf.mxu1 }
 0x25b   :  { %v6988_v37 = vadd.f32 %v1310_v25, %v6984_v38  ;;  %v6993_v7 = vadd.f32 %v1351_v0, %v6984_v38 }
 0x25d   :  { %v4809_v11 = vmul.f32 -1.442695, %v6988_v37  ;;  %v4810_v29 = vmul.f32 -1.442695, %v6993_v7  ;;  %v5168_v39 = vpop.eup %5167 }
 0x25e   :  { %v5170_v27 = vpop.eup %5169  ;;  %v7005_v8 = vadd.f32 1.0, %v5168_v39 }
 0x25f   :  { %5171 = vpow2.f32 %v4809_v11  ;;  %v7007_v59 = vadd.f32 1.0, %v5170_v27 }
 0x260   :  { %5173 = vpow2.f32 %v4810_v29  ;;  %v1593_v0 = vand.u32 2147483648, %v7005_v8  ;;  %vm1587_vm10 = vweird.f32 %v7005_v8 }
 0x261   :  { %v1608_v48 = vand.u32 2147483648, %v7007_v59  ;;  %vm1602_vm11 = vweird.f32 %v7007_v59 }
 0x262   :  { %v1313_v43 = vpop.f32.mrf.mxu0  ;;  %v1354_v52 = vpop.f32.mrf.mxu1 }
 0x263   :  { %v6996_v18 = vadd.f32 %v1313_v43, %v6990_v30  ;;  %v6999_v51 = vadd.f32 %v1354_v52, %v6990_v30  ;;  %v1591_v52 = vand.u32 2147483647, %v7005_v8 }
 0x265   :  { %v4813_v4 = vmul.f32 -1.442695, %v6996_v18  ;;  %v4814_v36 = vmul.f32 -1.442695, %v6999_v51  ;;  %v5172_v61 = vpop.eup %5171  ;;  %vm7070_vm0 = vcmp.eq.f32.partialorder %v1591_v52, 8.507059e+37 }
 0x266   :  { %v5174_v26 = vpop.eup %5173  ;;  %v7011_v60 = vadd.f32 1.0, %v5172_v61 }
 0x267   :  { %5175 = vpow2.f32 %v4813_v4  ;;  %v7013_v14 = vadd.f32 1.0, %v5174_v26  ;;  %v1606_v4 = vand.u32 2147483647, %v7007_v59 }
 0x268   :  { %5177 = vpow2.f32 %v4814_v36  ;;  %vm1647_vm15 = vweird.f32 %v7011_v60 }
 0x269   :  { %5179 = vrcp.f32 %v7005_v8  ;;  %v1668_v44 = vand.u32 2147483648, %v7013_v14  ;;  %vm7091_vm2 = vcmp.eq.f32.partialorder %v1606_v4, 8.507059e+37  ;;  %v1666_v4 = vand.u32 2147483647, %v7013_v14 }
 0x26a   :  { %5181 = vrcp.f32 %v7007_v59  ;;  %v1316_v5 = vpop.f32.mrf.mxu0  ;;  %v1357_v9 = vpop.f32.mrf.mxu1  ;;  %vm1662_vm5 = vweird.f32 %v7013_v14 }
 0x26b   :  { %5183 = vrcp.f32 %v7011_v60  ;;  %v7024_v47 = vadd.f32 %v1316_v5, %v6973_v63  ;;  %v7032_v40 = vadd.f32 %v1357_v9, %v6973_v63  ;;  %vm7138_vm3 = vcmp.eq.f32.partialorder %v1666_v4, 8.507059e+37 }
 0x26c   :  { %5185 = vrcp.f32 %v7013_v14 }
 0x26d   :  { %v5176_v41 = vpop.eup %5175  ;;  %v4817_v50 = vmul.f32 -1.442695, %v7024_v47  ;;  %v4818_v16 = vmul.f32 -1.442695, %v7032_v40 }
 0x26e   :  { %v5178_v54 = vpop.eup %5177  ;;  %v7015_v57 = vadd.f32 1.0, %v5176_v41  ;;  %v1594_v41 = vor.u32 1.1754944e-38, %v1593_v0 }
 0x26f   :  { %v7017_v56 = vpop.eup %5179  ;;  %v7019_v3 = vadd.f32 1.0, %v5178_v54  ;;  %v7064_v54 = vor.u32 1.1754944e-38, %v1608_v48  ;;  %v1653_v48 = vand.u32 2147483648, %v7011_v60 }
 0x270   :  { %v7026_v6 = vpop.eup %5181  ;;  %v1583_v19 = vmul.f32 %v7017_v56, %v7005_v8  ;;  %5187 = vrcp.f32 %v7015_v57  ;;  %vm1588_vm12 = vweird.f32 %v7017_v56 }
 0x271   :  { %5189 = vrcp.f32 %v7019_v3  ;;  %v1598_v45 = vmul.f32 %v7026_v6, %v7007_v59  ;;  %v7038_v17 = vpop.eup %5183  ;;  %vm1603_vm14 = vweird.f32 %v7026_v6  ;;  %vm7101_vm6 = vmor %vm1587_vm10, %vm1588_vm12  ;;  %v1654_v33 = vor.u32 1.1754944e-38, %v1653_v48 }
 0x272   :  { %v1584_v35 = vsub.f32 1.0, %v1583_v19  ;;  %v7043_v25 = vpop.eup %5185  ;;  %5191 = vpow2.f32 %v4817_v50  ;;  %v1319_v36 = vpop.f32.mrf.mxu0  ;;  %vm7122_vm4 = vmor %vm1602_vm11, %vm1603_vm14  ;;  %vm1648_vm7 = vweird.f32 %v7038_v17  ;;  %v1726_v4 = vand.u32 2147483647, %v7019_v3 }
 0x273   :  { %v1599_v29 = vsub.f32 1.0, %v1598_v45  ;;  %5193 = vpow2.f32 %v4818_v16  ;;  %v7079_v45 = vadd.f32 %v1319_v36, %v6975_v22  ;;  %v1360_v15 = vpop.f32.mrf.mxu1  ;;  %vm1663_vm1 = vweird.f32 %v7043_v25  ;;  %vm7156_vm10 = vmor %vm1647_vm15, %vm1648_vm7 }
 0x274   :  { %v1585_v27 = vmul.f32 %v7017_v56, %v1584_v35  ;;  %vm7170_vm12 = vmor %vm1662_vm5, %vm1663_vm1  ;;  %vm1727_vm5 = vcmp.eq.f32.partialorder %v1726_v4, 8.507059e+37 }
 0x275   :  { %v1600_v50 = vmul.f32 %v7026_v6, %v1599_v29 }
 0x276   :  { %v7049_v10 = vpop.eup %5187 }
 0x277   :  { %v7053_v11 = vpop.eup %5189  ;;  %vm1708_vm9 = vweird.f32 %v7049_v10 }
 0x278   :  { %v1718_v19 = vmul.f32 %v7053_v11, %v7019_v3  ;;  %v5192_v52 = vpop.eup %5191  ;;  %vm1723_vm11 = vweird.f32 %v7053_v11 }
 0x279   :  { %v5194_v29 = vpop.eup %5193  ;;  %v7112_v8 = vadd.f32 1.0, %v5192_v52 }
 0x27a   :  { %v1389_v42 = vpop.f32.mrf.mxu2  ;;  %v1430_v2 = vpop.f32.mrf.mxu3  ;;  %v7116_v1 = vadd.f32 1.0, %v5194_v29 }
 0x27b   :  { %v7040_v55 = vadd.f32 %v1389_v42, %v1236_v32  ;;  %v7047_v43 = vadd.f32 %v1430_v2, %v1236_v32  ;;  %v1643_v32 = vmul.f32 %v7038_v17, %v7011_v60  ;;  %v1658_v42 = vmul.f32 %v7043_v25, %v7013_v14 }
 0x27c   :  { %v1703_v2 = vmul.f32 %v7049_v10, %v7015_v57  ;;  %vm1782_vm7 = vweird.f32 %v7116_v1 }
 0x27d   :  { %11269 = vst [vmem:[#allocation28_spill] sm:$0xff] %v7040_v55  ;;  %v4807_v61 = vmul.f32 -1.442695, %v7040_v55  ;;  %v4808_v5 = vmul.f32 -1.442695, %v7047_v43  ;;  %v1644_v0 = vsub.f32 1.0, %v1643_v32 }
 0x27e   :  { %11270 = vst [vmem:[#allocation41_spill] sm:$0xff] %v7047_v43  ;;  %v1659_v36 = vsub.f32 1.0, %v1658_v42  ;;  %v4821_v32 = vmul.f32 -1.442695, %v7079_v45  ;;  %v1601_v42 = vadd.f32 %v7026_v6, %v1600_v50  ;;  %v1669_v50 = vor.u32 1.1754944e-38, %v1668_v44 }
 0x27f   :  { %5195 = vpow2.f32 %v4807_v61 }
 0x280   :  { %5197 = vpow2.f32 %v4808_v5  ;;  %v1660_v28 = vmul.f32 %v7043_v25, %v1659_v36  ;;  %v1605_v59 = vsel %vm7122_vm4, %v7026_v6, %v1601_v42  ;;  %v1711_v36 = vand.u32 2147483647, %v7015_v57 }
 0x281   :  { %v1610_v42 = vsel %vm7091_vm2, %v7064_v54, %v1605_v59  ;;  %vm1722_vm2 = vweird.f32 %v7019_v3  ;;  %vm1767_vm4 = vweird.f32 %v7112_v8 }
 0x282   :  { %v1392_v24 = vpop.f32.mrf.mxu2  ;;  %v1433_v26 = vpop.f32.mrf.mxu3  ;;  %v1661_v9 = vadd.f32 %v7043_v25, %v1660_v28  ;;  %vm7186_vm15 = vcmp.eq.f32.partialorder %v1711_v36, 8.507059e+37 }
 0x283   :  { %v7057_v39 = vadd.f32 %v1392_v24, %v6984_v38  ;;  %v7085_v16 = vadd.f32 %v1433_v26, %v6984_v38  ;;  %v1586_v24 = vadd.f32 %v7017_v56, %v1585_v27  ;;  %v1651_v38 = vand.u32 2147483647, %v7011_v60 }
 0x284   :  { %v1704_v26 = vsub.f32 1.0, %v1703_v2  ;;  %v1719_v27 = vsub.f32 1.0, %v1718_v19  ;;  %v1645_v19 = vmul.f32 %v7038_v17, %v1644_v0  ;;  %v1665_v61 = vsel %vm7170_vm12, %v7043_v25, %v1661_v9 }
 0x285   :  { %11271 = vst [vmem:[#allocation51_spill] sm:$0xff] %v7057_v39  ;;  %v4811_v35 = vmul.f32 -1.442695, %v7057_v39  ;;  %v4812_v5 = vmul.f32 -1.442695, %v7085_v16  ;;  %v1590_v2 = vsel %vm7101_vm6, %v7017_v56, %v1586_v24  ;;  %vm7127_vm8 = vcmp.eq.f32.partialorder %v1651_v38, 8.507059e+37  ;;  %vm7198_vm6 = vmor %vm1722_vm2, %vm1723_vm11 }
 0x286   :  { %11274 = vst [vmem:[#allocation30_spill] sm:$0xff] %v7085_v16  ;;  %v1705_v24 = vmul.f32 %v7049_v10, %v1704_v26  ;;  %v1720_v44 = vmul.f32 %v7053_v11, %v1719_v27  ;;  %v1595_v48 = vsel %vm7070_vm0, %v1594_v41, %v1590_v2  ;;  %v1646_v29 = vadd.f32 %v7038_v17, %v1645_v19  ;;  %v1322_v2 = vpop.f32.mrf.mxu0 }
 0x287   :  { %5199 = vpow2.f32 %v4811_v35  ;;  %v5196_v35 = vpop.eup %5195  ;;  %v1713_v38 = vand.u32 2147483648, %v7015_v57  ;;  %vm1707_vm0 = vweird.f32 %v7015_v57  ;;  %v7216_v36 = vadd.f32 %v1322_v2, %v6977_v58 }
 0x288   :  { %5201 = vpow2.f32 %v4821_v32  ;;  %v5198_v0 = vpop.eup %5197  ;;  %v7149_v6 = vadd.f32 1.0, %v5196_v35  ;;  %v1706_v27 = vadd.f32 %v7049_v10, %v1705_v24  ;;  %v1721_v32 = vadd.f32 %v7053_v11, %v1720_v44  ;;  %vm7182_vm14 = vmor %vm1707_vm0, %vm1708_vm9 }
 0x289   :  { %5203 = vpow2.f32 %v4812_v5  ;;  %v7163_v28 = vadd.f32 1.0, %v5198_v0  ;;  %v1728_v5 = vand.u32 2147483648, %v7019_v3  ;;  %v1650_v35 = vsel %vm7156_vm10, %v7038_v17, %v1646_v29  ;;  %v1363_v3 = vpop.f32.mrf.mxu1 }
 0x28a   :  { %5205 = vrcp.f32 %v7112_v8  ;;  %11285 = vst [vmem:[#allocation42_spill] sm:$0xff] %v7149_v6  ;;  %v1714_v17 = vor.u32 1.1754944e-38, %v1713_v38  ;;  %v7204_v44 = vadd.f32 %v1360_v15, %v6975_v22  ;;  %v1710_v59 = vsel %vm7182_vm14, %v7049_v10, %v1706_v27  ;;  %v1395_v9 = vpop.f32.mrf.mxu2  ;;  %v1436_v49 = vpop.f32.mrf.mxu3 }
 0x28b   :  { %5207 = vrcp.f32 %v7116_v1  ;;  %11288 = vst [vmem:[#allocation53_spill] sm:$0xff] %v7163_v28  ;;  %v1725_v25 = vsel %vm7198_vm6, %v7053_v11, %v1721_v32  ;;  %v1655_v15 = vsel %vm7127_vm8, %v1654_v33, %v1650_v35  ;;  %v1729_v38 = vor.u32 1.1754944e-38, %v1728_v5 }
 0x28c   :  { %5209 = vrcp.f32 %v7149_v6  ;;  %11298 = vst [vmem:[#allocation52_spill] sm:$0xff] %v7204_v44  ;;  %v1670_v10 = vsel %vm7138_vm3, %v1669_v50, %v1665_v61  ;;  %v7230_v26 = vadd.f32 %v1363_v3, %v6977_v58  ;;  %v1715_v27 = vsel %vm7186_vm15, %v1714_v17, %v1710_v59 }
 0x28d   :  { %v5200_v41 = vpop.eup %5199  ;;  %5211 = vrcp.f32 %v7163_v28  ;;  %v1730_v56 = vsel %vm1727_vm5, %v1729_v38, %v1725_v25  ;;  %v4822_v32 = vmul.f32 -1.442695, %v7204_v44  ;;  %v7238_v60 = vmul.f32 %v1595_v48, %v6979_v23 }
 0x28e   :  { %v5202_v19 = vpop.eup %5201  ;;  %v7191_v57 = vadd.f32 1.0, %v5200_v41  ;;  %v4825_v52 = vmul.f32 -1.442695, %v7216_v36  ;;  %v7246_v5 = vmul.f32 %v1610_v42, %v6981_v34  ;;  %v7249_v2 = vmul.f32 %v1655_v15, %v6988_v37 }
 0x28f   :  { %v5204_v54 = vpop.eup %5203  ;;  %v7222_v41 = vadd.f32 1.0, %v5202_v19  ;;  %11300 = vst [vmem:[#allocation55_spill] sm:$0xff] %v7238_v60  ;;  %v7252_v19 = vmul.f32 %v1670_v10, %v6993_v7  ;;  %v7258_v48 = vmul.f32 %v1715_v27, %v6996_v18  ;;  %v7261_v35 = vmul.f32 %v1730_v56, %v6999_v51 }
 0x290   :  { %11295 = vst [vmem:[#allocation60_spill] sm:$0xff] %v7191_v57  ;;  %v7206_v0 = vpop.eup %5205  ;;  %5213 = vrcp.f32 %v7191_v57  ;;  %v7227_v11 = vadd.f32 1.0, %v5204_v54  ;;  %v4826_v34 = vmul.f32 -1.442695, %v7230_v26  ;;  %v1623_v37 = vand.u32 2147483648, %v7149_v6 }
 0x291   :  { %v7218_v29 = vpop.eup %5207  ;;  %v1763_v33 = vmul.f32 %v7206_v0, %v7112_v8  ;;  %11302 = vst [vmem:[#allocation18_spill] sm:$0xff] %v7246_v5  ;;  %5215 = vrcp.f32 %v7222_v41  ;;  %v7267_v7 = vadd.f32 %v1395_v9, %v6990_v30  ;;  %v1771_v17 = vand.u32 2147483647, %v7112_v8 }
 0x292   :  { %11299 = vst [vmem:[#allocation17_spill] sm:$0xff] %v7227_v11  ;;  %v1778_v50 = vmul.f32 %v7218_v29, %v7116_v1  ;;  %v7243_v4 = vpop.eup %5209  ;;  %5217 = vrcp.f32 %v7227_v11  ;;  %v1773_v24 = vand.u32 2147483648, %v7112_v8  ;;  %v1788_v3 = vand.u32 2147483648, %v7116_v1 }
 0x293   :  { %11301 = vst [vmem:[#allocation61_spill] sm:$0xff] %v7243_v4  ;;  %v7255_v23 = vpop.eup %5211  ;;  %v1764_v42 = vsub.f32 1.0, %v1763_v33  ;;  %5219 = vpow2.f32 %v4822_v32  ;;  %v1613_v18 = vmul.f32 %v7243_v4, %v7149_v6  ;;  %v1786_v25 = vand.u32 2147483647, %v7116_v1  ;;  %v1398_v33 = vpop.f32.mrf.mxu2 }
 0x294   :  { %11303 = vst [vmem:[#allocation22_spill] sm:$0xff] %v7249_v2  ;;  %v1779_v54 = vsub.f32 1.0, %v1778_v50  ;;  %5221 = vpow2.f32 %v4825_v52  ;;  %v1628_v61 = vmul.f32 %v7255_v23, %v7163_v28  ;;  %v7282_v15 = vadd.f32 %v1436_v49, %v6990_v30 }
 0x295   :  { %11304 = vst [vmem:[#allocation31_spill] sm:$0xff] %v7252_v19  ;;  %5223 = vpow2.f32 %v4826_v34  ;;  %v7286_v9 = vor.u32 1.1754944e-38, %v1623_v37  ;;  %v1765_v10 = vmul.f32 %v7206_v0, %v1764_v42  ;;  %v4815_v56 = vmul.f32 -1.442695, %v7267_v7 }
 0x296   :  { %11305 = vst [vmem:[#allocation44_spill] sm:$0xff] %v7255_v23  ;;  %v7269_v14 = vpop.eup %5213  ;;  %v1614_v50 = vsub.f32 1.0, %v1613_v18  ;;  %v1780_v30 = vmul.f32 %v7218_v29, %v1779_v54  ;;  %v1629_v34 = vsub.f32 1.0, %v1628_v61  ;;  %vm7297_vm8 = vcmp.eq.f32.partialorder %v1771_v17, 8.507059e+37  ;;  %v1325_v17 = vpop.f32.mrf.mxu0 }
 0x297   :  { %11306 = vst [vmem:[#allocation24_spill] sm:$0xff] %v7258_v48  ;;  %v7284_v38 = vpop.eup %5215  ;;  %v1673_v27 = vmul.f32 %v7269_v14, %v7191_v57  ;;  %v1774_v42 = vor.u32 1.1754944e-38, %v1773_v24  ;;  %v1789_v49 = vor.u32 1.1754944e-38, %v1788_v3  ;;  %vm7301_vm3 = vcmp.eq.f32.partialorder %v1786_v25, 8.507059e+37 }
 0x298   :  { %11307 = vst [vmem:[#allocation33_spill] sm:$0xff] %v7261_v35  ;;  %v7292_v32 = vpop.eup %5217  ;;  %v1683_v18 = vand.u32 2147483648, %v7191_v57  ;;  %v1823_v54 = vmul.f32 %v7284_v38, %v7222_v41  ;;  %v4816_v53 = vmul.f32 -1.442695, %v7282_v15  ;;  %v7310_v61 = vadd.f32 %v1398_v33, %v6973_v63 }
 0x299   :  { %11308 = vst [vmem:[#allocation49_spill] sm:$0xff] %v7267_v7  ;;  %v5220_v52 = vpop.eup %5219  ;;  %v1766_v20 = vadd.f32 %v7206_v0, %v1765_v10  ;;  %vm1768_vm1 = vweird.f32 %v7206_v0  ;;  %v1674_v24 = vsub.f32 1.0, %v1673_v27  ;;  %5225 = vpow2.f32 %v4815_v56 }
 0x29a   :  { %11309 = vst [vmem:[#allocation54_spill] sm:$0xff] %v7269_v14  ;;  %v5222_v59 = vpop.eup %5221  ;;  %v1615_v25 = vmul.f32 %v7243_v4, %v1614_v50  ;;  %v1781_v13 = vadd.f32 %v7218_v29, %v1780_v30  ;;  %vm1783_vm9 = vweird.f32 %v7218_v29  ;;  %v7317_v21 = vadd.f32 1.0, %v5220_v52  ;;  %vm7329_vm10 = vmor %vm1767_vm4, %vm1768_vm1 }
 0x29b   :  { %11310 = vst [vmem:[#allocation39_spill] sm:$0xff] %v7282_v15  ;;  %v5224_v3 = vpop.eup %5223  ;;  %v1630_v12 = vmul.f32 %v7255_v23, %v1629_v34  ;;  %v1688_v33 = vmul.f32 %v7292_v32, %v7227_v11  ;;  %v7322_v31 = vadd.f32 1.0, %v5222_v59  ;;  %v7325_v10 = vadd.f32 %v1325_v17, %v6969_v62  ;;  %vm7340_vm12 = vmor %vm1782_vm7, %vm1783_vm9 }
 0x29c   :  { %11311 = vst [vmem:[#allocation63_spill] sm:$0xff] %v7286_v9  ;;  %vm1677_vm11 = vweird.f32 %v7191_v57  ;;  %v1824_v56 = vsub.f32 1.0, %v1823_v54  ;;  %5227 = vpow2.f32 %v4816_v53  ;;  %v4819_v50 = vmul.f32 -1.442695, %v7310_v61  ;;  %v1439_v54 = vpop.f32.mrf.mxu3  ;;  %v1366_v53 = vpop.f32.mrf.mxu1 }
 0x29d   :  { %11312 = vst [vmem:[#allocation45_spill] sm:$0xff] %v7292_v32  ;;  %v1770_v59 = vsel %vm7329_vm10, %v7206_v0, %v1766_v20  ;;  %v1675_v8 = vmul.f32 %v7269_v14, %v1674_v24  ;;  %v7346_v34 = vadd.f32 1.0, %v5224_v3  ;;  %v1785_v17 = vsel %vm7340_vm12, %v7218_v29, %v1781_v13 }
 0x29e   :  { %11317 = vst [vmem:[#allocation14_spill] sm:$0xff] %v7310_v61  ;;  %v7351_v27 = vor.u32 1.1754944e-38, %v1683_v18  ;;  %5229 = vrcp.f32 %v7317_v21  ;;  %v4829_v20 = vmul.f32 -1.442695, %v7325_v10  ;;  %v7356_v0 = vadd.f32 %v7243_v4, %v1615_v25 }
 0x29f   :  { %v5226_v1 = vpop.eup %5225  ;;  %v7359_v24 = vadd.f32 %v7255_v23, %v1630_v12  ;;  %v1689_v3 = vsub.f32 1.0, %v1688_v33  ;;  %5231 = vrcp.f32 %v7322_v31  ;;  %v1775_v30 = vsel %vm7297_vm8, %v1774_v42, %v1770_v59 }
 0x2a0   :  { %11322 = vst [vmem:[#allocation50_spill] sm:$0xff] %v7351_v27  ;;  %vm1678_vm0 = vweird.f32 %v7269_v14  ;;  %v1825_v13 = vmul.f32 %v7284_v38, %v1824_v56  ;;  %5233 = vpow2.f32 %v4819_v50  ;;  %v1790_v29 = vsel %vm7301_vm3, %v1789_v49, %v1785_v17  ;;  %v1401_v56 = vpop.f32.mrf.mxu2  ;;  %v1328_v49 = vpop.f32.mrf.mxu0 }
 0x2a1   :  { %11323 = vst [vmem:[#allocation56_spill] sm:$0xff] %v7356_v0  ;;  %v7369_v18 = vadd.f32 %v7269_v14, %v1675_v8  ;;  %v1831_v12 = vand.u32 2147483647, %v7222_v41  ;;  %5235 = vrcp.f32 %v7346_v34  ;;  %v1833_v33 = vand.u32 2147483648, %v7222_v41  ;;  %vm7397_vm14 = vmor %vm1677_vm11, %vm1678_vm0 }
 0x2a2   :  { %11324 = vst [vmem:[#allocation15_spill] sm:$0xff] %v7359_v24  ;;  %v5228_v25 = vpop.eup %5227  ;;  %v7374_v37 = vadd.f32 1.0, %v5226_v1  ;;  %v7377_v42 = vadd.f32 %v1439_v54, %v6973_v63  ;;  %5237 = vpow2.f32 %v4829_v20  ;;  %v1690_v51 = vmul.f32 %v7292_v32, %v1689_v3 }
 0x2a3   :  { %11325 = vst [vmem:[#allocation40_spill] sm:$0xff] %v7369_v18  ;;  %v7383_v59 = vadd.f32 %v1366_v53, %v6969_v62  ;;  %v7388_v17 = vmul.f32 %v1775_v30, %v7024_v47  ;;  %v7391_v1 = vmul.f32 %v1790_v29, %v7032_v40  ;;  %v11329_v63 = vmov 0 }
 0x2a4   :  { %11326 = vst [vmem:[#allocation48_spill] sm:$0xff] %v7377_v42  ;;  %v7385_v8 = vpop.eup %5229  ;;  %v11330_v63 = vsel %vm7397_vm14, 4294967295, %v11329_v63  ;;  %v1826_v54 = vadd.f32 %v7284_v38, %v1825_v13  ;;  %vm1828_vm15 = vweird.f32 %v7284_v38  ;;  %vm1827_vm2 = vweird.f32 %v7222_v41  ;;  %v1369_v52 = vpop.f32.mrf.mxu1 }
 0x2a5   :  { %11327 = vst [vmem:[#allocation62_spill] sm:$0xff] %v7388_v17  ;;  %v7403_v53 = vpop.eup %5231  ;;  %v7410_v40 = vadd.f32 1.0, %v5228_v25  ;;  %v4830_v20 = vmul.f32 -1.442695, %v7383_v59  ;;  %vm7413_vm6 = vcmp.eq.f32.partialorder %v1831_v12, 8.507059e+37  ;;  %v1834_v13 = vor.u32 1.1754944e-38, %v1833_v33  ;;  %vm7424_vm5 = vmor %vm1827_vm2, %vm1828_vm15  ;;  %v1442_v33 = vpop.f32.mrf.mxu3 }
 0x2a6   :  { %11328 = vst [vmem:[#allocation36_spill] sm:$0xff] %v7391_v1  ;;  %v5234_v3 = vpop.eup %5233  ;;  %5239 = vrcp.f32 %v7374_v37  ;;  %v4820_v29 = vmul.f32 -1.442695, %v7377_v42  ;;  %v7422_v47 = vadd.f32 %v7292_v32, %v1690_v51  ;;  %v1848_v12 = vand.u32 2147483648, %v7317_v21 }
 0x2a7   :  { %11331 = vst [vmem:[#allocation37_spill] sm:$0xff] %v11330_v63  ;;  %v7419_v50 = vpop.eup %5235  ;;  %5241 = vpow2.f32 %v4830_v20  ;;  %v7430_v25 = vadd.f32 %v1401_v56, %v6975_v22  ;;  %v1830_v16 = vsel %vm7424_vm5, %v7284_v38, %v1826_v54  ;;  %v1883_v51 = vmul.f32 %v7403_v53, %v7322_v31 }
 0x2a8   :  { %11332 = vst [vmem:[#allocation32_spill] sm:$0xff] %v7410_v40  ;;  %v5238_v43 = vpop.eup %5237  ;;  %v7438_v15 = vadd.f32 %v1328_v49, %v6971_v46  ;;  %v7441_v55 = vadd.f32 %v1369_v52, %v6971_v46  ;;  %v1838_v56 = vmul.f32 %v7385_v8, %v7317_v21  ;;  %5243 = vrcp.f32 %v7410_v40 }
 0x2a9   :  { %11335 = vst [vmem:[#allocation43_spill] sm:$0xff] %v7422_v47  ;;  %v7446_v20 = vadd.f32 1.0, %v5234_v3  ;;  %v7448_v42 = vadd.f32 1.0, %v5238_v43  ;;  %5245 = vpow2.f32 %v4820_v29  ;;  %v7451_v38 = vadd.f32 %v1442_v33, %v6975_v22  ;;  %v1404_v33 = vpop.f32.mrf.mxu2 }
 0x2aa   :  { %11338 = vst [vmem:[#allocation27_spill] sm:$0xff] %v7430_v25  ;;  %v4833_v54 = vmul.f32 -1.442695, %v7438_v15  ;;  %v4834_v49 = vmul.f32 -1.442695, %v7441_v55  ;;  %v1898_v41 = vmul.f32 %v7419_v50, %v7346_v34  ;;  %v7462_v43 = vor.u32 1.1754944e-38, %v1848_v12 }
 0x2ab   :  { %11339 = vst [vmem:[#allocation26_spill] sm:$0xff] %v7451_v38  ;;  %5247 = vrcp.f32 %v7448_v42  ;;  %v4823_v3 = vmul.f32 -1.442695, %v7430_v25  ;;  %v1743_v22 = vand.u32 2147483648, %v7374_v37  ;;  %v1884_v29 = vsub.f32 1.0, %v1883_v51 }
 0x2ac   :  { %v7460_v24 = vpop.eup %5239  ;;  %5249 = vpow2.f32 %v4833_v54  ;;  %v1835_v52 = vsel %vm7413_vm6, %v1834_v13, %v1830_v16  ;;  %v1839_v47 = vsub.f32 1.0, %v1838_v56  ;;  %v1891_v9 = vand.u32 2147483647, %v7322_v31 }
 0x2ad   :  { %v5242_v39 = vpop.eup %5241  ;;  %5251 = vpow2.f32 %v4834_v49  ;;  %v1893_v7 = vand.u32 2147483648, %v7322_v31  ;;  %v4824_v12 = vmul.f32 -1.442695, %v7451_v38  ;;  %vm1842_vm4 = vweird.f32 %v7317_v21  ;;  %v7505_v14 = vpop.f32.mrf.mxu3 }
 0x2ae   :  { %5253 = vrcp.f32 %v7446_v20  ;;  %v7470_v27 = vadd.f32 1.0, %v5242_v39  ;;  %v7473_v18 = vpop.eup %5243  ;;  %v1899_v30 = vsub.f32 1.0, %v1898_v41  ;;  %v7478_v16 = vadd.f32 %v1404_v33, %v6977_v58 }
 0x2af   :  { %5255 = vpow2.f32 %v4823_v3  ;;  %v5246_v13 = vpop.eup %5245  ;;  %v7481_v56 = vmul.f32 %v1835_v52, %v7079_v45  ;;  %v1733_v39 = vmul.f32 %v7460_v24, %v7374_v37  ;;  %v1885_v54 = vmul.f32 %v7403_v53, %v1884_v29 }
 0x2b0   :  { %11340 = vst [vmem:[#allocation34_spill] sm:$0xff] %v7478_v16  ;;  %5257 = vrcp.f32 %v7470_v27  ;;  %v1840_v51 = vmul.f32 %v7385_v8, %v1839_v47  ;;  %vm1843_vm7 = vweird.f32 %v7385_v8  ;;  %v7491_v41 = vor.u32 1.1754944e-38, %v1743_v22 }
 0x2b1   :  { %v7487_v49 = vpop.eup %5247  ;;  %vm1887_vm8 = vweird.f32 %v7322_v31  ;;  %vm7494_vm3 = vcmp.eq.f32.partialorder %v1891_v9, 8.507059e+37  ;;  %v1894_v52 = vor.u32 1.1754944e-38, %v1893_v7  ;;  %5259 = vpow2.f32 %v4824_v12  ;;  %vm7547_vm12 = vmor %vm1842_vm4, %vm1843_vm7 }
 0x2b2   :  { %11341 = vst [vmem:[#allocation29_spill] sm:$0xff] %v7491_v41  ;;  %v5250_v3 = vpop.eup %5249  ;;  %v1943_v29 = vmul.f32 %v7487_v49, %v7448_v42  ;;  %v1900_v38 = vmul.f32 %v7419_v50, %v1899_v30  ;;  %vm1902_vm1 = vweird.f32 %v7346_v34  ;;  %v4827_v22 = vmul.f32 -1.442695, %v7478_v16 }
 0x2b3   :  { %v5252_v33 = vpop.eup %5251  ;;  %v7502_v47 = vadd.f32 1.0, %v5250_v3  ;;  %v1734_v63 = vsub.f32 1.0, %v1733_v39  ;;  %v1886_v7 = vadd.f32 %v7403_v53, %v1885_v54  ;;  %vm1888_vm9 = vweird.f32 %v7403_v53 }
 0x2b4   :  { %v7507_v9 = vpop.eup %5253  ;;  %v7513_v30 = vadd.f32 %v7385_v8, %v1840_v51  ;;  %v7517_v3 = vmul.f32 %v7473_v18, %v7410_v40  ;;  %v1908_v0 = vand.u32 2147483648, %v7346_v34  ;;  %v7520_v41 = vadd.f32 1.0, %v5252_v33  ;;  %vm7530_vm11 = vmor %vm1887_vm8, %vm1888_vm9 }
 0x2b5   :  { %v5256_v61 = vpop.eup %5255  ;;  %vm1903_vm10 = vweird.f32 %v7419_v50  ;;  %v7525_v39 = vadd.f32 1.0, %v5246_v13  ;;  %v1944_v54 = vsub.f32 1.0, %v1943_v29  ;;  %5261 = vrcp.f32 %v7502_v47  ;;  %v1448_v45 = vpop.f32.mrf.mxu3 }
 0x2b6   :  { %v7522_v25 = vpop.eup %5257  ;;  %v7535_v12 = vadd.f32 %v7419_v50, %v1900_v38  ;;  %v7539_v33 = vmul.f32 %v7507_v9, %v7446_v20  ;;  %5263 = vpow2.f32 %v4827_v22  ;;  %v7552_v38 = vmul.f32 %v7460_v24, %v1734_v63  ;;  %vm7572_vm0 = vmor %vm1902_vm1, %vm1903_vm10 }
 0x2b7   :  { %v1958_v13 = vmul.f32 %v7522_v25, %v7470_v27  ;;  %v5260_v29 = vpop.eup %5259  ;;  %v1890_v16 = vsel %vm7530_vm11, %v7403_v53, %v1886_v7  ;;  %v1951_v28 = vand.u32 2147483647, %v7448_v42  ;;  %v1953_v22 = vand.u32 2147483648, %v7448_v42 }
 0x2b8   :  { %v7563_v23 = vor.u32 1.1754944e-38, %v1908_v0  ;;  %v7565_v57 = vadd.f32 1.0, %v5256_v61  ;;  %5265 = vrcp.f32 %v7520_v41  ;;  %v1945_v53 = vmul.f32 %v7487_v49, %v1944_v54 }
 0x2b9   :  { %5267 = vrcp.f32 %v7525_v39  ;;  %v1959_v7 = vsub.f32 1.0, %v1958_v13  ;;  %v1968_v0 = vand.u32 2147483648, %v7470_v27  ;;  %v7581_v61 = vsel %vm7494_vm3, %v1894_v52, %v1890_v16  ;;  %v1407_v16 = vpop.f32.mrf.mxu2 }
 0x2ba   :  { %v7588_v32 = vadd.f32 1.0, %v5260_v29  ;;  %vm1947_vm15 = vweird.f32 %v7448_v42  ;;  %vm7591_vm2 = vcmp.eq.f32.partialorder %v1951_v28, 8.507059e+37  ;;  %v1954_v13 = vor.u32 1.1754944e-38, %v1953_v22 }
 0x2bb   :  { %v5262_v6 = vpop.eup %5261  ;;  %vm1962_vm6 = vweird.f32 %v7470_v27  ;;  %vm1948_vm5 = vweird.f32 %v7487_v49  ;;  %v1966_v51 = vand.u32 2147483647, %v7470_v27  ;;  %5269 = vrcp.f32 %v7565_v57 }
 0x2bc   :  { %11350 = vst [vmem:[#allocation20_spill] sm:$0xff] %v7588_v32  ;;  %v5264_v52 = vpop.eup %5263  ;;  %v2003_v29 = vmul.f32 %v5262_v6, %v7502_v47  ;;  %v1946_v11 = vadd.f32 %v7487_v49, %v1945_v53  ;;  %v1960_v28 = vmul.f32 %v7522_v25, %v1959_v7  ;;  %v1969_v4 = vor.u32 1.1754944e-38, %v1968_v0  ;;  %vm7622_vm7 = vmor %vm1947_vm15, %vm1948_vm5 }
 0x2bd   :  { %v2011_v22 = vand.u32 2147483647, %v7502_v47  ;;  %5271 = vrcp.f32 %v7588_v32  ;;  %vm2007_vm4 = vweird.f32 %v7502_v47  ;;  %v2013_v60 = vand.u32 2147483648, %v7502_v47 }
 0x2be   :  { %v5266_v5 = vpop.eup %5265  ;;  %v2004_v19 = vsub.f32 1.0, %v2003_v29  ;;  %v7609_v1 = vadd.f32 1.0, %v5264_v52  ;;  %v7613_v53 = vadd.f32 %v7505_v14, %v6977_v58  ;;  %v7616_v7 = vadd.f32 %v1407_v16, %v6969_v62 }
 0x2bf   :  { %v7606_v35 = vpop.eup %5267  ;;  %v2018_v2 = vmul.f32 %v5266_v5, %v7520_v41  ;;  %vm1963_vm8 = vweird.f32 %v7522_v25  ;;  %vm2008_vm3 = vweird.f32 %v5262_v6  ;;  %v2028_v52 = vand.u32 2147483648, %v7520_v41 }
 0x2c0   :  { %v2005_v29 = vmul.f32 %v5262_v6, %v2004_v19  ;;  %v11355_v58 = vand.u32 2147483647, %v7346_v34  ;;  %v1950_v42 = vsel %vm7622_vm7, %v7487_v49, %v1946_v11  ;;  %v1961_v16 = vadd.f32 %v7522_v25, %v1960_v28  ;;  %vm2009_vm15 = vmor %vm2007_vm4, %vm2008_vm3 }
 0x2c1   :  { %vm7638_vm9 = vcmp.eq.f32.partialorder %v2011_v22, 8.507059e+37  ;;  %v2019_v19 = vsub.f32 1.0, %v2018_v2  ;;  %v7642_v17 = vpop.eup %5269  ;;  %v2014_v32 = vor.u32 1.1754944e-38, %v2013_v60  ;;  %vm2023_vm10 = vweird.f32 %v5266_v5  ;;  %v1410_v60 = vpop.f32.mrf.mxu2  ;;  %vm7664_vm5 = vmor %vm1962_vm6, %vm1963_vm8 }
 0x2c2   :  { %vm7630_vm1 = vcmp.eq.f32.partialorder %v11355_v58, 8.507059e+37  ;;  %v2006_v40 = vadd.f32 %v5262_v6, %v2005_v29  ;;  %v2026_v34 = vand.u32 2147483647, %v7520_v41  ;;  %v11360_v58 = vand.u32 2147483647, %v7317_v21  ;;  %v1451_v29 = vpop.f32.mrf.mxu3 }
 0x2c3   :  { %v2020_v11 = vmul.f32 %v5266_v5, %v2019_v19  ;;  %5273 = vrcp.f32 %v7609_v1  ;;  %v4828_v2 = vmul.f32 -1.442695, %v7613_v53  ;;  %v4831_v49 = vmul.f32 -1.442695, %v7616_v7  ;;  %v7656_v28 = vpop.eup %5271 }
 0x2c4   :  { %vm7647_vm11 = vcmp.eq.f32.partialorder %v11360_v58, 8.507059e+37  ;;  %v1955_v21 = vsel %vm7591_vm2, %v1954_v13, %v1950_v42  ;;  %v2010_v22 = vsel %vm2009_vm15, %v5262_v6, %v2006_v40  ;;  %vm2022_vm4 = vweird.f32 %v7520_v41 }
 0x2c5   :  { %v2029_v0 = vor.u32 1.1754944e-38, %v2028_v52  ;;  %v1965_v19 = vsel %vm7664_vm5, %v7522_v25, %v1961_v16  ;;  %v2015_v54 = vsel %vm7638_vm9, %v2014_v32, %v2010_v22  ;;  %v2021_v13 = vadd.f32 %v5266_v5, %v2020_v11  ;;  %vm2024_vm2 = vmor %vm2022_vm4, %vm2023_vm10  ;;  %v11369_v11 = vld [vmem:[#allocation20_spill] sm:$0xff]  ;;  %v11371_v22 = vld [vmem:[#allocation62_spill] sm:$0xff] }
 0x2c6   :  { %5275 = vpow2.f32 %v4828_v2  ;;  %v2090_v27 = vmul.f32 %v2015_v54, %v7438_v15  ;;  %v7677_v6 = vadd.f32 %v1448_v45, %v6969_v62  ;;  %v7680_v40 = vadd.f32 %v1410_v60, %v6971_v46 }
 0x2c7   :  { %5277 = vpow2.f32 %v4831_v49  ;;  %vm1967_vm6 = vcmp.eq.f32.partialorder %v1966_v51, 8.507059e+37  ;;  %v2025_v41 = vsel %vm2024_vm2, %v5266_v5, %v2021_v13  ;;  %vm2027_vm7 = vcmp.eq.f32.partialorder %v2026_v34, 8.507059e+37  ;;  %v11404_v13 = vld [vmem:[#allocation45_spill] sm:$0xff] }
 0x2c8   :  { %v7683_v25 = vadd.f32 %v1451_v29, %v6971_v46  ;;  %vm1737_vm8 = vweird.f32 %v7374_v37  ;;  %v2086_v48 = vmul.f32 %v1955_v21, %v7325_v10  ;;  %v1970_v15 = vsel %vm1967_vm6, %v1969_v4, %v1965_v19  ;;  %2102 = vmatpush.msrb.mxu0 %v2090_v27 }
 0x2c9   :  { %v2030_v32 = vsel %vm2027_vm7, %v2029_v0, %v2025_v41  ;;  %v4832_v52 = vmul.f32 -1.442695, %v7677_v6  ;;  %v7688_v62 = vpop.eup %5273  ;;  %v1808_v45 = vmul.f32 %v7606_v35, %v7525_v39  ;;  %v4835_v51 = vmul.f32 -1.442695, %v7680_v40 }
 0x2ca   :  { %v2091_v5 = vmul.f32 %v2030_v32, %v7441_v55  ;;  %v4836_v46 = vmul.f32 -1.442695, %v7683_v25  ;;  %v1749_v42 = vsub.f32 1.0, %v7517_v3  ;;  %v2082_v4 = vmul.f32 %v7581_v61, %v7216_v36  ;;  %2103 = vmatpush.msrb.mxu0 %v2086_v48 }
 0x2cb   :  { %v11365_v10 = vsel %vm7572_vm0, %v7419_v50, %v7535_v12  ;;  %5279 = vpow2.f32 %v4832_v52  ;;  %vm1738_vm3 = vweird.f32 %v7460_v24  ;;  %v2087_v34 = vmul.f32 %v1970_v15, %v7383_v59  ;;  %v11374_v15 = vld [vmem:[#allocation24_spill] sm:$0xff] }
 0x2cc   :  { %v1910_v16 = vsel %vm7630_vm1, %v7563_v23, %v11365_v10  ;;  %v5276_v55 = vpop.eup %5275  ;;  %v1853_v3 = vmul.f32 %v7642_v17, %v7565_v57  ;;  %5281 = vpow2.f32 %v4835_v51  ;;  %2122 = vmatpush.msrb.mxu1 %v2091_v5  ;;  %v11366_v50 = vsel %vm7547_vm12, %v7385_v8, %v7513_v30  ;;  %2104 = vmatpush.msrb.mxu0 %v2082_v4  ;;  %v11368_v30 = vld [vmem:[#allocation52_spill] sm:$0xff]  ;;  %vm7748_vm0 = vmor %vm1737_vm8, %vm1738_vm3  ;;  %v11426_v4 = vld [vmem:[#allocation34_spill] sm:$0xff] }
 0x2cd   :  { %v5278_v36 = vpop.eup %5277  ;;  %v1850_v23 = vsel %vm7647_vm11, %v7462_v43, %v11366_v50  ;;  %v11367_v12 = vsub.f32 1.0, %v7539_v33  ;;  %v1913_v59 = vmul.f32 %v7688_v62, %v7609_v1  ;;  %v7723_v61 = vadd.f32 1.0, %v5276_v55  ;;  %v11375_v51 = vld [vmem:[#allocation36_spill] sm:$0xff]  ;;  %v11378_v55 = vld [vmem:[#allocation22_spill] sm:$0xff] }
 0x2ce   :  { %v2083_v14 = vmul.f32 %v1910_v16, %v7230_v26  ;;  %v1809_v31 = vsub.f32 1.0, %v1808_v45  ;;  %v7726_v58 = vadd.f32 1.0, %v5278_v36  ;;  %5283 = vpow2.f32 %v4836_v46  ;;  %2123 = vmatpush.msrb.mxu1 %v2087_v34  ;;  %2105 = vmatpush.msrb.mxu0 %v7481_v56 }
 0x2cf   :  { %v1795_v63 = vmul.f32 %v7507_v9, %v11367_v12  ;;  %v7730_v44 = vadd.f32 %v7460_v24, %v7552_v38  ;;  %v1750_v8 = vmul.f32 %v7473_v18, %v1749_v42  ;;  %v1803_v43 = vand.u32 2147483648, %v7446_v20  ;;  %v11370_v38 = vld [vmem:[#allocation32_spill] sm:$0xff] }
 0x2d0   :  { %5285 = vrcp.f32 %v7723_v61  ;;  %v2079_v33 = vmul.f32 %v1850_v23, %v11368_v30  ;;  %v1854_v26 = vsub.f32 1.0, %v1853_v3  ;;  %v1868_v2 = vmul.f32 %v7656_v28, %v11369_v11  ;;  %2124 = vmatpush.msrb.mxu1 %v2083_v14  ;;  %2106 = vmatpush.msrb.mxu0 %v11371_v22  ;;  %v11379_v23 = vld [vmem:[#allocation33_spill] sm:$0xff]  ;;  %v11380_v14 = vld [vmem:[#allocation55_spill] sm:$0xff] }
 0x2d1   :  { %5287 = vrcp.f32 %v7726_v58  ;;  %v5280_v49 = vpop.eup %5279  ;;  %vm1797_vm12 = vweird.f32 %v7446_v20  ;;  %v1801_v21 = vand.u32 2147483647, %v7446_v20  ;;  %v1914_v47 = vsub.f32 1.0, %v1913_v59 }
 0x2d2   :  { %v5282_v56 = vpop.eup %5281  ;;  %v7753_v29 = vadd.f32 %v7507_v9, %v1795_v63  ;;  %vm1798_vm1 = vweird.f32 %v7507_v9  ;;  %v1810_v19 = vmul.f32 %v7606_v35, %v1809_v31  ;;  %v7757_v54 = vadd.f32 1.0, %v5280_v49  ;;  %2125 = vmatpush.msrb.mxu1 %v2079_v33  ;;  %2107 = vmatpush.msrb.mxu0 %v11374_v15  ;;  %v11381_v33 = vld [vmem:[#allocation31_spill] sm:$0xff] }
 0x2d3   :  { %v7764_v27 = vadd.f32 %v7473_v18, %v1750_v8  ;;  %v1863_v41 = vand.u32 2147483648, %v7565_v57  ;;  %v7767_v48 = vadd.f32 1.0, %v5282_v56  ;;  %v7770_v52 = vor.u32 1.1754944e-38, %v1803_v43  ;;  %vm7781_vm9 = vmor %vm1797_vm12, %vm1798_vm1 }
 0x2d4   :  { %v5284_v32 = vpop.eup %5283  ;;  %v1855_v45 = vmul.f32 %v7642_v17, %v1854_v26  ;;  %v1869_v5 = vsub.f32 1.0, %v1868_v2  ;;  %5289 = vrcp.f32 %v7757_v54  ;;  %2126 = vmatpush.msrb.mxu1 %v11375_v51  ;;  %v1915_v16 = vmul.f32 %v7688_v62, %v1914_v47  ;;  %2108 = vmatpush.msrb.mxu0 %v11378_v55  ;;  %v7821_v26 = vld [vmem:[%s10861_s3] sm:$0xff] }
 0x2d5   :  { %5291 = vrcp.f32 %v7767_v48  ;;  %v1800_v3 = vsel %vm7781_vm9, %v7507_v9, %v7753_v29  ;;  %v7797_v36 = vadd.f32 %v7606_v35, %v1810_v19  ;;  %vm1857_vm10 = vweird.f32 %v7565_v57  ;;  %v11431_v29 = vld [vmem:[#allocation27_spill] sm:$0xff] }
 0x2d6   :  { %v7775_v46 = vpop.eup %5285  ;;  %v1861_v50 = vand.u32 2147483647, %v7565_v57  ;;  %2127 = vmatpush.msrb.mxu1 %v11379_v23  ;;  %vm1858_vm11 = vweird.f32 %v7642_v17  ;;  %v7803_v12 = vor.u32 1.1754944e-38, %v1863_v41  ;;  %2109 = vmatpush.msrb.mxu0 %v11380_v14  ;;  %v7810_v31 = vadd.f32 %v7642_v17, %v1855_v45  ;;  %v11382_v41 = vld [vmem:[#allocation18_spill] sm:$0xff] }
 0x2d7   :  { %v7790_v34 = vpop.eup %5287  ;;  %v1870_v8 = vmul.f32 %v7656_v28, %v1869_v5  ;;  %v1928_v43 = vmul.f32 %v7775_v46, %v7723_v61  ;;  %v7815_v30 = vadd.f32 1.0, %v5284_v32  ;;  %4837 = vmatmul.msk.f32.vlgmr.msrb.gmra.mxu0 %vm10981_vm13, %v7821_v26  ;;  %v7826_v2 = vadd.f32 %v7688_v62, %v1915_v16  ;;  %vm7843_vm4 = vmor %vm1857_vm10, %vm1858_vm11 }
 0x2d8   :  { %v1973_v59 = vmul.f32 %v7790_v34, %v7726_v58  ;;  %2128 = vmatpush.msrb.mxu1 %v11381_v33  ;;  %vm1918_vm15 = vweird.f32 %v7688_v62  ;;  %v1923_v49 = vand.u32 2147483648, %v7609_v1  ;;  %v1878_v56 = vand.u32 2147483648, %v11369_v11 }
 0x2d9   :  { %vm1917_vm5 = vweird.f32 %v7609_v1  ;;  %v1921_v19 = vand.u32 2147483647, %v7609_v1  ;;  %5293 = vrcp.f32 %v7815_v30  ;;  %v1981_v5 = vand.u32 2147483647, %v7726_v58 }
 0x2da   :  { %v1974_v47 = vsub.f32 1.0, %v1973_v59  ;;  %v7830_v22 = vpop.eup %5289  ;;  %2129 = vmatpush.msrb.mxu1 %v11382_v41  ;;  %v1983_v1 = vand.u32 2147483648, %v7726_v58  ;;  %v1860_v57 = vsel %vm7843_vm4, %v7642_v17, %v7810_v31  ;;  %v7859_v16 = vadd.f32 %v7656_v28, %v1870_v8  ;;  %vm7863_vm2 = vmor %vm1917_vm5, %vm1918_vm15 }
 0x2db   :  { %v7837_v15 = vpop.eup %5291  ;;  %v1988_v51 = vmul.f32 %v7830_v22, %v7757_v54  ;;  %4838 = vmatmul.msk.f32.vlgmr.msrb.gmra.mxu1 %vm10981_vm13, %v7821_v26  ;;  %v1929_v23 = vsub.f32 1.0, %v1928_v43  ;;  %v1920_v14 = vsel %vm7863_vm2, %v7688_v62, %v7826_v2  ;;  %v1924_v33 = vor.u32 1.1754944e-38, %v1923_v49 }
 0x2dc   :  { %v1975_v45 = vmul.f32 %v7790_v34, %v1974_v47  ;;  %v2033_v59 = vmul.f32 %v7837_v15, %v7767_v48  ;;  %vm1977_vm6 = vweird.f32 %v7726_v58  ;;  %vm7874_vm7 = vcmp.eq.f32.partialorder %v1921_v19, 8.507059e+37  ;;  %v11421_v47 = vld [vmem:[#allocation53_spill] sm:$0xff] }
 0x2dd   :  { %v1989_v8 = vsub.f32 1.0, %v1988_v51  ;;  %vm1978_vm8 = vweird.f32 %v7790_v34  ;;  %v2041_v60 = vand.u32 2147483647, %v7767_v48  ;;  %vm7881_vm3 = vcmp.eq.f32.partialorder %v1861_v50, 8.507059e+37 }
 0x2de   :  { %v1976_v41 = vadd.f32 %v7790_v34, %v1975_v45  ;;  %v2034_v43 = vsub.f32 1.0, %v2033_v59  ;;  %vm7886_vm1 = vcmp.eq.f32.partialorder %v1981_v5, 8.507059e+37  ;;  %v1984_v2 = vor.u32 1.1754944e-38, %v1983_v1  ;;  %vm7904_vm2 = vmor %vm1977_vm6, %vm1978_vm8  ;;  %v11395_v59 = vld [vmem:[#allocation61_spill] sm:$0xff] }
 0x2df   :  { %v1990_v49 = vmul.f32 %v7830_v22, %v1989_v8  ;;  %v2043_v19 = vand.u32 2147483648, %v7767_v48  ;;  %v7892_v45 = vpop.eup %5293  ;;  %v1930_v51 = vmul.f32 %v7775_v46, %v1929_v23  ;;  %vm2038_vm11 = vweird.f32 %v7837_v15 }
 0x2e0   :  { %v2035_v50 = vmul.f32 %v7837_v15, %v2034_v43  ;;  %v1996_v1 = vand.u32 2147483647, %v7757_v54  ;;  %v1998_v55 = vand.u32 2147483648, %v7757_v54  ;;  %vm2037_vm13 = vweird.f32 %v7767_v48  ;;  %v11413_v48 = vld [vmem:[#allocation17_spill] sm:$0xff] }
 0x2e1   :  { %v2048_v23 = vmul.f32 %v7892_v45, %v7815_v30  ;;  %vm7916_vm5 = vcmp.eq.f32.partialorder %v1801_v21, 8.507059e+37  ;;  %v1980_v58 = vsel %vm7904_vm2, %v7790_v34, %v1976_v41  ;;  %vm7925_vm8 = vcmp.eq.f32.partialorder %v2041_v60, 8.507059e+37  ;;  %vm2039_vm6 = vmor %vm2037_vm13, %vm2038_vm11  ;;  %v11400_v34 = vld [vmem:[#allocation42_spill] sm:$0xff]  ;;  %v11446_v41 = vld [vmem:[#allocation37_spill] sm:$0xff] }
 0x2e2   :  { %v2036_v43 = vadd.f32 %v7837_v15, %v2035_v50  ;;  %v1991_v20 = vadd.f32 %v7830_v22, %v1990_v49  ;;  %vm1993_vm10 = vweird.f32 %v7830_v22  ;;  %v2044_v21 = vor.u32 1.1754944e-38, %v2043_v19 }
 0x2e3   :  { %v2049_v5 = vsub.f32 1.0, %v2048_v23  ;;  %v11401_v60 = vand.u32 2147483647, %v7374_v37  ;;  %v1931_v50 = vadd.f32 %v7775_v46, %v1930_v51  ;;  %v2056_v49 = vand.u32 2147483647, %v7815_v30  ;;  %v11405_v51 = vld [vmem:[#allocation60_spill] sm:$0xff] }
 0x2e4   :  { %v2040_v10 = vsel %vm2039_vm6, %v7837_v15, %v2036_v43  ;;  %v2058_v63 = vand.u32 2147483648, %v7815_v30  ;;  %v1985_v19 = vsel %vm7886_vm1, %v1984_v2, %v1980_v58  ;;  %v11406_v15 = vand.u32 2147483647, %v11405_v51  ;;  %v11412_v58 = vld [vmem:[#allocation44_spill] sm:$0xff] }
 0x2e5   :  { %vm7938_vm14 = vcmp.eq.f32.partialorder %v11401_v60, 8.507059e+37  ;;  %v2045_v37 = vsel %vm7925_vm8, %v2044_v21, %v2040_v10  ;;  %v2050_v23 = vmul.f32 %v7892_v45, %v2049_v5  ;;  %vm1932_vm13 = vweird.f32 %v7723_v61 }
 0x2e6   :  { %vm7956_vm6 = vcmp.eq.f32.partialorder %v11406_v15, 8.507059e+37  ;;  %v1936_v60 = vand.u32 2147483647, %v7723_v61  ;;  %v1938_v62 = vand.u32 2147483648, %v7723_v61  ;;  %vm11409_vm1 = vweird.f32 %v7757_v54 }
 0x2e7   :  { %vm7967_vm8 = vmor %vm11409_vm1, %vm1993_vm10  ;;  %v2092_v2 = vmul.f32 %v2045_v37, %v7680_v40  ;;  %v1925_v21 = vsel %vm7874_vm7, %v1924_v33, %v1920_v14  ;;  %vm11414_vm12 = vweird.f32 %v7775_v46  ;;  %v2051_v5 = vadd.f32 %v7892_v45, %v2050_v23  ;;  %v11451_v23 = vld [vmem:[#allocation50_spill] sm:$0xff]  ;;  %v11465_v37 = vld [vmem:[#allocation51_spill] sm:$0xff] }
 0x2e8   :  { %vm7978_vm15 = vmor %vm1932_vm13, %vm11414_vm12  ;;  %v1995_v54 = vsel %vm7967_vm8, %v7830_v22, %v1991_v20  ;;  %vm2052_vm10 = vweird.f32 %v7815_v30  ;;  %v11417_v40 = vand.u32 2147483647, %v11400_v34  ;;  %v1865_v14 = vsel %vm7881_vm3, %v7803_v12, %v1860_v57 }
 0x2e9   :  { %v2088_v22 = vmul.f32 %v1985_v19, %v7616_v7  ;;  %v1999_v33 = vor.u32 1.1754944e-38, %v1998_v55  ;;  %vm11420_vm7 = vweird.f32 %v7892_v45  ;;  %v2059_v30 = vor.u32 1.1754944e-38, %v2058_v63  ;;  %2142 = vmatpush.msrb.mxu2 %v2092_v2  ;;  %v11449_v19 = vld [vmem:[#allocation40_spill] sm:$0xff]  ;;  %v11457_v2 = vld [vmem:[#allocation49_spill] sm:$0xff] }
 0x2ea   :  { %vm7989_vm1 = vcmp.eq.f32.partialorder %v11417_v40, 8.507059e+37  ;;  %vm2054_vm12 = vmor %vm2052_vm10, %vm11420_vm7  ;;  %vm1632_vm13 = vweird.f32 %v11421_v47  ;;  %v1935_v32 = vsel %vm7978_vm15, %v7775_v46, %v1931_v50  ;;  %vm1997_vm8 = vcmp.eq.f32.partialorder %v1996_v1, 8.507059e+37  ;;  %v11439_v50 = vld [vmem:[#allocation56_spill] sm:$0xff]  ;;  %v11461_v40 = vld [vmem:[#allocation26_spill] sm:$0xff] }
 0x2eb   :  { %v2055_v17 = vsel %vm2054_vm12, %v7892_v45, %v2051_v5  ;;  %vm2057_vm4 = vcmp.eq.f32.partialorder %v2056_v49, 8.507059e+37  ;;  %vm11422_vm3 = vweird.f32 %v7656_v28  ;;  %vm11423_vm11 = vweird.f32 %v11369_v11  ;;  %2143 = vmatpush.msrb.mxu2 %v2088_v22  ;;  %v11448_v49 = vld [vmem:[#allocation54_spill] sm:$0xff] }
 0x2ec   :  { %vm8013_vm2 = vmor %vm11423_vm11, %vm11422_vm3  ;;  %v2084_v12 = vmul.f32 %v1925_v21, %v11426_v4  ;;  %v1939_v63 = vor.u32 1.1754944e-38, %v1938_v62  ;;  %v2000_v31 = vsel %vm1997_vm8, %v1999_v33, %v1995_v54  ;;  %v2060_v57 = vsel %vm2057_vm4, %v2059_v30, %v2055_v17  ;;  %v11469_v4 = vld [vmem:[#allocation48_spill] sm:$0xff] }
 0x2ed   :  { %v1805_v46 = vsel %vm7916_vm5, %v7770_v52, %v1800_v3  ;;  %v1875_v45 = vsel %vm8013_vm2, %v7656_v28, %v7859_v16  ;;  %vm1937_vm15 = vcmp.eq.f32.partialorder %v1936_v60, 8.507059e+37  ;;  %v2093_v1 = vmul.f32 %v2060_v57, %v7683_v25  ;;  %v11437_v16 = vld [vmem:[#allocation29_spill] sm:$0xff] }
 0x2ee   :  { %v1758_v55 = vand.u32 2147483648, %v11370_v38  ;;  %vm11427_vm11 = vweird.f32 %v7606_v35  ;;  %vm11428_vm10 = vweird.f32 %v7525_v39  ;;  %v2080_v52 = vmul.f32 %v1865_v14, %v11431_v29  ;;  %2144 = vmatpush.msrb.mxu2 %v2084_v12 }
 0x2ef   :  { %vm8036_vm7 = vmor %vm11428_vm10, %vm11427_vm11  ;;  %v1879_v42 = vor.u32 1.1754944e-38, %v1878_v56  ;;  %v1940_v3 = vsel %vm1937_vm15, %v1939_v63, %v1935_v32  ;;  %vm11432_vm9 = vweird.f32 %v11395_v59  ;;  %vm11433_vm5 = vweird.f32 %v11400_v34  ;;  %2162 = vmatpush.msrb.mxu3 %v2093_v1  ;;  %v11470_v63 = vld [vmem:[#allocation28_spill] sm:$0xff]  ;;  %v11472_v1 = vld [vmem:[#allocation39_spill] sm:$0xff] }
 0x2f0   :  { %vm8047_vm2 = vmor %vm11433_vm5, %vm11432_vm9  ;;  %v11436_v25 = vsel %vm7748_vm0, %v7460_v24, %v7730_v44  ;;  %v1815_v56 = vsel %vm8036_vm7, %v7606_v35, %v7797_v36  ;;  %v11438_v20 = vand.u32 2147483647, %v11369_v11  ;;  %v2089_v34 = vmul.f32 %v2000_v31, %v7677_v6  ;;  %v11444_v35 = vld [vmem:[#allocation14_spill] sm:$0xff]  ;;  %2145 = vmatpush.msrb.mxu2 %v2080_v52 }
 0x2f1   :  { %v1745_v8 = vsel %vm7938_vm14, %v11437_v16, %v11436_v25  ;;  %v1620_v24 = vsel %vm8047_vm2, %v11395_v59, %v11439_v50  ;;  %vm11440_vm0 = vweird.f32 %v7473_v18  ;;  %vm11441_vm14 = vweird.f32 %v11370_v38  ;;  %v4759_v25 = vld [vmem:[%s10863_s5 + $0x10] sm:$0xff] }
 0x2f2   :  { %vm1877_vm12 = vcmp.eq.f32.partialorder %v11438_v20, 8.507059e+37  ;;  %vm8074_vm8 = vmor %vm11441_vm14, %vm11440_vm0  ;;  %v2076_v0 = vmul.f32 %v1805_v46, %v11444_v35  ;;  %v11445_v11 = vand.u32 2147483648, %v7525_v39  ;;  %vm11447_vm4 = vnez %v11446_v41  ;;  %2163 = vmatpush.msrb.mxu3 %v2089_v34 }
 0x2f3   :  { %v1880_v6 = vsel %vm1877_vm12, %v1879_v42, %v1875_v45  ;;  %v11450_v59 = vsel %vm11447_vm4, %v11448_v49, %v11449_v19  ;;  %v1755_v15 = vsel %vm8074_vm8, %v7473_v18, %v7764_v27  ;;  %v11452_v60 = vand.u32 2147483647, %v7525_v39  ;;  %v11458_v39 = vld [vmem:[#allocation63_spill] sm:$0xff] }
 0x2f4   :  { %v1819_v36 = vor.u32 1.1754944e-38, %v11445_v11  ;;  %v1685_v51 = vsel %vm7956_vm6, %v11451_v23, %v11450_v59  ;;  %v2085_v62 = vmul.f32 %v1940_v3, %v7613_v53  ;;  %v1638_v10 = vand.u32 2147483648, %v11421_v47  ;;  %2146 = vmatpush.msrb.mxu2 %v2076_v0  ;;  %v11459_v27 = vld [vmem:[#allocation43_spill] sm:$0xff] }
 0x2f5   :  { %vm1817_vm3 = vcmp.eq.f32.partialorder %v11452_v60, 8.507059e+37  ;;  %vm11453_vm15 = vweird.f32 %v11404_v13  ;;  %vm11454_vm11 = vweird.f32 %v11413_v48  ;;  %v2072_v21 = vmul.f32 %v1745_v8, %v11457_v2  ;;  %v11477_v3 = vld [vmem:[#allocation35_spill] sm:$0xff] }
 0x2f6   :  { %vm8101_vm10 = vmor %vm11454_vm11, %vm11453_vm15  ;;  %v1759_v61 = vor.u32 1.1754944e-38, %v1758_v55  ;;  %v1820_v18 = vsel %vm1817_vm3, %v1819_v36, %v1815_v56  ;;  %v1625_v53 = vsel %vm7989_vm1, %v11458_v39, %v1620_v24  ;;  %v11460_v5 = vand.u32 2147483647, %v11370_v38  ;;  %2164 = vmatpush.msrb.mxu3 %v2085_v62  ;;  %v11467_v38 = vld [vmem:[#allocation15_spill] sm:$0xff] }
 0x2f7   :  { %v1695_v54 = vsel %vm8101_vm10, %v11404_v13, %v11459_v27  ;;  %v2081_v14 = vmul.f32 %v1880_v6, %v11461_v40  ;;  %vm11462_vm7 = vweird.f32 %v11412_v58  ;;  %v2068_v33 = vmul.f32 %v1685_v51, %v11465_v37  ;;  %2147 = vmatpush.msrb.mxu2 %v2072_v21  ;;  %v11479_v24 = vld [vmem:[#allocation47_spill] sm:$0xff] }
 0x2f8   :  { %vm1757_vm6 = vcmp.eq.f32.partialorder %v11460_v5, 8.507059e+37  ;;  %vm8120_vm9 = vmor %vm1632_vm13, %vm11462_vm7  ;;  %v11466_v30 = vand.u32 2147483648, %v11413_v48  ;;  %v11468_v7 = vand.u32 2147483647, %v11413_v48  ;;  %v2077_v12 = vmul.f32 %v1820_v18, %v11469_v4  ;;  %v11475_v48 = vld [vmem:[#allocation41_spill] sm:$0xff] }
 0x2f9   :  { %v1760_v13 = vsel %vm1757_vm6, %v1759_v61, %v1755_v15  ;;  %v1635_v17 = vsel %vm8120_vm9, %v11412_v58, %v11467_v38  ;;  %2165 = vmatpush.msrb.mxu3 %v2081_v14  ;;  %v2064_v31 = vmul.f32 %v1625_v53, %v11470_v63  ;;  %v1639_v57 = vor.u32 1.1754944e-38, %v1638_v10  ;;  %2148 = vmatpush.msrb.mxu2 %v2068_v33  ;;  %v11473_v58 = vld [vmem:[#allocation30_spill] sm:$0xff]  ;;  %v4760_v33 = vld [vmem:[%s10863_s5 + $0x18] sm:$0xff] }
 0x2fa   :  { %v1699_v32 = vor.u32 1.1754944e-38, %v11466_v30  ;;  %vm1697_vm1 = vcmp.eq.f32.partialorder %v11468_v7, 8.507059e+37  ;;  %v11471_v45 = vand.u32 2147483647, %v11421_v47  ;;  %v2073_v55 = vmul.f32 %v1760_v13, %v11472_v1 }
 0x2fb   :  { %2166 = vmatpush.msrb.mxu3 %v2077_v12  ;;  %2149 = vmatpush.msrb.mxu2 %v2064_v31  ;;  %vm11474_vm5 = vcmask 523264   ;;  %v2174_v42 = vstv %s4752_s11  ;;  %v2230_v20 = vmul.f32 %v4759_v25, %v4759_v25  ;;  %vm11478_vm12 = vcmask 1043456   ;;  %v5560_v12 = vld [vmem:[%s10859_s1] sm:$0xff] }
 0x2fc   :  { %v1700_v46 = vsel %vm1697_vm1, %v1699_v32, %v1695_v54  ;;  %vm1637_vm13 = vcmp.eq.f32.partialorder %v11471_v45, 8.507059e+37  ;;  %4839 = vmatmul.msk.f32.vlgmr.msrb.gmra.mxu2 %vm11474_vm5, %v7821_v26  ;;  %vm11476_vm2 = vmmov %vm11474_vm5  ;;  %v2191_v35 = vstv %s4753_s14  ;;  %v8157_v41 = vstv %s4758_s17  ;;  %v11491_v31 = vld [vmem:[#allocation64_spill] sm:$0xff]  ;;  %s4845_s17 = sld [smem:[#allocation2 + $0x100]] }
 0x2fd   :  { %v1640_v9 = vsel %vm1637_vm13, %v1639_v57, %v1635_v17  ;;  %v2069_v29 = vmul.f32 %v1700_v46, %v11473_v58  ;;  %2167 = vmatpush.msrb.mxu3 %v2073_v55  ;;  %11480 = vst [vmem:[#allocation25_spill] sm:$0xff] %v8157_v41  ;;  %v2285_v59 = vstv %s2282_s0  ;;  %v2288_v51 = vmul.f32 %v4759_v25, %v8157_v41  ;;  %vm11486_vm0 = vmmov %vm11478_vm12  ;;  %v5561_v55 = vld [vmem:[%s10859_s1 + $0x8] sm:$0xff] }
 0x2fe   :  { %v2065_v52 = vmul.f32 %v1640_v9, %v11475_v48  ;;  %v2216_v60 = vstv %s8150_s16  ;;  %v2219_v10 = vstv %s8155_s19  ;;  %v2225_v21 = vstv %s2224_s20  ;;  %vm11487_vm14 = vmmov %vm11486_vm0  ;;  %s4846_s19 = sld [smem:[#allocation2 + $0x101]]  ;;  %s4640_s16 = sshll.u32 %s10866_s8, 4  ;;  %s4641_s16 = int_to_ptr.hbm [resolvable:$true] %s4640_s16 }
 0x2ff   :  { %2168 = vmatpush.msrb.mxu3 %v2069_v29  ;;  %v2220_v39 = vmul.f32 %v2219_v10, %v11479_v24  ;;  %v2226_v27 = vmul.f32 %v4759_v25, %v2225_v21  ;;  %v2231_v13 = vmul.f32 %v4760_v33, %v4760_v33  ;;  %vm11488_vm8 = vcmask 31744   ;;  %vm11490_vm3 = vmmov %vm11486_vm0  ;;  %s4850_s20 = sld [smem:[#allocation2 + $0x105]]  ;;  %s5672_s8 = smov [#allocation8]  }
 0x300   :  { %vm11489_vm4 = vmmov %vm11488_vm8 }
 0x301   :  { %2169 = vmatpush.msrb.mxu3 %v2065_v52  ;;  %vm11492_vm15 = vmmov %vm11489_vm4  ;;  %v2289_v52 = vmul.f32 %v4760_v33, %v8157_v41 }
 0x302   :  { %4840 = vmatmul.msk.f32.vlgmr.msrb.gmra.mxu3 %vm11476_vm2, %v7821_v26  ;;  %vm11493_vm11 = vmmov %vm11489_vm4 }
 0x303   :  { %vm11494_vm10 = vmmov %vm11489_vm4 }
 0x304   :  { %vm11495_vm6 = vmmov %vm11489_vm4 }
 0x305   :  { %vm11498_vm7 = vmmov %vm11489_vm4  ;;  %s3407_s23 = smul.f32 %s4850_s20, %s9333_s4 }
 0x306   :  { %vm11499_vm9 = vmmov %vm11489_vm4 }
 0x307   :  { %vm11503_vm1 = vmmov %vm11489_vm4 }
 0x308   :  { %vm11504_vm13 = vmmov %vm11503_vm1 }
 0x309   :  { %vm11505_vm5 = vmmov %vm11486_vm0 }
 0x30a   :  { %vm11506_vm2 = vmmov %vm11486_vm0 }
 0x354   :  { %v2111_v47 = vpop.f32.mrf.mxu0 }
 0x355   :  { %v2112_v28 = vadd.f32 %v2111_v47, %v11477_v3 }
 0x357   :  { %v2175_v16 = vmul.f32 %v2174_v42, %v2112_v28 }
 0x358   :  { %v2131_v8 = vpop.f32.mrf.mxu1 }
 0x359   :  { %v2132_v56 = vadd.f32 %v2131_v8, %v11477_v3  ;;  %2198 = vst.sshfl [vmem:[#allocation1] sm:$0xff pattern:$0x75316420] %v2175_v16 }
 0x35b   :  { %v2176_v34 = vmul.f32 %v2174_v42, %v2132_v56 }
 0x35d   :  { %v2183_v50 = vrot.slane %v2176_v34, 4  ;;  %2199 = vst.sshfl [vmem:[#allocation1 + $0x8] sm:$0xff pattern:$0x75316420] %v2176_v34 }
 0x35e   :  { %2234 = vst [vmem:[#allocation1] ss:$2 sm:$0xff] %v2230_v20  ;;  %v2221_v20 = vmul.f32 %v2219_v10, %v11491_v31 }
 0x35f   :  { %v2185_v26 = vsel %vm11478_vm12, %v2175_v16, %v2183_v50  ;;  %v2227_v50 = vmul.f32 %v4760_v33, %v2225_v21  ;;  %vm11507_vm12 = vmmov %vm11503_vm1 }
 0x360   :  { %v2189_v44 = vsub.f32 %v11479_v24, %v2185_v26  ;;  %v5563_v26 = vld [vmem:[%s10859_s1 + $0x18] sm:$0xff] }
 0x362   :  { %v2192_v11 = vmul.f32 %v2191_v35, %v2189_v44 }
 0x364   :  { %v2203_v0 = vld [vmem:[#allocation1 + $0x1] ss:$2 sm:$0xff]  ;;  %v4841_v49 = vclamps-f32 %v2192_v11, 1.0 }
 0x365   :  { %v2208_v36 = vsub.f32 %v11479_v24, %v2203_v0  ;;  %v8162_v61 = vld.sshfl [vmem:[#allocation1] sm:$0xff pattern:$0x75316420]  ;;  %v8164_v18 = vld.sshfl [vmem:[#allocation1 + $0x8] sm:$0xff pattern:$0x75316420] }
 0x366   :  { %v2217_v43 = vmul.f32 %v4841_v49, %v2216_v60  ;;  %11481 = vst [vmem:[#allocation16_spill] sm:$0xff] %v8162_v61  ;;  %v5564_v0 = vld [vmem:[%s10859_s1 + $0x20] sm:$0xff] }
 0x367   :  { %v2210_v6 = vmul.f32 %v2208_v36, %v2191_v35  ;;  %11482 = vst [vmem:[#allocation19_spill] sm:$0xff] %v8164_v18 }
 0x368   :  { %v2222_v53 = vadd.f32 %v2220_v39, %v2217_v43 }
 0x369   :  { %v4843_v19 = vclamps-f32 %v2210_v6, 1.0  ;;  %v5565_v6 = vld [vmem:[%s10859_s1 + $0x28] sm:$0xff] }
 0x36a   :  { %v8167_v54 = vadd.f32 %v2226_v27, %v2222_v53  ;;  %v8272_v27 = vpop.permute.xlu1 %2385 }
 0x36b   :  { %v2283_v23 = vsub.f32 %v4841_v49, %v4843_v19  ;;  %v5566_v49 = vld [vmem:[%s10859_s1 + $0x30] sm:$0xff]  ;;  %v5567_v19 = vld [vmem:[%s10859_s1 + $0x38] sm:$0xff] }
 0x36c   :  { %11483 = vst [vmem:[#allocation12_spill] sm:$0xff] %v8167_v54 }
 0x36d   :  { %v2286_v15 = vmul.f32 %v2285_v59, %v2283_v23  ;;  %v8257_v23 = vpop.permute.xlu2 %2395 }
 0x36f   :  { %v2290_v62 = vadd.f32 %v2288_v51, %v2286_v15 }
 0x371   :  { %v2292_v2 = vmul.f32 %v2290_v62, %v2290_v62 }
 0x373   :  { %2296 = vst [vmem:[#allocation1] ss:$2 sm:$0xff] %v2292_v2 }
 0x375   :  { %v8261_v62 = vpop.permute.xlu2 %2380 }
 0x37a   :  { %v8169_v5 = vld.sshfl [vmem:[#allocation1] sm:$0xff pattern:$0x75316420]  ;;  %v8171_v40 = vld.sshfl [vmem:[#allocation1 + $0x8] sm:$0xff pattern:$0x75316420] }
 0x37b   :  { %11484 = vst [vmem:[#allocation13_spill] sm:$0xff] %v8169_v5 }
 0x37c   :  { %11485 = vst [vmem:[#allocation52_spill] sm:$0xff] %v8171_v40 }
 0x37d   :  { %2400 = vst [vmem:[#allocation1] ss:$2 sm:$0xff] %v8167_v54 }
 0x37f   :  { %v2151_v14 = vpop.f32.mrf.mxu2 }
 0x380   :  { %v2152_v22 = vadd.f32 %v2151_v14, %v11477_v3  ;;  %v8274_v14 = vpop.permute.xlu2 %2365 }
 0x382   :  { %v2177_v37 = vmul.f32 %v2174_v42, %v2152_v22 }
 0x384   :  { %2200 = vst.sshfl [vmem:[#allocation1 + $0x10] sm:$0xff pattern:$0x75316420] %v2177_v37  ;;  %v2403_v17 = vld.sshfl [vmem:[#allocation1] sm:$0xff pattern:$0x75316420] }
 0x385   :  { %v2171_v30 = vpop.f32.mrf.mxu3  ;;  %v2404_v7 = vld.sshfl [vmem:[#allocation1 + $0x8] sm:$0xff pattern:$0x75316420]  ;;  %4862 = vmatpush.msk.msra.mxu0 %vm11486_vm0, %v2403_v17  ;;  %vm11508_vm0 = vmmov %vm11503_vm1  ;;  %v8284_v17 = vpop.permute.xlu1 %2370 }
 0x386   :  { %v2172_v32 = vadd.f32 %v2171_v30, %v11477_v3  ;;  %4871 = vmatpush.msk.msra.mxu1 %vm11487_vm14, %v2404_v7  ;;  %4863 = vmatmul.msk.f32.vlgmr.msra.gmra.mxu0 %vm11488_vm8, %v5560_v12  ;;  %vm11509_vm14 = vmmov %vm11508_vm0 }
 0x387   :  { %4872 = vmatmul.msk.f32.vlgmr.msra.gmra.mxu1 %vm11489_vm4, %v5560_v12  ;;  %vm11510_vm8 = vmmov %vm11508_vm0 }
 0x388   :  { %v2178_v38 = vmul.f32 %v2174_v42, %v2172_v32  ;;  %v5562_v42 = vld [vmem:[%s10859_s1 + $0x10] sm:$0xff]  ;;  %vm11511_vm4 = vmmov %vm11508_vm0 }
 0x38a   :  { %v2184_v4 = vrot.slane %v2178_v38, 4  ;;  %2201 = vst.sshfl [vmem:[#allocation1 + $0x18] sm:$0xff pattern:$0x75316420] %v2178_v38 }
 0x38b   :  { %2236 = vst [vmem:[#allocation1 + $0x10] ss:$2 sm:$0xff] %v2231_v13 }
 0x38c   :  { %v2186_v63 = vsel %vm11490_vm3, %v2177_v37, %v2184_v4  ;;  %vm11512_vm3 = vmmov %vm11508_vm0 }
 0x38d   :  { %v2190_v57 = vsub.f32 %v11491_v31, %v2186_v63 }
 0x38e   :  { %4864 = vmatmul.msk.f32.gmra.mxu0 %vm11492_vm15, %v5561_v55  ;;  %vm11513_vm15 = vmmov %vm11508_vm0 }
 0x38f   :  { %v2193_v45 = vmul.f32 %v2191_v35, %v2190_v57  ;;  %4873 = vmatmul.msk.f32.gmra.mxu1 %vm11493_vm11, %v5561_v55  ;;  %vm11514_vm11 = vmmov %vm11508_vm0 }
 0x391   :  { %v2205_v46 = vld [vmem:[#allocation1 + $0x11] ss:$2 sm:$0xff]  ;;  %v4842_v58 = vclamps-f32 %v2193_v45, 1.0 }
 0x392   :  { %v2209_v1 = vsub.f32 %v11491_v31, %v2205_v46  ;;  %v8200_v8 = vld.sshfl [vmem:[#allocation1 + $0x10] sm:$0xff pattern:$0x75316420]  ;;  %v8202_v56 = vld.sshfl [vmem:[#allocation1 + $0x18] sm:$0xff pattern:$0x75316420] }
 0x393   :  { %v2218_v25 = vmul.f32 %v4842_v58, %v2216_v60  ;;  %11496 = vst [vmem:[#allocation20_spill] sm:$0xff] %v8200_v8 }
 0x394   :  { %v2211_v9 = vmul.f32 %v2209_v1, %v2191_v35  ;;  %11497 = vst [vmem:[#allocation32_spill] sm:$0xff] %v8202_v56 }
 0x395   :  { %v2223_v34 = vadd.f32 %v2221_v20, %v2218_v25 }
 0x396   :  { %v4844_v29 = vclamps-f32 %v2211_v9, 1.0  ;;  %4865 = vmatmul.msk.f32.gmra.mxu0 %vm11494_vm10, %v5562_v42  ;;  %vm11515_vm10 = vmmov %vm11508_vm0 }
 0x397   :  { %4874 = vmatmul.msk.f32.gmra.mxu1 %vm11495_vm6, %v5562_v42  ;;  %v8210_v24 = vadd.f32 %v2227_v50, %v2223_v34  ;;  %vm11516_vm6 = vmmov %vm11508_vm0 }
 0x398   :  { %v2284_v48 = vsub.f32 %v4842_v58, %v4844_v29 }
 0x399   :  { %11500 = vst [vmem:[#allocation62_spill] sm:$0xff] %v8210_v24 }
 0x39a   :  { %v2287_v47 = vmul.f32 %v2285_v59, %v2284_v48  ;;  %v8255_v59 = vpop.permute.xlu0 %2390 }
 0x39c   :  { %v2291_v28 = vadd.f32 %v2289_v52, %v2287_v47 }
 0x39e   :  { %v2293_v16 = vmul.f32 %v2291_v28, %v2291_v28  ;;  %4866 = vmatmul.msk.f32.gmra.mxu0 %vm11498_vm7, %v5563_v26  ;;  %vm11517_vm7 = vmmov %vm11508_vm0 }
 0x39f   :  { %4875 = vmatmul.msk.f32.gmra.mxu1 %vm11499_vm9, %v5563_v26  ;;  %vm11518_vm9 = vmmov %vm11508_vm0 }
 0x3a0   :  { %2298 = vst [vmem:[#allocation1 + $0x10] ss:$2 sm:$0xff] %v2293_v16 }
 0x3a2   :  { %v8259_v51 = vpop.permute.xlu0 %2375 }
 0x3a6   :  { %4867 = vmatmul.msk.f32.gmra.mxu0 %vm11503_vm1, %v5564_v0  ;;  %vm11519_vm1 = vmmov %vm11508_vm0 }
 0x3a7   :  { %v8212_v44 = vld.sshfl [vmem:[#allocation1 + $0x10] sm:$0xff pattern:$0x75316420]  ;;  %v8214_v35 = vld.sshfl [vmem:[#allocation1 + $0x18] sm:$0xff pattern:$0x75316420]  ;;  %4876 = vmatmul.msk.f32.gmra.mxu1 %vm11504_vm13, %v5564_v0  ;;  %vm11520_vm13 = vmmov %vm11508_vm0 }
 0x3a8   :  { %11501 = vst [vmem:[#allocation24_spill] sm:$0xff] %v8212_v44 }
 0x3a9   :  { %11502 = vst [vmem:[#allocation36_spill] sm:$0xff] %v8214_v35 }
 0x3aa   :  { %2402 = vst [vmem:[#allocation1 + $0x10] ss:$2 sm:$0xff] %v8210_v24  ;;  %v8263_v10 = vpop.permute.xlu0 %2360 }
 0x3ae   :  { %4868 = vmatmul.msk.f32.gmra.mxu0 %vm11509_vm14, %v5565_v6  ;;  %vm11524_vm14 = vmmov %vm11508_vm0 }
 0x3af   :  { %4877 = vmatmul.msk.f32.gmra.mxu1 %vm11510_vm8, %v5565_v6  ;;  %vm11525_vm8 = vmmov %vm11508_vm0 }
 0x3b1   :  { %v2405_v11 = vld.sshfl [vmem:[#allocation1 + $0x10] sm:$0xff pattern:$0x75316420]  ;;  %v2406_v36 = vld.sshfl [vmem:[#allocation1 + $0x18] sm:$0xff pattern:$0x75316420] }
 0x3b2   :  { %4880 = vmatpush.msk.msra.mxu2 %vm11505_vm5, %v2405_v11  ;;  %4889 = vmatpush.msk.msra.mxu3 %vm11506_vm2, %v2406_v36  ;;  %vm11521_vm5 = vmmov %vm11508_vm0 }
 0x3b3   :  { %4881 = vmatmul.msk.f32.vlgmr.msra.gmra.mxu2 %vm11507_vm12, %v5560_v12  ;;  %4890 = vmatmul.msk.f32.vlgmr.msra.gmra.mxu3 %vm11508_vm0, %v5560_v12  ;;  %vm11522_vm2 = vmmov %vm11508_vm0 }
 0x3b4   :  { %vm11523_vm12 = vmmov %vm11508_vm0 }
 0x3b6   :  { %4869 = vmatmul.msk.f32.gmra.mxu0 %vm11513_vm15, %v5566_v49 }
 0x3b7   :  { %4878 = vmatmul.msk.f32.gmra.mxu1 %vm11514_vm11, %v5566_v49 }
 0x3bb   :  { %4882 = vmatmul.msk.f32.gmra.mxu2 %vm11511_vm4, %v5561_v55  ;;  %4891 = vmatmul.msk.f32.gmra.mxu3 %vm11512_vm3, %v5561_v55  ;;  %vm11526_vm4 = vmmov %vm11508_vm0 }
 0x3bc   :  { %vm11527_vm3 = vmmov %vm11508_vm0 }
 0x3be   :  { %4870 = vmatmul.msk.f32.gmra.mxu0 %vm11517_vm7, %v5567_v19 }
 0x3bf   :  { %4879 = vmatmul.msk.f32.gmra.mxu1 %vm11518_vm9, %v5567_v19 }
 0x3c3   :  { %4883 = vmatmul.msk.f32.gmra.mxu2 %vm11515_vm10, %v5562_v42  ;;  %4892 = vmatmul.msk.f32.gmra.mxu3 %vm11516_vm6, %v5562_v42 }
 0x3cb   :  { %4884 = vmatmul.msk.f32.gmra.mxu2 %vm11519_vm1, %v5563_v26  ;;  %4893 = vmatmul.msk.f32.gmra.mxu3 %vm11520_vm13, %v5563_v26 }
 0x3d3   :  { %4885 = vmatmul.msk.f32.gmra.mxu2 %vm11521_vm5, %v5564_v0  ;;  %4894 = vmatmul.msk.f32.gmra.mxu3 %vm11522_vm2, %v5564_v0 }
 0x3db   :  { %4886 = vmatmul.msk.f32.gmra.mxu2 %vm11523_vm12, %v5565_v6  ;;  %4895 = vmatmul.msk.f32.gmra.mxu3 %vm11508_vm0, %v5565_v6 }
 0x3e3   :  { %4887 = vmatmul.msk.f32.gmra.mxu2 %vm11524_vm14, %v5566_v49  ;;  %4896 = vmatmul.msk.f32.gmra.mxu3 %vm11525_vm8, %v5566_v49 }
 0x3eb   :  { %4888 = vmatmul.msk.f32.gmra.mxu2 %vm11526_vm4, %v5567_v19  ;;  %4897 = vmatmul.msk.f32.gmra.mxu3 %vm11527_vm3, %v5567_v19 }
 0x403   :  { %v2432_v15 = vpop.f32.mrf.mxu0 }
 0x404   :  { %v2473_v60 = vpop.f32.mrf.mxu1  ;;  %v8266_v2 = vadd.f32 %v2432_v15, %v8263_v10 }
 0x405   :  { %v8269_v21 = vadd.f32 %v2473_v60, %v8263_v10 }
 0x406   :  { %v4898_v53 = vmul.f32 -1.442695, %v8266_v2 }
 0x407   :  { %v4899_v22 = vmul.f32 -1.442695, %v8269_v21 }
 0x408   :  { %5295 = vpow2.f32 %v4898_v53 }
 0x409   :  { %5297 = vpow2.f32 %v4899_v22 }
 0x40b   :  { %v2435_v43 = vpop.f32.mrf.mxu0 }
 0x40c   :  { %v2476_v39 = vpop.f32.mrf.mxu1  ;;  %v8278_v37 = vadd.f32 %v2435_v43, %v8274_v14 }
 0x40d   :  { %v8282_v32 = vadd.f32 %v2476_v39, %v8274_v14 }
 0x40e   :  { %v4902_v30 = vmul.f32 -1.442695, %v8278_v37  ;;  %v5296_v38 = vpop.eup %5295 }
 0x40f   :  { %v5298_v7 = vpop.eup %5297  ;;  %v4903_v4 = vmul.f32 -1.442695, %v8282_v32  ;;  %v8290_v63 = vadd.f32 1.0, %v5296_v38 }
 0x410   :  { %5299 = vpow2.f32 %v4902_v30  ;;  %v8292_v31 = vadd.f32 1.0, %v5298_v7 }
 0x411   :  { %5301 = vpow2.f32 %v4903_v4  ;;  %v2716_v19 = vand.u32 2147483647, %v8290_v63  ;;  %v2718_v15 = vand.u32 2147483648, %v8290_v63  ;;  %vm2712_vm15 = vweird.f32 %v8290_v63 }
 0x412   :  { %5303 = vrcp.f32 %v8290_v63  ;;  %vm2727_vm11 = vweird.f32 %v8292_v31  ;;  %v2731_v7 = vand.u32 2147483647, %v8292_v31 }
 0x413   :  { %v2438_v33 = vpop.f32.mrf.mxu0  ;;  %5305 = vrcp.f32 %v8292_v31  ;;  %vm8343_vm10 = vcmp.eq.f32.partialorder %v2716_v19, 8.507059e+37 }
 0x414   :  { %v2479_v13 = vpop.f32.mrf.mxu1  ;;  %v8288_v12 = vadd.f32 %v2438_v33, %v8284_v17  ;;  %v2733_v33 = vand.u32 2147483648, %v8292_v31  ;;  %vm8362_vm9 = vcmp.eq.f32.partialorder %v2731_v7, 8.507059e+37 }
 0x415   :  { %v8297_v1 = vadd.f32 %v2479_v13, %v8284_v17 }
 0x416   :  { %v4906_v46 = vmul.f32 -1.442695, %v8288_v12  ;;  %v5300_v45 = vpop.eup %5299 }
 0x417   :  { %v8303_v58 = vadd.f32 1.0, %v5300_v45  ;;  %v4907_v29 = vmul.f32 -1.442695, %v8297_v1  ;;  %v5302_v48 = vpop.eup %5301 }
 0x418   :  { %5307 = vpow2.f32 %v4906_v46  ;;  %v8310_v42 = vpop.eup %5303  ;;  %v8315_v25 = vadd.f32 1.0, %v5302_v48 }
 0x419   :  { %5309 = vrcp.f32 %v8303_v58  ;;  %v8313_v28 = vpop.eup %5305  ;;  %v2708_v20 = vmul.f32 %v8310_v42, %v8290_v63  ;;  %vm2713_vm6 = vweird.f32 %v8310_v42  ;;  %vm2772_vm13 = vweird.f32 %v8303_v58 }
 0x41a   :  { %5311 = vpow2.f32 %v4907_v29  ;;  %v2723_v50 = vmul.f32 %v8313_v28, %v8292_v31  ;;  %vm2728_vm7 = vweird.f32 %v8313_v28  ;;  %vm8375_vm1 = vmor %vm2712_vm15, %vm2713_vm6  ;;  %vm2787_vm5 = vweird.f32 %v8315_v25 }
 0x41b   :  { %v2441_v57 = vpop.f32.mrf.mxu0  ;;  %v2709_v11 = vsub.f32 1.0, %v2708_v20  ;;  %vm8412_vm2 = vmor %vm2727_vm11, %vm2728_vm7 }
 0x41c   :  { %v8300_v55 = vadd.f32 %v2441_v57, %v8259_v51  ;;  %v2482_v9 = vpop.f32.mrf.mxu1  ;;  %v2724_v60 = vsub.f32 1.0, %v2723_v50  ;;  %v2719_v57 = vor.u32 1.1754944e-38, %v2718_v15 }
 0x41d   :  { %v8308_v47 = vadd.f32 %v2482_v9, %v8259_v51  ;;  %v2710_v43 = vmul.f32 %v8310_v42, %v2709_v11 }
 0x41e   :  { %v4910_v52 = vmul.f32 -1.442695, %v8300_v55  ;;  %v5308_v16 = vpop.eup %5307  ;;  %v2725_v46 = vmul.f32 %v8313_v28, %v2724_v60 }
 0x41f   :  { %v4911_v34 = vmul.f32 -1.442695, %v8308_v47  ;;  %v8323_v26 = vadd.f32 1.0, %v5308_v16  ;;  %v8325_v0 = vpop.eup %5309  ;;  %v2711_v9 = vadd.f32 %v8310_v42, %v2710_v43  ;;  %v2734_v16 = vor.u32 1.1754944e-38, %v2733_v33 }
 0x420   :  { %5313 = vpow2.f32 %v4910_v52  ;;  %v5312_v6 = vpop.eup %5311  ;;  %v2768_v30 = vmul.f32 %v8325_v0, %v8303_v58  ;;  %v2726_v60 = vadd.f32 %v8313_v28, %v2725_v46  ;;  %v2793_v43 = vand.u32 2147483648, %v8315_v25 }
 0x421   :  { %5315 = vrcp.f32 %v8315_v25  ;;  %v8331_v39 = vadd.f32 1.0, %v5312_v6  ;;  %v2778_v6 = vand.u32 2147483648, %v8303_v58  ;;  %vm2773_vm0 = vweird.f32 %v8325_v0 }
 0x422   :  { %5317 = vpow2.f32 %v4911_v34  ;;  %v2769_v20 = vsub.f32 1.0, %v2768_v30  ;;  %v2794_v35 = vor.u32 1.1754944e-38, %v2793_v43  ;;  %v2730_v4 = vsel %vm8412_vm2, %v8313_v28, %v2726_v60  ;;  %vm8449_vm3 = vmor %vm2772_vm13, %vm2773_vm0 }
 0x423   :  { %v2444_v36 = vpop.f32.mrf.mxu0  ;;  %5319 = vrcp.f32 %v8323_v26  ;;  %v2779_v15 = vor.u32 1.1754944e-38, %v2778_v6  ;;  %vm2832_vm8 = vweird.f32 %v8323_v26  ;;  %v2853_v5 = vand.u32 2147483648, %v8331_v39 }
 0x424   :  { %v8349_v45 = vadd.f32 %v2444_v36, %v8261_v62  ;;  %5321 = vrcp.f32 %v8331_v39  ;;  %v2485_v50 = vpop.f32.mrf.mxu1  ;;  %v2776_v36 = vand.u32 2147483647, %v8303_v58  ;;  %v2770_v46 = vmul.f32 %v8325_v0, %v2769_v20 }
 0x425   :  { %v8391_v7 = vadd.f32 %v2485_v50, %v8261_v62  ;;  %vm2847_vm6 = vweird.f32 %v8331_v39 }
 0x426   :  { %v5314_v49 = vpop.eup %5313  ;;  %v4914_v30 = vmul.f32 -1.442695, %v8349_v45  ;;  %vm8416_vm12 = vcmp.eq.f32.partialorder %v2776_v36, 8.507059e+37  ;;  %v2771_v44 = vadd.f32 %v8325_v0, %v2770_v46 }
 0x427   :  { %v8333_v22 = vpop.eup %5315  ;;  %v8338_v13 = vadd.f32 1.0, %v5314_v49  ;;  %v4915_v31 = vmul.f32 -1.442695, %v8391_v7 }
 0x428   :  { %v5318_v38 = vpop.eup %5317  ;;  %v2783_v29 = vmul.f32 %v8333_v22, %v8315_v25  ;;  %vm2788_vm4 = vweird.f32 %v8333_v22  ;;  %v2775_v11 = vsel %vm8449_vm3, %v8325_v0, %v2771_v44 }
 0x429   :  { %v8356_v52 = vpop.eup %5319  ;;  %5323 = vrcp.f32 %v8338_v13  ;;  %v8359_v34 = vadd.f32 1.0, %v5318_v38  ;;  %vm8475_vm15 = vmor %vm2787_vm5, %vm2788_vm4  ;;  %vm2892_vm5 = vweird.f32 %v8338_v13 }
 0x42a   :  { %v2784_v38 = vsub.f32 1.0, %v2783_v29  ;;  %v2828_v63 = vmul.f32 %v8356_v52, %v8323_v26  ;;  %vm2833_vm11 = vweird.f32 %v8356_v52 }
 0x42b   :  { %v2447_v19 = vpop.f32.mrf.mxu0  ;;  %5325 = vrcp.f32 %v8359_v34  ;;  %vm8509_vm7 = vmor %vm2832_vm8, %vm2833_vm11  ;;  %vm2907_vm8 = vweird.f32 %v8359_v34 }
 0x42c   :  { %5327 = vpow2.f32 %v4914_v30 }
 0x436   :  { %v2514_v53 = vpop.f32.mrf.mxu2  ;;  %v2555_v48 = vpop.f32.mrf.mxu3 }
 0x437   :  { %v8369_v49 = vadd.f32 %v2514_v53, %v8263_v10  ;;  %v8382_v33 = vadd.f32 %v2555_v48, %v8263_v10  ;;  %v2715_v53 = vsel %vm8375_vm1, %v8310_v42, %v2711_v9  ;;  %v8397_v10 = vadd.f32 %v2447_v19, %v8272_v27  ;;  %v8399_v48 = vpop.eup %5321 }
 0x438   :  { %v2791_v42 = vand.u32 2147483647, %v8315_v25  ;;  %v8404_v50 = vpop.eup %5323  ;;  %v2720_v20 = vsel %vm8343_vm10, %v2719_v57, %v2715_v53  ;;  %v2785_v57 = vmul.f32 %v8333_v22, %v2784_v38  ;;  %v2829_v53 = vsub.f32 1.0, %v2828_v63  ;;  %v2488_v63 = vpop.f32.mrf.mxu1 }
 0x439   :  { %11534 = vst [vmem:[#allocation22_spill] sm:$0xff] %v8382_v33  ;;  %v4900_v9 = vmul.f32 -1.442695, %v8369_v49  ;;  %v4901_v41 = vmul.f32 -1.442695, %v8382_v33  ;;  %v2843_v36 = vmul.f32 %v8399_v48, %v8331_v39  ;;  %v8432_v30 = vmul.f32 %v2720_v20, %v8266_v2  ;;  %v8441_v60 = vpop.eup %5325 }
 0x43a   :  { %v4918_v43 = vmul.f32 -1.442695, %v8397_v10  ;;  %vm8434_vm14 = vcmp.eq.f32.partialorder %v2791_v42, 8.507059e+37  ;;  %v2888_v28 = vmul.f32 %v8404_v50, %v8338_v13  ;;  %v2735_v38 = vsel %vm8362_vm9, %v2734_v16, %v2730_v4  ;;  %v5328_v16 = vpop.eup %5327 }
 0x43b   :  { %11539 = vst [vmem:[#allocation33_spill] sm:$0xff] %v8432_v30  ;;  %5329 = vpow2.f32 %v4900_v9  ;;  %v2836_v2 = vand.u32 2147483647, %v8323_v26  ;;  %v2786_v42 = vadd.f32 %v8333_v22, %v2785_v57  ;;  %v2830_v9 = vmul.f32 %v8356_v52, %v2829_v53 }
 0x43c   :  { %5331 = vpow2.f32 %v4901_v41  ;;  %v2838_v20 = vand.u32 2147483648, %v8323_v26  ;;  %v2844_v41 = vsub.f32 1.0, %v2843_v36  ;;  %v2889_v40 = vsub.f32 1.0, %v2888_v28 }
 0x43d   :  { %5333 = vpow2.f32 %v4915_v31  ;;  %v2903_v57 = vmul.f32 %v8441_v60, %v8359_v34  ;;  %v8466_v53 = vadd.f32 %v2488_v63, %v8272_v27  ;;  %v8469_v31 = vmul.f32 %v2735_v38, %v8269_v21 }
 0x43e   :  { %v2517_v29 = vpop.f32.mrf.mxu2  ;;  %v2558_v58 = vpop.f32.mrf.mxu3  ;;  %5335 = vpow2.f32 %v4918_v43  ;;  %vm8480_vm10 = vcmp.eq.f32.partialorder %v2836_v2, 8.507059e+37  ;;  %v2780_v21 = vsel %vm8416_vm12, %v2779_v15, %v2775_v11  ;;  %v2790_v25 = vsel %vm8475_vm15, %v8333_v22, %v2786_v42 }
 0x43f   :  { %v8460_v4 = vadd.f32 %v2517_v29, %v8274_v14  ;;  %11545 = vst [vmem:[#allocation31_spill] sm:$0xff] %v8469_v31  ;;  %v2851_v29 = vand.u32 2147483647, %v8331_v39  ;;  %v2831_v43 = vadd.f32 %v8356_v52, %v2830_v9  ;;  %v8491_v28 = vadd.f32 1.0, %v5328_v16  ;;  %v2450_v2 = vpop.f32.mrf.mxu0 }
 0x440   :  { %v2839_v46 = vor.u32 1.1754944e-38, %v2838_v20  ;;  %v2845_v56 = vmul.f32 %v8399_v48, %v2844_v41  ;;  %v2854_v11 = vor.u32 1.1754944e-38, %v2853_v5  ;;  %v2890_v44 = vmul.f32 %v8404_v50, %v2889_v40 }
 0x441   :  { %11544 = vst [vmem:[#allocation55_spill] sm:$0xff] %v8460_v4  ;;  %v5330_v36 = vpop.eup %5329  ;;  %v4904_v6 = vmul.f32 -1.442695, %v8460_v4  ;;  %v2904_v22 = vsub.f32 1.0, %v2903_v57  ;;  %v4919_v42 = vmul.f32 -1.442695, %v8466_v53  ;;  %v8501_v16 = vmul.f32 %v2780_v21, %v8278_v37 }
 0x442   :  { %v5332_v63 = vpop.eup %5331  ;;  %v2795_v20 = vsel %vm8434_vm14, %v2794_v35, %v2790_v25  ;;  %vm8513_vm9 = vcmp.eq.f32.partialorder %v2851_v29, 8.507059e+37  ;;  %v8517_v40 = vadd.f32 1.0, %v5330_v36  ;;  %v8520_v37 = vadd.f32 %v2450_v2, %v8255_v59  ;;  %v2491_v29 = vpop.f32.mrf.mxu1 }
 0x443   :  { %v5334_v15 = vpop.eup %5333  ;;  %v2835_v35 = vsel %vm8509_vm7, %v8356_v52, %v2831_v43  ;;  %vm2848_vm1 = vweird.f32 %v8399_v48  ;;  %v8526_v26 = vadd.f32 1.0, %v5332_v63  ;;  %5337 = vrcp.f32 %v8491_v28 }
 0x444   :  { %v5336_v9 = vpop.eup %5335  ;;  %v2846_v19 = vadd.f32 %v8399_v48, %v2845_v56  ;;  %vm2893_vm13 = vweird.f32 %v8404_v50  ;;  %v8531_v57 = vadd.f32 1.0, %v5334_v15  ;;  %5339 = vpow2.f32 %v4904_v6  ;;  %vm8549_vm2 = vmor %vm2847_vm6, %vm2848_vm1 }
 0x445   :  { %11554 = vst [vmem:[#allocation18_spill] sm:$0xff] %v8526_v26  ;;  %v2891_v36 = vadd.f32 %v8404_v50, %v2890_v44  ;;  %v2905_v21 = vmul.f32 %v8441_v60, %v2904_v22  ;;  %v8535_v25 = vadd.f32 1.0, %v5336_v9  ;;  %5341 = vpow2.f32 %v4919_v42  ;;  %vm8563_vm12 = vmor %vm2892_vm5, %vm2893_vm13 }
 0x446   :  { %v8493_v38 = vpop.f32.mrf.mxu2  ;;  %v2898_v52 = vand.u32 2147483648, %v8338_v13  ;;  %5343 = vrcp.f32 %v8517_v40  ;;  %v8540_v56 = vpop.f32.mrf.mxu3  ;;  %v4922_v43 = vmul.f32 -1.442695, %v8520_v37  ;;  %v2840_v2 = vsel %vm8480_vm10, %v2839_v46, %v2835_v35 }
 0x447   :  { %v2896_v6 = vand.u32 2147483647, %v8338_v13  ;;  %5345 = vrcp.f32 %v8526_v26  ;;  %v8556_v15 = vadd.f32 %v2491_v29, %v8255_v59  ;;  %v2850_v0 = vsel %vm8549_vm2, %v8399_v48, %v2846_v19 }
 0x448   :  { %v2911_v39 = vand.u32 2147483647, %v8359_v34  ;;  %5347 = vrcp.f32 %v8531_v57  ;;  %v8570_v13 = vadd.f32 %v2558_v58, %v8274_v14  ;;  %v2895_v22 = vsel %vm8563_vm12, %v8404_v50, %v2891_v36 }
 0x449   :  { %v8572_v44 = vpop.eup %5337  ;;  %v2906_v48 = vadd.f32 %v8441_v60, %v2905_v21  ;;  %vm2908_vm0 = vweird.f32 %v8441_v60  ;;  %5349 = vrcp.f32 %v8535_v25  ;;  %v8583_v41 = vmul.f32 %v2795_v20, %v8282_v32 }
 0x44a   :  { %11559 = vst [vmem:[#allocation61_spill] sm:$0xff] %v8570_v13  ;;  %v5340_v9 = vpop.eup %5339  ;;  %v2899_v14 = vor.u32 1.1754944e-38, %v2898_v52  ;;  %v2913_v58 = vand.u32 2147483648, %v8359_v34  ;;  %5351 = vpow2.f32 %v4922_v43  ;;  %v2855_v50 = vsel %vm8513_vm9, %v2854_v11, %v2850_v0  ;;  %vm8597_vm4 = vmor %vm2907_vm8, %vm2908_vm0 }
 0x44b   :  { %11560 = vst [vmem:[#allocation42_spill] sm:$0xff] %v8583_v41  ;;  %v5342_v35 = vpop.eup %5341  ;;  %vm2897_vm14 = vcmp.eq.f32.partialorder %v2896_v6, 8.507059e+37  ;;  %v4923_v19 = vmul.f32 -1.442695, %v8556_v15  ;;  %v8593_v36 = vmul.f32 %v2840_v2, %v8288_v12  ;;  %vm8601_vm3 = vcmp.eq.f32.partialorder %v2911_v39, 8.507059e+37  ;;  %v2453_v2 = vpop.f32.mrf.mxu0 }
 0x44c   :  { %v8590_v29 = vpop.eup %5343  ;;  %v2900_v32 = vsel %vm2897_vm14, %v2899_v14, %v2895_v22  ;;  %v4905_v34 = vmul.f32 -1.442695, %v8570_v13  ;;  %v2910_v12 = vsel %vm8597_vm4, %v8441_v60, %v2906_v48  ;;  %v2948_v21 = vmul.f32 %v8572_v44, %v8491_v28 }
 0x44d   :  { %v8606_v11 = vpop.eup %5345  ;;  %v8613_v52 = vadd.f32 1.0, %v5340_v9  ;;  %v8617_v43 = vadd.f32 %v8493_v38, %v8284_v17  ;;  %v8622_v6 = vmul.f32 %v2855_v50, %v8297_v1  ;;  %v2914_v0 = vor.u32 1.1754944e-38, %v2913_v58 }
 0x44e   :  { %v8580_v42 = vpop.f32.mrf.mxu2  ;;  %v8619_v63 = vpop.eup %5347  ;;  %v2748_v46 = vand.u32 2147483648, %v8517_v40  ;;  %v8625_v39 = vadd.f32 1.0, %v5342_v35  ;;  %v8630_v22 = vmul.f32 %v2900_v32, %v8300_v55  ;;  %v2746_v48 = vand.u32 2147483647, %v8517_v40 }
 0x44f   :  { %11565 = vst [vmem:[#allocation45_spill] sm:$0xff] %v8617_v43  ;;  %v8627_v60 = vpop.eup %5349  ;;  %v2958_v38 = vand.u32 2147483648, %v8491_v28  ;;  %5353 = vpow2.f32 %v4923_v19  ;;  %v2915_v1 = vsel %vm8601_vm3, %v2914_v0, %v2910_v12  ;;  %v2738_v14 = vmul.f32 %v8590_v29, %v8517_v40  ;;  %v2564_v58 = vpop.f32.mrf.mxu3 }
 0x450   :  { %11566 = vst [vmem:[#allocation60_spill] sm:$0xff] %v8622_v6  ;;  %v5352_v9 = vpop.eup %5351  ;;  %5355 = vpow2.f32 %v4905_v34  ;;  %v8639_v35 = vadd.f32 %v2453_v2, %v8257_v23  ;;  %v2949_v50 = vsub.f32 1.0, %v2948_v21  ;;  %v2963_v55 = vmul.f32 %v8619_v63, %v8531_v57 }
 0x451   :  { %5357 = vrcp.f32 %v8613_v52  ;;  %v4908_v19 = vmul.f32 -1.442695, %v8617_v43  ;;  %v8645_v32 = vor.u32 1.1754944e-38, %v2748_v46  ;;  %v2753_v20 = vmul.f32 %v8606_v11, %v8526_v26 }
 0x452   :  { %v3008_v5 = vmul.f32 %v8627_v60, %v8535_v25  ;;  %5359 = vrcp.f32 %v8625_v39  ;;  %vm2952_vm15 = vweird.f32 %v8491_v28  ;;  %v2956_v34 = vand.u32 2147483647, %v8491_v28 }
 0x453   :  { %v2973_v12 = vand.u32 2147483648, %v8531_v57  ;;  %v8657_v21 = vadd.f32 %v8540_v56, %v8284_v17  ;;  %v8659_v2 = vadd.f32 1.0, %v5352_v9  ;;  %v8664_v46 = vmul.f32 %v2915_v1, %v8308_v47  ;;  %v2494_v17 = vpop.f32.mrf.mxu1 }
 0x454   :  { %v2739_v8 = vsub.f32 1.0, %v2738_v14  ;;  %v8666_v18 = vor.u32 1.1754944e-38, %v2958_v38  ;;  %v4926_v61 = vmul.f32 -1.442695, %v8639_v35  ;;  %v2950_v54 = vmul.f32 %v8572_v44, %v2949_v50 }
 0x455   :  { %11567 = vst [vmem:[#allocation44_spill] sm:$0xff] %v8657_v21  ;;  %v5354_v24 = vpop.eup %5353  ;;  %vm2953_vm11 = vweird.f32 %v8572_v44  ;;  %v2964_v3 = vsub.f32 1.0, %v2963_v55  ;;  %5361 = vpow2.f32 %v4908_v19  ;;  %vm2742_vm10 = vweird.f32 %v8517_v40 }
 0x456   :  { %v8661_v0 = vpop.f32.mrf.mxu2  ;;  %v5356_v56 = vpop.eup %5355  ;;  %vm2743_vm6 = vweird.f32 %v8590_v29  ;;  %v2754_v47 = vsub.f32 1.0, %v2753_v20  ;;  %v3009_v9 = vsub.f32 1.0, %v3008_v5  ;;  %5363 = vrcp.f32 %v8659_v2  ;;  %vm8732_vm2 = vmor %vm2952_vm15, %vm2953_vm11 }
 0x457   :  { %v8674_v38 = vpop.eup %5357  ;;  %vm8676_vm7 = vcmp.eq.f32.partialorder %v2956_v34, 8.507059e+37  ;;  %vm2967_vm9 = vweird.f32 %v8531_v57  ;;  %v2971_v14 = vand.u32 2147483647, %v8531_v57  ;;  %v8682_v50 = vor.u32 1.1754944e-38, %v2973_v12  ;;  %vm8756_vm14 = vmor %vm2742_vm10, %vm2743_vm6 }
 0x458   :  { %v4909_v55 = vmul.f32 -1.442695, %v8657_v21  ;;  %v8687_v19 = vadd.f32 %v8580_v42, %v8259_v51  ;;  %v8689_v20 = vpop.eup %5359  ;;  %v2740_v5 = vmul.f32 %v8590_v29, %v2739_v8  ;;  %v8692_v34 = vadd.f32 1.0, %v5354_v24  ;;  %v8710_v24 = vpop.f32.mrf.mxu3 }
 0x459   :  { %5365 = vpow2.f32 %v4926_v61  ;;  %v8695_v33 = vadd.f32 %v2494_v17, %v8257_v23  ;;  %v2951_v13 = vadd.f32 %v8572_v44, %v2950_v54  ;;  %v2965_v12 = vmul.f32 %v8619_v63, %v2964_v3 }
 0x45a   :  { %11570 = vst [vmem:[#allocation17_spill] sm:$0xff] %v8687_v19  ;;  %vm3012_vm1 = vweird.f32 %v8535_v25  ;;  %v3016_v21 = vand.u32 2147483647, %v8535_v25  ;;  %v8702_v42 = vmul.f32 %v8606_v11, %v2754_v47  ;;  %v8704_v26 = vadd.f32 1.0, %v5356_v56 }
 0x45b   :  { %v3010_v8 = vmul.f32 %v8627_v60, %v3009_v9  ;;  %v8708_v61 = vadd.f32 %v2564_v58, %v8259_v51  ;;  %v5362_v17 = vpop.eup %5361  ;;  %vm8712_vm13 = vcmp.eq.f32.partialorder %v2746_v48, 8.507059e+37  ;;  %vm8716_vm5 = vcmp.eq.f32.partialorder %v2971_v14, 8.507059e+37 }
 0x45c   :  { %11571 = vst [vmem:[#allocation53_spill] sm:$0xff] %v8704_v26  ;;  %v2798_v56 = vmul.f32 %v8674_v38, %v8613_v52  ;;  %v3023_v47 = vmul.f32 %v8689_v20, %v8625_v39  ;;  %5367 = vpow2.f32 %v4909_v55  ;;  %v4912_v51 = vmul.f32 -1.442695, %v8687_v19  ;;  %v8725_v58 = vpop.eup %5363 }
 0x45d   :  { %11572 = vst [vmem:[#allocation34_spill] sm:$0xff] %v8708_v61  ;;  %v2741_v48 = vadd.f32 %v8590_v29, %v2740_v5  ;;  %v3018_v14 = vand.u32 2147483648, %v8535_v25  ;;  %5369 = vrcp.f32 %v8692_v34  ;;  %v4927_v55 = vmul.f32 -1.442695, %v8695_v33 }
 0x45e   :  { %v2955_v43 = vsel %vm8732_vm2, %v8572_v44, %v2951_v13  ;;  %v2966_v5 = vadd.f32 %v8619_v63, %v2965_v12  ;;  %vm2968_vm12 = vweird.f32 %v8619_v63  ;;  %vm3013_vm0 = vweird.f32 %v8627_v60  ;;  %v8745_v28 = vpop.f32.mrf.mxu2 }
 0x45f   :  { %v5366_v19 = vpop.eup %5365  ;;  %5371 = vrcp.f32 %v8704_v26  ;;  %v3011_v31 = vadd.f32 %v8627_v60, %v3010_v8  ;;  %v3068_v41 = vmul.f32 %v8725_v58, %v8659_v2  ;;  %v4913_v6 = vmul.f32 -1.442695, %v8708_v61  ;;  %vm8772_vm8 = vmor %vm2967_vm9, %vm2968_vm12 }
 0x460   :  { %v2799_v44 = vsub.f32 1.0, %v2798_v56  ;;  %v3024_v12 = vsub.f32 1.0, %v3023_v47  ;;  %v8760_v9 = vadd.f32 1.0, %v5362_v17  ;;  %5373 = vpow2.f32 %v4912_v51  ;;  %vm8788_vm3 = vmor %vm3012_vm1, %vm3013_vm0 }
 0x461   :  { %v2745_v8 = vsel %vm8756_vm14, %v8590_v29, %v2741_v48  ;;  %v2960_v61 = vsel %vm8676_vm7, %v8666_v18, %v2955_v43  ;;  %vm8776_vm4 = vcmp.eq.f32.partialorder %v3016_v21, 8.507059e+37  ;;  %5375 = vpow2.f32 %v4927_v55 }
 0x462   :  { %v5368_v56 = vpop.eup %5367  ;;  %v2970_v29 = vsel %vm8772_vm8, %v8619_v63, %v2966_v5  ;;  %v3019_v43 = vor.u32 1.1754944e-38, %v3018_v14  ;;  %v8792_v21 = vadd.f32 1.0, %v5366_v19  ;;  %v3015_v47 = vsel %vm8788_vm3, %v8627_v60, %v3011_v31 }
 0x463   :  { %v8794_v1 = vpop.eup %5369  ;;  %v3069_v63 = vsub.f32 1.0, %v3068_v41  ;;  %5377 = vpow2.f32 %v4913_v6  ;;  %v8801_v51 = vadd.f32 %v8661_v0, %v8261_v62  ;;  %v2800_v25 = vmul.f32 %v8674_v38, %v2799_v44  ;;  %v8823_v0 = vpop.f32.mrf.mxu3 }
 0x464   :  { %v3025_v48 = vmul.f32 %v8689_v20, %v3024_v12  ;;  %v3033_v14 = vand.u32 2147483648, %v8625_v39  ;;  %5379 = vrcp.f32 %v8760_v9  ;;  %v8812_v31 = vsel %vm8712_vm13, %v8645_v32, %v2745_v8 }
 0x465   :  { %11587 = vst [vmem:[#allocation27_spill] sm:$0xff] %v8801_v51  ;;  %v8807_v19 = vpop.eup %5371  ;;  %v8815_v41 = vmul.f32 %v2960_v61, %v8349_v45  ;;  %v8820_v6 = vsel %vm8716_vm5, %v8682_v50, %v2970_v29  ;;  %v3020_v5 = vsel %vm8776_vm4, %v3019_v43, %v3015_v47  ;;  %v8827_v13 = vadd.f32 1.0, %v5368_v56 }
 0x466   :  { %v5374_v55 = vpop.eup %5373  ;;  %v3083_v32 = vmul.f32 %v8794_v1, %v8692_v34  ;;  %5381 = vrcp.f32 %v8792_v21  ;;  %vm3027_vm15 = vweird.f32 %v8625_v39  ;;  %v3070_v61 = vmul.f32 %v8725_v58, %v3069_v63  ;;  %v2532_v8 = vpop.f32.mrf.mxu2 }
 0x467   :  { %v5376_v45 = vpop.eup %5375  ;;  %v4916_v54 = vmul.f32 -1.442695, %v8801_v51  ;;  %v8837_v3 = vadd.f32 %v8674_v38, %v2800_v25  ;;  %v8840_v44 = vadd.f32 %v8689_v20, %v3025_v48  ;;  %vm3028_vm11 = vweird.f32 %v8689_v20 }
 0x468   :  { %v8843_v12 = vor.u32 1.1754944e-38, %v3033_v14  ;;  %v8847_v17 = vmul.f32 %v8807_v19, %v8704_v26  ;;  %v8850_v56 = vmul.f32 %v3020_v5, %v8397_v10  ;;  %v3076_v29 = vand.u32 2147483647, %v8659_v2  ;;  %vm8863_vm10 = vmor %vm3027_vm15, %vm3028_vm11 }
 0x469   :  { %v5378_v40 = vpop.eup %5377  ;;  %v3078_v57 = vand.u32 2147483648, %v8659_v2  ;;  %5383 = vrcp.f32 %v8827_v13  ;;  %v3084_v47 = vsub.f32 1.0, %v3083_v32  ;;  %v8857_v63 = vadd.f32 1.0, %v5374_v55 }
 0x46a   :  { %v8854_v43 = vpop.eup %5379  ;;  %v8859_v25 = vadd.f32 1.0, %v5376_v45  ;;  %v3071_v10 = vadd.f32 %v8725_v58, %v3070_v61  ;;  %vm3073_vm6 = vweird.f32 %v8725_v58  ;;  %5385 = vpow2.f32 %v4916_v54 }
 0x46b   :  { %v8871_v14 = vadd.f32 %v8745_v28, %v8272_v27  ;;  %vm3072_vm7 = vweird.f32 %v8659_v2  ;;  %v8878_v32 = vadd.f32 1.0, %v5378_v40  ;;  %v8883_v45 = vmul.f32 %v8854_v43, %v8760_v9 }
 0x46c   :  { %v5382_v5 = vpop.eup %5381  ;;  %5387 = vrcp.f32 %v8859_v25  ;;  %vm8885_vm9 = vcmp.eq.f32.partialorder %v3076_v29, 8.507059e+37  ;;  %v3079_v28 = vor.u32 1.1754944e-38, %v3078_v57  ;;  %vm8890_vm1 = vmor %vm3072_vm7, %vm3073_vm6  ;;  %v3085_v2 = vmul.f32 %v8794_v1, %v3084_v47  ;;  %v2573_v47 = vpop.f32.mrf.mxu3 }
 0x46d   :  { %11590 = vst [vmem:[#allocation29_spill] sm:$0xff] %v8871_v14  ;;  %v3128_v54 = vmul.f32 %v5382_v5, %v8792_v21  ;;  %vm3087_vm13 = vweird.f32 %v8692_v34  ;;  %v3093_v55 = vand.u32 2147483648, %v8692_v34  ;;  %v4920_v29 = vmul.f32 -1.442695, %v8871_v14 }
 0x46e   :  { %v3075_v57 = vsel %vm8890_vm1, %v8725_v58, %v3071_v10  ;;  %5389 = vrcp.f32 %v8857_v63  ;;  %v8905_v50 = vadd.f32 %v8710_v24, %v8261_v62  ;;  %vm2803_vm5 = vweird.f32 %v8674_v38 }
 0x46f   :  { %v3129_v60 = vsub.f32 1.0, %v3128_v54  ;;  %v8907_v26 = vpop.eup %5383  ;;  %5391 = vrcp.f32 %v8878_v32  ;;  %v3136_v40 = vand.u32 2147483647, %v8792_v21  ;;  %v3138_v51 = vand.u32 2147483648, %v8792_v21 }
 0x470   :  { %11595 = vst [vmem:[#allocation56_spill] sm:$0xff] %v8905_v50  ;;  %v8914_v58 = vadd.f32 %v2532_v8, %v8255_v59  ;;  %v5386_v18 = vpop.eup %5385  ;;  %vm3088_vm2 = vweird.f32 %v8794_v1  ;;  %vm3133_vm12 = vweird.f32 %v5382_v5  ;;  %5393 = vpow2.f32 %v4920_v29  ;;  %v2535_v8 = vpop.f32.mrf.mxu2 }
 0x471   :  { %v3130_v10 = vmul.f32 %v5382_v5, %v3129_v60  ;;  %vm2802_vm0 = vweird.f32 %v8613_v52  ;;  %v3080_v24 = vsel %vm8885_vm9, %v3079_v28, %v3075_v57  ;;  %v3086_v54 = vadd.f32 %v8794_v1, %v3085_v2  ;;  %vm8954_vm15 = vmor %vm3087_vm13, %vm3088_vm2 }
 0x472   :  { %v5388_v62 = vpop.eup %5387  ;;  %v4924_v14 = vmul.f32 -1.442695, %v8914_v58  ;;  %v8923_v4 = vadd.f32 %v2573_v47, %v8255_v59  ;;  %vm3132_vm14 = vweird.f32 %v8792_v21  ;;  %v8929_v29 = vadd.f32 %v8823_v0, %v8272_v27  ;;  %vm8975_vm9 = vmor %vm2802_vm0, %vm2803_vm5 }
 0x473   :  { %v3131_v30 = vadd.f32 %v5382_v5, %v3130_v10  ;;  %v3143_v60 = vmul.f32 %v5388_v62, %v8859_v25  ;;  %vm3134_vm8 = vmor %vm3132_vm14, %vm3133_vm12  ;;  %vm3137_vm4 = vcmp.eq.f32.partialorder %v3136_v40, 8.507059e+37  ;;  %v3139_v61 = vor.u32 1.1754944e-38, %v3138_v51 }
 0x474   :  { %v8931_v28 = vadd.f32 1.0, %v5386_v18  ;;  %v4917_v2 = vmul.f32 -1.442695, %v8905_v50  ;;  %v8934_v57 = vpop.eup %5389  ;;  %v11596_v59 = vand.u32 2147483647, %v8625_v39  ;;  %5395 = vpow2.f32 %v4924_v14 }
 0x475   :  { %v3135_v21 = vsel %vm3134_vm8, %v5382_v5, %v3131_v30  ;;  %v3144_v10 = vsub.f32 1.0, %v3143_v60  ;;  %v8943_v27 = vadd.f32 %v2535_v8, %v8257_v23  ;;  %v8945_v0 = vpop.eup %5391  ;;  %v3151_v40 = vand.u32 2147483647, %v8859_v25 }
 0x476   :  { %vm8938_vm3 = vcmp.eq.f32.partialorder %v11596_v59, 8.507059e+37  ;;  %v3140_v51 = vsel %vm3137_vm4, %v3139_v61, %v3135_v21  ;;  %v3153_v18 = vand.u32 2147483648, %v8859_v25  ;;  %v4925_v50 = vmul.f32 -1.442695, %v8923_v4  ;;  %v5394_v39 = vpop.eup %5393 }
 0x477   :  { %v3215_v14 = vmul.f32 %v3140_v51, %v8639_v35  ;;  %v3145_v5 = vmul.f32 %v5388_v62, %v3144_v10  ;;  %vm3148_vm11 = vweird.f32 %v5388_v62  ;;  %v4921_v8 = vmul.f32 -1.442695, %v8929_v29 }
 0x478   :  { %v3211_v60 = vmul.f32 %v3080_v24, %v8520_v37  ;;  %v3090_v61 = vsel %vm8954_vm15, %v8794_v1, %v3086_v54  ;;  %v2918_v59 = vmul.f32 %v8934_v57, %v8857_v63  ;;  %5397 = vpow2.f32 %v4917_v2 }
 0x479   :  { %v3146_v21 = vadd.f32 %v5388_v62, %v3145_v5  ;;  %vm3147_vm6 = vweird.f32 %v8859_v25  ;;  %5399 = vrcp.f32 %v8931_v28  ;;  %v4928_v35 = vmul.f32 -1.442695, %v8943_v27  ;;  %3227 = vmatpush.msrb.mxu0 %v3215_v14 }
 0x47a   :  { %v3094_v10 = vor.u32 1.1754944e-38, %v3093_v55  ;;  %vm3149_vm7 = vmor %vm3147_vm6, %vm3148_vm11  ;;  %v3154_v51 = vor.u32 1.1754944e-38, %v3153_v18  ;;  %v8969_v37 = vadd.f32 1.0, %v5394_v39  ;;  %5401 = vpow2.f32 %v4925_v50  ;;  %v5396_v24 = vpop.eup %5395 }
 0x47b   :  { %v11603_v25 = vand.u32 2147483647, %v8692_v34  ;;  %v3150_v54 = vsel %vm3149_vm7, %v5388_v62, %v3146_v21  ;;  %vm3152_vm13 = vcmp.eq.f32.partialorder %v3151_v40, 8.507059e+37  ;;  %5403 = vpow2.f32 %v4921_v8  ;;  %3228 = vmatpush.msrb.mxu0 %v3211_v60 }
 0x47c   :  { %v2805_v50 = vsel %vm8975_vm9, %v8674_v38, %v8837_v3  ;;  %v2919_v2 = vsub.f32 1.0, %v2918_v59  ;;  %v3155_v18 = vsel %vm3152_vm13, %v3154_v51, %v3150_v54  ;;  %v2814_v39 = vsub.f32 1.0, %v8847_v17 }
 0x47d   :  { %vm3092_vm1 = vcmp.eq.f32.partialorder %v11603_v25, 8.507059e+37  ;;  %v3216_v30 = vmul.f32 %v3155_v18, %v8695_v33  ;;  %v8987_v14 = vadd.f32 1.0, %v5396_v24  ;;  %5405 = vpow2.f32 %v4928_v35  ;;  %3229 = vmatpush.msrb.mxu0 %v8850_v56 }
 0x47e   :  { %v3095_v55 = vsel %vm3092_vm1, %v3094_v10, %v3090_v61  ;;  %v5398_v34 = vpop.eup %5397  ;;  %v11604_v62 = vand.u32 2147483648, %v8613_v52  ;;  %v11605_v38 = vsel %vm8863_vm10, %v8689_v20, %v8840_v44  ;;  %v2859_v33 = vsub.f32 1.0, %v8883_v45 }
 0x47f   :  { %v3035_v3 = vsel %vm8938_vm3, %v8843_v12, %v11605_v38  ;;  %5407 = vrcp.f32 %v8969_v37  ;;  %v9002_v17 = vpop.eup %5399  ;;  %v9006_v56 = vmul.f32 %v8812_v31, %v8369_v49  ;;  %v9010_v48 = vadd.f32 %v8606_v11, %v8702_v42  ;;  %v2576_v12 = vpop.f32.mrf.mxu3  ;;  %3247 = vmatpush.msrb.mxu1 %v3216_v30  ;;  %3230 = vmatpush.msrb.mxu0 %v8815_v41  ;;  %v9079_v30 = vld [vmem:[%s10861_s3] sm:$0xff] }
 0x480   :  { %v2809_v40 = vor.u32 1.1754944e-38, %v11604_v62  ;;  %v11606_v20 = vand.u32 2147483647, %v8613_v52  ;;  %v3212_v44 = vmul.f32 %v3095_v55, %v8556_v15  ;;  %v5402_v45 = vpop.eup %5401  ;;  %v3204_v47 = vmul.f32 %v8820_v6, %v8391_v7  ;;  %v11614_v38 = vld [vmem:[#allocation60_spill] sm:$0xff] }
 0x481   :  { %v2920_v49 = vmul.f32 %v8934_v57, %v2919_v2  ;;  %5409 = vrcp.f32 %v8987_v14  ;;  %v5404_v42 = vpop.eup %5403  ;;  %v2815_v31 = vmul.f32 %v8807_v19, %v2814_v39  ;;  %v3208_v52 = vmul.f32 %v3035_v3, %v8466_v53  ;;  %3231 = vmatpush.msrb.mxu0 %v8630_v22 }
 0x482   :  { %vm2807_vm10 = vcmp.eq.f32.partialorder %v11606_v20, 8.507059e+37  ;;  %v2933_v15 = vmul.f32 %v8945_v0, %v8878_v32  ;;  %3248 = vmatpush.msrb.mxu1 %v3212_v44  ;;  %v2860_v41 = vmul.f32 %v8854_v43, %v2859_v33  ;;  %vm2862_vm5 = vweird.f32 %v8760_v9 }
 0x483   :  { %v2810_v5 = vsel %vm2807_vm10, %v2809_v40, %v2805_v50  ;;  %v9027_v7 = vadd.f32 1.0, %v5398_v34  ;;  %v9030_v6 = vadd.f32 %v2576_v12, %v8257_v23  ;;  %v5406_v8 = vpop.eup %5405  ;;  %vm2863_vm2 = vweird.f32 %v8854_v43  ;;  %3232 = vmatpush.msrb.mxu0 %v8593_v36  ;;  %v11611_v34 = vld [vmem:[#allocation55_spill] sm:$0xff] }
 0x484   :  { %v2866_v53 = vand.u32 2147483647, %v8760_v9  ;;  %v2873_v60 = vmul.f32 %v8907_v26, %v8827_v13  ;;  %v9036_v61 = vadd.f32 1.0, %v5402_v45  ;;  %3249 = vmatpush.msrb.mxu1 %v3208_v52  ;;  %v2921_v59 = vadd.f32 %v8934_v57, %v2920_v49  ;;  %vm9090_vm4 = vmor %vm2862_vm5, %vm2863_vm2  ;;  %v11615_v45 = vld [vmem:[#allocation42_spill] sm:$0xff] }
 0x485   :  { %v9039_v22 = vpop.eup %5407  ;;  %vm2923_vm12 = vweird.f32 %v8934_v57  ;;  %v2978_v23 = vmul.f32 %v9002_v17, %v8931_v28  ;;  %v9045_v21 = vadd.f32 1.0, %v5404_v42  ;;  %vm2922_vm0 = vweird.f32 %v8857_v63  ;;  %3233 = vmatpush.msrb.mxu0 %v8501_v16 }
 0x486   :  { %v2928_v35 = vand.u32 2147483648, %v8857_v63  ;;  %v2934_v10 = vsub.f32 1.0, %v2933_v15  ;;  %v9049_v51 = vadd.f32 1.0, %v5406_v8  ;;  %3250 = vmatpush.msrb.mxu1 %v3204_v47  ;;  %v2861_v24 = vadd.f32 %v8854_v43, %v2860_v41  ;;  %vm9061_vm14 = vmor %vm2922_vm0, %vm2923_vm12 }
 0x487   :  { %v9052_v36 = vpop.eup %5409  ;;  %v2926_v1 = vand.u32 2147483647, %v8857_v63  ;;  %5411 = vrcp.f32 %v9027_v7  ;;  %v4929_v25 = vmul.f32 -1.442695, %v9030_v6  ;;  %v2868_v54 = vand.u32 2147483648, %v8760_v9  ;;  %v11609_v63 = vld [vmem:[#allocation33_spill] sm:$0xff] }
 0x488   :  { %v3038_v16 = vmul.f32 %v9039_v22, %v8969_v37  ;;  %v3098_v55 = vmul.f32 %v9052_v36, %v8987_v14  ;;  %5413 = vrcp.f32 %v9036_v61  ;;  %3251 = vmatpush.msrb.mxu1 %v8664_v46  ;;  %3234 = vmatpush.msrb.mxu0 %v11609_v63  ;;  %v2874_v2 = vsub.f32 1.0, %v2873_v60  ;;  %v11616_v60 = vld [vmem:[#allocation31_spill] sm:$0xff] }
 0x489   :  { %v2925_v18 = vsel %vm9061_vm14, %v8934_v57, %v2921_v59  ;;  %v2979_v39 = vsub.f32 1.0, %v2978_v23  ;;  %5415 = vrcp.f32 %v9045_v21  ;;  %vm11610_vm8 = vcmask 523264  }
 0x48a   :  { %4930 = vmatmul.msk.f32.vlgmr.msrb.gmra.mxu0 %vm11610_vm8, %v9079_v30  ;;  %v9084_v46 = vmul.f32 %v2810_v5, %v11611_v34  ;;  %v2929_v62 = vor.u32 1.1754944e-38, %v2928_v35  ;;  %v2935_v40 = vmul.f32 %v8945_v0, %v2934_v10  ;;  %5417 = vrcp.f32 %v9049_v51  ;;  %3252 = vmatpush.msrb.mxu1 %v11614_v38  ;;  %vm11618_vm6 = vmmov %vm11610_vm8  ;;  %v11627_v34 = vld [vmem:[#allocation29_spill] sm:$0xff] }
 0x48b   :  { %v2865_v3 = vsel %vm9090_vm4, %v8854_v43, %v2861_v24  ;;  %vm2927_vm3 = vcmp.eq.f32.partialorder %v2926_v1, 8.507059e+37  ;;  %v3099_v33 = vsub.f32 1.0, %v3098_v55  ;;  %5419 = vpow2.f32 %v4929_v25 }
 0x48c   :  { %v2869_v20 = vor.u32 1.1754944e-38, %v2868_v54  ;;  %v2930_v9 = vsel %vm2927_vm3, %v2929_v62, %v2925_v18  ;;  %v2988_v44 = vand.u32 2147483648, %v8931_v28  ;;  %v3039_v12 = vsub.f32 1.0, %v3038_v16  ;;  %3253 = vmatpush.msrb.mxu1 %v11615_v45 }
 0x48d   :  { %v9102_v47 = vpop.eup %5411  ;;  %v9105_v5 = vadd.f32 %v8807_v19, %v2815_v31  ;;  %vm2867_vm15 = vcmp.eq.f32.partialorder %v2866_v53, 8.507059e+37  ;;  %v9108_v49 = vmul.f32 %v8907_v26, %v2874_v2  ;;  %v2980_v43 = vmul.f32 %v9002_v17, %v2979_v39  ;;  %v11617_v53 = vld [vmem:[#allocation17_spill] sm:$0xff] }
 0x48e   :  { %v9111_v42 = vpop.eup %5413  ;;  %v9113_v52 = vsel %vm2867_vm15, %v2869_v20, %v2865_v3  ;;  %v9116_v15 = vadd.f32 %v8945_v0, %v2935_v40  ;;  %v2941_v41 = vand.u32 2147483647, %v8878_v32  ;;  %v2943_v8 = vand.u32 2147483648, %v8878_v32  ;;  %3254 = vmatpush.msrb.mxu1 %v11616_v60 }
 0x48f   :  { %v9121_v31 = vpop.eup %5415  ;;  %v9124_v59 = vmul.f32 %v2930_v9, %v11617_v53  ;;  %vm2982_vm11 = vweird.f32 %v8931_v28  ;;  %v2986_v23 = vand.u32 2147483647, %v8931_v28  ;;  %v3100_v35 = vmul.f32 %v9052_v36, %v3099_v33  ;;  %4931 = vmatmul.msk.f32.vlgmr.msrb.gmra.mxu1 %vm11618_vm6, %v9079_v30 }
 0x490   :  { %v5418_v10 = vpop.eup %5417  ;;  %vm2983_vm7 = vweird.f32 %v9002_v17  ;;  %v2989_v24 = vor.u32 1.1754944e-38, %v2988_v44  ;;  %v3040_v1 = vmul.f32 %v9039_v22, %v3039_v12  ;;  %v3048_v25 = vand.u32 2147483648, %v8969_v37 }
 0x491   :  { %v5420_v54 = vpop.eup %5419  ;;  %v2981_v50 = vadd.f32 %v9002_v17, %v2980_v43  ;;  %v2993_v16 = vmul.f32 %v9102_v47, %v9027_v7  ;;  %v3113_v55 = vmul.f32 %v9111_v42, %v9036_v61  ;;  %v3158_v63 = vmul.f32 %v5418_v10, %v9049_v51  ;;  %vm9161_vm5 = vmor %vm2982_vm11, %vm2983_vm7 }
 0x492   :  { %vm3102_vm9 = vweird.f32 %v8987_v14  ;;  %v3106_v2 = vand.u32 2147483647, %v8987_v14  ;;  %v3108_v18 = vand.u32 2147483648, %v8987_v14  ;;  %v9143_v39 = vadd.f32 1.0, %v5420_v54 }
 0x493   :  { %vm9145_vm1 = vcmp.eq.f32.partialorder %v2986_v23, 8.507059e+37  ;;  %v3053_v57 = vmul.f32 %v9121_v31, %v9045_v21  ;;  %v3101_v62 = vadd.f32 %v9052_v36, %v3100_v35  ;;  %vm3103_vm13 = vweird.f32 %v9052_v36 }
 0x494   :  { %v3159_v40 = vsub.f32 1.0, %v3158_v63  ;;  %v3041_v38 = vadd.f32 %v9039_v22, %v3040_v1  ;;  %vm3043_vm10 = vweird.f32 %v9039_v22  ;;  %v3168_v3 = vand.u32 2147483648, %v9049_v51  ;;  %vm9172_vm0 = vmor %vm3102_vm9, %vm3103_vm13 }
 0x495   :  { %5421 = vrcp.f32 %v9143_v39  ;;  %v3114_v20 = vsub.f32 1.0, %v3113_v55  ;;  %vm3163_vm2 = vweird.f32 %v5418_v10  ;;  %v3166_v44 = vand.u32 2147483647, %v9049_v51 }
 0x496   :  { %v3160_v9 = vmul.f32 %v5418_v10, %v3159_v40  ;;  %v2994_v12 = vsub.f32 1.0, %v2993_v16  ;;  %vm3042_vm12 = vweird.f32 %v8969_v37  ;;  %v3046_v45 = vand.u32 2147483647, %v8969_v37 }
 0x497   :  { %v3049_v43 = vor.u32 1.1754944e-38, %v3048_v25  ;;  %vm9176_vm14 = vmor %vm3042_vm12, %vm3043_vm10  ;;  %v3054_v53 = vsub.f32 1.0, %v3053_v57  ;;  %v3105_v23 = vsel %vm9172_vm0, %v9052_v36, %v3101_v62  ;;  %vm3162_vm8 = vweird.f32 %v9049_v51 }
 0x498   :  { %v3161_v35 = vadd.f32 %v5418_v10, %v3160_v9  ;;  %v2985_v37 = vsel %vm9161_vm5, %v9002_v17, %v2981_v50  ;;  %v3045_v14 = vsel %vm9176_vm14, %v9039_v22, %v3041_v38  ;;  %v3109_v1 = vor.u32 1.1754944e-38, %v3108_v18  ;;  %vm3164_vm4 = vmor %vm3162_vm8, %vm3163_vm2 }
 0x499   :  { %v3169_v25 = vor.u32 1.1754944e-38, %v3168_v3  ;;  %vm3107_vm3 = vcmp.eq.f32.partialorder %v3106_v2, 8.507059e+37  ;;  %v3115_v54 = vmul.f32 %v9111_v42, %v3114_v20  ;;  %vm3167_vm15 = vcmp.eq.f32.partialorder %v3166_v44, 8.507059e+37  ;;  %v11628_v20 = vld [vmem:[#allocation27_spill] sm:$0xff] }
 0x49a   :  { %v3165_v16 = vsel %vm3164_vm4, %v5418_v10, %v3161_v35  ;;  %vm2998_vm11 = vweird.f32 %v9102_v47  ;;  %vm3047_vm6 = vcmp.eq.f32.partialorder %v3046_v45, 8.507059e+37  ;;  %v3110_v51 = vsel %vm3107_vm3, %v3109_v1, %v3105_v23  ;;  %v4852_v45 = vld [vmem:[%s10863_s5 + $0x20] sm:$0xff] }
 0x49b   :  { %v5422_v36 = vpop.eup %5421  ;;  %v3170_v55 = vsel %vm3167_vm15, %v3169_v25, %v3165_v16  ;;  %vm2938_vm7 = vweird.f32 %v8945_v0  ;;  %vm2997_vm9 = vweird.f32 %v9027_v7  ;;  %v3050_v17 = vsel %vm3047_vm6, %v3049_v43, %v3045_v14 }
 0x49c   :  { %v3055_v22 = vmul.f32 %v9121_v31, %v3054_v53  ;;  %v3217_v50 = vmul.f32 %v3170_v55, %v8943_v27  ;;  %v3173_v63 = vmul.f32 %v5422_v36, %v9143_v39  ;;  %v2990_v10 = vsel %vm9145_vm1, %v2989_v24, %v2985_v37 }
 0x49d   :  { %v2995_v2 = vmul.f32 %v9102_v47, %v2994_v12  ;;  %vm3117_vm13 = vweird.f32 %v9036_v61  ;;  %v3121_v18 = vand.u32 2147483647, %v9036_v61  ;;  %vm2878_vm10 = vweird.f32 %v8907_v26 }
 0x49e   :  { %vm2937_vm5 = vweird.f32 %v8878_v32  ;;  %v3213_v57 = vmul.f32 %v3110_v51, %v8914_v58  ;;  %v3116_v62 = vadd.f32 %v9111_v42, %v3115_v54  ;;  %vm3118_vm2 = vweird.f32 %v9111_v42  ;;  %3267 = vmatpush.msrb.mxu2 %v3217_v50 }
 0x49f   :  { %v3174_v27 = vsub.f32 1.0, %v3173_v63  ;;  %v3209_v24 = vmul.f32 %v3050_v17, %v11627_v34  ;;  %vm3058_vm1 = vweird.f32 %v9121_v31  ;;  %v3123_v40 = vand.u32 2147483648, %v9036_v61  ;;  %vm9223_vm8 = vmor %vm3117_vm13, %vm3118_vm2  ;;  %v11638_v17 = vld [vmem:[#allocation53_spill] sm:$0xff]  ;;  %v11646_v34 = vld [vmem:[#allocation34_spill] sm:$0xff] }
 0x4a0   :  { %v3183_v38 = vand.u32 2147483648, %v9143_v39  ;;  %vm2818_vm12 = vweird.f32 %v8807_v19  ;;  %v3056_v3 = vadd.f32 %v9121_v31, %v3055_v22  ;;  %vm3178_vm0 = vweird.f32 %v5422_v36  ;;  %3268 = vmatpush.msrb.mxu2 %v3213_v57 }
 0x4a1   :  { %v3175_v33 = vmul.f32 %v5422_v36, %v3174_v27  ;;  %v3181_v58 = vand.u32 2147483647, %v9143_v39  ;;  %v3205_v9 = vmul.f32 %v2990_v10, %v11628_v20  ;;  %vm3057_vm14 = vweird.f32 %v9045_v21  ;;  %v11641_v10 = vld [vmem:[#allocation18_spill] sm:$0xff] }
 0x4a2   :  { %v3061_v44 = vand.u32 2147483647, %v9045_v21  ;;  %v3063_v12 = vand.u32 2147483648, %v9045_v21  ;;  %vm2758_vm4 = vweird.f32 %v8606_v11  ;;  %v2996_v43 = vadd.f32 %v9102_v47, %v2995_v2  ;;  %vm9231_vm3 = vmor %vm3057_vm14, %vm3058_vm1  ;;  %3269 = vmatpush.msrb.mxu2 %v3209_v24 }
 0x4a3   :  { %v3120_v21 = vsel %vm9223_vm8, %v9111_v42, %v3116_v62  ;;  %v3176_v60 = vadd.f32 %v5422_v36, %v3175_v33  ;;  %vm3177_vm15 = vweird.f32 %v9143_v39  ;;  %v3001_v61 = vand.u32 2147483647, %v9027_v7  ;;  %v11633_v42 = vld [vmem:[#allocation45_spill] sm:$0xff]  ;;  %vm9251_vm1 = vmor %vm2997_vm9, %vm2998_vm11 }
 0x4a4   :  { %v3003_v53 = vand.u32 2147483648, %v9027_v7  ;;  %v3124_v23 = vor.u32 1.1754944e-38, %v3123_v40  ;;  %vm3179_vm6 = vmor %vm3177_vm15, %vm3178_vm0  ;;  %v3184_v35 = vor.u32 1.1754944e-38, %v3183_v38  ;;  %v3060_v37 = vsel %vm9231_vm3, %v9121_v31, %v3056_v3  ;;  %3270 = vmatpush.msrb.mxu2 %v3205_v9  ;;  %v11647_v40 = vld [vmem:[#allocation44_spill] sm:$0xff]  ;;  %v11648_v3 = vld [vmem:[#allocation61_spill] sm:$0xff] }
 0x4a5   :  { %vm3122_vm13 = vcmp.eq.f32.partialorder %v3121_v18, 8.507059e+37  ;;  %v3180_v14 = vsel %vm3179_vm6, %v5422_v36, %v3176_v60  ;;  %vm3182_vm2 = vcmp.eq.f32.partialorder %v3181_v58, 8.507059e+37  ;;  %v3197_v39 = vmul.f32 %v9113_v52, %v11633_v42  ;;  %vm9268_vm9 = vmor %vm2937_vm5, %vm2938_vm7  ;;  %v11649_v58 = vld [vmem:[#allocation22_spill] sm:$0xff]  ;;  %v11651_v9 = vld [vmem:[#allocation35_spill] sm:$0xff] }
 0x4a6   :  { %v3064_v25 = vor.u32 1.1754944e-38, %v3063_v12  ;;  %v3125_v54 = vsel %vm3122_vm13, %v3124_v23, %v3120_v21  ;;  %v3185_v16 = vsel %vm3182_vm2, %v3184_v35, %v3180_v14  ;;  %v2876_v31 = vadd.f32 %v8907_v26, %v9108_v49  ;;  %3271 = vmatpush.msrb.mxu2 %v9124_v59 }
 0x4a7   :  { %v3000_v36 = vsel %vm9251_vm1, %v9102_v47, %v2996_v43  ;;  %vm3062_vm0 = vcmp.eq.f32.partialorder %v3061_v44, 8.507059e+37  ;;  %v3218_v52 = vmul.f32 %v3185_v16, %v9030_v6  ;;  %vm2877_vm11 = vweird.f32 %v8827_v13 }
 0x4a8   :  { %v2883_v7 = vand.u32 2147483648, %v8827_v13  ;;  %v3004_v49 = vor.u32 1.1754944e-38, %v3003_v53  ;;  %v3065_v55 = vsel %vm3062_vm0, %v3064_v25, %v3060_v37  ;;  %v2881_v47 = vand.u32 2147483647, %v8827_v13  ;;  %3272 = vmatpush.msrb.mxu2 %v3197_v39  ;;  %vm9282_vm7 = vmor %vm2877_vm11, %vm2878_vm10  ;;  %v11653_v53 = vld [vmem:[#allocation12_spill] sm:$0xff] }
 0x4a9   :  { %v2940_v6 = vsel %vm9268_vm9, %v8945_v0, %v9116_v15  ;;  %vm3002_vm14 = vcmp.eq.f32.partialorder %v3001_v61, 8.507059e+37  ;;  %v3214_v59 = vmul.f32 %v3125_v54, %v8923_v4  ;;  %3287 = vmatpush.msrb.mxu3 %v3218_v52  ;;  %vm2817_vm8 = vweird.f32 %v11638_v17 }
 0x4aa   :  { %v2823_v22 = vand.u32 2147483648, %v11638_v17  ;;  %v2944_v13 = vor.u32 1.1754944e-38, %v2943_v8  ;;  %v3005_v63 = vsel %vm3002_vm14, %v3004_v49, %v3000_v36  ;;  %v2821_v0 = vand.u32 2147483647, %v11638_v17  ;;  %3273 = vmatpush.msrb.mxu2 %v9084_v46  ;;  %vm9300_vm3 = vmor %vm2817_vm8, %vm2818_vm12  ;;  %v11644_v46 = vld [vmem:[#allocation56_spill] sm:$0xff] }
 0x4ab   :  { %v2880_v4 = vsel %vm9282_vm7, %v8907_v26, %v2876_v31  ;;  %vm2942_vm5 = vcmp.eq.f32.partialorder %v2941_v41, 8.507059e+37  ;;  %v3210_v15 = vmul.f32 %v3065_v55, %v8929_v29  ;;  %3288 = vmatpush.msrb.mxu3 %v3214_v59  ;;  %vm2757_vm10 = vweird.f32 %v11641_v10 }
 0x4ac   :  { %v2763_v2 = vand.u32 2147483648, %v11641_v10  ;;  %v2884_v18 = vor.u32 1.1754944e-38, %v2883_v7  ;;  %v2945_v26 = vsel %vm2942_vm5, %v2944_v13, %v2940_v6  ;;  %v2761_v32 = vand.u32 2147483647, %v11641_v10  ;;  %3274 = vmatpush.msrb.mxu2 %v9006_v56  ;;  %vm2759_vm12 = vmor %vm2757_vm10, %vm2758_vm4 }
 0x4ad   :  { %v2820_v29 = vsel %vm9300_vm3, %v8807_v19, %v9105_v5  ;;  %vm2882_vm15 = vcmp.eq.f32.partialorder %v2881_v47, 8.507059e+37  ;;  %v3206_v41 = vmul.f32 %v3005_v63, %v11644_v46  ;;  %3289 = vmatpush.msrb.mxu3 %v3210_v15  ;;  %v2824_v57 = vor.u32 1.1754944e-38, %v2823_v22 }
 0x4ae   :  { %v2885_v62 = vsel %vm2882_vm15, %v2884_v18, %v2880_v4  ;;  %vm11645_vm6 = vcmask 523264   ;;  %v2760_v27 = vsel %vm2759_vm12, %v8606_v11, %v9010_v48  ;;  %vm2822_vm13 = vcmp.eq.f32.partialorder %v2821_v0, 8.507059e+37 }
 0x4af   :  { %4932 = vmatmul.msk.f32.vlgmr.msrb.gmra.mxu2 %vm11645_vm6, %v9079_v30  ;;  %v3202_v19 = vmul.f32 %v2945_v26, %v11646_v34  ;;  %3290 = vmatpush.msrb.mxu3 %v3206_v41  ;;  %v2764_v5 = vor.u32 1.1754944e-38, %v2763_v2  ;;  %v2825_v24 = vsel %vm2822_vm13, %v2824_v57, %v2820_v29  ;;  %vm2762_vm2 = vcmp.eq.f32.partialorder %v2761_v32, 8.507059e+37  ;;  %vm11650_vm4 = vmmov %vm11645_vm6  ;;  %v4853_v26 = vld [vmem:[%s10863_s5 + $0x28] sm:$0xff]  ;;  %v5569_v32 = vld [vmem:[%s10859_s1] sm:$0xff] }
 0x4b0   :  { %v3198_v56 = vmul.f32 %v2885_v62, %v11647_v40  ;;  %v3194_v33 = vmul.f32 %v2825_v24, %v11648_v3  ;;  %v9323_v48 = vstv %s4845_s17  ;;  %v3355_v21 = vmul.f32 %v4852_v45, %v4852_v45  ;;  %v5570_v34 = vld [vmem:[%s10859_s1 + $0x8] sm:$0xff]  ;;  %v5571_v3 = vld [vmem:[%s10859_s1 + $0x10] sm:$0xff]  ;;  %s4649_s17 = sshll.u32 %s5672_s8, 4  ;;  %s4650_s17 = int_to_ptr.vmem [resolvable:$true] %s4649_s17 }
 0x4b1   :  { %3291 = vmatpush.msrb.mxu3 %v3202_v19  ;;  %v2765_v38 = vsel %vm2762_vm2, %v2764_v5, %v2760_v27  ;;  %vm11652_vm1 = vcmask 1043456   ;;  %v3316_v35 = vstv %s4846_s19  ;;  %v9340_v1 = vstv %s4851_s21  ;;  %v11667_v19 = vld [vmem:[#allocation62_spill] sm:$0xff]  ;;  %s10615_s21 = sld [smem:[#allocation2 + $0x186]]  ;;  %s4651_s19 = sshll.u32 %s10867_s9, 4  ;;  %s4652_s19 = int_to_ptr.hbm [resolvable:$true] %s4651_s19 }
 0x4b2   :  { %v3190_v20 = vmul.f32 %v2765_v38, %v11649_v58  ;;  %11654 = vst [vmem:[#allocation14_spill] sm:$0xff] %v9340_v1  ;;  %v3410_v16 = vstv %s3407_s23  ;;  %v3413_v36 = vmul.f32 %v4852_v45, %v9340_v1  ;;  %v3341_v7 = vstv %s9333_s4  ;;  %vm11660_vm0 = vmmov %vm11652_vm1  ;;  %s4939_s4 = sld [smem:[#allocation2 + $0x181]] }
 0x4b3   :  { %3292 = vmatpush.msrb.mxu3 %v3198_v56  ;;  %v3344_v49 = vstv %s9338_s24  ;;  %v3350_v6 = vstv %s3349_s25  ;;  %vm11661_vm11 = vmmov %vm11660_vm0  ;;  %vm11662_vm9 = vcmask 31744   ;;  %v3356_v41 = vmul.f32 %v4853_v26, %v4853_v26  ;;  %s4942_s24 = sld [smem:[#allocation2 + $0x184]] }
 0x4b4   :  { %v3345_v22 = vmul.f32 %v3344_v49, %v11653_v53  ;;  %v3351_v13 = vmul.f32 %v4852_v45, %v3350_v6  ;;  %vm11663_vm14 = vmmov %vm11662_vm9  ;;  %s10621_s25 = sld [smem:[#allocation2 + $0x183]] }
 0x4b5   :  { %3293 = vmatpush.msrb.mxu3 %v3194_v33  ;;  %vm11664_vm8 = vmmov %vm11660_vm0 }
 0x4b6   :  { %vm11665_vm7 = vmmov %vm11662_vm9 }
 0x4b7   :  { %3294 = vmatpush.msrb.mxu3 %v3190_v20  ;;  %vm11666_vm5 = vmmov %vm11665_vm7 }
 0x4b8   :  { %4933 = vmatmul.msk.f32.vlgmr.msrb.gmra.mxu3 %vm11650_vm4, %v9079_v30  ;;  %vm11668_vm10 = vmmov %vm11666_vm5 }
 0x4b9   :  { %vm11669_vm3 = vmmov %vm11666_vm5  ;;  %s4474_s26 = smul.f32 %s10615_s21, %s4942_s24 }
 0x4ba   :  { %vm11670_vm15 = vmmov %vm11669_vm3 }
 0x4bb   :  { %vm11671_vm12 = vmmov %vm11669_vm3 }
 0x4bc   :  { %vm11674_vm6 = vmmov %vm11669_vm3 }
 0x4bd   :  { %vm11675_vm13 = vmmov %vm11669_vm3 }
 0x4be   :  { %vm11679_vm2 = vmmov %vm11669_vm3 }
 0x4bf   :  { %vm11680_vm4 = vmmov %vm11679_vm2 }
 0x507   :  { %v3236_v11 = vpop.f32.mrf.mxu0 }
 0x508   :  { %v3237_v44 = vadd.f32 %v3236_v11, %v11651_v9  ;;  %v3414_v11 = vmul.f32 %v4853_v26, %v9340_v1 }
 0x50a   :  { %v3300_v12 = vmul.f32 %v9323_v48, %v3237_v44 }
 0x50c   :  { %3323 = vst.sshfl [vmem:[#allocation1] sm:$0xff pattern:$0x75316420] %v3300_v12  ;;  %v3256_v43 = vpop.f32.mrf.mxu1 }
 0x50d   :  { %v3257_v28 = vadd.f32 %v3256_v43, %v11651_v9 }
 0x50f   :  { %v3301_v30 = vmul.f32 %v9323_v48, %v3257_v28 }
 0x511   :  { %v3308_v60 = vrot.slane %v3301_v30, 4  ;;  %3324 = vst.sshfl [vmem:[#allocation1 + $0x8] sm:$0xff pattern:$0x75316420] %v3301_v30  ;;  %v3346_v30 = vmul.f32 %v3344_v49, %v11667_v19 }
 0x512   :  { %3359 = vst [vmem:[#allocation1] ss:$2 sm:$0xff] %v3355_v21 }
 0x513   :  { %v3310_v61 = vsel %vm11652_vm1, %v3300_v12, %v3308_v60  ;;  %v5572_v12 = vld [vmem:[%s10859_s1 + $0x18] sm:$0xff]  ;;  %vm11681_vm1 = vmmov %vm11660_vm0 }
 0x514   :  { %v3314_v23 = vsub.f32 %v11653_v53, %v3310_v61  ;;  %v3352_v61 = vmul.f32 %v4853_v26, %v3350_v6 }
 0x516   :  { %v3317_v14 = vmul.f32 %v3316_v35, %v3314_v23 }
 0x518   :  { %v3328_v37 = vld [vmem:[#allocation1 + $0x1] ss:$2 sm:$0xff]  ;;  %v4934_v25 = vclamps-f32 %v3317_v14, 1.0 }
 0x519   :  { %v3333_v42 = vsub.f32 %v11653_v53, %v3328_v37  ;;  %v9345_v59 = vld.sshfl [vmem:[#allocation1] sm:$0xff pattern:$0x75316420]  ;;  %v9347_v17 = vld.sshfl [vmem:[#allocation1 + $0x8] sm:$0xff pattern:$0x75316420] }
 0x51a   :  { %v3342_v55 = vmul.f32 %v4934_v25, %v3341_v7  ;;  %11655 = vst [vmem:[#allocation37_spill] sm:$0xff] %v9345_v59  ;;  %v5573_v53 = vld [vmem:[%s10859_s1 + $0x20] sm:$0xff]  ;;  %v5574_v14 = vld [vmem:[%s10859_s1 + $0x28] sm:$0xff] }
 0x51b   :  { %v3335_v39 = vmul.f32 %v3333_v42, %v3316_v35  ;;  %11656 = vst [vmem:[#allocation54_spill] sm:$0xff] %v9347_v17 }
 0x51c   :  { %v3347_v50 = vadd.f32 %v3345_v22, %v3342_v55 }
 0x51d   :  { %v4936_v54 = vclamps-f32 %v3335_v39, 1.0 }
 0x51e   :  { %v9350_v63 = vadd.f32 %v3351_v13, %v3347_v50  ;;  %v9456_v13 = vpop.permute.xlu0 %3510 }
 0x51f   :  { %v3408_v31 = vsub.f32 %v4934_v25, %v4936_v54  ;;  %v5575_v25 = vld [vmem:[%s10859_s1 + $0x30] sm:$0xff]  ;;  %v5576_v54 = vld [vmem:[%s10859_s1 + $0x38] sm:$0xff] }
 0x520   :  { %11657 = vst [vmem:[#allocation40_spill] sm:$0xff] %v9350_v63 }
 0x521   :  { %v3411_v52 = vmul.f32 %v3410_v16, %v3408_v31 }
 0x523   :  { %v3415_v51 = vadd.f32 %v3413_v36, %v3411_v52  ;;  %v9442_v36 = vpop.permute.xlu1 %3520 }
 0x525   :  { %v3417_v47 = vmul.f32 %v3415_v51, %v3415_v51 }
 0x527   :  { %3421 = vst [vmem:[#allocation1] ss:$2 sm:$0xff] %v3417_v47 }
 0x52b   :  { %v9446_v49 = vpop.permute.xlu1 %3505 }
 0x52e   :  { %v9352_v0 = vld.sshfl [vmem:[#allocation1] sm:$0xff pattern:$0x75316420]  ;;  %v9354_v4 = vld.sshfl [vmem:[#allocation1 + $0x8] sm:$0xff pattern:$0x75316420] }
 0x52f   :  { %11658 = vst [vmem:[#allocation50_spill] sm:$0xff] %v9352_v0 }
 0x530   :  { %11659 = vst [vmem:[#allocation49_spill] sm:$0xff] %v9354_v4 }
 0x531   :  { %3525 = vst [vmem:[#allocation1] ss:$2 sm:$0xff] %v9350_v63 }
 0x532   :  { %v3276_v15 = vpop.f32.mrf.mxu2 }
 0x533   :  { %v3277_v10 = vadd.f32 %v3276_v15, %v11651_v9 }
 0x535   :  { %v3302_v2 = vmul.f32 %v9323_v48, %v3277_v10 }
 0x537   :  { %3325 = vst.sshfl [vmem:[#allocation1 + $0x10] sm:$0xff pattern:$0x75316420] %v3302_v2 }
 0x538   :  { %v3528_v8 = vld.sshfl [vmem:[#allocation1] sm:$0xff pattern:$0x75316420]  ;;  %v3529_v18 = vld.sshfl [vmem:[#allocation1 + $0x8] sm:$0xff pattern:$0x75316420] }
 0x539   :  { %4955 = vmatpush.msk.msra.mxu0 %vm11660_vm0, %v3528_v8  ;;  %4964 = vmatpush.msk.msra.mxu1 %vm11661_vm11, %v3529_v18  ;;  %vm11682_vm11 = vmmov %vm11679_vm2 }
 0x53a   :  { %4956 = vmatmul.msk.f32.vlgmr.msra.gmra.mxu0 %vm11662_vm9, %v5569_v32  ;;  %4965 = vmatmul.msk.f32.vlgmr.msra.gmra.mxu1 %vm11663_vm14, %v5569_v32  ;;  %vm11683_vm9 = vmmov %vm11679_vm2 }
 0x53b   :  { %v3296_v29 = vpop.f32.mrf.mxu3  ;;  %vm11684_vm14 = vmmov %vm11679_vm2 }
 0x53c   :  { %v3297_v46 = vadd.f32 %v3296_v29, %v11651_v9 }
 0x53e   :  { %v3303_v57 = vmul.f32 %v9323_v48, %v3297_v46 }
 0x540   :  { %v3309_v62 = vrot.slane %v3303_v57, 4  ;;  %3326 = vst.sshfl [vmem:[#allocation1 + $0x18] sm:$0xff pattern:$0x75316420] %v3303_v57 }
 0x541   :  { %3361 = vst [vmem:[#allocation1 + $0x10] ss:$2 sm:$0xff] %v3356_v41  ;;  %v9469_v41 = vpop.permute.xlu0 %3495 }
 0x542   :  { %v3311_v27 = vsel %vm11664_vm8, %v3302_v2, %v3309_v62  ;;  %4957 = vmatmul.msk.f32.gmra.mxu0 %vm11665_vm7, %v5570_v34  ;;  %4966 = vmatmul.msk.f32.gmra.mxu1 %vm11666_vm5, %v5570_v34  ;;  %vm11685_vm8 = vmmov %vm11679_vm2  ;;  %v9460_v2 = vpop.permute.xlu1 %3490 }
 0x543   :  { %v3315_v5 = vsub.f32 %v11667_v19, %v3311_v27  ;;  %vm11686_vm7 = vmmov %vm11679_vm2 }
 0x544   :  { %vm11687_vm5 = vmmov %vm11679_vm2 }
 0x545   :  { %v3318_v40 = vmul.f32 %v3316_v35, %v3315_v5 }
 0x547   :  { %v3330_v24 = vld [vmem:[#allocation1 + $0x11] ss:$2 sm:$0xff]  ;;  %v4935_v33 = vclamps-f32 %v3318_v40, 1.0 }
 0x548   :  { %v3334_v56 = vsub.f32 %v11667_v19, %v3330_v24  ;;  %v9390_v28 = vld.sshfl [vmem:[#allocation1 + $0x10] sm:$0xff pattern:$0x75316420]  ;;  %v9392_v21 = vld.sshfl [vmem:[#allocation1 + $0x18] sm:$0xff pattern:$0x75316420] }
 0x549   :  { %v3343_v45 = vmul.f32 %v4935_v33, %v3341_v7  ;;  %11672 = vst [vmem:[#allocation63_spill] sm:$0xff] %v9390_v28 }
 0x54a   :  { %v3336_v38 = vmul.f32 %v3334_v56, %v3316_v35  ;;  %4958 = vmatmul.msk.f32.gmra.mxu0 %vm11668_vm10, %v5571_v3  ;;  %4967 = vmatmul.msk.f32.gmra.mxu1 %vm11669_vm3, %v5571_v3  ;;  %11673 = vst [vmem:[#allocation43_spill] sm:$0xff] %v9392_v21  ;;  %vm11688_vm10 = vmmov %vm11679_vm2 }
 0x54b   :  { %v3348_v60 = vadd.f32 %v3346_v30, %v3343_v45  ;;  %vm11689_vm3 = vmmov %vm11679_vm2 }
 0x54c   :  { %v4937_v58 = vclamps-f32 %v3336_v38, 1.0 }
 0x54d   :  { %v9400_v23 = vadd.f32 %v3352_v61, %v3348_v60 }
 0x54e   :  { %v3409_v20 = vsub.f32 %v4935_v33, %v4937_v58 }
 0x54f   :  { %11676 = vst [vmem:[#allocation26_spill] sm:$0xff] %v9400_v23 }
 0x550   :  { %v3412_v48 = vmul.f32 %v3410_v16, %v3409_v20  ;;  %v9440_v16 = vpop.permute.xlu2 %3515 }
 0x552   :  { %v3416_v44 = vadd.f32 %v3414_v11, %v3412_v48  ;;  %4959 = vmatmul.msk.f32.gmra.mxu0 %vm11670_vm15, %v5572_v12  ;;  %4968 = vmatmul.msk.f32.gmra.mxu1 %vm11671_vm12, %v5572_v12  ;;  %vm11690_vm15 = vmmov %vm11679_vm2 }
 0x553   :  { %vm11691_vm12 = vmmov %vm11679_vm2 }
 0x554   :  { %v3418_v43 = vmul.f32 %v3416_v44, %v3416_v44 }
 0x556   :  { %3423 = vst [vmem:[#allocation1 + $0x10] ss:$2 sm:$0xff] %v3418_v43 }
 0x558   :  { %v9444_v52 = vpop.permute.xlu2 %3500 }
 0x55a   :  { %4960 = vmatmul.msk.f32.gmra.mxu0 %vm11674_vm6, %v5573_v53  ;;  %4969 = vmatmul.msk.f32.gmra.mxu1 %vm11675_vm13, %v5573_v53  ;;  %vm11692_vm6 = vmmov %vm11679_vm2 }
 0x55b   :  { %vm11693_vm13 = vmmov %vm11679_vm2 }
 0x55d   :  { %v9402_v35 = vld.sshfl [vmem:[#allocation1 + $0x10] sm:$0xff pattern:$0x75316420]  ;;  %v9404_v37 = vld.sshfl [vmem:[#allocation1 + $0x18] sm:$0xff pattern:$0x75316420] }
 0x55e   :  { %11677 = vst [vmem:[#allocation51_spill] sm:$0xff] %v9402_v35 }
 0x55f   :  { %11678 = vst [vmem:[#allocation15_spill] sm:$0xff] %v9404_v37 }
 0x560   :  { %3527 = vst [vmem:[#allocation1 + $0x10] ss:$2 sm:$0xff] %v9400_v23  ;;  %v9448_v55 = vpop.permute.xlu2 %3485 }
 0x562   :  { %4961 = vmatmul.msk.f32.gmra.mxu0 %vm11679_vm2, %v5574_v14  ;;  %4970 = vmatmul.msk.f32.gmra.mxu1 %vm11680_vm4, %v5574_v14  ;;  %vm11694_vm4 = vmmov %vm11679_vm2 }
 0x567   :  { %v3530_v42 = vld.sshfl [vmem:[#allocation1 + $0x10] sm:$0xff pattern:$0x75316420]  ;;  %v3531_v39 = vld.sshfl [vmem:[#allocation1 + $0x18] sm:$0xff pattern:$0x75316420] }
 0x568   :  { %4973 = vmatpush.msk.msra.mxu2 %vm11681_vm1, %v3530_v42  ;;  %4982 = vmatpush.msk.msra.mxu3 %vm11660_vm0, %v3531_v39  ;;  %vm11695_vm1 = vmmov %vm11679_vm2 }
 0x569   :  { %4974 = vmatmul.msk.f32.vlgmr.msra.gmra.mxu2 %vm11682_vm11, %v5569_v32  ;;  %4983 = vmatmul.msk.f32.vlgmr.msra.gmra.mxu3 %vm11683_vm9, %v5569_v32  ;;  %vm11696_vm0 = vmmov %vm11695_vm1 }
 0x56a   :  { %4962 = vmatmul.msk.f32.gmra.mxu0 %vm11684_vm14, %v5575_v25  ;;  %4971 = vmatmul.msk.f32.gmra.mxu1 %vm11685_vm8, %v5575_v25  ;;  %vm11697_vm11 = vmmov %vm11696_vm0 }
 0x56b   :  { %vm11698_vm9 = vmmov %vm11696_vm0 }
 0x56c   :  { %vm11699_vm14 = vmmov %vm11696_vm0 }
 0x56d   :  { %vm11700_vm8 = vmmov %vm11696_vm0 }
 0x571   :  { %4975 = vmatmul.msk.f32.gmra.mxu2 %vm11686_vm7, %v5570_v34  ;;  %4984 = vmatmul.msk.f32.gmra.mxu3 %vm11687_vm5, %v5570_v34 }
 0x572   :  { %4963 = vmatmul.msk.f32.gmra.mxu0 %vm11688_vm10, %v5576_v54  ;;  %4972 = vmatmul.msk.f32.gmra.mxu1 %vm11689_vm3, %v5576_v54 }
 0x579   :  { %4976 = vmatmul.msk.f32.gmra.mxu2 %vm11690_vm15, %v5571_v3  ;;  %4985 = vmatmul.msk.f32.gmra.mxu3 %vm11691_vm12, %v5571_v3 }
 0x581   :  { %4977 = vmatmul.msk.f32.gmra.mxu2 %vm11692_vm6, %v5572_v12  ;;  %4986 = vmatmul.msk.f32.gmra.mxu3 %vm11693_vm13, %v5572_v12 }
 0x589   :  { %4978 = vmatmul.msk.f32.gmra.mxu2 %vm11679_vm2, %v5573_v53  ;;  %4987 = vmatmul.msk.f32.gmra.mxu3 %vm11694_vm4, %v5573_v53 }
 0x591   :  { %4979 = vmatmul.msk.f32.gmra.mxu2 %vm11695_vm1, %v5574_v14  ;;  %4988 = vmatmul.msk.f32.gmra.mxu3 %vm11696_vm0, %v5574_v14 }
 0x599   :  { %4980 = vmatmul.msk.f32.gmra.mxu2 %vm11697_vm11, %v5575_v25  ;;  %4989 = vmatmul.msk.f32.gmra.mxu3 %vm11698_vm9, %v5575_v25 }
 0x5a1   :  { %4981 = vmatmul.msk.f32.gmra.mxu2 %vm11699_vm14, %v5576_v54  ;;  %4990 = vmatmul.msk.f32.gmra.mxu3 %vm11700_vm8, %v5576_v54 }
 0x5b7   :  { %v3557_v31 = vpop.f32.mrf.mxu0  ;;  %v3598_v7 = vpop.f32.mrf.mxu1 }
 0x5b8   :  { %v9451_v47 = vadd.f32 %v3557_v31, %v9448_v55  ;;  %v9454_v6 = vadd.f32 %v3598_v7, %v9448_v55 }
 0x5ba   :  { %v4991_v15 = vmul.f32 -1.442695, %v9451_v47  ;;  %v4992_v10 = vmul.f32 -1.442695, %v9454_v6 }
 0x5bc   :  { %5423 = vpow2.f32 %v4991_v15 }
 0x5bd   :  { %5425 = vpow2.f32 %v4992_v10 }
 0x5bf   :  { %v3560_v51 = vpop.f32.mrf.mxu0  ;;  %v3601_v50 = vpop.f32.mrf.mxu1 }
 0x5c0   :  { %v9463_v8 = vadd.f32 %v3560_v51, %v9460_v2  ;;  %v9466_v18 = vadd.f32 %v3601_v50, %v9460_v2 }
 0x5c2   :  { %v4995_v32 = vmul.f32 -1.442695, %v9463_v8  ;;  %v5424_v46 = vpop.eup %5423  ;;  %v4996_v57 = vmul.f32 -1.442695, %v9466_v18 }
 0x5c3   :  { %v5426_v62 = vpop.eup %5425  ;;  %v9475_v34 = vadd.f32 1.0, %v5424_v46 }
 0x5c4   :  { %5427 = vpow2.f32 %v4995_v32  ;;  %v9477_v19 = vadd.f32 1.0, %v5426_v62 }
 0x5c5   :  { %5429 = vpow2.f32 %v4996_v57  ;;  %vm3837_vm7 = vweird.f32 %v9475_v34  ;;  %v3841_v32 = vand.u32 2147483647, %v9475_v34 }
 0x5c6   :  { %5431 = vrcp.f32 %v9475_v34  ;;  %vm3852_vm5 = vweird.f32 %v9477_v19 }
 0x5c7   :  { %v3563_v22 = vpop.f32.mrf.mxu0  ;;  %v3604_v29 = vpop.f32.mrf.mxu1  ;;  %5433 = vrcp.f32 %v9477_v19  ;;  %vm9556_vm15 = vcmp.eq.f32.partialorder %v3841_v32, 8.507059e+37 }
 0x5c8   :  { %v9473_v27 = vadd.f32 %v3563_v22, %v9469_v41  ;;  %v9482_v56 = vadd.f32 %v3604_v29, %v9469_v41 }
 0x5ca   :  { %v4999_v5 = vmul.f32 -1.442695, %v9473_v27  ;;  %v5428_v40 = vpop.eup %5427  ;;  %v5000_v20 = vmul.f32 -1.442695, %v9482_v56 }
 0x5cb   :  { %v5430_v33 = vpop.eup %5429  ;;  %v9488_v58 = vadd.f32 1.0, %v5428_v40 }
 0x5cc   :  { %5435 = vpow2.f32 %v4999_v5  ;;  %v9492_v48 = vpop.eup %5431  ;;  %v9494_v44 = vadd.f32 1.0, %v5430_v33  ;;  %v3843_v5 = vand.u32 2147483648, %v9475_v34  ;;  %v3856_v33 = vand.u32 2147483647, %v9477_v19 }
 0x5cd   :  { %v9496_v12 = vpop.eup %5433  ;;  %5437 = vrcp.f32 %v9488_v58  ;;  %v3833_v43 = vmul.f32 %v9492_v48, %v9475_v34  ;;  %vm3838_vm10 = vweird.f32 %v9492_v48  ;;  %vm3897_vm2 = vweird.f32 %v9488_v58 }
 0x5ce   :  { %5439 = vpow2.f32 %v5000_v20  ;;  %v3848_v60 = vmul.f32 %v9496_v12, %v9477_v19  ;;  %v3858_v20 = vand.u32 2147483648, %v9477_v19  ;;  %vm3853_vm3 = vweird.f32 %v9496_v12  ;;  %vm9563_vm12 = vmor %vm3837_vm7, %vm3838_vm10 }
 0x5cf   :  { %v3566_v26 = vpop.f32.mrf.mxu0  ;;  %v3607_v3 = vpop.f32.mrf.mxu1  ;;  %v3834_v25 = vsub.f32 1.0, %v3833_v43  ;;  %v3844_v37 = vor.u32 1.1754944e-38, %v3843_v5  ;;  %vm9575_vm6 = vmor %vm3852_vm5, %vm3853_vm3  ;;  %vm9579_vm13 = vcmp.eq.f32.partialorder %v3856_v33, 8.507059e+37  ;;  %v3916_v35 = vand.u32 2147483647, %v9494_v44 }
 0x5d0   :  { %v9486_v38 = vadd.f32 %v3566_v26, %v9444_v52  ;;  %v9510_v14 = vadd.f32 %v3607_v3, %v9444_v52  ;;  %v3849_v31 = vsub.f32 1.0, %v3848_v60  ;;  %vm3912_vm1 = vweird.f32 %v9494_v44 }
 0x5d1   :  { %v3835_v26 = vmul.f32 %v9492_v48, %v3834_v25  ;;  %vm9614_vm11 = vcmp.eq.f32.partialorder %v3916_v35, 8.507059e+37 }
 0x5d2   :  { %v5003_v11 = vmul.f32 -1.442695, %v9486_v38  ;;  %v5436_v45 = vpop.eup %5435  ;;  %v5004_v22 = vmul.f32 -1.442695, %v9510_v14  ;;  %v3850_v46 = vmul.f32 %v9496_v12, %v3849_v31  ;;  %v3903_v31 = vand.u32 2147483648, %v9488_v58 }
 0x5d3   :  { %v9507_v53 = vadd.f32 1.0, %v5436_v45  ;;  %v9512_v39 = vpop.eup %5437  ;;  %v3836_v43 = vadd.f32 %v9492_v48, %v3835_v26 }
 0x5d4   :  { %5441 = vpow2.f32 %v5003_v11  ;;  %v5440_v54 = vpop.eup %5439  ;;  %v3893_v57 = vmul.f32 %v9512_v39, %v9488_v58  ;;  %v3904_v33 = vor.u32 1.1754944e-38, %v3903_v31  ;;  %vm3898_vm0 = vweird.f32 %v9512_v39 }
 0x5d5   :  { %5443 = vrcp.f32 %v9494_v44  ;;  %v9528_v29 = vadd.f32 1.0, %v5440_v54  ;;  %v3963_v54 = vand.u32 2147483648, %v9507_v53  ;;  %vm3957_vm14 = vweird.f32 %v9507_v53  ;;  %vm9646_vm8 = vmor %vm3897_vm2, %vm3898_vm0 }
 0x5d6   :  { %5445 = vrcp.f32 %v9507_v53  ;;  %v3894_v60 = vsub.f32 1.0, %v3893_v57  ;;  %v3918_v57 = vand.u32 2147483648, %v9494_v44 }
 0x5d7   :  { %v3569_v24 = vpop.f32.mrf.mxu0  ;;  %v3610_v42 = vpop.f32.mrf.mxu1  ;;  %vm3972_vm3 = vweird.f32 %v9528_v29 }
 0x5d8   :  { %v9505_v61 = vadd.f32 %v3569_v24, %v9446_v49  ;;  %v9518_v50 = vadd.f32 %v3610_v42, %v9446_v49  ;;  %v3895_v19 = vmul.f32 %v9512_v39, %v3894_v60 }
 0x5da   :  { %v5007_v7 = vmul.f32 -1.442695, %v9505_v61  ;;  %v5442_v51 = vpop.eup %5441  ;;  %v5008_v40 = vmul.f32 -1.442695, %v9518_v50 }
 0x5db   :  { %v9520_v15 = vpop.eup %5443  ;;  %v9533_v62 = vadd.f32 1.0, %v5442_v51 }
 0x5dc   :  { %5447 = vpow2.f32 %v5007_v7  ;;  %v3908_v24 = vmul.f32 %v9520_v15, %v9494_v44  ;;  %v9543_v45 = vpop.eup %5445  ;;  %vm3913_vm9 = vweird.f32 %v9520_v15  ;;  %v3976_v44 = vand.u32 2147483647, %v9528_v29 }
 0x5dd   :  { %5449 = vpow2.f32 %v5004_v22  ;;  %v3953_v32 = vmul.f32 %v9543_v45, %v9507_v53  ;;  %vm9661_vm7 = vmor %vm3912_vm1, %vm3913_vm9  ;;  %vm3958_vm10 = vweird.f32 %v9543_v45 }
 0x5de   :  { %5451 = vrcp.f32 %v9528_v29  ;;  %v3909_v7 = vsub.f32 1.0, %v3908_v24 }
 0x5df   :  { %v3572_v30 = vpop.f32.mrf.mxu0  ;;  %5453 = vrcp.f32 %v9533_v62  ;;  %v3613_v51 = vpop.f32.mrf.mxu1 }
 0x5e0   :  { %v9523_v10 = vadd.f32 %v3572_v30, %v9456_v13  ;;  %v3851_v30 = vadd.f32 %v9496_v12, %v3850_v46  ;;  %5455 = vpow2.f32 %v5008_v40  ;;  %v3901_v46 = vand.u32 2147483647, %v9488_v58 }
 0x5e1   :  { %v3859_v40 = vor.u32 1.1754944e-38, %v3858_v20  ;;  %v3910_v20 = vmul.f32 %v9520_v15, %v3909_v7 }
 0x5e2   :  { %v5011_v11 = vmul.f32 -1.442695, %v9523_v10  ;;  %v5448_v22 = vpop.eup %5447  ;;  %v3855_v5 = vsel %vm9575_vm6, %v9496_v12, %v3851_v30  ;;  %vm9602_vm4 = vcmp.eq.f32.partialorder %v3901_v46, 8.507059e+37  ;;  %v3919_v12 = vor.u32 1.1754944e-38, %v3918_v57 }
 0x5e3   :  { %v9596_v1 = vadd.f32 1.0, %v5448_v22  ;;  %v3954_v30 = vsub.f32 1.0, %v3953_v32  ;;  %v3860_v7 = vsel %vm9579_vm13, %v3859_v40, %v3855_v5  ;;  %v3961_v46 = vand.u32 2147483647, %v9507_v53 }
 0x5e4   :  { %5457 = vpow2.f32 %v5011_v11  ;;  %v3840_v11 = vsel %vm9563_vm12, %v9492_v48, %v3836_v43  ;;  %v3896_v57 = vadd.f32 %v9512_v39, %v3895_v19  ;;  %v9622_v32 = vadd.f32 %v3613_v51, %v9456_v13 }
 0x5e5   :  { %v3845_v31 = vsel %vm9556_vm15, %v3844_v37, %v3840_v11  ;;  %v3911_v37 = vadd.f32 %v9520_v15, %v3910_v20  ;;  %v9640_v40 = vmul.f32 %v3860_v7, %v9454_v6  ;;  %vm9665_vm5 = vcmp.eq.f32.partialorder %v3961_v46, 8.507059e+37  ;;  %vm9698_vm15 = vmor %vm3957_vm14, %vm3958_vm10 }
 0x5e6   :  { %v3964_v7 = vor.u32 1.1754944e-38, %v3963_v54  ;;  %vm9716_vm12 = vcmp.eq.f32.partialorder %v3976_v44, 8.507059e+37  ;;  %vm4017_vm13 = vweird.f32 %v9533_v62  ;;  %vm4077_vm9 = vweird.f32 %v9596_v1 }
 0x5e7   :  { %v3575_v3 = vpop.f32.mrf.mxu0  ;;  %v3616_v20 = vpop.f32.mrf.mxu1 }
 0x5e8   :  { %v9554_v25 = vadd.f32 %v3575_v3, %v9440_v16  ;;  %v5450_v3 = vpop.eup %5449  ;;  %v9679_v46 = vadd.f32 %v3616_v20, %v9440_v16 }
 0x5e9   :  { %v9592_v0 = vpop.eup %5451  ;;  %v9607_v60 = vadd.f32 1.0, %v5450_v3  ;;  %v3955_v3 = vmul.f32 %v9543_v45, %v3954_v30  ;;  %v3978_v30 = vand.u32 2147483648, %v9528_v29 }
 0x5ea   :  { %v5015_v4 = vmul.f32 -1.442695, %v9554_v25  ;;  %v9600_v48 = vpop.eup %5453  ;;  %v3968_v35 = vmul.f32 %v9592_v0, %v9528_v29  ;;  %vm3973_vm6 = vweird.f32 %v9592_v0 }
 0x5eb   :  { %v5456_v26 = vpop.eup %5455  ;;  %v4013_v5 = vmul.f32 %v9600_v48, %v9533_v62  ;;  %v3956_v11 = vadd.f32 %v9543_v45, %v3955_v3  ;;  %v3979_v20 = vor.u32 1.1754944e-38, %v3978_v30  ;;  %v5016_v30 = vmul.f32 -1.442695, %v9679_v46  ;;  %vm9759_vm1 = vmor %vm3972_vm3, %vm3973_vm6 }
 0x5ec   :  { %v9551_v42 = vpop.f32.mrf.mxu2  ;;  %v9598_v23 = vpop.f32.mrf.mxu3  ;;  %5459 = vpow2.f32 %v5015_v4  ;;  %v9632_v24 = vadd.f32 1.0, %v5456_v26  ;;  %v9637_v4 = vmul.f32 %v3845_v31, %v9451_v47  ;;  %v3900_v47 = vsel %vm9646_vm8, %v9512_v39, %v3896_v57 }
 0x5ed   :  { %v5458_v34 = vpop.eup %5457  ;;  %5461 = vrcp.f32 %v9596_v1  ;;  %v5012_v26 = vmul.f32 -1.442695, %v9622_v32  ;;  %v3915_v39 = vsel %vm9661_vm7, %v9520_v15, %v3911_v37  ;;  %v3905_v6 = vsel %vm9602_vm4, %v3904_v33, %v3900_v47 }
 0x5ee   :  { %5463 = vrcp.f32 %v9607_v60  ;;  %v9652_v19 = vadd.f32 1.0, %v5458_v34  ;;  %v3969_v34 = vsub.f32 1.0, %v3968_v35  ;;  %v4014_v15 = vsub.f32 1.0, %v4013_v5 }
 0x5ef   :  { %v3578_v31 = vpop.f32.mrf.mxu0  ;;  %5465 = vrcp.f32 %v9632_v24  ;;  %v3920_v3 = vsel %vm9614_vm11, %v3919_v12, %v3915_v39  ;;  %v4021_v5 = vand.u32 2147483647, %v9533_v62  ;;  %v4023_v47 = vand.u32 2147483648, %v9533_v62 }
 0x5f0   :  { %5467 = vrcp.f32 %v9652_v19  ;;  %v9689_v54 = vadd.f32 %v3578_v31, %v9442_v36  ;;  %v3970_v43 = vmul.f32 %v9592_v0, %v3969_v34  ;;  %v9708_v12 = vmul.f32 %v3905_v6, %v9463_v8 }
 0x5f1   :  { %5469 = vpow2.f32 %v5012_v26  ;;  %v3960_v22 = vsel %vm9698_vm15, %v9543_v45, %v3956_v11  ;;  %v4015_v39 = vmul.f32 %v9600_v48, %v4014_v15  ;;  %v9725_v8 = vadd.f32 %v9551_v42, %v9448_v55 }
 0x5f2   :  { %v5460_v57 = vpop.eup %5459  ;;  %v5019_v45 = vmul.f32 -1.442695, %v9689_v54  ;;  %v9731_v11 = vmul.f32 %v3920_v3, %v9466_v18  ;;  %v9737_v44 = vadd.f32 %v9598_v23, %v9448_v55  ;;  %v3965_v42 = vsel %vm9665_vm5, %v3964_v7, %v3960_v22 }
 0x5f3   :  { %v9681_v21 = vpop.eup %5461  ;;  %v9705_v31 = vadd.f32 1.0, %v5460_v57  ;;  %11723 = vst [vmem:[#allocation48_spill] sm:$0xff] %v9725_v8  ;;  %v3971_v33 = vadd.f32 %v9592_v0, %v3970_v43  ;;  %vm9746_vm2 = vcmp.eq.f32.partialorder %v4021_v5, 8.507059e+37  ;;  %v4024_v3 = vor.u32 1.1754944e-38, %v4023_v47 }
 0x5f4   :  { %v9634_v51 = vpop.f32.mrf.mxu2  ;;  %v9686_v37 = vpop.f32.mrf.mxu3  ;;  %v4073_v53 = vmul.f32 %v9681_v21, %v9596_v1  ;;  %11724 = vst [vmem:[#allocation28_spill] sm:$0xff] %v9737_v44  ;;  %vm4018_vm4 = vweird.f32 %v9600_v48  ;;  %v4038_v23 = vand.u32 2147483648, %v9607_v60  ;;  %v4016_v59 = vadd.f32 %v9600_v48, %v4015_v39 }
 0x5f5   :  { %v9691_v35 = vpop.eup %5463  ;;  %5471 = vrcp.f32 %v9705_v31  ;;  %v4993_v7 = vmul.f32 -1.442695, %v9725_v8  ;;  %v4081_v5 = vand.u32 2147483647, %v9596_v1  ;;  %v4083_v47 = vand.u32 2147483648, %v9596_v1  ;;  %vm9785_vm11 = vmor %vm4017_vm13, %vm4018_vm4 }
 0x5f6   :  { %v4028_v34 = vmul.f32 %v9691_v35, %v9607_v60  ;;  %v9728_v57 = vpop.eup %5465  ;;  %v4074_v55 = vsub.f32 1.0, %v4073_v53  ;;  %5473 = vpow2.f32 %v5016_v30  ;;  %v4994_v53 = vmul.f32 -1.442695, %v9737_v44 }
 0x5f7   :  { %v9741_v15 = vpop.eup %5467  ;;  %5475 = vpow2.f32 %v5019_v45  ;;  %v3975_v30 = vsel %vm9759_vm1, %v9592_v0, %v3971_v33  ;;  %vm4032_vm0 = vweird.f32 %v9607_v60  ;;  %v4088_v29 = vmul.f32 %v9728_v57, %v9632_v24 }
 0x5f8   :  { %v5470_v28 = vpop.eup %5469  ;;  %v4029_v58 = vsub.f32 1.0, %v4028_v34  ;;  %v4133_v22 = vmul.f32 %v9741_v15, %v9652_v19  ;;  %v9779_v45 = vmul.f32 %v3965_v42, %v9473_v27  ;;  %v4036_v0 = vand.u32 2147483647, %v9607_v60 }
 0x5f9   :  { %v9774_v39 = vadd.f32 1.0, %v5470_v28  ;;  %v4075_v33 = vmul.f32 %v9681_v21, %v4074_v55  ;;  %v4020_v27 = vsel %vm9785_vm11, %v9600_v48, %v4016_v59  ;;  %v4039_v43 = vor.u32 1.1754944e-38, %v4038_v23  ;;  %v3619_v48 = vpop.f32.mrf.mxu1 }
 0x5fa   :  { %v4030_v42 = vmul.f32 %v9691_v35, %v4029_v58  ;;  %5477 = vpow2.f32 %v4993_v7  ;;  %v9800_v63 = vsel %vm9716_vm12, %v3979_v20, %v3975_v30  ;;  %vm9802_vm14 = vcmp.eq.f32.partialorder %v4081_v5, 8.507059e+37 }
 0x5fb   :  { %v9792_v28 = vpop.eup %5471  ;;  %v4084_v55 = vor.u32 1.1754944e-38, %v4083_v47  ;;  %v4134_v44 = vsub.f32 1.0, %v4133_v22  ;;  %5479 = vpow2.f32 %v4994_v53  ;;  %vm4033_vm8 = vweird.f32 %v9691_v35 }
 0x5fc   :  { %v9739_v6 = vpop.f32.mrf.mxu2  ;;  %v9776_v34 = vpop.f32.mrf.mxu3  ;;  %v4089_v59 = vsub.f32 1.0, %v4088_v29  ;;  %v4098_v17 = vand.u32 2147483648, %v9632_v24  ;;  %5481 = vrcp.f32 %v9774_v39  ;;  %v4025_v20 = vsel %vm9746_vm2, %v4024_v3, %v4020_v27  ;;  %vm9853_vm12 = vmor %vm4032_vm0, %vm4033_vm8 }
 0x5fd   :  { %v5474_v62 = vpop.eup %5473  ;;  %vm9811_vm7 = vcmp.eq.f32.partialorder %v4036_v0, 8.507059e+37  ;;  %v4076_v23 = vadd.f32 %v9681_v21, %v4075_v33  ;;  %vm4078_vm5 = vweird.f32 %v9681_v21  ;;  %v4193_v58 = vmul.f32 %v9792_v28, %v9705_v31 }
 0x5fe   :  { %v5476_v8 = vpop.eup %5475  ;;  %v4031_v5 = vadd.f32 %v9691_v35, %v4030_v42  ;;  %vm4092_vm10 = vweird.f32 %v9632_v24  ;;  %v9824_v3 = vadd.f32 1.0, %v5474_v62  ;;  %v4135_v47 = vmul.f32 %v9741_v15, %v4134_v44  ;;  %vm9841_vm3 = vmor %vm4077_vm9, %vm4078_vm5 }
 0x5ff   :  { %v9829_v22 = vadd.f32 %v9634_v51, %v9460_v2  ;;  %v9831_v53 = vadd.f32 1.0, %v5476_v8  ;;  %v9834_v30 = vadd.f32 %v3619_v48, %v9442_v36  ;;  %v9837_v0 = vmul.f32 %v4025_v20, %v9486_v38 }
 0x600   :  { %v5478_v29 = vpop.eup %5477  ;;  %v4090_v44 = vmul.f32 %v9728_v57, %v4089_v59  ;;  %v9846_v27 = vor.u32 1.1754944e-38, %v4098_v17  ;;  %vm4137_vm15 = vweird.f32 %v9652_v19  ;;  %v4080_v1 = vsel %vm9841_vm3, %v9681_v21, %v4076_v23 }
 0x601   :  { %11735 = vst [vmem:[#allocation39_spill] sm:$0xff] %v9829_v22  ;;  %v5480_v51 = vpop.eup %5479  ;;  %v4141_v8 = vand.u32 2147483647, %v9652_v19  ;;  %v4194_v42 = vsub.f32 1.0, %v4193_v58  ;;  %5483 = vrcp.f32 %v9831_v53  ;;  %v4035_v59 = vsel %vm9853_vm12, %v9691_v35, %v4031_v5 }
 0x602   :  { %v9862_v62 = vpop.eup %5481  ;;  %v4143_v60 = vand.u32 2147483648, %v9652_v19  ;;  %5485 = vrcp.f32 %v9824_v3  ;;  %v9871_v17 = vadd.f32 %v9686_v37, %v9460_v2  ;;  %v4136_v48 = vadd.f32 %v9741_v15, %v4135_v47 }
 0x603   :  { %vm4138_vm6 = vweird.f32 %v9741_v15  ;;  %v4997_v20 = vmul.f32 -1.442695, %v9829_v22  ;;  %v5020_v23 = vmul.f32 -1.442695, %v9834_v30  ;;  %v4085_v35 = vsel %vm9802_vm14, %v4084_v55, %v4080_v1 }
 0x604   :  { %v9819_v7 = vpop.f32.mrf.mxu2  ;;  %11740 = vst [vmem:[#allocation30_spill] sm:$0xff] %v9871_v17  ;;  %v9873_v21 = vpop.f32.mrf.mxu3  ;;  %v9882_v58 = vadd.f32 %v9728_v57, %v4090_v44  ;;  %vm4093_vm13 = vweird.f32 %v9728_v57  ;;  %v9885_v2 = vadd.f32 1.0, %v5478_v29  ;;  %v4148_v37 = vmul.f32 %v9862_v62, %v9774_v39  ;;  %vm9898_vm2 = vmor %vm4137_vm15, %vm4138_vm6 }
 0x605   :  { %v9889_v5 = vadd.f32 1.0, %v5480_v51  ;;  %v4195_v47 = vmul.f32 %v9792_v28, %v4194_v42  ;;  %5487 = vpow2.f32 %v5020_v23  ;;  %v9894_v33 = vsel %vm9811_vm7, %v4039_v43, %v4035_v59  ;;  %vm9912_vm1 = vmor %vm4092_vm10, %vm4093_vm13 }
 0x606   :  { %11741 = vst [vmem:[#allocation41_spill] sm:$0xff] %v9885_v2  ;;  %vm9902_vm4 = vcmp.eq.f32.partialorder %v4141_v8, 8.507059e+37  ;;  %v4144_v29 = vor.u32 1.1754944e-38, %v4143_v60  ;;  %v4998_v44 = vmul.f32 -1.442695, %v9871_v17  ;;  %v9908_v38 = vmul.f32 %v4085_v35, %v9505_v61 }
 0x607   :  { %v5484_v51 = vpop.eup %5483  ;;  %v4140_v19 = vsel %vm9898_vm2, %v9741_v15, %v4136_v48  ;;  %5489 = vpow2.f32 %v4997_v20  ;;  %v4149_v60 = vsub.f32 1.0, %v4148_v37  ;;  %v4196_v15 = vadd.f32 %v9792_v28, %v4195_v47 }
 0x608   :  { %v9920_v8 = vpop.eup %5485  ;;  %5491 = vrcp.f32 %v9885_v2  ;;  %v4253_v59 = vmul.f32 %v5484_v51, %v9831_v53  ;;  %vm4198_vm0 = vweird.f32 %v9792_v28  ;;  %v4145_v48 = vsel %vm9902_vm4, %v4144_v29, %v4140_v19 }
 0x609   :  { %5493 = vrcp.f32 %v9889_v5  ;;  %vm4197_vm11 = vweird.f32 %v9705_v31  ;;  %v4201_v35 = vand.u32 2147483647, %v9705_v31  ;;  %v4203_v9 = vand.u32 2147483648, %v9705_v31 }
 0x60a   :  { %5495 = vpow2.f32 %v4998_v44  ;;  %v4254_v20 = vsub.f32 1.0, %v4253_v59  ;;  %v4208_v37 = vmul.f32 %v9920_v8, %v9824_v3  ;;  %v4263_v26 = vand.u32 2147483648, %v9831_v53  ;;  %vm9940_vm9 = vmor %vm4197_vm11, %vm4198_vm0 }
 0x60b   :  { %v5488_v23 = vpop.eup %5487  ;;  %vm4258_vm14 = vweird.f32 %v5484_v51  ;;  %v4261_v29 = vand.u32 2147483647, %v9831_v53  ;;  %v4332_v42 = vmul.f32 %v4145_v48, %v9523_v10  ;;  %v4150_v31 = vmul.f32 %v9862_v62, %v4149_v60 }
 0x60c   :  { %v3651_v1 = vpop.f32.mrf.mxu2  ;;  %v4255_v55 = vmul.f32 %v5484_v51, %v4254_v20  ;;  %v9945_v44 = vadd.f32 1.0, %v5488_v23  ;;  %v3692_v19 = vpop.f32.mrf.mxu3  ;;  %v4200_v61 = vsel %vm9940_vm9, %v9792_v28, %v4196_v15  ;;  %v9954_v18 = vadd.f32 %v9739_v6, %v9469_v41 }
 0x60d   :  { %v5490_v59 = vpop.eup %5489  ;;  %vm4257_vm8 = vweird.f32 %v9831_v53  ;;  %v9962_v10 = vadd.f32 %v9776_v34, %v9469_v41  ;;  %vm4202_vm7 = vcmp.eq.f32.partialorder %v4201_v35, 8.507059e+37  ;;  %v4204_v48 = vor.u32 1.1754944e-38, %v4203_v9 }
 0x60e   :  { %11750 = vst [vmem:[#allocation47_spill] sm:$0xff] %v9954_v18  ;;  %v9956_v20 = vpop.eup %5491  ;;  %v4256_v17 = vadd.f32 %v5484_v51, %v4255_v55  ;;  %5497 = vrcp.f32 %v9945_v44  ;;  %v4209_v28 = vsub.f32 1.0, %v4208_v37  ;;  %vm4259_vm5 = vmor %vm4257_vm8, %vm4258_vm14  ;;  %v4264_v6 = vor.u32 1.1754944e-38, %v4263_v26 }
 0x60f   :  { %11751 = vst [vmem:[#allocation64_spill] sm:$0xff] %v9956_v20  ;;  %v9964_v60 = vpop.eup %5493  ;;  %vm4153_vm10 = vweird.f32 %v9862_v62  ;;  %v9968_v23 = vadd.f32 1.0, %v5490_v59  ;;  %vm4262_vm3 = vcmp.eq.f32.partialorder %v4261_v29, 8.507059e+37  ;;  %v9971_v47 = vadd.f32 %v3651_v1, %v9446_v49 }
 0x610   :  { %11752 = vst [vmem:[#allocation33_spill] sm:$0xff] %v9962_v10  ;;  %v5496_v15 = vpop.eup %5495  ;;  %v4260_v53 = vsel %vm4259_vm5, %v5484_v51, %v4256_v17  ;;  %v11755_v41 = vand.u32 2147483647, %v9632_v24  ;;  %v4205_v35 = vsel %vm4202_vm7, %v4204_v48, %v4200_v61  ;;  %v5001_v26 = vmul.f32 -1.442695, %v9954_v18 }
 0x611   :  { %11753 = vst [vmem:[#allocation55_spill] sm:$0xff] %v9968_v23  ;;  %v4265_v9 = vsel %vm4262_vm3, %v4264_v6, %v4260_v53  ;;  %v9982_v37 = vadd.f32 %v9819_v7, %v9444_v52  ;;  %vm4152_vm12 = vweird.f32 %v9774_v39  ;;  %v9987_v17 = vmul.f32 %v9956_v20, %v9885_v2 }
 0x612   :  { %11754 = vst [vmem:[#allocation60_spill] sm:$0xff] %v9971_v47  ;;  %vm9975_vm15 = vcmp.eq.f32.partialorder %v11755_v41, 8.507059e+37  ;;  %v4340_v24 = vmul.f32 %v4265_v9, %v9689_v54  ;;  %v5002_v51 = vmul.f32 -1.442695, %v9962_v10  ;;  %v9993_v1 = vadd.f32 %v9873_v21, %v9444_v52 }
 0x613   :  { %11758 = vst [vmem:[#allocation42_spill] sm:$0xff] %v9982_v37  ;;  %v9996_v61 = vadd.f32 %v9862_v62, %v4150_v31  ;;  %v4210_v7 = vmul.f32 %v9920_v8, %v4209_v28  ;;  %v9999_v29 = vadd.f32 1.0, %v5496_v15  ;;  %v10002_v59 = vadd.f32 %v3692_v19, %v9446_v49 }
 0x614   :  { %v3654_v55 = vpop.f32.mrf.mxu2  ;;  %11759 = vst [vmem:[#allocation31_spill] sm:$0xff] %v9993_v1  ;;  %v5498_v48 = vpop.eup %5497  ;;  %v4336_v6 = vmul.f32 %v4205_v35, %v9554_v25  ;;  %5499 = vrcp.f32 %v9968_v23  ;;  %v5009_v54 = vmul.f32 -1.442695, %v9971_v47  ;;  %4352 = vmatpush.msrb.mxu0 %v4340_v24  ;;  %vm4212_vm6 = vweird.f32 %v9824_v3 }
 0x615   :  { %11760 = vst [vmem:[#allocation17_spill] sm:$0xff] %v10002_v59  ;;  %v10008_v52 = vadd.f32 %v3654_v55, %v9456_v13  ;;  %v4268_v21 = vmul.f32 %v5498_v48, %v9945_v44  ;;  %5501 = vpow2.f32 %v5001_v26  ;;  %v5005_v31 = vmul.f32 -1.442695, %v9982_v37  ;;  %v10016_v19 = vpop.f32.mrf.mxu3 }
 0x616   :  { %vm4213_vm13 = vweird.f32 %v9920_v8  ;;  %v4216_v49 = vand.u32 2147483647, %v9824_v3  ;;  %5503 = vpow2.f32 %v5002_v51  ;;  %v5006_v25 = vmul.f32 -1.442695, %v9993_v1  ;;  %4353 = vmatpush.msrb.mxu0 %v4336_v6 }
 0x617   :  { %v4211_v28 = vadd.f32 %v9920_v8, %v4210_v7  ;;  %5505 = vrcp.f32 %v9999_v29  ;;  %v4269_v15 = vsub.f32 1.0, %v4268_v21  ;;  %v5010_v53 = vmul.f32 -1.442695, %v10002_v59  ;;  %vm10042_vm4 = vmor %vm4212_vm6, %vm4213_vm13 }
 0x618   :  { %v4218_v41 = vand.u32 2147483648, %v9824_v3  ;;  %v4278_v35 = vand.u32 2147483648, %v9945_v44  ;;  %5507 = vpow2.f32 %v5009_v54  ;;  %v5013_v9 = vmul.f32 -1.442695, %v10008_v52  ;;  %4354 = vmatpush.msrb.mxu0 %v4332_v42 }
 0x619   :  { %v4270_v26 = vmul.f32 %v5498_v48, %v4269_v15  ;;  %vm4273_vm2 = vweird.f32 %v5498_v48  ;;  %v4276_v55 = vand.u32 2147483647, %v9945_v44  ;;  %5509 = vpow2.f32 %v5005_v31 }
 0x61a   :  { %v10025_v24 = vpop.eup %5499  ;;  %v11762_v51 = vsel %vm9912_vm1, %v9728_v57, %v9882_v58  ;;  %v11763_v6 = vand.u32 2147483648, %v9774_v39  ;;  %v3864_v42 = vsub.f32 1.0, %v9987_v17  ;;  %5511 = vpow2.f32 %v5006_v25  ;;  %4355 = vmatpush.msrb.mxu0 %v9908_v38  ;;  %vm10051_vm1 = vmor %vm4152_vm12, %vm4153_vm10 }
 0x61b   :  { %11761 = vst [vmem:[#allocation29_spill] sm:$0xff] %v10025_v24  ;;  %v4100_v7 = vsel %vm9975_vm15, %v9846_v27, %v11762_v51  ;;  %v5502_v57 = vpop.eup %5501  ;;  %v4215_v3 = vsel %vm10042_vm4, %v9920_v8, %v4211_v28  ;;  %v4271_v58 = vadd.f32 %v5498_v48, %v4270_v26  ;;  %vm4272_vm0 = vweird.f32 %v9945_v44 }
 0x61c   :  { %v4159_v54 = vor.u32 1.1754944e-38, %v11763_v6  ;;  %5513 = vpow2.f32 %v5010_v53  ;;  %v5504_v43 = vpop.eup %5503  ;;  %v10061_v38 = vmul.f32 %v9964_v60, %v9889_v5  ;;  %v4219_v34 = vor.u32 1.1754944e-38, %v4218_v41  ;;  %vm4274_vm11 = vmor %vm4272_vm0, %vm4273_vm2  ;;  %4356 = vmatpush.msrb.mxu0 %v9837_v0  ;;  %v3657_v25 = vpop.f32.mrf.mxu2 }
 0x61d   :  { %v4279_v17 = vor.u32 1.1754944e-38, %v4278_v35  ;;  %5515 = vpow2.f32 %v5013_v9  ;;  %v10065_v31 = vpop.eup %5505  ;;  %v4155_v8 = vsel %vm10051_vm1, %v9862_v62, %v9996_v61  ;;  %vm4217_vm9 = vcmp.eq.f32.partialorder %v4216_v49, 8.507059e+37  ;;  %v3698_v6 = vpop.f32.mrf.mxu3 }
 0x61e   :  { %11768 = vst [vmem:[#allocation27_spill] sm:$0xff] %v10065_v31  ;;  %v4275_v44 = vsel %vm4274_vm11, %v5498_v48, %v4271_v58  ;;  %vm4277_vm14 = vcmp.eq.f32.partialorder %v4276_v55, 8.507059e+37  ;;  %v5508_v28 = vpop.eup %5507  ;;  %v4220_v15 = vsel %vm4217_vm9, %v4219_v34, %v4215_v3  ;;  %v3923_v53 = vmul.f32 %v10025_v24, %v9968_v23  ;;  %4357 = vmatpush.msrb.mxu0 %v9779_v45 }
 0x61f   :  { %v4280_v41 = vsel %vm4277_vm14, %v4279_v17, %v4275_v44  ;;  %v10073_v35 = vadd.f32 1.0, %v5502_v57  ;;  %v5510_v0 = vpop.eup %5509  ;;  %v10078_v9 = vmul.f32 %v9800_v63, %v9482_v56  ;;  %v11769_v62 = vand.u32 2147483647, %v9774_v39 }
 0x620   :  { %v4341_v61 = vmul.f32 %v4280_v41, %v9834_v30  ;;  %v10083_v48 = vadd.f32 1.0, %v5504_v43  ;;  %v5512_v49 = vpop.eup %5511  ;;  %v4325_v26 = vmul.f32 %v9894_v33, %v9510_v14  ;;  %v4329_v55 = vmul.f32 %v4100_v7, %v9518_v50  ;;  %4358 = vmatpush.msrb.mxu0 %v9708_v12 }
 0x621   :  { %vm4157_vm8 = vcmp.eq.f32.partialorder %v11769_v62, 8.507059e+37  ;;  %v3865_v45 = vmul.f32 %v9956_v20, %v3864_v42  ;;  %v3873_v56 = vand.u32 2147483648, %v9885_v2  ;;  %v3879_v39 = vsub.f32 1.0, %v10061_v38 }
 0x622   :  { %v4160_v51 = vsel %vm4157_vm8, %v4159_v54, %v4155_v8  ;;  %v5514_v63 = vpop.eup %5513  ;;  %v4337_v30 = vmul.f32 %v4220_v15, %v9679_v46  ;;  %v10093_v21 = vadd.f32 1.0, %v5508_v28  ;;  %4372 = vmatpush.msrb.mxu1 %v4341_v61  ;;  %v3924_v14 = vsub.f32 1.0, %v3923_v53  ;;  %4359 = vmatpush.msrb.mxu0 %v9637_v4  ;;  %v10112_v54 = vld [vmem:[%s10861_s3] sm:$0xff]  ;;  %s4938_s3 = sld [smem:[#allocation2 + $0x180]] }
 0x623   :  { %v5516_v57 = vpop.eup %5515  ;;  %5517 = vrcp.f32 %v10073_v35  ;;  %v10096_v50 = vadd.f32 1.0, %v5510_v0  ;;  %v10100_v33 = vadd.f32 %v10016_v19, %v9456_v13  ;;  %v4333_v12 = vmul.f32 %v4160_v51, %v9622_v32  ;;  %11771 = vst [vmem:[#allocation53_spill] sm:$0xff] %v10112_v54 }
 0x624   :  { %v3938_v46 = vmul.f32 %v10065_v31, %v9999_v29  ;;  %5519 = vrcp.f32 %v10083_v48  ;;  %v10107_v7 = vadd.f32 1.0, %v5512_v49  ;;  %4373 = vmatpush.msrb.mxu1 %v4337_v30  ;;  %vm11772_vm7 = vcmask 523264   ;;  %v3660_v8 = vpop.f32.mrf.mxu2 }
 0x625   :  { %11770 = vst [vmem:[#allocation45_spill] sm:$0xff] %v10100_v33  ;;  %5023 = vmatmul.msk.f32.vlgmr.msrb.gmra.mxu0 %vm11772_vm7, %v10112_v54  ;;  %v10117_v13 = vadd.f32 %v9956_v20, %v3865_v45  ;;  %vm3867_vm5 = vweird.f32 %v9885_v2  ;;  %vm3868_vm10 = vweird.f32 %v9956_v20  ;;  %v10122_v32 = vadd.f32 %v3657_v25, %v9440_v16  ;;  %v3701_v49 = vpop.f32.mrf.mxu3  ;;  %vm11785_vm13 = vmmov %vm11772_vm7 }
 0x626   :  { %5521 = vrcp.f32 %v10093_v21  ;;  %v10126_v19 = vadd.f32 1.0, %v5514_v63  ;;  %v10128_v42 = vadd.f32 1.0, %v5516_v57  ;;  %4374 = vmatpush.msrb.mxu1 %v4333_v12  ;;  %v10130_v27 = vor.u32 1.1754944e-38, %v3873_v56  ;;  %vm10135_vm3 = vmor %vm3867_vm5, %vm3868_vm10 }
 0x627   :  { %11773 = vst [vmem:[#allocation18_spill] sm:$0xff] %v10117_v13  ;;  %v3925_v3 = vmul.f32 %v10025_v24, %v3924_v14  ;;  %5523 = vrcp.f32 %v10096_v50  ;;  %v5014_v58 = vmul.f32 -1.442695, %v10100_v33  ;;  %v11775_v43 = vmov 0 }
 0x628   :  { %11774 = vst [vmem:[#allocation56_spill] sm:$0xff] %v10130_v27  ;;  %v11776_v43 = vsel %vm10135_vm3, 4294967295, %v11775_v43  ;;  %v3880_v38 = vmul.f32 %v9964_v60, %v3879_v39  ;;  %v3939_v17 = vsub.f32 1.0, %v3938_v46  ;;  %5525 = vrcp.f32 %v10107_v7  ;;  %4375 = vmatpush.msrb.mxu1 %v4329_v55 }
 0x629   :  { %11777 = vst [vmem:[#allocation34_spill] sm:$0xff] %v11776_v43  ;;  %v10142_v44 = vpop.eup %5517  ;;  %5527 = vrcp.f32 %v10128_v42  ;;  %v5017_v15 = vmul.f32 -1.442695, %v10122_v32  ;;  %vm3927_vm15 = vweird.f32 %v9968_v23  ;;  %vm3928_vm12 = vweird.f32 %v10025_v24 }
 0x62a   :  { %v10151_v53 = vpop.eup %5519  ;;  %v3933_v41 = vand.u32 2147483648, %v9968_v23  ;;  %5529 = vrcp.f32 %v10126_v19  ;;  %4376 = vmatpush.msrb.mxu1 %v4325_v26  ;;  %v10158_v0 = vadd.f32 %v10025_v24, %v3925_v3  ;;  %v10161_v62 = vadd.f32 %v3698_v6, %v9440_v16  ;;  %vm10188_vm6 = vmor %vm3927_vm15, %vm3928_vm12 }
 0x62b   :  { %5531 = vpow2.f32 %v5014_v58  ;;  %v10164_v61 = vadd.f32 %v3660_v8, %v9442_v36  ;;  %v10169_v51 = vadd.f32 %v9964_v60, %v3880_v38  ;;  %v3940_v26 = vmul.f32 %v10065_v31, %v3939_v17 }
 0x62c   :  { %11778 = vst [vmem:[#allocation44_spill] sm:$0xff] %v10158_v0  ;;  %v10166_v55 = vpop.eup %5521  ;;  %v3983_v63 = vmul.f32 %v10142_v44, %v10073_v35  ;;  %4377 = vmatpush.msrb.mxu1 %v10078_v9  ;;  %v3998_v6 = vmul.f32 %v10151_v53, %v10083_v48  ;;  %5533 = vpow2.f32 %v5017_v15  ;;  %v5018_v56 = vmul.f32 -1.442695, %v10161_v62 }
 0x62d   :  { %11779 = vst [vmem:[#allocation61_spill] sm:$0xff] %v10169_v51  ;;  %v10176_v16 = vpop.eup %5523  ;;  %v5021_v39 = vmul.f32 -1.442695, %v10164_v61  ;;  %v11780_v57 = vmov 0  ;;  %v10192_v9 = vor.u32 1.1754944e-38, %v3933_v41  ;;  %v10197_v46 = vadd.f32 %v3701_v49, %v9442_v36 }
 0x62e   :  { %v10182_v30 = vpop.eup %5525  ;;  %v11781_v57 = vsel %vm10188_vm6, 4294967295, %v11780_v57  ;;  %4378 = vmatpush.msrb.mxu1 %v9731_v11  ;;  %v3993_v38 = vand.u32 2147483648, %v10073_v35  ;;  %v4103_v17 = vmul.f32 %v10166_v55, %v10093_v21  ;;  %5535 = vpow2.f32 %v5018_v56 }
 0x62f   :  { %11782 = vst [vmem:[#allocation22_spill] sm:$0xff] %v11781_v57  ;;  %v10200_v3 = vpop.eup %5527  ;;  %v10212_v36 = vadd.f32 %v10065_v31, %v3940_v26  ;;  %v3984_v15 = vsub.f32 1.0, %v3983_v63  ;;  %v4043_v41 = vmul.f32 %v10176_v16, %v10096_v50  ;;  %v3999_v34 = vsub.f32 1.0, %v3998_v6 }
 0x630   :  { %11783 = vst [vmem:[#allocation12_spill] sm:$0xff] %v10192_v9  ;;  %v10209_v8 = vpop.eup %5529  ;;  %4379 = vmatpush.msrb.mxu1 %v9640_v40  ;;  %v4058_v25 = vmul.f32 %v10182_v30, %v10107_v7  ;;  %5537 = vpow2.f32 %v5021_v39  ;;  %v5022_v56 = vmul.f32 -1.442695, %v10197_v46  ;;  %v4163_v28 = vmul.f32 %v10200_v3, %v10128_v42 }
 0x631   :  { %11784 = vst [vmem:[#allocation62_spill] sm:$0xff] %v10212_v36  ;;  %v5532_v49 = vpop.eup %5531  ;;  %5024 = vmatmul.msk.f32.vlgmr.msrb.gmra.mxu1 %vm11785_vm13, %v10112_v54  ;;  %v10229_v6 = vor.u32 1.1754944e-38, %v3993_v38  ;;  %v4053_v14 = vand.u32 2147483648, %v10096_v50  ;;  %v4104_v39 = vsub.f32 1.0, %v4103_v17  ;;  %v4044_v58 = vsub.f32 1.0, %v4043_v41 }
 0x632   :  { %v10227_v4 = vadd.f32 1.0, %v5532_v49  ;;  %v5534_v40 = vpop.eup %5533  ;;  %5539 = vpow2.f32 %v5022_v56  ;;  %v4118_v45 = vmul.f32 %v10209_v8, %v10126_v19  ;;  %v3985_v63 = vmul.f32 %v10142_v44, %v3984_v15 }
 0x633   :  { %11786 = vst [vmem:[#allocation67_spill] sm:$0xff] %v10229_v6  ;;  %v4000_v49 = vmul.f32 %v10151_v53, %v3999_v34  ;;  %v4059_v11 = vsub.f32 1.0, %v4058_v25  ;;  %v10238_v38 = vadd.f32 1.0, %v5534_v40  ;;  %v4113_v17 = vand.u32 2147483648, %v10093_v21 }
 0x634   :  { %5541 = vrcp.f32 %v10227_v4  ;;  %v5536_v26 = vpop.eup %5535  ;;  %v4164_v41 = vsub.f32 1.0, %v4163_v28  ;;  %v10244_v22 = vor.u32 1.1754944e-38, %v4053_v14  ;;  %v4105_v27 = vmul.f32 %v10166_v55, %v4104_v39 }
 0x635   :  { %v10242_v56 = vadd.f32 1.0, %v5536_v26  ;;  %5543 = vrcp.f32 %v10238_v38  ;;  %v4045_v34 = vmul.f32 %v10176_v16, %v4044_v58  ;;  %vm4107_vm2 = vweird.f32 %v10093_v21 }
 0x636   :  { %v5538_v12 = vpop.eup %5537  ;;  %v4119_v25 = vsub.f32 1.0, %v4118_v45  ;;  %v10253_v28 = vadd.f32 %v10142_v44, %v3985_v63  ;;  %v10256_v14 = vadd.f32 %v10151_v53, %v4000_v49  ;;  %v4060_v26 = vmul.f32 %v10182_v30, %v4059_v11 }
 0x637   :  { %5545 = vrcp.f32 %v10242_v56  ;;  %v10262_v54 = vor.u32 1.1754944e-38, %v4113_v17  ;;  %v4165_v58 = vmul.f32 %v10200_v3, %v4164_v41  ;;  %v10265_v45 = vadd.f32 1.0, %v5538_v12 }
 0x638   :  { %v5540_v15 = vpop.eup %5539  ;;  %v10270_v63 = vadd.f32 %v10166_v55, %v4105_v27  ;;  %vm4108_vm4 = vweird.f32 %v10166_v55  ;;  %v4173_v11 = vand.u32 2147483648, %v10128_v42  ;;  %v10276_v40 = vadd.f32 %v10176_v16, %v4045_v34 }
 0x639   :  { %v10267_v10 = vadd.f32 1.0, %v5540_v15  ;;  %v4120_v17 = vmul.f32 %v10209_v8, %v4119_v25  ;;  %5547 = vrcp.f32 %v10265_v45  ;;  %v10285_v27 = vadd.f32 %v10182_v30, %v4060_v26  ;;  %vm10294_vm0 = vmor %vm4107_vm2, %vm4108_vm4 }
 0x63a   :  { %v10260_v39 = vpop.eup %5541  ;;  %vm4167_vm1 = vweird.f32 %v10128_v42  ;;  %v10299_v49 = vadd.f32 %v10200_v3, %v4165_v58  ;;  %vm4168_vm11 = vweird.f32 %v10200_v3  ;;  %v4171_v26 = vand.u32 2147483647, %v10128_v42 }
 0x63b   :  { %v4178_v12 = vmul.f32 %v10260_v39, %v10227_v4  ;;  %v10282_v41 = vpop.eup %5543  ;;  %5549 = vrcp.f32 %v10267_v10  ;;  %v10309_v20 = vor.u32 1.1754944e-38, %v4173_v11  ;;  %v4231_v43 = vand.u32 2147483647, %v10238_v38  ;;  %vm10320_vm9 = vmor %vm4167_vm1, %vm4168_vm11 }
 0x63c   :  { %v4223_v15 = vmul.f32 %v10282_v41, %v10238_v38  ;;  %v10315_v18 = vadd.f32 %v10209_v8, %v4120_v17  ;;  %v4233_v9 = vand.u32 2147483648, %v10238_v38  ;;  %vm4182_vm14 = vweird.f32 %v10227_v4 }
 0x63d   :  { %v10290_v34 = vpop.eup %5545  ;;  %v4179_v2 = vsub.f32 1.0, %v4178_v12  ;;  %vm4227_vm7 = vweird.f32 %v10238_v38  ;;  %vm10340_vm15 = vcmp.eq.f32.partialorder %v4231_v43, 8.507059e+37  ;;  %v4246_v11 = vand.u32 2147483647, %v10242_v56 }
 0x63e   :  { %v4238_v58 = vmul.f32 %v10290_v34, %v10242_v56  ;;  %v4224_v1 = vsub.f32 1.0, %v4223_v15  ;;  %v4248_v42 = vand.u32 2147483648, %v10242_v56  ;;  %vm4183_vm2 = vweird.f32 %v10260_v39 }
 0x63f   :  { %v10327_v57 = vpop.eup %5547  ;;  %v4180_v13 = vmul.f32 %v10260_v39, %v4179_v2  ;;  %v4234_v43 = vor.u32 1.1754944e-38, %v4233_v9  ;;  %vm10357_vm11 = vcmp.eq.f32.partialorder %v4171_v26, 8.507059e+37  ;;  %vm4228_vm12 = vweird.f32 %v10282_v41  ;;  %vm10380_vm10 = vmor %vm4182_vm14, %vm4183_vm2 }
 0x640   :  { %v4239_v24 = vsub.f32 1.0, %v4238_v58  ;;  %v4225_v17 = vmul.f32 %v10282_v41, %v4224_v1  ;;  %v4283_v1 = vmul.f32 %v10327_v57, %v10265_v45  ;;  %v4291_v2 = vand.u32 2147483647, %v10265_v45  ;;  %vm10395_vm14 = vmor %vm4227_vm7, %vm4228_vm12 }
 0x641   :  { %v10337_v12 = vpop.eup %5549  ;;  %vm4243_vm4 = vweird.f32 %v10290_v34  ;;  %v4293_v26 = vand.u32 2147483648, %v10265_v45  ;;  %v11796_v6 = vmov 0  ;;  %vm10399_vm2 = vcmp.eq.f32.partialorder %v4246_v11, 8.507059e+37  ;;  %v11854_v11 = vld [vmem:[#allocation17_spill] sm:$0xff] }
 0x642   :  { %v4240_v58 = vmul.f32 %v10290_v34, %v4239_v24  ;;  %v4298_v51 = vmul.f32 %v10337_v12, %v10267_v10  ;;  %v4226_v37 = vadd.f32 %v10282_v41, %v4225_v17  ;;  %v4284_v23 = vsub.f32 1.0, %v4283_v1  ;;  %v11843_v24 = vld [vmem:[#allocation27_spill] sm:$0xff] }
 0x643   :  { %v11795_v17 = vand.u32 2147483647, %v10093_v21  ;;  %v4308_v21 = vand.u32 2147483648, %v10267_v10  ;;  %v11804_v31 = vand.u32 2147483647, %v10096_v50  ;;  %vm11807_vm7 = vweird.f32 %v10242_v56 }
 0x644   :  { %v4241_v9 = vadd.f32 %v10290_v34, %v4240_v58  ;;  %v4299_v59 = vsub.f32 1.0, %v4298_v51  ;;  %v4285_v58 = vmul.f32 %v10327_v57, %v4284_v23  ;;  %v4306_v51 = vand.u32 2147483647, %v10267_v10  ;;  %vm10418_vm12 = vmor %vm11807_vm7, %vm4243_vm4  ;;  %v11852_v23 = vld [vmem:[#allocation67_spill] sm:$0xff] }
 0x645   :  { %vm10372_vm8 = vcmp.eq.f32.partialorder %v11795_v17, 8.507059e+37  ;;  %v4181_v17 = vadd.f32 %v10260_v39, %v4180_v13  ;;  %vm10407_vm5 = vcmp.eq.f32.partialorder %v11804_v31, 8.507059e+37  ;;  %v11805_v13 = vmov 0 }
 0x646   :  { %v11797_v6 = vsel %vm10372_vm8, 4294967295, %v11796_v6  ;;  %v4300_v47 = vmul.f32 %v10337_v12, %v4299_v59  ;;  %v11806_v13 = vsel %vm10407_vm5, 4294967295, %v11805_v13  ;;  %v4230_v38 = vsel %vm10395_vm14, %v10282_v41, %v4226_v37 }
 0x647   :  { %v4249_v59 = vor.u32 1.1754944e-38, %v4248_v42  ;;  %v4286_v33 = vadd.f32 %v10327_v57, %v4285_v58  ;;  %vm4287_vm1 = vweird.f32 %v10265_v45  ;;  %v4245_v37 = vsel %vm10418_vm12, %v10290_v34, %v4241_v9 }
 0x648   :  { %vm11810_vm14 = vweird.f32 %v10327_v57  ;;  %v4294_v31 = vor.u32 1.1754944e-38, %v4293_v26  ;;  %v4301_v36 = vadd.f32 %v10337_v12, %v4300_v47  ;;  %vm4302_vm4 = vweird.f32 %v10267_v10 }
 0x649   :  { %vm4289_vm6 = vmor %vm4287_vm1, %vm11810_vm14  ;;  %vm4292_vm7 = vcmp.eq.f32.partialorder %v4291_v2, 8.507059e+37  ;;  %vm11811_vm5 = vweird.f32 %v10337_v12  ;;  %vm4307_vm8 = vcmp.eq.f32.partialorder %v4306_v51, 8.507059e+37  ;;  %v4309_v45 = vor.u32 1.1754944e-38, %v4308_v21  ;;  %v11851_v21 = vld [vmem:[#allocation62_spill] sm:$0xff] }
 0x64a   :  { %v4290_v56 = vsel %vm4289_vm6, %v10327_v57, %v4286_v33  ;;  %vm4304_vm13 = vmor %vm4302_vm4, %vm11811_vm5  ;;  %vm3882_vm3 = vweird.f32 %v9889_v5  ;;  %v4185_v41 = vsel %vm10380_vm10, %v10260_v39, %v4181_v17  ;;  %v4235_v34 = vsel %vm10340_vm15, %v4234_v43, %v4230_v38  ;;  %v11865_v33 = vld [vmem:[#allocation29_spill] sm:$0xff] }
 0x64b   :  { %v4295_v47 = vsel %vm4292_vm7, %v4294_v31, %v4290_v56  ;;  %v4305_v10 = vsel %vm4304_vm13, %v10337_v12, %v4301_v36  ;;  %vm11812_vm6 = vweird.f32 %v10209_v8  ;;  %vm11813_vm1 = vweird.f32 %v10126_v19  ;;  %v11870_v12 = vld [vmem:[#allocation31_spill] sm:$0xff] }
 0x64c   :  { %vm10447_vm12 = vmor %vm11813_vm1, %vm11812_vm6  ;;  %v11816_v57 = vand.u32 2147483648, %v10227_v4  ;;  %v4250_v39 = vsel %vm10399_vm2, %v4249_v59, %v4245_v37  ;;  %v4342_v15 = vmul.f32 %v4295_v47, %v10164_v61  ;;  %v4310_v43 = vsel %vm4307_vm8, %v4309_v45, %v4305_v10  ;;  %v11858_v37 = vld [vmem:[#allocation55_spill] sm:$0xff]  ;;  %v11863_v10 = vld [vmem:[#allocation22_spill] sm:$0xff] }
 0x64d   :  { %vm11817_vm5 = vweird.f32 %v10176_v16  ;;  %vm11818_vm10 = vweird.f32 %v10096_v50  ;;  %v4125_v2 = vsel %vm10447_vm12, %v10209_v8, %v10315_v18  ;;  %v11821_v9 = vsel %vm10320_vm9, %v10200_v3, %v10299_v49  ;;  %v11893_v59 = vld [vmem:[#allocation57_spill] sm:$0xff] }
 0x64e   :  { %v4189_v42 = vor.u32 1.1754944e-38, %v11816_v57  ;;  %vm10460_vm15 = vmor %vm11818_vm10, %vm11817_vm5  ;;  %v4175_v61 = vsel %vm10357_vm11, %v10309_v20, %v11821_v9  ;;  %v11822_v50 = vand.u32 2147483647, %v10227_v4  ;;  %v4343_v26 = vmul.f32 %v4310_v43, %v10197_v46  ;;  %4392 = vmatpush.msrb.mxu2 %v4342_v15  ;;  %v11866_v57 = vld [vmem:[#allocation44_spill] sm:$0xff]  ;;  %v11871_v9 = vld [vmem:[#allocation41_spill] sm:$0xff] }
 0x64f   :  { %v4050_v1 = vsel %vm10460_vm15, %v10176_v16, %v10276_v40  ;;  %vm11823_vm13 = vweird.f32 %v10182_v30  ;;  %vm11824_vm2 = vweird.f32 %v10107_v7  ;;  %v11827_v20 = vand.u32 2147483648, %v10126_v19 }
 0x650   :  { %vm4187_vm8 = vcmp.eq.f32.partialorder %v11822_v50, 8.507059e+37  ;;  %vm10487_vm14 = vmor %vm11824_vm2, %vm11823_vm13  ;;  %v4338_v3 = vmul.f32 %v4235_v34, %v10122_v32  ;;  %vm11828_vm9 = vweird.f32 %v10142_v44  ;;  %vm11829_vm11 = vweird.f32 %v10073_v35  ;;  %4412 = vmatpush.msrb.mxu3 %v4343_v26  ;;  %v11862_v34 = vld [vmem:[#allocation61_spill] sm:$0xff] }
 0x651   :  { %v4129_v0 = vor.u32 1.1754944e-38, %v11827_v20  ;;  %v4190_v4 = vsel %vm4187_vm8, %v4189_v42, %v4185_v41  ;;  %vm10498_vm4 = vmor %vm11829_vm11, %vm11828_vm9  ;;  %v4065_v46 = vsel %vm10487_vm14, %v10182_v30, %v10285_v27  ;;  %v11832_v8 = vsel %vm10294_vm0, %v10166_v55, %v10270_v63  ;;  %v11842_v27 = vld [vmem:[#allocation45_spill] sm:$0xff]  ;;  %v11875_v20 = vld [vmem:[#allocation34_spill] sm:$0xff] }
 0x652   :  { %vm11833_vm7 = vnez %v11797_v6  ;;  %v11834_v40 = vand.u32 2147483647, %v10126_v19  ;;  %v4339_v49 = vmul.f32 %v4250_v39, %v10161_v62  ;;  %v3990_v30 = vsel %vm10498_vm4, %v10142_v44, %v10253_v28  ;;  %4393 = vmatpush.msrb.mxu2 %v4338_v3  ;;  %v11868_v39 = vld [vmem:[#allocation12_spill] sm:$0xff]  ;;  %v11884_v55 = vld [vmem:[#allocation30_spill] sm:$0xff] }
 0x653   :  { %v4115_v32 = vsel %vm11833_vm7, %v10262_v54, %v11832_v8  ;;  %vm11835_vm1 = vweird.f32 %v10151_v53  ;;  %vm11836_vm12 = vweird.f32 %v10083_v48  ;;  %v11839_v54 = vand.u32 2147483648, %v10107_v7  ;;  %v11882_v8 = vld [vmem:[#allocation33_spill] sm:$0xff] }
 0x654   :  { %vm4127_vm6 = vcmp.eq.f32.partialorder %v11834_v40, 8.507059e+37  ;;  %vm10525_vm0 = vmor %vm11836_vm12, %vm11835_vm1  ;;  %v4334_v62 = vmul.f32 %v4175_v61, %v10008_v52  ;;  %vm11840_vm5 = vnez %v11806_v13  ;;  %v11841_v63 = vand.u32 2147483647, %v10107_v7  ;;  %4413 = vmatpush.msrb.mxu3 %v4339_v49  ;;  %v11850_v7 = vld [vmem:[#allocation60_spill] sm:$0xff]  ;;  %v11883_v49 = vld [vmem:[#allocation39_spill] sm:$0xff] }
 0x655   :  { %v4069_v19 = vor.u32 1.1754944e-38, %v11839_v54  ;;  %v4130_v6 = vsel %vm4127_vm6, %v4129_v0, %v4125_v2  ;;  %v4005_v44 = vsel %vm10525_vm0, %v10151_v53, %v10256_v14  ;;  %v4055_v28 = vsel %vm11840_vm5, %v10244_v22, %v4050_v1  ;;  %v11874_v1 = vld [vmem:[#allocation47_spill] sm:$0xff]  ;;  %v11877_v0 = vld [vmem:[#allocation64_spill] sm:$0xff]  ;;  %v4945_v52 = vld [vmem:[%s10863_s5 + $0x30] sm:$0xff] }
 0x656   :  { %vm4067_vm10 = vcmp.eq.f32.partialorder %v11841_v63, 8.507059e+37  ;;  %v4335_v25 = vmul.f32 %v4190_v4, %v11842_v27  ;;  %vm11844_vm15 = vweird.f32 %v11843_v24  ;;  %vm11845_vm8 = vweird.f32 %v9999_v29  ;;  %4394 = vmatpush.msrb.mxu2 %v4334_v62  ;;  %v11878_v4 = vld [vmem:[#allocation18_spill] sm:$0xff]  ;;  %v11886_v62 = vld [vmem:[#allocation28_spill] sm:$0xff]  ;;  %v11890_v27 = vld [vmem:[#allocation35_spill] sm:$0xff] }
 0x657   :  { %vm10546_vm13 = vmor %vm11845_vm8, %vm11844_vm15  ;;  %v11848_v53 = vand.u32 2147483647, %v10073_v35  ;;  %v11849_v14 = vand.u32 2147483648, %v10083_v48  ;;  %v4070_v58 = vsel %vm4067_vm10, %v4069_v19, %v4065_v46  ;;  %v4330_v51 = vmul.f32 %v4115_v32, %v11850_v7  ;;  %v11885_v19 = vld [vmem:[#allocation48_spill] sm:$0xff] }
 0x658   :  { %v3945_v17 = vsel %vm10546_vm13, %v11843_v24, %v11851_v21  ;;  %v11853_v38 = vand.u32 2147483647, %v10083_v48  ;;  %v4331_v35 = vmul.f32 %v4130_v6, %v11854_v11  ;;  %4414 = vmatpush.msrb.mxu3 %v4335_v25  ;;  %vm11855_vm9 = vweird.f32 %v9964_v60  ;;  %v11861_v48 = vld [vmem:[#allocation42_spill] sm:$0xff] }
 0x659   :  { %vm3992_vm2 = vcmp.eq.f32.partialorder %v11848_v53, 8.507059e+37  ;;  %v4009_v22 = vor.u32 1.1754944e-38, %v11849_v14  ;;  %vm10567_vm11 = vmor %vm3882_vm3, %vm11855_vm9  ;;  %v11859_v31 = vand.u32 2147483647, %v11858_v37  ;;  %v11860_v36 = vand.u32 2147483648, %v9999_v29  ;;  %4395 = vmatpush.msrb.mxu2 %v4330_v51 }
 0x65a   :  { %v3995_v13 = vsel %vm3992_vm2, %v11852_v23, %v3990_v30  ;;  %vm4007_vm14 = vcmp.eq.f32.partialorder %v11853_v38, 8.507059e+37  ;;  %v4326_v41 = vmul.f32 %v4055_v28, %v11861_v48  ;;  %v3885_v47 = vsel %vm10567_vm11, %v9964_v60, %v11862_v34  ;;  %4415 = vmatpush.msrb.mxu3 %v4331_v35  ;;  %v11897_v48 = vld [vmem:[#allocation58_spill] sm:$0xff] }
 0x65b   :  { %vm3932_vm4 = vcmp.eq.f32.partialorder %v11859_v31, 8.507059e+37  ;;  %v3949_v56 = vor.u32 1.1754944e-38, %v11860_v36  ;;  %v4010_v45 = vsel %vm4007_vm14, %v4009_v22, %v4005_v44  ;;  %vm11864_vm3 = vnez %v11863_v10 }
 0x65c   :  { %v11867_v42 = vsel %vm11864_vm3, %v11865_v33, %v11866_v57  ;;  %v11869_v43 = vand.u32 2147483647, %v9999_v29  ;;  %v4327_v2 = vmul.f32 %v4070_v58, %v11870_v12  ;;  %v11872_v61 = vand.u32 2147483647, %v11871_v9  ;;  %4396 = vmatpush.msrb.mxu2 %v4326_v41  ;;  %v11880_v29 = vld [vmem:[#allocation56_spill] sm:$0xff] }
 0x65d   :  { %v3935_v15 = vsel %vm3932_vm4, %v11868_v39, %v11867_v42  ;;  %v11873_v50 = vand.u32 2147483648, %v9889_v5  ;;  %v4322_v18 = vmul.f32 %v3995_v13, %v11874_v1  ;;  %vm11876_vm1 = vnez %v11875_v20 }
 0x65e   :  { %vm3947_vm7 = vcmp.eq.f32.partialorder %v11869_v43, 8.507059e+37  ;;  %vm3872_vm6 = vcmp.eq.f32.partialorder %v11872_v61, 8.507059e+37  ;;  %v11879_v3 = vsel %vm11876_vm1, %v11877_v0, %v11878_v4  ;;  %v11881_v46 = vand.u32 2147483647, %v9889_v5  ;;  %4416 = vmatpush.msrb.mxu3 %v4327_v2  ;;  %v11887_v5 = vld [vmem:[#allocation53_spill] sm:$0xff] }
 0x65f   :  { %v3889_v26 = vor.u32 1.1754944e-38, %v11873_v50  ;;  %v3950_v60 = vsel %vm3947_vm7, %v3949_v56, %v3945_v17  ;;  %v3875_v16 = vsel %vm3872_vm6, %v11880_v29, %v11879_v3  ;;  %v4323_v32 = vmul.f32 %v4010_v45, %v11882_v8  ;;  %4397 = vmatpush.msrb.mxu2 %v4322_v18  ;;  %v11892_v17 = vld [vmem:[#allocation40_spill] sm:$0xff]  ;;  %v11895_v56 = vld [vmem:[#allocation38_spill] sm:$0xff]  ;;  %v11903_v8 = vld [vmem:[#allocation19_spill] sm:$0xff] }
 0x660   :  { %vm3887_vm12 = vcmp.eq.f32.partialorder %v11881_v46, 8.507059e+37  ;;  %v4318_v30 = vmul.f32 %v3935_v15, %v11883_v49  ;;  %v4319_v54 = vmul.f32 %v3950_v60, %v11884_v55  ;;  %v4314_v6 = vmul.f32 %v3875_v16, %v11885_v19  ;;  %v11901_v29 = vld [vmem:[#allocation16_spill] sm:$0xff] }
 0x661   :  { %v3890_v40 = vsel %vm3887_vm12, %v3889_v26, %v3885_v47  ;;  %4417 = vmatpush.msrb.mxu3 %v4323_v32  ;;  %vm11888_vm0 = vcmask 523264   ;;  %v10611_v63 = vstv %s4938_s3  ;;  %v4480_v22 = vmul.f32 %v4945_v52, %v4945_v52  ;;  %v11899_v47 = vld [vmem:[#allocation21_spill] sm:$0xff] }
 0x662   :  { %4398 = vmatpush.msrb.mxu2 %v4318_v30  ;;  %v4315_v44 = vmul.f32 %v3890_v40, %v11886_v62  ;;  %vm11889_vm5 = vmmov %vm11888_vm0  ;;  %vm11891_vm10 = vcmask 1043456   ;;  %v10629_v21 = vstv %s4939_s4  ;;  %v4466_v38 = vstv %s10624_s2 }
 0x663   :  { %4418 = vmatpush.msrb.mxu3 %v4319_v54  ;;  %v4469_v11 = vstv %s10621_s25  ;;  %v10636_v35 = vstv %s4474_s26  ;;  %vm11894_vm15 = vmmov %vm11891_vm10  ;;  %v10657_v12 = vstv %s10615_s21  ;;  %v10659_v60 = vstv %s4532_s27 }
 0x664   :  { %4399 = vmatpush.msrb.mxu2 %v4314_v6  ;;  %v1120_v37 = vsel %vm11894_vm15, %v11893_v59, 0.0  ;;  %vm11896_vm8 = vmmov %vm11891_vm10  ;;  %v4470_v57 = vmul.f32 %v4469_v11, %v11892_v17  ;;  %v4476_v42 = vmul.f32 %v4945_v52, %v10636_v35  ;;  %v4538_v20 = vmul.f32 %v4945_v52, %v10657_v12 }
 0x665   :  { %4419 = vmatpush.msrb.mxu3 %v4315_v44  ;;  %5025 = vmatmul.msk.f32.vlgmr.msrb.gmra.mxu2 %vm11888_vm0, %v11887_v5  ;;  %v1127_v45 = vsel %vm11896_vm8, %v11895_v56, 0.0  ;;  %vm11898_vm13 = vmmov %vm11896_vm8  ;;  %v1121_v39 = vrot.slane %v1120_v37, 4 }
 0x666   :  { %5026 = vmatmul.msk.f32.vlgmr.msrb.gmra.mxu3 %vm11889_vm5, %v11887_v5  ;;  %v1134_v41 = vsel %vm11898_vm13, %v11897_v48, 0.0  ;;  %vm11900_vm2 = vmmov %vm11896_vm8  ;;  %v1128_v43 = vrot.slane %v1127_v45, 4 }
 0x667   :  { %v1141_v10 = vsel %vm11900_vm2, %v11899_v47, 0.0  ;;  %v1135_v9 = vrot.slane %v1134_v41, 4  ;;  %v1122_v1 = vadd.f32 %v1121_v39, %v1120_v37  ;;  %vm11902_vm14 = vmmov %vm11900_vm2  ;;  %v11915_v39 = vld [vmem:[#allocation54_spill] sm:$0xff] }
 0x668   :  { %v1142_v61 = vrot.slane %v1141_v10, 4  ;;  %v1129_v0 = vadd.f32 %v1128_v43, %v1127_v45  ;;  %v2245_v16 = vsel %vm11902_vm14, %v11901_v29, 0.0  ;;  %vm11904_vm9 = vmmov %vm11900_vm2 }
 0x669   :  { %v1136_v4 = vadd.f32 %v1135_v9, %v1134_v41  ;;  %v2252_v32 = vsel %vm11904_vm9, %v11903_v8, 0.0  ;;  %v1123_v40 = vrot.slane %v1122_v1, 2  ;;  %v2246_v55 = vrot.slane %v2245_v16, 4  ;;  %vm11906_vm11 = vmmov %vm11900_vm2 }
 0x66a   :  { %v1143_v3 = vadd.f32 %v1142_v61, %v1141_v10  ;;  %v1130_v30 = vrot.slane %v1129_v0, 2  ;;  %v2253_v6 = vrot.slane %v2252_v32, 4  ;;  %vm11908_vm4 = vmmov %vm11900_vm2 }
 0x66b   :  { %v1137_v54 = vrot.slane %v1136_v4, 2  ;;  %vm11910_vm3 = vmmov %vm11900_vm2 }
 0x66c   :  { %v1144_v19 = vrot.slane %v1143_v3, 2  ;;  %v1131_v52 = vadd.f32 %v1130_v30, %v1129_v0  ;;  %vm11912_vm7 = vmmov %vm11900_vm2 }
 0x66d   :  { %vm11914_vm6 = vmmov %vm11900_vm2 }
 0x66e   :  { %v1132_v48 = vrot.slane %v1131_v52, 1  ;;  %vm11916_vm1 = vmmov %vm11900_vm2 }
 0x66f   :  { %vm11918_vm12 = vmmov %vm11916_vm1 }
 0x670   :  { %v1133_v61 = vadd.f32 %v1132_v48, %v1131_v52  ;;  %vm11920_vm0 = vmmov %vm11916_vm1 }
 0x671   :  { %vm11923_vm5 = vmmov %vm11920_vm0 }
 0x672   :  { %vm11927_vm15 = vmmov %vm11920_vm0 }
 0x673   :  { %vm11929_vm8 = vmmov %vm11920_vm0 }
 0x674   :  { %vm11930_vm13 = vmmov %vm11920_vm0 }
 0x675   :  { %vm11932_vm2 = vmmov %vm11920_vm0 }
 0x676   :  { %vm11934_vm14 = vmmov %vm11920_vm0 }
 0x677   :  { %vm11936_vm9 = vmmov %vm11920_vm0 }
 0x6a2   :  { %v4361_v28 = vpop.f32.mrf.mxu0 }
 0x6a3   :  { %v4362_v25 = vadd.f32 %v4361_v28, %v11890_v27  ;;  %v1124_v28 = vadd.f32 %v1123_v40, %v1122_v1  ;;  %v11917_v1 = vld [vmem:[#allocation23_spill] sm:$0xff]  ;;  %v11921_v40 = vld [vmem:[#allocation46_spill] sm:$0xff] }
 0x6a5   :  { %v4425_v24 = vmul.f32 %v10611_v63, %v4362_v25  ;;  %v11905_v25 = vld [vmem:[#allocation59_spill] sm:$0xff] }
 0x6a7   :  { %4448 = vst.sshfl [vmem:[#allocation1] sm:$0xff pattern:$0x75316420] %v4425_v24 }
 0x6ae   :  { %v4381_v53 = vpop.f32.mrf.mxu1 }
 0x6af   :  { %v4382_v14 = vadd.f32 %v4381_v53, %v11890_v27  ;;  %v2247_v53 = vadd.f32 %v2246_v55, %v2245_v16 }
 0x6b1   :  { %v4426_v58 = vmul.f32 %v10611_v63, %v4382_v14  ;;  %v11907_v14 = vld [vmem:[#allocation65_spill] sm:$0xff]  ;;  %v2248_v41 = vrot.slane %v2247_v53, 2 }
 0x6b3   :  { %v4433_v7 = vrot.slane %v4426_v58, 4  ;;  %4449 = vst.sshfl [vmem:[#allocation1 + $0x8] sm:$0xff pattern:$0x75316420] %v4426_v58  ;;  %v1138_v58 = vadd.f32 %v1137_v54, %v1136_v4  ;;  %v11919_v4 = vld [vmem:[#allocation37_spill] sm:$0xff] }
 0x6b4   :  { %4484 = vst [vmem:[#allocation1] ss:$2 sm:$0xff] %v4480_v22  ;;  %v1189_v22 = vsel %vm11908_vm4, %v11907_v14, 0.0  ;;  %vm11941_vm4 = vmmov %vm11920_vm0 }
 0x6b5   :  { %v4435_v51 = vsel %vm11891_vm10, %v4425_v24, %v4433_v7  ;;  %v1182_v24 = vsel %vm11906_vm11, %v11905_v25, 0.0  ;;  %v1145_v7 = vadd.f32 %v1144_v19, %v1143_v3  ;;  %v1190_v45 = vrot.slane %v1189_v22, 4  ;;  %vm11925_vm10 = vmmov %vm11920_vm0 }
 0x6b6   :  { %v4439_v23 = vsub.f32 %v11892_v17, %v4435_v51  ;;  %v11909_v51 = vld [vmem:[#allocation66_spill] sm:$0xff]  ;;  %v1183_v37 = vrot.slane %v1182_v24, 4  ;;  %v1139_v47 = vrot.slane %v1138_v58, 1  ;;  %v3370_v3 = vsel %vm11920_vm0, %v11919_v4, 0.0  ;;  %vm11937_vm11 = vmmov %vm11920_vm0 }
 0x6b7   :  { %v1146_v10 = vrot.slane %v1145_v7, 1  ;;  %v1191_v9 = vadd.f32 %v1190_v45, %v1189_v22  ;;  %v3371_v19 = vrot.slane %v3370_v3, 4  ;;  %v10693_v25 = vmul.f32 %v11921_v40, %v1133_v61 }
 0x6b8   :  { %v4442_v13 = vmul.f32 %v10629_v21, %v4439_v23  ;;  %v2254_v23 = vadd.f32 %v2253_v6, %v2252_v32  ;;  %v1184_v43 = vadd.f32 %v1183_v37, %v1182_v24 }
 0x6b9   :  { %v1147_v16 = vadd.f32 %v1146_v10, %v1145_v7  ;;  %v1192_v30 = vrot.slane %v1191_v9, 2 }
 0x6ba   :  { %v5027_v31 = vclamps-f32 %v4442_v13, 1.0  ;;  %v4453_v36 = vld [vmem:[#allocation1 + $0x1] ss:$2 sm:$0xff]  ;;  %v1185_v32 = vrot.slane %v1184_v43, 2 }
 0x6bb   :  { %v4458_v34 = vsub.f32 %v11892_v17, %v4453_v36  ;;  %v10667_v44 = vld.sshfl [vmem:[#allocation1] sm:$0xff pattern:$0x75316420]  ;;  %v10669_v5 = vld.sshfl [vmem:[#allocation1 + $0x8] sm:$0xff pattern:$0x75316420]  ;;  %v10699_v14 = vmul.f32 %v11921_v40, %v1147_v16 }
 0x6bc   :  { %v4467_v33 = vmul.f32 %v5027_v31, %v4466_v38  ;;  %v1196_v17 = vsel %vm11910_vm3, %v11909_v51, 0.0  ;;  %v11911_v13 = vld [vmem:[#allocation20_spill] sm:$0xff]  ;;  %v10701_v7 = vadd.f32 %v1185_v32, %v1184_v43  ;;  %v10703_v51 = vadd.f32 %v1192_v30, %v1191_v9  ;;  %vm11943_vm3 = vmmov %vm11920_vm0 }
 0x6bd   :  { %v4460_v15 = vmul.f32 %v4458_v34, %v10629_v21  ;;  %v2259_v59 = vsel %vm11912_vm7, %v11911_v13, 0.0  ;;  %v11913_v36 = vld [vmem:[#allocation32_spill] sm:$0xff]  ;;  %v1197_v34 = vrot.slane %v1196_v17, 4  ;;  %v4502_v10 = vsel %vm11930_vm13, %v10669_v5, 0.0  ;;  %vm11944_vm7 = vmmov %vm11920_vm0 }
 0x6be   :  { %v4472_v2 = vadd.f32 %v4470_v57, %v4467_v33  ;;  %v2266_v56 = vsel %vm11914_vm6, %v11913_v36, 0.0  ;;  %v2260_v33 = vrot.slane %v2259_v59, 4  ;;  %v2255_v57 = vrot.slane %v2254_v23, 2  ;;  %v11926_v36 = vld [vmem:[#allocation63_spill] sm:$0xff]  ;;  %vm11945_vm6 = vmmov %vm11920_vm0 }
 0x6bf   :  { %v5029_v50 = vclamps-f32 %v4460_v15, 1.0  ;;  %v3377_v15 = vsel %vm11916_vm1, %v11915_v39, 0.0  ;;  %v1194_v43 = vrot.slane %v10703_v51, 1  ;;  %vm11947_vm1 = vmmov %vm11920_vm0 }
 0x6c0   :  { %v4478_v26 = vadd.f32 %v4476_v42, %v4472_v2  ;;  %v2267_v42 = vrot.slane %v2266_v56, 4  ;;  %v2261_v0 = vadd.f32 %v2260_v33, %v2259_v59  ;;  %v3378_v29 = vrot.slane %v3377_v15, 4 }
 0x6c1   :  { %v4533_v18 = vsub.f32 %v5027_v31, %v5029_v50  ;;  %v1125_v31 = vrot.slane %v1124_v28, 1  ;;  %v2249_v50 = vadd.f32 %v2248_v41, %v2247_v53 }
 0x6c2   :  { %4589 = vst [vmem:[#allocation5] sm:$0xff] %v4478_v26  ;;  %v1198_v26 = vadd.f32 %v1197_v34, %v1196_v17  ;;  %v2268_v8 = vadd.f32 %v2267_v42, %v2266_v56  ;;  %v2262_v52 = vrot.slane %v2261_v0, 2  ;;  %v3379_v53 = vadd.f32 %v3378_v29, %v3377_v15  ;;  %v11928_v34 = vld [vmem:[#allocation43_spill] sm:$0xff] }
 0x6c3   :  { %v4536_v46 = vmul.f32 %v10659_v60, %v4533_v18  ;;  %v1126_v2 = vadd.f32 %v1125_v31, %v1124_v28  ;;  %v1203_v18 = vsel %vm11918_vm12, %v11917_v1, 0.0  ;;  %v2250_v54 = vrot.slane %v2249_v50, 1  ;;  %v11931_v1 = vld [vmem:[#allocation24_spill] sm:$0xff]  ;;  %vm11948_vm12 = vmmov %vm11920_vm0 }
 0x6c4   :  { %v1204_v55 = vrot.slane %v1203_v18, 4  ;;  %v1199_v6 = vrot.slane %v1198_v26, 2  ;;  %v3372_v31 = vadd.f32 %v3371_v19, %v3370_v3  ;;  %v3384_v56 = vsel %vm11927_vm15, %v11926_v36, 0.0  ;;  %v11935_v19 = vld [vmem:[#allocation36_spill] sm:$0xff] }
 0x6c5   :  { %v4540_v49 = vadd.f32 %v4538_v20, %v4536_v46  ;;  %v1140_v20 = vadd.f32 %v1139_v47, %v1138_v58  ;;  %v2256_v46 = vadd.f32 %v2255_v57, %v2254_v23  ;;  %v2269_v58 = vrot.slane %v2268_v8, 2  ;;  %v11924_v23 = vld [vmem:[#allocation13_spill] sm:$0xff] }
 0x6c6   :  { %v1205_v17 = vadd.f32 %v1204_v55, %v1203_v18  ;;  %v2307_v13 = vsel %vm11925_vm10, %v11924_v23, 0.0  ;;  %v2251_v37 = vadd.f32 %v2250_v54, %v2249_v50  ;;  %v10709_v45 = vadd.f32 %v1199_v6, %v1198_v26 }
 0x6c7   :  { %v4542_v62 = vmul.f32 %v4540_v49, %v4540_v49  ;;  %v10688_v49 = vmul.f32 %v11921_v40, %v1126_v2  ;;  %v10696_v24 = vmul.f32 %v11921_v40, %v1140_v20  ;;  %v2257_v22 = vrot.slane %v2256_v46, 1  ;;  %v10727_v40 = vld [vmem:[%s10863_s5 + $0x38] sm:$0xff]  ;;  %s5670_s5 = smov [#allocation5]  }
 0x6c8   :  { %v2263_v48 = vadd.f32 %v2262_v52, %v2261_v0  ;;  %v3380_v41 = vrot.slane %v3379_v53, 2  ;;  %v3391_v47 = vsel %vm11929_vm8, %v11928_v34, 0.0  ;;  %v2270_v57 = vadd.f32 %v2269_v58, %v2268_v8  ;;  %v11933_v0 = vld [vmem:[#allocation25_spill] sm:$0xff]  ;;  %s10785_s30 = sshll.u32 %s5670_s5, 4  ;;  %s4628_s30 = int_to_ptr.vmem [resolvable:$true] %s10785_s30 }
 0x6c9   :  { %4546 = vst [vmem:[#allocation1] ss:$2 sm:$0xff] %v4542_v62  ;;  %v11922_v62 = vld [vmem:[#allocation52_spill] sm:$0xff]  ;;  %v2258_v33 = vadd.f32 %v2257_v22, %v2256_v46  ;;  %v1187_v42 = vrot.slane %v10701_v7, 1  ;;  %v2308_v39 = vrot.slane %v2307_v13, 4  ;;  %v3385_v15 = vrot.slane %v3384_v56, 4 }
 0x6ca   :  { %v2314_v28 = vsel %vm11923_vm5, %v11922_v62, 0.0  ;;  %v1206_v2 = vrot.slane %v1205_v17, 2  ;;  %v3373_v61 = vrot.slane %v3372_v31, 2  ;;  %v3392_v50 = vrot.slane %v3391_v47, 4  ;;  %vm11950_vm5 = vmmov %vm11920_vm0 }
 0x6cb   :  { %v2315_v59 = vrot.slane %v2314_v28, 4  ;;  %v4503_v26 = vrot.slane %v4502_v10, 4  ;;  %v2321_v18 = vsel %vm11932_vm2, %v11931_v1, 0.0  ;;  %v2264_v20 = vrot.slane %v2263_v48, 1  ;;  %vm11953_vm2 = vmmov %vm11920_vm0 }
 0x6cc   :  { %v2274_v4 = vmul.f32 %v11933_v0, %v2251_v37  ;;  %v3381_v5 = vadd.f32 %v3380_v41, %v3379_v53  ;;  %v1201_v3 = vrot.slane %v10709_v45, 1  ;;  %v2271_v29 = vrot.slane %v2270_v57, 1 }
 0x6cd   :  { %v2316_v9 = vadd.f32 %v2315_v59, %v2314_v28  ;;  %v2275_v16 = vmul.f32 %v11933_v0, %v2258_v33  ;;  %v4495_v46 = vsel %vm11934_vm14, %v10667_v44, 0.0  ;;  %v2309_v8 = vadd.f32 %v2308_v39, %v2307_v13  ;;  %vm11954_vm14 = vmmov %vm11920_vm0 }
 0x6ce   :  { %v3386_v30 = vadd.f32 %v3385_v15, %v3384_v56  ;;  %v2322_v54 = vrot.slane %v2321_v18, 4  ;;  %v2328_v6 = vsel %vm11936_vm9, %v11935_v19, 0.0  ;;  %v3374_v52 = vadd.f32 %v3373_v61, %v3372_v31 }
 0x6cf   :  { %v2317_v55 = vrot.slane %v2316_v9, 2  ;;  %v3393_v53 = vadd.f32 %v3392_v50, %v3391_v47  ;;  %v4504_v22 = vadd.f32 %v4503_v26, %v4502_v10  ;;  %v2265_v58 = vadd.f32 %v2264_v20, %v2263_v48 }
 0x6d0   :  { %v3382_v23 = vrot.slane %v3381_v5, 1  ;;  %v4496_v13 = vrot.slane %v4495_v46, 4  ;;  %v4481_v37 = vmul.f32 %v10727_v40, %v10727_v40  ;;  %v2272_v36 = vadd.f32 %v2271_v29, %v2270_v57 }
 0x6d1   :  { %v2329_v56 = vrot.slane %v2328_v6, 4  ;;  %v3387_v34 = vrot.slane %v3386_v30, 2  ;;  %v2310_v33 = vrot.slane %v2309_v8, 2  ;;  %v2323_v39 = vadd.f32 %v2322_v54, %v2321_v18 }
 0x6d2   :  { %v3375_v31 = vrot.slane %v3374_v52, 1  ;;  %v3394_v47 = vrot.slane %v3393_v53, 2  ;;  %v4505_v10 = vrot.slane %v4504_v22, 2  ;;  %v3383_v15 = vadd.f32 %v3382_v23, %v3381_v5  ;;  %v11938_v5 = vld [vmem:[#allocation26_spill] sm:$0xff] }
 0x6d3   :  { %v4497_v61 = vadd.f32 %v4496_v13, %v4495_v46  ;;  %v10739_v50 = vadd.f32 %v2317_v55, %v2316_v9  ;;  %v2276_v57 = vmul.f32 %v11933_v0, %v2265_v58  ;;  %v10744_v26 = vadd.f32 %v2274_v4, %v10688_v49  ;;  %v11939_v55 = vld [vmem:[#allocation14_spill] sm:$0xff] }
 0x6d4   :  { %v10746_v1 = vadd.f32 %v2329_v56, %v2328_v6  ;;  %v2324_v20 = vrot.slane %v2323_v39, 2  ;;  %v3376_v9 = vadd.f32 %v3375_v31, %v3374_v52  ;;  %v3395_v46 = vadd.f32 %v3394_v47, %v3393_v53  ;;  %v11942_v52 = vld [vmem:[#allocation49_spill] sm:$0xff] }
 0x6d5   :  { %v3400_v54 = vmul.f32 %v11939_v55, %v3383_v15  ;;  %v4498_v19 = vrot.slane %v4497_v61, 2  ;;  %v2319_v49 = vrot.slane %v10739_v50, 1  ;;  %v10756_v4 = vadd.f32 %v2276_v57, %v10696_v24  ;;  %v4550_v31 = vld.sshfl [vmem:[#allocation1 + $0x8] sm:$0xff pattern:$0x75316420]  ;;  %v11946_v57 = vld [vmem:[#allocation51_spill] sm:$0xff] }
 0x6d6   :  { %v3439_v24 = vsel %vm11943_vm3, %v11942_v52, 0.0  ;;  %v3396_v53 = vrot.slane %v3395_v46, 1  ;;  %v4471_v56 = vmul.f32 %v4469_v11, %v11938_v5  ;;  %vm4598_vm10 = vcmask 1040384  }
 0x6d7   :  { %v3440_v11 = vrot.slane %v3439_v24, 4  ;;  %vm4600_vm15 = vcmask 1042434   ;;  %vm4602_vm8 = vcmask 1041408  }
 0x6d9   :  { %v3441_v52 = vadd.f32 %v3440_v11, %v3439_v24 }
 0x6e8   :  { %v4401_v32 = vpop.f32.mrf.mxu2 }
 0x6e9   :  { %v4402_v62 = vadd.f32 %v4401_v32, %v11890_v27  ;;  %v4421_v28 = vpop.f32.mrf.mxu3  ;;  %v4506_v32 = vadd.f32 %v4505_v10, %v4504_v22 }
 0x6ea   :  { %v4422_v44 = vadd.f32 %v4421_v28, %v11890_v27  ;;  %v10737_v27 = vadd.f32 %v1206_v2, %v1205_v17  ;;  %v2279_v17 = vadd.f32 %v2275_v16, %v10693_v25  ;;  %v3388_v2 = vadd.f32 %v3387_v34, %v3386_v30  ;;  %v11940_v28 = vld [vmem:[#allocation50_spill] sm:$0xff] }
 0x6eb   :  { %v4427_v59 = vmul.f32 %v10611_v63, %v4402_v62  ;;  %v2331_v16 = vrot.slane %v10746_v1, 2  ;;  %v10763_v62 = vadd.f32 %v2324_v20, %v2323_v39  ;;  %v4507_v22 = vrot.slane %v4506_v32, 1 }
 0x6ec   :  { %v4428_v41 = vmul.f32 %v10611_v63, %v4422_v44  ;;  %v2277_v63 = vmul.f32 %v11933_v0, %v2272_v36  ;;  %v10752_v0 = vadd.f32 %v2310_v33, %v2309_v8  ;;  %v3389_v30 = vrot.slane %v3388_v2, 1 }
 0x6ed   :  { %4450 = vst.sshfl [vmem:[#allocation1 + $0x10] sm:$0xff pattern:$0x75316420] %v4427_v59  ;;  %v10767_v8 = vsel %vm11941_vm4, %v11940_v28, 0.0  ;;  %v3404_v23 = vadd.f32 %v3400_v54, %v2279_v17  ;;  %v4477_v39 = vmul.f32 %v10727_v40, %v10636_v35  ;;  %v3446_v35 = vsel %vm11947_vm1, %v11946_v57, 0.0 }
 0x6ee   :  { %v4434_v48 = vrot.slane %v4428_v41, 4  ;;  %4451 = vst.sshfl [vmem:[#allocation1 + $0x18] sm:$0xff pattern:$0x75316420] %v4428_v41  ;;  %v10759_v6 = vadd.f32 %v2277_v63, %v10699_v14  ;;  %v10772_v14 = vmul.f32 %v11939_v55, %v3376_v9  ;;  %v3390_v15 = vadd.f32 %v3389_v30, %v3388_v2  ;;  %v11949_v9 = vld [vmem:[#allocation15_spill] sm:$0xff] }
 0x6ef   :  { %4486 = vst [vmem:[#allocation1 + $0x10] ss:$2 sm:$0xff] %v4481_v37  ;;  %v4499_v37 = vadd.f32 %v4498_v19, %v4497_v61  ;;  %v4508_v61 = vadd.f32 %v4507_v22, %v4506_v32  ;;  %v3397_v20 = vadd.f32 %v3396_v53, %v3395_v46  ;;  %v3453_v54 = vsel %vm11920_vm0, %v11949_v9, 0.0  ;;  %v4549_v30 = vld.sshfl [vmem:[#allocation1] sm:$0xff pattern:$0x75316420] }
 0x6f0   :  { %v4436_v18 = vsel %vm11937_vm11, %v4427_v59, %v4434_v48  ;;  %v3447_v22 = vrot.slane %v3446_v35, 4 }
 0x6f1   :  { %v4440_v29 = vsub.f32 %v11938_v5, %v4436_v18  ;;  %v4525_v28 = vmul.f32 %v10657_v12, %v4508_v61 }
 0x6f3   :  { %v4443_v25 = vmul.f32 %v10629_v21, %v4440_v29 }
 0x6f5   :  { %v5028_v44 = vclamps-f32 %v4443_v25, 1.0  ;;  %v4455_v58 = vld [vmem:[#allocation1 + $0x11] ss:$2 sm:$0xff]  ;;  %v4539_v25 = vmul.f32 %v10727_v40, %v10657_v12  ;;  %v4557_v40 = vsel %vm11950_vm5, %v4549_v30, 0.0 }
 0x6f6   :  { %v4489_v13 = vld.sshfl [vmem:[#allocation1 + $0x10] sm:$0xff pattern:$0x75316420]  ;;  %v4490_v59 = vld.sshfl [vmem:[#allocation1 + $0x18] sm:$0xff pattern:$0x75316420]  ;;  %v4459_v36 = vsub.f32 %v11938_v5, %v4455_v58 }
 0x6f7   :  { %v4509_v41 = vsel %vm11944_vm7, %v4489_v13, 0.0  ;;  %v4516_v34 = vsel %vm11945_vm6, %v4490_v59, 0.0  ;;  %v4468_v33 = vmul.f32 %v5028_v44, %v4466_v38  ;;  %v4500_v5 = vrot.slane %v4499_v37, 1 }
 0x6f8   :  { %v4510_v47 = vrot.slane %v4509_v41, 4  ;;  %v4517_v10 = vrot.slane %v4516_v34, 4  ;;  %v4461_v48 = vmul.f32 %v4459_v36, %v10629_v21  ;;  %v4564_v21 = vsel %vm11948_vm12, %v4550_v31, 0.0 }
 0x6f9   :  { %v4473_v38 = vadd.f32 %v4471_v56, %v4468_v33  ;;  %v4565_v46 = vrot.slane %v4564_v21, 4  ;;  %v3433_v59 = vrot.slane %v10767_v8, 4  ;;  %v3401_v36 = vmul.f32 %v11939_v55, %v3390_v15 }
 0x6fa   :  { %v4511_v63 = vadd.f32 %v4510_v47, %v4509_v41  ;;  %v4518_v18 = vadd.f32 %v4517_v10, %v4516_v34  ;;  %v5030_v17 = vclamps-f32 %v4461_v48, 1.0  ;;  %v3454_v56 = vrot.slane %v3453_v54, 4 }
 0x6fb   :  { %v4479_v29 = vadd.f32 %v4477_v39, %v4473_v38  ;;  %v4501_v41 = vadd.f32 %v4500_v5, %v4499_v37  ;;  %v4529_v39 = vadd.f32 %v4525_v28, %v3404_v23  ;;  %v3442_v31 = vrot.slane %v3441_v52, 2 }
 0x6fc   :  { %v4512_v19 = vrot.slane %v4511_v63, 2  ;;  %v4519_v2 = vrot.slane %v4518_v18, 2  ;;  %v4534_v32 = vsub.f32 %v5028_v44, %v5030_v17  ;;  %v3402_v44 = vmul.f32 %v11939_v55, %v3397_v20 }
 0x6fd   :  { %4590 = vst [vmem:[#allocation5 + $0x8] sm:$0xff] %v4479_v29  ;;  %v3448_v47 = vadd.f32 %v3447_v22, %v3446_v35  ;;  %v4566_v10 = vadd.f32 %v4565_v46, %v4564_v21  ;;  %v4558_v61 = vrot.slane %v4557_v40, 4  ;;  %v3403_v15 = vadd.f32 %v10772_v14, %v10744_v26 }
 0x6fe   :  { %v4513_v53 = vadd.f32 %v4512_v19, %v4511_v63  ;;  %v4520_v58 = vadd.f32 %v4519_v2, %v4518_v18  ;;  %v4537_v13 = vmul.f32 %v10659_v60, %v4534_v32  ;;  %4632 = dma.vmem_to_hbm [thread:$0]  %s4628_s30, 256, %s4630_s12, [#allocation3]   ;;  %v3405_v55 = vadd.f32 %v3401_v36, %v10756_v4 }
 0x6ff   :  { %v3434_v38 = vadd.f32 %v3433_v59, %v10767_v8  ;;  %v3455_v57 = vadd.f32 %v3454_v56, %v3453_v54  ;;  %v3406_v37 = vadd.f32 %v3402_v44, %v10759_v6  ;;  %v4524_v63 = vmul.f32 %v10657_v12, %v4501_v41 }
 0x700   :  { %v4514_v34 = vrot.slane %v4513_v53, 1  ;;  %v4521_v33 = vrot.slane %v4520_v58, 1  ;;  %v4541_v24 = vadd.f32 %v4539_v25, %v4537_v13  ;;  %v4605_v18 = vlaneseq }
 0x701   :  { %v3443_v17 = vadd.f32 %v3442_v31, %v3441_v52  ;;  %v3449_v21 = vrot.slane %v3448_v47, 2  ;;  %v4567_v20 = vrot.slane %v4566_v10, 2  ;;  %v4595_v14 = vrot.slane %v4529_v39, 7 }
 0x702   :  { %v4515_v48 = vadd.f32 %v4514_v34, %v4513_v53  ;;  %v4522_v60 = vadd.f32 %v4521_v33, %v4520_v58  ;;  %v4543_v11 = vmul.f32 %v4541_v24, %v4541_v24  ;;  %v4559_v4 = vadd.f32 %v4558_v61, %v4557_v40 }
 0x703   :  { %v3456_v6 = vrot.slane %v3455_v57, 2  ;;  %v4528_v8 = vadd.f32 %v4524_v63, %v3403_v15  ;;  %vm10820_vm13 = vcmp.lt.s32.totalorder %v4605_v18, 512  ;;  %v3435_v19 = vrot.slane %v3434_v38, 2 }
 0x704   :  { %v4526_v23 = vmul.f32 %v10657_v12, %v4515_v48  ;;  %v4527_v35 = vmul.f32 %v10657_v12, %v4522_v60  ;;  %4548 = vst [vmem:[#allocation1 + $0x10] ss:$2 sm:$0xff] %v4543_v11  ;;  %v2332_v12 = vadd.f32 %v2331_v16, %v10746_v1  ;;  %v3444_v2 = vrot.slane %v3443_v17, 1 }
 0x705   :  { %v4568_v32 = vadd.f32 %v4567_v20, %v4566_v10  ;;  %v4599_v25 = vsel %vm4598_vm10, %v4528_v8, %v4595_v14  ;;  %v3450_v28 = vadd.f32 %v3449_v21, %v3448_v47  ;;  %v4560_v1 = vrot.slane %v4559_v4, 2 }
 0x706   :  { %v4530_v5 = vadd.f32 %v4526_v23, %v3405_v55  ;;  %v4531_v26 = vadd.f32 %v4527_v35, %v3406_v37  ;;  %v1195_v52 = vadd.f32 %v1194_v43, %v10703_v51  ;;  %v2320_v22 = vadd.f32 %v2319_v49, %v10739_v50 }
 0x707   :  { %v3457_v46 = vadd.f32 %v3456_v6, %v3455_v57  ;;  %v2326_v13 = vrot.slane %v10763_v62, 1  ;;  %v2333_v59 = vrot.slane %v2332_v12, 1  ;;  %v3436_v56 = vadd.f32 %v3435_v19, %v3434_v38 }
 0x708   :  { %v4596_v29 = vrot.slane %v4530_v5, 6  ;;  %v4597_v9 = vrot.slane %v4531_v26, 5  ;;  %v4569_v51 = vrot.slane %v4568_v32, 1  ;;  %v1208_v50 = vrot.slane %v10737_v27, 1 }
 0x709   :  { %v2312_v49 = vrot.slane %v10752_v0, 1  ;;  %v3445_v41 = vadd.f32 %v3444_v2, %v3443_v17  ;;  %v3451_v34 = vrot.slane %v3450_v28, 1  ;;  %v3458_v33 = vrot.slane %v3457_v46, 1 }
 0x70a   :  { %v4601_v30 = vsel %vm4600_vm15, %v4596_v29, %v4597_v9  ;;  %v4561_v24 = vadd.f32 %v4560_v1, %v4559_v4  ;;  %v1202_v47 = vadd.f32 %v1201_v3, %v10709_v45  ;;  %v2327_v10 = vadd.f32 %v2326_v13, %v10763_v62 }
 0x70b   :  { %v4603_v16 = vsel %vm4602_vm8, %v4599_v25, %v4601_v30  ;;  %v4551_v53 = vld.sshfl [vmem:[#allocation1 + $0x10] sm:$0xff pattern:$0x75316420]  ;;  %v4552_v58 = vld.sshfl [vmem:[#allocation1 + $0x18] sm:$0xff pattern:$0x75316420]  ;;  %v2334_v48 = vadd.f32 %v2333_v59, %v2332_v12  ;;  %v2336_v60 = vadd.f32 %v2320_v22, %v1195_v52  ;;  %v4570_v61 = vadd.f32 %v4569_v51, %v4568_v32 }
 0x70c   :  { %4609 = vst.msk [vmem:[#allocation6] sm:$0xf] %vm10820_vm13, %v4603_v16  ;;  %v4571_v36 = vsel %vm11953_vm2, %v4551_v53, 0.0  ;;  %v4578_v44 = vsel %vm11954_vm14, %v4552_v58, 0.0  ;;  %v3437_v11 = vrot.slane %v3436_v56, 1  ;;  %v1209_v38 = vadd.f32 %v1208_v50, %v10737_v27 }
 0x70d   :  { %4643 = dma.vmem_to_hbm [thread:$0]  %s4639_s13, 64, %s4641_s16, [#allocation7]   ;;  %v4572_v43 = vrot.slane %v4571_v36, 4  ;;  %v4579_v40 = vrot.slane %v4578_v44, 4  ;;  %v2313_v57 = vadd.f32 %v2312_v49, %v10752_v0  ;;  %v3452_v37 = vadd.f32 %v3451_v34, %v3450_v28 }
 0x70e   :  { %v3461_v63 = vadd.f32 %v3445_v41, %v2336_v60  ;;  %v3459_v23 = vadd.f32 %v3458_v33, %v3457_v46  ;;  %v4562_v35 = vrot.slane %v4561_v24, 1  ;;  %v1188_v45 = vadd.f32 %v1187_v42, %v10701_v7 }
 0x70f   :  { %v4573_v39 = vadd.f32 %v4572_v43, %v4571_v36  ;;  %v4580_v31 = vadd.f32 %v4579_v40, %v4578_v44  ;;  %v2337_v3 = vadd.f32 %v2327_v10, %v1202_v47  ;;  %v2338_v62 = vadd.f32 %v2334_v48, %v1209_v38 }
 0x710   :  { %v3438_v21 = vadd.f32 %v3437_v11, %v3436_v56  ;;  %v4586_v26 = vadd.f32 %v4570_v61, %v3461_v63  ;;  %v2335_v14 = vadd.f32 %v2313_v57, %v1188_v45  ;;  %v4563_v0 = vadd.f32 %v4562_v35, %v4561_v24 }
 0x711   :  { %v4574_v15 = vrot.slane %v4573_v39, 2  ;;  %v4581_v55 = vrot.slane %v4580_v31, 2  ;;  %v3462_v27 = vadd.f32 %v3452_v37, %v2337_v3  ;;  %v3463_v4 = vadd.f32 %v3459_v23, %v2338_v62 }
 0x712   :  { %v3460_v8 = vadd.f32 %v3438_v21, %v2335_v14  ;;  %v4614_v19 = vrot.slane %v4586_v26, 7 }
 0x713   :  { %v4575_v18 = vadd.f32 %v4574_v15, %v4573_v39  ;;  %v4582_v17 = vadd.f32 %v4581_v55, %v4580_v31 }
 0x714   :  { %v4585_v7 = vadd.f32 %v4563_v0, %v3460_v8 }
 0x715   :  { %v4576_v20 = vrot.slane %v4575_v18, 1  ;;  %v4583_v5 = vrot.slane %v4582_v17, 1 }
 0x716   :  { %v4617_v32 = vsel %vm4598_vm10, %v4585_v7, %v4614_v19 }
 0x717   :  { %v4577_v12 = vadd.f32 %v4576_v20, %v4575_v18  ;;  %v4584_v6 = vadd.f32 %v4583_v5, %v4582_v17 }
 0x719   :  { %v4587_v29 = vadd.f32 %v4577_v12, %v3462_v27  ;;  %v4588_v9 = vadd.f32 %v4584_v6, %v3463_v4 }
 0x71b   :  { %v4615_v42 = vrot.slane %v4587_v29, 6  ;;  %v4616_v2 = vrot.slane %v4588_v9, 5 }
 0x71d   :  { %v4618_v25 = vsel %vm4600_vm15, %v4615_v42, %v4616_v2 }
 0x71e   :  { %v4619_v30 = vsel %vm4602_vm8, %v4617_v32, %v4618_v25 }
 0x71f   :  { %4621 = vst.msk [vmem:[#allocation8] sm:$0xf] %vm10820_vm13, %v4619_v30 }
 0x720   :  { %4654 = dma.vmem_to_hbm [thread:$0]  %s4650_s17, 64, %s4652_s19, [#allocation7]  }
 0x721   :  { %5664 = dma.done.wait [#allocation3], 256  }
 0x722   :  { %5665 = vsyncadd [#allocation3], 4294967040 }
 0x723   :  { %5666 = dma.done.wait [#allocation7], 128  }
 0x724   :  { %5667 = vsyncadd [#allocation7], 4294967168 }
 0x725   :  { %4667 = vsyncpa [#allocation3], 1 }
 0x726   :  { %4668 = vsyncpa [#allocation7], 1 }
 0x727   :  { %4669 = vsyncpa [#allocation4], 1 }

</bundles_post_ra>
